<compile_context>
chip_gen: v5e
topology: v5e:2x2
jax: 0.10.0
libtpu: 0.0.40
codegen_flags: <defaults>
</compile_context>

<pallas_src>
import jax
import jax.numpy as jnp
from jax import lax
from jax.experimental import pallas as pl
from jax.experimental.pallas import tpu as pltpu


def _bottleneck_kernel(x_ref,
                       w1_ref, s1_ref, t1_ref,
                       w2_ref, s2_ref, t2_ref,
                       w3_ref, s3_ref, t3_ref,
                       o_ref,
                       h1pad_ref, tap_ref):
    """grid = (N, H // TH); batch parallel, row tiles sequential ('arbitrary').

    At h_idx == 0 the conv1+bn1+relu stage is computed for the whole image into a zero-padded
    bf16 VMEM scratch that persists across this image's row tiles.  Every step then builds a
    (TH*W, 9*Cslot) bf16 im2col matrix for its TH-row slab with 128-lane-aligned tap stores,
    does a single K=9*Cslot matmul for conv2, the 1x1 conv3 and the residual add, and writes
    its output slab.
    """
    _, H, W, Cin = x_ref.shape
    Cslot = w1_ref.shape[1]          # mid channels padded to a multiple of 128 lanes
    Cmid = w2_ref.shape[1]           # true mid channels
    Cout = w3_ref.shape[1]
    TH = o_ref.shape[1]
    h_idx = pl.program_id(1)
    bf16 = jnp.bfloat16

    # ---- stage 1: 1x1 conv + BN + ReLU, once per image, into padded bf16 scratch ----
    @pl.when(h_idx == 0)
    def _():
        # Zero only the 1-pixel spatial border (conv2's pad=1); interior is fully rewritten.
        # Done per image (cheap) so it is megacore-safe (per-core scratch, any batch shard).
        zrow = jnp.zeros((1, W + 2, Cslot), bf16)
        h1pad_ref[0:1, :, :] = zrow
        h1pad_ref[H + 1:H + 2, :, :] = zrow
        zcol = jnp.zeros((H + 2, 1, Cslot), bf16)
        h1pad_ref[:, 0:1, :] = zcol
        h1pad_ref[:, W + 1:W + 2, :] = zcol

        x2d = x_ref[0].reshape(H * W, Cin).astype(bf16)
        h1 = jnp.dot(x2d, w1_ref[...], preferred_element_type=jnp.float32)
        h1 = jnp.maximum(h1 * s1_ref[...] + t1_ref[...], 0.0)     # pad channels stay exactly 0
        h1pad_ref[1:H + 1, 1:W + 1, :] = h1.reshape(H, W, Cslot).astype(bf16)

    # ---- stage 2: 3x3 conv (pad=1, stride=1) as ONE im2col matmul (K = 9*Cslot) -------------
    r0 = pl.multiple_of(h_idx * TH, TH)          # first output row of this tile
    for ky in range(3):
        for kx in range(3):
            t = ky * 3 + kx
            tap = h1pad_ref[pl.ds(r0 + ky, TH), kx:kx + W, :]      # (TH, W, Cslot) bf16
            # t*Cslot is a multiple of 128 -> lane-dense, unmasked store.
            tap_ref[:, t * Cslot:(t + 1) * Cslot] = tap.reshape(TH * W, Cslot)
    h2 = jnp.dot(tap_ref[...], w2_ref[...], preferred_element_type=jnp.float32)
    h2 = jnp.maximum(h2 * s2_ref[...] + t2_ref[...], 0.0)

    # ---- stage 3: 1x1 conv (expansion) + BN ---------------------------------------------------
    h3 = jnp.dot(h2.astype(bf16), w3_ref[...], preferred_element_type=jnp.float32)
    h3 = h3 * s3_ref[...] + t3_ref[...]

    # ---- residual add (identity, Cin == Cout) + ReLU (x rows re-read here only) ---------------
    xres = x_ref[0, pl.ds(r0, TH), :, :].reshape(TH * W, Cin)
    out = jnp.maximum(h3 + xres, 0.0)
    o_ref[0] = out.reshape(TH, W, Cout).astype(o_ref.dtype)


def _vmem_budget_bytes():
    """Generation-aware admissible VMEM (per core), with headroom for the compiler."""
    cap = 64 * 1024 * 1024
    try:
        info = pltpu.get_tpu_info()
        cap = int(getattr(info, "vmem_capacity_bytes", cap)) or cap
    except Exception:
        pass
    # ~75% of physical: ~96 MiB on v5e/v6e (128 MiB), ~48 MiB on v7x (64 MiB).
    return max(int(cap * 3 // 4), 32 * 1024 * 1024)


def _vmem_estimate(TH, H, W, Cin, Cmid, Cslot, Cout):
    f32, bf = 4, 2
    x_blk = 2 * H * W * Cin * f32                  # whole-image input block, double buffered
    o_blk = 2 * TH * W * Cout * f32                # output row-tile, double buffered
    h1pad = (H + 2) * (W + 2) * Cslot * bf         # persistent stage-1 scratch (bf16)
    tap = TH * W * 9 * Cslot * bf                  # im2col scratch (bf16)
    params = 2 * ((Cin * Cslot + 9 * Cslot * Cmid + Cmid * Cout) * bf
                  + 2 * (Cslot + Cmid + Cout) * f32)
    temps = 2 * TH * W * (Cslot + Cmid + Cout) * f32   # f32 intermediates / spill headroom
    return x_blk + o_blk + h1pad + tap + params + temps


def _prepare_params(p):
    """Fold biases into BN shifts, pre-cast weights to bf16, pad mid channels to Cslot lanes."""
    bf16 = jnp.bfloat16
    Cin, Cmid = p["w1"].shape
    Cout = p["w3"].shape[1]
    Cslot = ((Cmid + 127) // 128) * 128

    w1p = jnp.zeros((Cin, Cslot), bf16).at[:, :Cmid].set(p["w1"].astype(bf16))
    s1p = jnp.zeros((1, Cslot), jnp.float32).at[:, :Cmid].set(p["s1"])
    t1p = jnp.zeros((1, Cslot), jnp.float32).at[:, :Cmid].set(p["t1"] + p["b1"] * p["s1"])

    w2src = p["w2"].astype(bf16).reshape(9, Cmid, Cmid)
    w2p = jnp.zeros((9, Cslot, Cmid), bf16).at[:, :Cmid, :].set(w2src).reshape(9 * Cslot, Cmid)
    s2p = p["s2"]
    t2p = p["t2"] + p["b2"] * p["s2"]

    w3p = p["w3"].astype(bf16)
    s3p = p["s3"]
    t3p = p["t3"] + p["b3"] * p["s3"]
    return (w1p, s1p, t1p, w2p, s2p, t2p, w3p, s3p, t3p), Cslot


def bottleneck_forward(x_nchw, p, out_dtype=jnp.float32):
    """x_nchw: (N, Cin, H, W) float32, PyTorch layout. Returns (N, 4*Cmid, H, W).

    out_dtype=jnp.bfloat16 halves output HBM traffic if the surrounding net tolerates it.
    """
    N, Cin, H, W = x_nchw.shape
    Cmid = p["w1"].shape[1]
    Cout = p["w3"].shape[1]
    assert Cin == Cout, "identity residual requires in_channels == 4*out_channels"

    (w1p, s1p, t1p, w2p, s2p, t2p, w3p, s3p, t3p), Cslot = _prepare_params(p)

    # Pick the largest row tile (prefer the whole image) that fits the gen-aware VMEM budget.
    budget = _vmem_budget_bytes()
    TH = 1
    for d in [d for d in range(H, 0, -1) if H % d == 0]:
        if _vmem_estimate(d, H, W, Cin, Cmid, Cslot, Cout) <= budget:
            TH = d
            break
    n_h = H // TH
    est = _vmem_estimate(TH, H, W, Cin, Cmid, Cslot, Cout)
    vmem_limit = int(min(max(int(1.5 * est), 32 * 1024 * 1024), budget))

    x = jnp.transpose(x_nchw, (0, 2, 3, 1))      # NCHW -> NHWC (channels on lanes)

    def full_spec(arr):
        shape = arr.shape
        return pl.BlockSpec(shape, lambda n, h: (0,) * len(shape))

    out = pl.pallas_call(
        _bottleneck_kernel,
        grid=(N, n_h),
        in_specs=[
            pl.BlockSpec((1, H, W, Cin), lambda n, h: (n, 0, 0, 0)),
            full_spec(w1p), full_spec(s1p), full_spec(t1p),
            full_spec(w2p), full_spec(s2p), full_spec(t2p),
            full_spec(w3p), full_spec(s3p), full_spec(t3p),
        ],
        out_specs=pl.BlockSpec((1, TH, W, Cout), lambda n, h: (n, h, 0, 0)),
        out_shape=jax.ShapeDtypeStruct((N, H, W, Cout), out_dtype),
        scratch_shapes=[
            pltpu.VMEM((H + 2, W + 2, Cslot), jnp.bfloat16),   # padded stage-1 activations
            pltpu.VMEM((TH * W, 9 * Cslot), jnp.bfloat16),     # im2col tap matrix
        ],
        compiler_params=pltpu.CompilerParams(
            dimension_semantics=("parallel", "arbitrary"),
            vmem_limit_bytes=vmem_limit,
        ),
    )(x,
      w1p, s1p, t1p,
      w2p, s2p, t2p,
      w3p, s3p, t3p)

    return jnp.transpose(out, (0, 3, 1, 2))      # NHWC -> NCHW


def make_params(key, in_channels, out_channels, eps=1e-5):
    """Deterministic synthetic weights matching the nn.Module shapes (BN folded).

    Layout notes for real PyTorch weights:
      conv1 OIHW (Cmid,Cin,1,1)  -> w1 = w[:, :, 0, 0].T                       (Cin, Cmid)
      conv2 OIHW (Cmid,Cmid,3,3) -> w2 = w.transpose(2,3,1,0).reshape(9*Cmid,Cmid)
      conv3 OIHW (Cout,Cmid,1,1) -> w3 = w[:, :, 0, 0].T                       (Cmid, Cout)
    """
    Cmid = out_channels
    Cout = out_channels * 4  # expansion
    assert Cout == in_channels
    ks = jax.random.split(key, 16)

    def fold_bn(k, c):
        gamma = 1.0 + 0.1 * jax.random.normal(k, (1, c), jnp.float32)
        beta = 0.1 * jax.random.normal(jax.random.fold_in(k, 1), (1, c), jnp.float32)
        mean = 0.1 * jax.random.normal(jax.random.fold_in(k, 2), (1, c), jnp.float32)
        var = jax.random.uniform(jax.random.fold_in(k, 3), (1, c), jnp.float32, 0.5, 1.5)
        scale = gamma / jnp.sqrt(var + eps)
        shift = beta - mean * scale
        return scale, shift

    s1, t1 = fold_bn(ks[0], Cmid)
    s2, t2 = fold_bn(ks[1], Cmid)
    s3, t3 = fold_bn(ks[2], Cout)

    p = {
        "w1": 0.1 * jax.random.normal(ks[3], (in_channels, Cmid), jnp.float32),
        "b1": 0.1 * jax.random.normal(ks[4], (1, Cmid), jnp.float32),
        # conv2 stored as im2col weight: row index = (ky*3+kx)*Cmid + in_channel
        "w2": 0.1 * jax.random.normal(ks[5], (9 * Cmid, Cmid), jnp.float32),
        "b2": 0.1 * jax.random.normal(ks[6], (1, Cmid), jnp.float32),
        "w3": 0.1 * jax.random.normal(ks[7], (Cmid, Cout), jnp.float32),
        "b3": 0.1 * jax.random.normal(ks[8], (1, Cout), jnp.float32),
        "s1": s1, "t1": t1, "s2": s2, "t2": t2, "s3": s3, "t3": t3,
    }
    return p


def reference_forward(x_nchw, p):
    """Pure-JAX reference with the same bf16-operand / f32-accumulate math (biases unfolded)."""
    bf16 = jnp.bfloat16
    x = jnp.transpose(x_nchw, (0, 2, 3, 1))
    Cmid = p["w1"].shape[1]
    h = jnp.einsum("nhwc,cd->nhwd", x.astype(bf16), p["w1"].astype(bf16),
                   preferred_element_type=jnp.float32) + p["b1"]
    h = jnp.maximum(h * p["s1"] + p["t1"], 0.0)
    w2_hwio = p["w2"].reshape(3, 3, Cmid, Cmid)
    h = lax.conv_general_dilated(h.astype(bf16), w2_hwio.astype(bf16), (1, 1), "SAME",
                                 dimension_numbers=("NHWC", "HWIO", "NHWC"),
                                 preferred_element_type=jnp.float32) + p["b2"]
    h = jnp.maximum(h * p["s2"] + p["t2"], 0.0)
    h = jnp.einsum("nhwc,cd->nhwd", h.astype(bf16), p["w3"].astype(bf16),
                   preferred_element_type=jnp.float32) + p["b3"]
    h = h * p["s3"] + p["t3"]
    out = jnp.maximum(h + x, 0.0)
    return jnp.transpose(out, (0, 3, 1, 2))


if __name__ == "__main__":
    key = jax.random.PRNGKey(0)
    kx, kp = jax.random.split(key)

    # NOTE: demo shapes are tiny (Cmid=4 -> padded to Cslot=128, Cout=16) so the output store
    # path is masked; real ResNet channel counts (64/256) fill the 128 lanes automatically.
    in_channels, out_channels = 16, 4   # expansion=4 -> identity residual works
    N, H, W = 2, 16, 16

    x = jax.random.normal(kx, (N, in_channels, H, W), jnp.float32)
    params = make_params(kp, in_channels, out_channels)

    y = bottleneck_forward(x, params)
    y = jax.block_until_ready(y)

    y_ref = reference_forward(x, params)
    assert y.shape == (N, out_channels * 4, H, W)
    assert jnp.allclose(y, y_ref, atol=1e-2, rtol=1e-2), "mismatch vs reference"

    print("KERNEL_OK")
</pallas_src>

<mosaic_0001>
module attributes {stable_mosaic.version = 11 : i64} {
  func.func @_bottleneck_kernel(%arg0: i32, %arg1: i32, %arg2: memref<1x16x16x16xf32, #tpu.memory_space<vmem>>, %arg3: memref<16x128xbf16, #tpu.memory_space<vmem>>, %arg4: memref<1x128xf32, #tpu.memory_space<vmem>>, %arg5: memref<1x128xf32, #tpu.memory_space<vmem>>, %arg6: memref<1152x4xbf16, #tpu.memory_space<vmem>>, %arg7: memref<1x4xf32, #tpu.memory_space<vmem>>, %arg8: memref<1x4xf32, #tpu.memory_space<vmem>>, %arg9: memref<4x16xbf16, #tpu.memory_space<vmem>>, %arg10: memref<1x16xf32, #tpu.memory_space<vmem>>, %arg11: memref<1x16xf32, #tpu.memory_space<vmem>>, %arg12: memref<1x16x16x16xf32, #tpu.memory_space<vmem>>, %arg13: memref<18x18x128xbf16, #tpu.memory_space<vmem>>, %arg14: memref<256x1152xbf16, #tpu.memory_space<vmem>>) attributes {dimension_semantics = [#tpu.dimension_semantics<parallel>, #tpu.dimension_semantics<arbitrary>], iteration_bounds = array<i64: 2, 1>, scalar_prefetch = 0 : i64, scratch_operands = 2 : i64, tpu.core_type = #tpu.core_type<tc>, window_params = [{transform_indices = @transform_0, window_bounds = array<i64: 1, 16, 16, 16>}, {pipeline_mode = #tpu.pipeline_mode<synchronous>, transform_indices = @transform_1, window_bounds = array<i64: 16, 128>}, {pipeline_mode = #tpu.pipeline_mode<synchronous>, transform_indices = @transform_2, window_bounds = array<i64: 1, 128>}, {pipeline_mode = #tpu.pipeline_mode<synchronous>, transform_indices = @transform_3, window_bounds = array<i64: 1, 128>}, {pipeline_mode = #tpu.pipeline_mode<synchronous>, transform_indices = @transform_4, window_bounds = array<i64: 1152, 4>}, {pipeline_mode = #tpu.pipeline_mode<synchronous>, transform_indices = @transform_5, window_bounds = array<i64: 1, 4>}, {pipeline_mode = #tpu.pipeline_mode<synchronous>, transform_indices = @transform_6, window_bounds = array<i64: 1, 4>}, {pipeline_mode = #tpu.pipeline_mode<synchronous>, transform_indices = @transform_7, window_bounds = array<i64: 4, 16>}, {pipeline_mode = #tpu.pipeline_mode<synchronous>, transform_indices = @transform_8, window_bounds = array<i64: 1, 16>}, {pipeline_mode = #tpu.pipeline_mode<synchronous>, transform_indices = @transform_9, window_bounds = array<i64: 1, 16>}, {transform_indices = @transform_10, window_bounds = array<i64: 1, 16, 16, 16>}]} {
    %c0_i32 = arith.constant 0 : i32
    %0 = arith.cmpi eq, %arg1, %c0_i32 : i32
    %1 = arith.extui %0 : i1 to i32
    %c0_i32_0 = arith.constant 0 : i32
    %2 = arith.cmpi ne, %1, %c0_i32_0 : i32
    scf.if %2 {
      %cst_57 = arith.constant 0.000000e+00 : bf16
      %81 = vector.broadcast %cst_57 : bf16 to vector<1x18x128xbf16>
      %c0_58 = arith.constant 0 : index
      %c0_59 = arith.constant 0 : index
      %c0_60 = arith.constant 0 : index
      %82 = vector.load %arg13[%c0_58, %c0_59, %c0_60] : memref<18x18x128xbf16, #tpu.memory_space<vmem>>, vector<1x18x128xbf16>
      tpu.vector_store %arg13[%c0_58, %c0_59, %c0_60], %81 {strides = array<i32>} : memref<18x18x128xbf16, #tpu.memory_space<vmem>>, vector<1x18x128xbf16>,
      %c17 = arith.constant 17 : index
      %c0_61 = arith.constant 0 : index
      %c0_62 = arith.constant 0 : index
      %83 = vector.load %arg13[%c17, %c0_61, %c0_62] : memref<18x18x128xbf16, #tpu.memory_space<vmem>>, vector<1x18x128xbf16>
      tpu.vector_store %arg13[%c17, %c0_61, %c0_62], %81 {strides = array<i32>} : memref<18x18x128xbf16, #tpu.memory_space<vmem>>, vector<1x18x128xbf16>,
      %cst_63 = arith.constant 0.000000e+00 : bf16
      %84 = vector.broadcast %cst_63 : bf16 to vector<18x1x128xbf16>
      %c0_64 = arith.constant 0 : index
      %c0_65 = arith.constant 0 : index
      %c0_66 = arith.constant 0 : index
      %85 = vector.load %arg13[%c0_64, %c0_65, %c0_66] : memref<18x18x128xbf16, #tpu.memory_space<vmem>>, vector<18x1x128xbf16>
      tpu.vector_store %arg13[%c0_64, %c0_65, %c0_66], %84 {strides = array<i32>} : memref<18x18x128xbf16, #tpu.memory_space<vmem>>, vector<18x1x128xbf16>,
      %c0_67 = arith.constant 0 : index
      %c17_68 = arith.constant 17 : index
      %c0_69 = arith.constant 0 : index
      %86 = vector.load %arg13[%c0_67, %c17_68, %c0_69] : memref<18x18x128xbf16, #tpu.memory_space<vmem>>, vector<18x1x128xbf16>
      tpu.vector_store %arg13[%c0_67, %c17_68, %c0_69], %84 {strides = array<i32>} : memref<18x18x128xbf16, #tpu.memory_space<vmem>>, vector<18x1x128xbf16>,
      %c0_70 = arith.constant 0 : index
      %c0_71 = arith.constant 0 : index
      %c0_72 = arith.constant 0 : index
      %c0_73 = arith.constant 0 : index
      %87 = vector.load %arg2[%c0_70, %c0_71, %c0_72, %c0_73] : memref<1x16x16x16xf32, #tpu.memory_space<vmem>>, vector<1x16x16x16xf32>
      %88 = vector.shape_cast %87 : vector<1x16x16x16xf32> to vector<16x16x16xf32>
      %89 = vector.shape_cast %88 : vector<16x16x16xf32> to vector<256x16xf32>
      %90 = arith.truncf %89 : vector<256x16xf32> to vector<256x16xbf16>
      %c0_74 = arith.constant 0 : index
      %c0_75 = arith.constant 0 : index
      %91 = vector.load %arg3[%c0_74, %c0_75] : memref<16x128xbf16, #tpu.memory_space<vmem>>, vector<16x128xbf16>
      %cst_76 = arith.constant dense<0.000000e+00> : vector<256x128xf32>
      %92 = tpu.matmul %90, %91, %cst_76 {dimension_numbers = #tpu.dot_dimension_numbers<[1], [0], [0], [1], [0, 0, 1, 1], [], []>} : vector<256x16xbf16>, vector<16x128xbf16>, vector<256x128xf32> -> vector<256x128xf32>
      %c0_77 = arith.constant 0 : index
      %c0_78 = arith.constant 0 : index
      %93 = vector.load %arg4[%c0_77, %c0_78] : memref<1x128xf32, #tpu.memory_space<vmem>>, vector<1x128xf32>
      %94 = vector.broadcast %93 : vector<1x128xf32> to vector<256x128xf32>
      %95 = arith.mulf %92, %94 : vector<256x128xf32>
      %c0_79 = arith.constant 0 : index
      %c0_80 = arith.constant 0 : index
      %96 = vector.load %arg5[%c0_79, %c0_80] : memref<1x128xf32, #tpu.memory_space<vmem>>, vector<1x128xf32>
      %97 = vector.broadcast %96 : vector<1x128xf32> to vector<256x128xf32>
      %98 = arith.addf %95, %97 : vector<256x128xf32>
      %cst_81 = arith.constant 0.000000e+00 : f32
      %99 = vector.broadcast %cst_81 : f32 to vector<256x128xf32>
      %100 = arith.maximumf %98, %99 : vector<256x128xf32>
      %101 = vector.shape_cast %100 : vector<256x128xf32> to vector<16x16x128xf32>
      %102 = arith.truncf %101 : vector<16x16x128xf32> to vector<16x16x128xbf16>
      %c1_82 = arith.constant 1 : index
      %c1_83 = arith.constant 1 : index
      %c0_84 = arith.constant 0 : index
      %103 = vector.load %arg13[%c1_82, %c1_83, %c0_84] : memref<18x18x128xbf16, #tpu.memory_space<vmem>>, vector<16x16x128xbf16>
      tpu.vector_store %arg13[%c1_82, %c1_83, %c0_84], %102 {strides = array<i32>} : memref<18x18x128xbf16, #tpu.memory_space<vmem>>, vector<16x16x128xbf16>,
    } else {
    }
    %c16_i32 = arith.constant 16 : i32
    %3 = arith.muli %arg1, %c16_i32 : i32
    %4 = tpu.assume_multiple %3, 16 : i32
    %c0_i32_1 = arith.constant 0 : i32
    %5 = arith.addi %4, %c0_i32_1 : i32
    %6 = arith.index_cast %5 : i32 to index
    %c0 = arith.constant 0 : index
    %c0_2 = arith.constant 0 : index
    %7 = vector.load %arg13[%6, %c0, %c0_2] : memref<18x18x128xbf16, #tpu.memory_space<vmem>>, vector<16x16x128xbf16>
    %8 = vector.shape_cast %7 : vector<16x16x128xbf16> to vector<256x128xbf16>
    %c0_3 = arith.constant 0 : index
    %c0_4 = arith.constant 0 : index
    %9 = vector.load %arg14[%c0_3, %c0_4] : memref<256x1152xbf16, #tpu.memory_space<vmem>>, vector<256x128xbf16>
    tpu.vector_store %arg14[%c0_3, %c0_4], %8 {strides = array<i32>} : memref<256x1152xbf16, #tpu.memory_space<vmem>>, vector<256x128xbf16>,
    %c0_i32_5 = arith.constant 0 : i32
    %10 = arith.addi %4, %c0_i32_5 : i32
    %11 = arith.index_cast %10 : i32 to index
    %c1 = arith.constant 1 : index
    %c0_6 = arith.constant 0 : index
    %12 = vector.load %arg13[%11, %c1, %c0_6] : memref<18x18x128xbf16, #tpu.memory_space<vmem>>, vector<16x16x128xbf16>
    %13 = vector.shape_cast %12 : vector<16x16x128xbf16> to vector<256x128xbf16>
    %c0_7 = arith.constant 0 : index
    %c128 = arith.constant 128 : index
    %14 = vector.load %arg14[%c0_7, %c128] : memref<256x1152xbf16, #tpu.memory_space<vmem>>, vector<256x128xbf16>
    tpu.vector_store %arg14[%c0_7, %c128], %13 {strides = array<i32>} : memref<256x1152xbf16, #tpu.memory_space<vmem>>, vector<256x128xbf16>,
    %c0_i32_8 = arith.constant 0 : i32
    %15 = arith.addi %4, %c0_i32_8 : i32
    %16 = arith.index_cast %15 : i32 to index
    %c2 = arith.constant 2 : index
    %c0_9 = arith.constant 0 : index
    %17 = vector.load %arg13[%16, %c2, %c0_9] : memref<18x18x128xbf16, #tpu.memory_space<vmem>>, vector<16x16x128xbf16>
    %18 = vector.shape_cast %17 : vector<16x16x128xbf16> to vector<256x128xbf16>
    %c0_10 = arith.constant 0 : index
    %c256 = arith.constant 256 : index
    %19 = vector.load %arg14[%c0_10, %c256] : memref<256x1152xbf16, #tpu.memory_space<vmem>>, vector<256x128xbf16>
    tpu.vector_store %arg14[%c0_10, %c256], %18 {strides = array<i32>} : memref<256x1152xbf16, #tpu.memory_space<vmem>>, vector<256x128xbf16>,
    %c1_i32 = arith.constant 1 : i32
    %20 = arith.addi %4, %c1_i32 : i32
    %21 = arith.index_cast %20 : i32 to index
    %c0_11 = arith.constant 0 : index
    %c0_12 = arith.constant 0 : index
    %22 = vector.load %arg13[%21, %c0_11, %c0_12] : memref<18x18x128xbf16, #tpu.memory_space<vmem>>, vector<16x16x128xbf16>
    %23 = vector.shape_cast %22 : vector<16x16x128xbf16> to vector<256x128xbf16>
    %c0_13 = arith.constant 0 : index
    %c384 = arith.constant 384 : index
    %24 = vector.load %arg14[%c0_13, %c384] : memref<256x1152xbf16, #tpu.memory_space<vmem>>, vector<256x128xbf16>
    tpu.vector_store %arg14[%c0_13, %c384], %23 {strides = array<i32>} : memref<256x1152xbf16, #tpu.memory_space<vmem>>, vector<256x128xbf16>,
    %c1_i32_14 = arith.constant 1 : i32
    %25 = arith.addi %4, %c1_i32_14 : i32
    %26 = arith.index_cast %25 : i32 to index
    %c1_15 = arith.constant 1 : index
    %c0_16 = arith.constant 0 : index
    %27 = vector.load %arg13[%26, %c1_15, %c0_16] : memref<18x18x128xbf16, #tpu.memory_space<vmem>>, vector<16x16x128xbf16>
    %28 = vector.shape_cast %27 : vector<16x16x128xbf16> to vector<256x128xbf16>
    %c0_17 = arith.constant 0 : index
    %c512 = arith.constant 512 : index
    %29 = vector.load %arg14[%c0_17, %c512] : memref<256x1152xbf16, #tpu.memory_space<vmem>>, vector<256x128xbf16>
    tpu.vector_store %arg14[%c0_17, %c512], %28 {strides = array<i32>} : memref<256x1152xbf16, #tpu.memory_space<vmem>>, vector<256x128xbf16>,
    %c1_i32_18 = arith.constant 1 : i32
    %30 = arith.addi %4, %c1_i32_18 : i32
    %31 = arith.index_cast %30 : i32 to index
    %c2_19 = arith.constant 2 : index
    %c0_20 = arith.constant 0 : index
    %32 = vector.load %arg13[%31, %c2_19, %c0_20] : memref<18x18x128xbf16, #tpu.memory_space<vmem>>, vector<16x16x128xbf16>
    %33 = vector.shape_cast %32 : vector<16x16x128xbf16> to vector<256x128xbf16>
    %c0_21 = arith.constant 0 : index
    %c640 = arith.constant 640 : index
    %34 = vector.load %arg14[%c0_21, %c640] : memref<256x1152xbf16, #tpu.memory_space<vmem>>, vector<256x128xbf16>
    tpu.vector_store %arg14[%c0_21, %c640], %33 {strides = array<i32>} : memref<256x1152xbf16, #tpu.memory_space<vmem>>, vector<256x128xbf16>,
    %c2_i32 = arith.constant 2 : i32
    %35 = arith.addi %4, %c2_i32 : i32
    %36 = arith.index_cast %35 : i32 to index
    %c0_22 = arith.constant 0 : index
    %c0_23 = arith.constant 0 : index
    %37 = vector.load %arg13[%36, %c0_22, %c0_23] : memref<18x18x128xbf16, #tpu.memory_space<vmem>>, vector<16x16x128xbf16>
    %38 = vector.shape_cast %37 : vector<16x16x128xbf16> to vector<256x128xbf16>
    %c0_24 = arith.constant 0 : index
    %c768 = arith.constant 768 : index
    %39 = vector.load %arg14[%c0_24, %c768] : memref<256x1152xbf16, #tpu.memory_space<vmem>>, vector<256x128xbf16>
    tpu.vector_store %arg14[%c0_24, %c768], %38 {strides = array<i32>} : memref<256x1152xbf16, #tpu.memory_space<vmem>>, vector<256x128xbf16>,
    %c2_i32_25 = arith.constant 2 : i32
    %40 = arith.addi %4, %c2_i32_25 : i32
    %41 = arith.index_cast %40 : i32 to index
    %c1_26 = arith.constant 1 : index
    %c0_27 = arith.constant 0 : index
    %42 = vector.load %arg13[%41, %c1_26, %c0_27] : memref<18x18x128xbf16, #tpu.memory_space<vmem>>, vector<16x16x128xbf16>
    %43 = vector.shape_cast %42 : vector<16x16x128xbf16> to vector<256x128xbf16>
    %c0_28 = arith.constant 0 : index
    %c896 = arith.constant 896 : index
    %44 = vector.load %arg14[%c0_28, %c896] : memref<256x1152xbf16, #tpu.memory_space<vmem>>, vector<256x128xbf16>
    tpu.vector_store %arg14[%c0_28, %c896], %43 {strides = array<i32>} : memref<256x1152xbf16, #tpu.memory_space<vmem>>, vector<256x128xbf16>,
    %c2_i32_29 = arith.constant 2 : i32
    %45 = arith.addi %4, %c2_i32_29 : i32
    %46 = arith.index_cast %45 : i32 to index
    %c2_30 = arith.constant 2 : index
    %c0_31 = arith.constant 0 : index
    %47 = vector.load %arg13[%46, %c2_30, %c0_31] : memref<18x18x128xbf16, #tpu.memory_space<vmem>>, vector<16x16x128xbf16>
    %48 = vector.shape_cast %47 : vector<16x16x128xbf16> to vector<256x128xbf16>
    %c0_32 = arith.constant 0 : index
    %c1024 = arith.constant 1024 : index
    %49 = vector.load %arg14[%c0_32, %c1024] : memref<256x1152xbf16, #tpu.memory_space<vmem>>, vector<256x128xbf16>
    tpu.vector_store %arg14[%c0_32, %c1024], %48 {strides = array<i32>} : memref<256x1152xbf16, #tpu.memory_space<vmem>>, vector<256x128xbf16>,
    %c0_33 = arith.constant 0 : index
    %c0_34 = arith.constant 0 : index
    %50 = vector.load %arg14[%c0_33, %c0_34] : memref<256x1152xbf16, #tpu.memory_space<vmem>>, vector<256x1152xbf16>
    %c0_35 = arith.constant 0 : index
    %c0_36 = arith.constant 0 : index
    %51 = vector.load %arg6[%c0_35, %c0_36] : memref<1152x4xbf16, #tpu.memory_space<vmem>>, vector<1152x4xbf16>
    %cst = arith.constant dense<0.000000e+00> : vector<256x4xf32>
    %52 = tpu.matmul %50, %51, %cst {dimension_numbers = #tpu.dot_dimension_numbers<[1], [0], [0], [1], [0, 0, 1, 1], [], []>} : vector<256x1152xbf16>, vector<1152x4xbf16>, vector<256x4xf32> -> vector<256x4xf32>
    %c0_37 = arith.constant 0 : index
    %c0_38 = arith.constant 0 : index
    %53 = vector.load %arg7[%c0_37, %c0_38] : memref<1x4xf32, #tpu.memory_space<vmem>>, vector<1x4xf32>
    %54 = vector.broadcast %53 : vector<1x4xf32> to vector<256x4xf32>
    %55 = arith.mulf %52, %54 : vector<256x4xf32>
    %c0_39 = arith.constant 0 : index
    %c0_40 = arith.constant 0 : index
    %56 = vector.load %arg8[%c0_39, %c0_40] : memref<1x4xf32, #tpu.memory_space<vmem>>, vector<1x4xf32>
    %57 = vector.broadcast %56 : vector<1x4xf32> to vector<256x4xf32>
    %58 = arith.addf %55, %57 : vector<256x4xf32>
    %cst_41 = arith.constant 0.000000e+00 : f32
    %59 = vector.broadcast %cst_41 : f32 to vector<256x4xf32>
    %60 = arith.maximumf %58, %59 : vector<256x4xf32>
    %61 = arith.truncf %60 : vector<256x4xf32> to vector<256x4xbf16>
    %c0_42 = arith.constant 0 : index
    %c0_43 = arith.constant 0 : index
    %62 = vector.load %arg9[%c0_42, %c0_43] : memref<4x16xbf16, #tpu.memory_space<vmem>>, vector<4x16xbf16>
    %cst_44 = arith.constant dense<0.000000e+00> : vector<256x16xf32>
    %63 = tpu.matmul %61, %62, %cst_44 {dimension_numbers = #tpu.dot_dimension_numbers<[1], [0], [0], [1], [0, 0, 1, 1], [], []>} : vector<256x4xbf16>, vector<4x16xbf16>, vector<256x16xf32> -> vector<256x16xf32>
    %c0_45 = arith.constant 0 : index
    %c0_46 = arith.constant 0 : index
    %64 = vector.load %arg10[%c0_45, %c0_46] : memref<1x16xf32, #tpu.memory_space<vmem>>, vector<1x16xf32>
    %65 = vector.broadcast %64 : vector<1x16xf32> to vector<256x16xf32>
    %66 = arith.mulf %63, %65 : vector<256x16xf32>
    %c0_47 = arith.constant 0 : index
    %c0_48 = arith.constant 0 : index
    %67 = vector.load %arg11[%c0_47, %c0_48] : memref<1x16xf32, #tpu.memory_space<vmem>>, vector<1x16xf32>
    %68 = vector.broadcast %67 : vector<1x16xf32> to vector<256x16xf32>
    %69 = arith.addf %66, %68 : vector<256x16xf32>
    %c0_49 = arith.constant 0 : index
    %70 = arith.index_cast %4 : i32 to index
    %c0_50 = arith.constant 0 : index
    %c0_51 = arith.constant 0 : index
    %71 = vector.load %arg2[%c0_49, %70, %c0_50, %c0_51] : memref<1x16x16x16xf32, #tpu.memory_space<vmem>>, vector<1x16x16x16xf32>
    %72 = vector.shape_cast %71 : vector<1x16x16x16xf32> to vector<16x16x16xf32>
    %73 = vector.shape_cast %72 : vector<16x16x16xf32> to vector<256x16xf32>
    %74 = arith.addf %69, %73 : vector<256x16xf32>
    %cst_52 = arith.constant 0.000000e+00 : f32
    %75 = vector.broadcast %cst_52 : f32 to vector<256x16xf32>
    %76 = arith.maximumf %74, %75 : vector<256x16xf32>
    %77 = vector.shape_cast %76 : vector<256x16xf32> to vector<16x16x16xf32>
    %c0_53 = arith.constant 0 : index
    %c0_54 = arith.constant 0 : index
    %c0_55 = arith.constant 0 : index
    %c0_56 = arith.constant 0 : index
    %78 = vector.load %arg12[%c0_53, %c0_54, %c0_55, %c0_56] : memref<1x16x16x16xf32, #tpu.memory_space<vmem>>, vector<1x16x16x16xf32>
    %79 = vector.shape_cast %78 : vector<1x16x16x16xf32> to vector<16x16x16xf32>
    %80 = vector.shape_cast %77 : vector<16x16x16xf32> to vector<1x16x16x16xf32>
    tpu.vector_store %arg12[%c0_53, %c0_54, %c0_55, %c0_56], %80 {strides = array<i32>} : memref<1x16x16x16xf32, #tpu.memory_space<vmem>>, vector<1x16x16x16xf32>,
    return
  }
  func.func @transform_0(%arg0: i32, %arg1: i32) -> (i32, i32, i32, i32) {
    %c0_i32 = arith.constant 0 : i32
    %c0_i32_0 = arith.constant 0 : i32
    %c0_i32_1 = arith.constant 0 : i32
    %c0_i32_2 = arith.constant 0 : i32
    return %arg0, %c0_i32, %c0_i32_0, %c0_i32_1 : i32, i32, i32, i32
  }
  func.func @transform_1(%arg0: i32, %arg1: i32) -> (i32, i32) {
    %c0_i32 = arith.constant 0 : i32
    %c0_i32_0 = arith.constant 0 : i32
    %c0_i32_1 = arith.constant 0 : i32
    return %c0_i32, %c0_i32_0 : i32, i32
  }
  func.func @transform_2(%arg0: i32, %arg1: i32) -> (i32, i32) {
    %c0_i32 = arith.constant 0 : i32
    %c0_i32_0 = arith.constant 0 : i32
    %c0_i32_1 = arith.constant 0 : i32
    return %c0_i32, %c0_i32_0 : i32, i32
  }
  func.func @transform_3(%arg0: i32, %arg1: i32) -> (i32, i32) {
    %c0_i32 = arith.constant 0 : i32
    %c0_i32_0 = arith.constant 0 : i32
    %c0_i32_1 = arith.constant 0 : i32
    return %c0_i32, %c0_i32_0 : i32, i32
  }
  func.func @transform_4(%arg0: i32, %arg1: i32) -> (i32, i32) {
    %c0_i32 = arith.constant 0 : i32
    %c0_i32_0 = arith.constant 0 : i32
    %c0_i32_1 = arith.constant 0 : i32
    return %c0_i32, %c0_i32_0 : i32, i32
  }
  func.func @transform_5(%arg0: i32, %arg1: i32) -> (i32, i32) {
    %c0_i32 = arith.constant 0 : i32
    %c0_i32_0 = arith.constant 0 : i32
    %c0_i32_1 = arith.constant 0 : i32
    return %c0_i32, %c0_i32_0 : i32, i32
  }
  func.func @transform_6(%arg0: i32, %arg1: i32) -> (i32, i32) {
    %c0_i32 = arith.constant 0 : i32
    %c0_i32_0 = arith.constant 0 : i32
    %c0_i32_1 = arith.constant 0 : i32
    return %c0_i32, %c0_i32_0 : i32, i32
  }
  func.func @transform_7(%arg0: i32, %arg1: i32) -> (i32, i32) {
    %c0_i32 = arith.constant 0 : i32
    %c0_i32_0 = arith.constant 0 : i32
    %c0_i32_1 = arith.constant 0 : i32
    return %c0_i32, %c0_i32_0 : i32, i32
  }
  func.func @transform_8(%arg0: i32, %arg1: i32) -> (i32, i32) {
    %c0_i32 = arith.constant 0 : i32
    %c0_i32_0 = arith.constant 0 : i32
    %c0_i32_1 = arith.constant 0 : i32
    return %c0_i32, %c0_i32_0 : i32, i32
  }
  func.func @transform_9(%arg0: i32, %arg1: i32) -> (i32, i32) {
    %c0_i32 = arith.constant 0 : i32
    %c0_i32_0 = arith.constant 0 : i32
    %c0_i32_1 = arith.constant 0 : i32
    return %c0_i32, %c0_i32_0 : i32, i32
  }
  func.func @transform_10(%arg0: i32, %arg1: i32) -> (i32, i32, i32, i32) {
    %c0_i32 = arith.constant 0 : i32
    %c0_i32_0 = arith.constant 0 : i32
    %c0_i32_1 = arith.constant 0 : i32
    return %arg0, %arg1, %c0_i32, %c0_i32_0 : i32, i32, i32, i32
  }
}

</mosaic_0001>

<bundles_post_ra>
// kernel: tpu_custom_call.1
= control target key start
LH: loop header
LB: loop body
LE: loop exit
PB: predicated region body
PF: predicated region fallthrough
CT: control target
= control target key end

     0   :  { %s10464_s0 = inlined_call_operand.vmem [shape: f32[2,16,16,16], index: 0, kind: input, shape index: {}]   ;;  %s10465_s1 = inlined_call_operand.vmem [shape: bf16[16,128], index: 1, kind: input, shape index: {}]   ;;  %s10466_s2 = inlined_call_operand.vmem [shape: f32[1,128], index: 2, kind: input, shape index: {}]   ;;  %s10467_s3 = inlined_call_operand.vmem [shape: f32[1,128], index: 3, kind: input, shape index: {}]   ;;  %s10468_s4 = inlined_call_operand.vmem [shape: bf16[1152,4], index: 4, kind: input, shape index: {}]   ;;  %s10469_s5 = inlined_call_operand.vmem [shape: f32[1,4], index: 5, kind: input, shape index: {}]   ;;  %s10470_s6 = inlined_call_operand.vmem [shape: f32[1,4], index: 6, kind: input, shape index: {}]   ;;  %s10471_s7 = inlined_call_operand.vmem [shape: bf16[4,16], index: 7, kind: input, shape index: {}]   ;;  %s10472_s8 = inlined_call_operand.vmem [shape: f32[1,16], index: 8, kind: input, shape index: {}]   ;;  %s10473_s9 = inlined_call_operand.vmem [shape: f32[1,16], index: 9, kind: input, shape index: {}]   ;;  %s10474_s10 = inlined_call_operand.hbm [shape: f32[2,16,16,16], index: 10, kind: output, shape index: {}]  }
   0x1   :  { %10477 = sst [smem:[#allocation88_spill]] %s10464_s0 }
   0x2   :  { %15 = vsyncpa [#allocation5], 0 }
   0x3   :  { %17 = vsyncpa [#allocation5 + $0x1], 0  ;;  %s8283_s13 = smov 0   ;;  %s8285_s14 = smov 0  }
   0x4   :  { %s8287_s15 = smov 0   ;;  %s8289_s16 = smov 0  }
   0x5   :  { %s8291_s17 = smov 0   ;;  %s8293_s18 = smov 0  }
   0x6 LB: > { %s6622_s19 = sadd.s32 4294967295, %s8223_s18   ;;  %s6623_s20 = sadd.s32 4294967294, %s8223_s18   ;;  %s8223_s18 = sphi %s8293_s18, %s23_s18   ;;  %s8219_s17 = sphi %s8291_s17, %s10665_s17   ;;  %s8215_s16 = sphi %s8289_s16, %s10664_s16   ;;  %s8211_s15 = sphi %s8287_s15, %s10663_s15   ;;  %s8207_s14 = sphi %s8285_s14, %s10662_s14   ;;  %s8203_s13 = sphi %s8283_s13, %s10661_s13  }
   0x7   : > { %s35_s21 = sadd.s32 1, %s8219_s17  ;;  %s259_s22 = sadd.s32 1, %s8211_s15 }
   0x8   : > { %p37_p0 = scmp.ge.s32.totalorder %s35_s21, 2  ;;  %p269_p1 = scmp.ne.s32.totalorder %s8211_s15, %s8207_s14 }
   0x9   : > { %p270_p2 = scmp.eq.s32.totalorder %s6622_s19, 1  ;;  %p275_p3 = scmp.ne.s32.totalorder %s8207_s14, %s8203_s13 }
   0xa   : > { %s10667_s21 = smov (%p37_p0, %s35_s21), 0  ;;  %p276_p5 = scmp.eq.s32.totalorder %s6623_s20, 1 }
   0xb   : > { %p8323_p4 = por %p270_p2, %p269_p1  ;;  %s254_s24 = ssub.s32 %s8219_s17, %s10667_s21 }
   0xc   : > { %p6626_p6 = scmp.ge.s32.totalorder %s8223_s18, 1  ;;  %p257_p7 = scmp.eq.s32.totalorder %s254_s24, 0 }
   0xd   : > { %p8330_p8 = por %p276_p5, %p275_p3  ;;  %p329_p9 = scmp.lt.s32.totalorder %s8223_s18, 3 }
   0xe   : > { %s8336_s26 = scalar_select %p257_p7, %s8211_s15, %s259_s22  }
   0xf   : > { %p330_p10 = pnand %p6626_p6, %p329_p9 }
  0x11   : > { %333 = sbr.rel (%p330_p10) target bundleno = 1310 (0x51e), region = 60 }
  0x16   : > { %v7840_v0 = vld [vmem:[%s10465_s1] sm:$0xff]  ;;  %p367_p11 = scmp.lt.s32.totalorder %s8215_s16, 1  ;;  %s10480_s0 = sld [smem:[#allocation88_spill]]  ;;  %vm554_vm0 = vcmask 130048   ;;  %v7992_v19 = vld [vmem:[%s10468_s4 + $0x38] sm:$0xff]  ;;  %vm385_vm1 = vcmask 1040384  }
  0x17   : > { %610 = vmatpush.bf16.msra.mxu0 %v7840_v0  ;;  %8058 = vmatpush.bf16.msra.mxu3 %v7840_v0  ;;  %vm386_vm2 = vsmask.f32 256  ;;  %v10481_v20 = vmov 0  ;;  %v391_v21 = vld [vmem:[#allocation2 + $0xc] sm:$0x1]  ;;  %v7991_v22 = vld [vmem:[%s10468_s4 + $0x30] sm:$0xff] }
  0x18   : > { %s368_s29 = scalar_select %p367_p11, %s8215_s16, 1  ;;  %vm8371_vm3 = vmand %vm385_vm1, %vm386_vm2  ;;  %5251 = vmatpush.bf16.msra.mxu1 %v7992_v19  ;;  %v8225_v27 = vmov 0   ;;  %v7990_v28 = vld [vmem:[%s10468_s4 + $0x28] sm:$0xff]  ;;  %v8388_v29 = vld [vmem:[%s10468_s4 + $0x78] sm:$0xff]  ;;  %vm442_vm4 = vsmask.f32 7938 }
  0x19   : > { %v10482_v20 = vsel %vm8371_vm3, 4294967295, %v10481_v20  ;;  %v392_v23 = vsel %vm8371_vm3, 0, %v391_v21  ;;  %378 = vst [vmem:[#allocation2] sm:$0xf] %v8225_v27  ;;  %5340 = vmatpush.bf16.msra.mxu2 %v8388_v29  ;;  %v7989_v30 = vld [vmem:[%s10468_s4 + $0x20] sm:$0xff]  ;;  %v8398_v31 = vld [vmem:[%s10468_s4 + $0x70] sm:$0xff]  ;;  %vm8404_vm5 = vmand %vm385_vm1, %vm442_vm4 }
  0x1a   : > { %s7839_s30 = sshll.u32 %s368_s29, 8  ;;  %10483 = vst [vmem:[#allocation7_spill] sm:$0xff] %v10482_v20  ;;  %v10484_v34 = vmov 0  ;;  %v7988_v35 = vld [vmem:[%s10468_s4 + $0x18] sm:$0xff]  ;;  %v8415_v36 = vld [vmem:[%s10468_s4 + $0x68] sm:$0xff]  ;;  %v7987_v43 = vld [vmem:[%s10468_s4 + $0x10] sm:$0xff] }
  0x1b   : > { %8059 = vmatpush.bf16.msrb.mxu3 %v7992_v19  ;;  %393 = vst [vmem:[#allocation2 + $0xc] sm:$0x1] %v392_v23  ;;  %v10485_v34 = vsel %vm8404_vm5, 4294967295, %v10484_v34  ;;  %v447_v41 = vld [vmem:[#allocation2 + $0x14] sm:$0x1]  ;;  %v8430_v45 = vld [vmem:[%s10468_s4 + $0x60] sm:$0xff] }
  0x1c   : > { %s8346_s19 = scalar_lea.vmem %s10480_s0, %s7839_s30  ;;  %5252 = vmatpush.bf16.msra.mxu1 %v7991_v22  ;;  %379 = vst [vmem:[#allocation2 + $0x4] sm:$0xf] %v8225_v27  ;;  %v448_v42 = vsel %vm8404_vm5, 0, %v447_v41  ;;  %v7986_v50 = vld [vmem:[%s10468_s4 + $0x8] sm:$0xff]  ;;  %v8440_v54 = vld [vmem:[%s10468_s4 + $0x58] sm:$0xff]  ;;  %vm1151_vm9 = vcmask 1043456  }
  0x1d   : > { %v498_v1 = vld [vmem:[%s8346_s19] sm:$0xff]  ;;  %v499_v2 = vld [vmem:[%s8346_s19 + $0x8] sm:$0xff]  ;;  %v500_v4 = vld [vmem:[%s8346_s19 + $0x10] sm:$0xff]  ;;  %380 = vst [vmem:[#allocation2 + $0x8] sm:$0x1] %v8225_v27  ;;  %5341 = vmatpush.bf16.msra.mxu2 %v8398_v31  ;;  %vm1928_vm13 = vcmask 1042432  }
  0x1e   : > { %v530_v3 = vpack.c.bf16 %v499_v2, %v498_v1  ;;  %v501_v5 = vld [vmem:[%s8346_s19 + $0x18] sm:$0xff]  ;;  %v502_v7 = vld [vmem:[%s8346_s19 + $0x20] sm:$0xff]  ;;  %v503_v8 = vld [vmem:[%s8346_s19 + $0x28] sm:$0xff]  ;;  %382 = vst [vmem:[#allocation2 + $0xcc] sm:$0xf] %v8225_v27  ;;  %vm1929_vm14 = vcmask 1046532  }
  0x1f   : > { %v531_v6 = vpack.c.bf16 %v501_v5, %v500_v4  ;;  %v532_v9 = vpack.c.bf16 %v503_v8, %v502_v7  ;;  %v504_v10 = vld [vmem:[%s8346_s19 + $0x30] sm:$0xff]  ;;  %v505_v11 = vld [vmem:[%s8346_s19 + $0x38] sm:$0xff]  ;;  %v506_v13 = vld [vmem:[%s8346_s19 + $0x40] sm:$0xff]  ;;  %8060 = vmatpush.bf16.msrb.mxu3 %v7991_v22  ;;  %383 = vst [vmem:[#allocation2 + $0xd0] sm:$0xf] %v8225_v27  ;;  %vm6222_vm1 = vcmask 1041408  }
  0x20   : > { %6634 = vmatmul.msk.bf16.vlgmr.msra.gmra.mxu0 %vm554_vm0, %v530_v3  ;;  %v533_v12 = vpack.c.bf16 %v505_v11, %v504_v10  ;;  %v507_v14 = vld [vmem:[%s8346_s19 + $0x48] sm:$0xff]  ;;  %v508_v16 = vld [vmem:[%s8346_s19 + $0x50] sm:$0xff]  ;;  %v509_v17 = vld [vmem:[%s8346_s19 + $0x58] sm:$0xff]  ;;  %5253 = vmatpush.bf16.msra.mxu1 %v7990_v28  ;;  %384 = vst [vmem:[#allocation2 + $0xd4] sm:$0x1] %v8225_v27  ;;  %s364_s28 = sand.u32 1, %s8207_s14  }
  0x21   : > { %v534_v15 = vpack.c.bf16 %v507_v14, %v506_v13  ;;  %v535_v18 = vpack.c.bf16 %v509_v17, %v508_v16  ;;  %v510_v24 = vld [vmem:[%s8346_s19 + $0x60] sm:$0xff]  ;;  %v511_v25 = vld [vmem:[%s8346_s19 + $0x68] sm:$0xff]  ;;  %10486 = vst [vmem:[#allocation8_spill] sm:$0xff] %v10485_v34  ;;  %v512_v38 = vld [vmem:[%s8346_s19 + $0x70] sm:$0xff]  ;;  %5342 = vmatpush.bf16.msra.mxu2 %v8415_v36  ;;  %vm1381_vm6 = vsmask.f32 3328 }
  0x22   : > { %v536_v26 = vpack.c.bf16 %v511_v25, %v510_v24  ;;  %v388_v32 = vld [vmem:[#allocation2] sm:$0x1]  ;;  %v513_v39 = vld [vmem:[%s8346_s19 + $0x78] sm:$0xff]  ;;  %449 = vst [vmem:[#allocation2 + $0x14] sm:$0x1] %v448_v42  ;;  %v8451_v2 = vld [vmem:[%s10468_s4 + $0x50] sm:$0xff] }
  0x23   : > { %8061 = vmatpush.bf16.msrb.mxu3 %v7990_v28  ;;  %v389_v33 = vsel %vm8371_vm3, 0, %v388_v32  ;;  %v537_v44 = vpack.c.bf16 %v513_v39, %v512_v38  ;;  %v1270_v47 = vld [vmem:[#allocation2 + $0x4] sm:$0xf]  ;;  %v394_v61 = vld [vmem:[#allocation2 + $0x18] sm:$0x1]  ;;  %v8461_v11 = vld [vmem:[%s10468_s4 + $0x48] sm:$0xff] }
  0x24   : > { %5254 = vmatpush.bf16.msra.mxu1 %v7989_v30  ;;  %390 = vst [vmem:[#allocation2] sm:$0x1] %v389_v33  ;;  %v444_v37 = vld [vmem:[#allocation2 + $0x8] sm:$0x1]  ;;  %v1334_v49 = vld [vmem:[#allocation2 + $0x4] sm:$0xf]  ;;  %vm8496_vm10 = vmand %vm1151_vm9, %vm442_vm4 }
  0x25   : > { %v445_v40 = vsel %vm8404_vm5, 0, %v444_v37  ;;  %5343 = vmatpush.bf16.msra.mxu2 %v8430_v45  ;;  %1302 = vst [vmem:[#allocation3 + $0x24] sm:$0xf] %v1270_v47  ;;  %v1394_v53 = vshll.u32 %v1334_v49, 16  ;;  %v1398_v55 = vshrl.u32 %v1334_v49, 16  ;;  %v395_v0 = vsel %vm8371_vm3, 0, %v394_v61  ;;  %vm8740_vm15 = vmor %vm1928_vm13, %vm1929_vm14 }
  0x26   : > { %446 = vst [vmem:[#allocation2 + $0x8] sm:$0x1] %v445_v40  ;;  %v7985_v1 = vld [vmem:[%s10468_s4] sm:$0xff]  ;;  %vm1382_vm7 = vsmask.f32 7440  ;;  %v517_v47 = vld [vmem:[%s8346_s19 + $0x98] sm:$0xff] }
  0x27   : > { %8062 = vmatpush.bf16.msrb.mxu3 %v7989_v30  ;;  %v1396_v58 = vrot.slane %v1394_v53, 5  ;;  %v1400_v60 = vrot.slane %v1398_v55, 4  ;;  %396 = vst [vmem:[#allocation2 + $0x18] sm:$0x1] %v395_v0  ;;  %vm8454_vm8 = vmor %vm1381_vm6, %vm1382_vm7  ;;  %v514_v14 = vld [vmem:[%s8346_s19 + $0x80] sm:$0xff]  ;;  %v8016_v0 = vld [vmem:[%s10468_s4 + $0xf8] sm:$0xff] }
  0x28   : > { %5255 = vmatpush.bf16.msra.mxu1 %v7988_v35  ;;  %v8472_v16 = vld [vmem:[%s10466_s2] ss:$0 sm:$0xff]  ;;  %v397_v32 = vld [vmem:[#allocation2 + $0x24] sm:$0x1]  ;;  %v1153_v42 = vld [vmem:[#allocation2 + $0xc] sm:$0xf]  ;;  %5518 = vmatpush.bf16.msrb.mxu0 %v8016_v0 }
  0x29   : > { %5344 = vmatpush.bf16.msra.mxu2 %v8440_v54  ;;  %v1401_v3 = vor.u32 %v1400_v60, %v1396_v58  ;;  %v450_v17 = vld [vmem:[#allocation2 + $0x20] sm:$0x1]  ;;  %vm828_vm11 = vsmask.f32 4368  ;;  %v524_v0 = vld [vmem:[%s8346_s19 + $0xd0] sm:$0xff]  ;;  %s6627_s29 = sshll.u32 %s364_s28, 8 }
  0x2a   : > { %v451_v21 = vsel %vm8404_vm5, 0, %v450_v17  ;;  %v8485_v22 = vld [vmem:[%s10468_s4 + $0x40] sm:$0xff]  ;;  %vm8510_vm12 = vmor %vm386_vm2, %vm828_vm11  ;;  %vm6173_vm2 = vcmask 31744   ;;  %s10196_s30 = scalar_lea.vmem [#allocation4], %s6627_s29  ;;  %s8057_s24 = sshll.u32 %s8215_s16, 8 }
  0x2b   : > { %8063 = vmatpush.bf16.msrb.mxu3 %v7988_v35  ;;  %v1269_v46 = vld [vmem:[#allocation2] sm:$0xf]  ;;  %v1402_v8 = vrot.slane %v1401_v3, 4  ;;  %452 = vst [vmem:[#allocation2 + $0x20] sm:$0x1] %v451_v21  ;;  %v398_v35 = vsel %vm8371_vm3, 0, %v397_v32  ;;  %s6533_s11 = scalar_lea.hbm %s10474_s10, %s8057_s24 }
  0x2c   : > { %5256 = vmatpush.bf16.msra.mxu1 %v7987_v43  ;;  %v1333_v48 = vld [vmem:[#allocation2] sm:$0xf]  ;;  %1301 = vst [vmem:[#allocation3] sm:$0xf] %v1269_v46  ;;  %v7845_v5 = vld [vmem:[#allocation3 + $0x20] sm:$0xf0] }
  0x2d   : > { %v1385_v51 = vshrl.u32 %v1333_v48, 16  ;;  %v1388_v52 = vshll.u32 %v1333_v48, 16  ;;  %v1335_v59 = vld [vmem:[#allocation2 + $0x8] sm:$0x1]  ;;  %5345 = vmatpush.bf16.msra.mxu2 %v8451_v2  ;;  %399 = vst [vmem:[#allocation2 + $0x24] sm:$0x1] %v398_v35 }
  0x2e   : > { %v1404_v63 = vshll.u32 %v1335_v59, 16  ;;  %v516_v46 = vld [vmem:[%s8346_s19 + $0x90] sm:$0xff]  ;;  %v518_v32 = vld [vmem:[%s8346_s19 + $0xa0] sm:$0xff]  ;;  %s6534_s12 = sshll.u32 %s10196_s30, 4  ;;  %s6536_s20 = sshll.u32 %s6533_s11, 4  ;;  %s6535_s12 = int_to_ptr.vmem [resolvable:$true] %s6534_s12  ;;  %s6537_s20 = int_to_ptr.hbm [resolvable:$true] %s6536_s20 }
  0x2f   : > { %8064 = vmatpush.bf16.msrb.mxu3 %v7987_v43  ;;  %v1387_v56 = vrot.slane %v1385_v51, 4  ;;  %v1390_v57 = vrot.slane %v1388_v52, 5  ;;  %v539_v53 = vpack.c.bf16 %v517_v47, %v516_v46  ;;  %s6519_s16 = scalar_lea.sflag [#allocation5], %s364_s28  ;;  %s8159_s22 = sshra.s32 %s6537_s20, 4  ;;  %s8160_s22 = int_to_ptr.hbm [resolvable:$true] %s8159_s22 }
  0x30   : > { %6635 = vmatmul.msk.bf16.gmra.mxu0 %vm554_vm0, %v531_v6  ;;  %5257 = vmatpush.bf16.msra.mxu1 %v7986_v50  ;;  %s8161_s24 = scalar_lea.hbm %s8160_s22, 256  ;;  %s8165_s29 = scalar_lea.hbm %s10474_s10, 512 }
  0x31   : > { %v1391_v62 = vor.u32 %v1390_v57, %v1387_v56  ;;  %5346 = vmatpush.bf16.msra.mxu2 %v8461_v11  ;;  %p8162_p12 = scmp.ne.s32.totalorder %s8160_s22, %s8161_s24  ;;  %p8166_p1 = scmp.lt.s32.totalorder %s8160_s22, %s10474_s10 }
  0x32   : > { %p8167_p2 = scmp.lt.s32.totalorder %s8165_s29, %s8161_s24 }
  0x33   : > { %8065 = vmatpush.bf16.msrb.mxu3 %v7986_v50  ;;  %v6956_v4 = vld [vmem:[#allocation3] sm:$0xf]  ;;  %v1392_v7 = vrot.slane %v1391_v62, 4  ;;  %v453_v50 = vld [vmem:[#allocation2 + $0x2c] sm:$0x1]  ;;  %p8163_p13 = pnand %p8162_p12, %p8323_p4 }
  0x34   : > { %5258 = vmatpush.bf16.msra.mxu1 %v7985_v1  ;;  %v6957_v10 = vor.u32 %v7845_v5, %v6956_v4  ;;  %v454_v55 = vsel %vm8404_vm5, 0, %v453_v50  ;;  %p8168_p3 = por %p8167_p2, %p8166_p1 }
  0x35   : > { %5347 = vmatpush.bf16.msra.mxu2 %v8485_v22  ;;  %455 = vst [vmem:[#allocation2 + $0x2c] sm:$0x1] %v454_v55  ;;  %v1164_v55 = vld [vmem:[#allocation2 + $0x20] sm:$0x1]  ;;  %p8164_p0 = pneg %p8163_p13 }
  0x37   : > { %8066 = vmatpush.bf16.msrb.mxu3 %v7985_v1  ;;  %5259 = vmatmul.bf16.vlgmr.msra.gmra.mxu1 %v6957_v10  ;;  %p8169_p5 = pnand %p8168_p3, %p8164_p0 }
  0x40   : > { %6636 = vmatmul.msk.bf16.gmra.mxu0 %vm554_vm0, %v532_v9  ;;  %v1406_v9 = vrot.slane %v1404_v63, 5  ;;  %v1157_v63 = vld [vmem:[#allocation2 + $0x14] sm:$0x1] }
  0x42   : > { %v1407_v13 = vsel %vm8454_vm8, %v1402_v8, %v1406_v9 }
  0x43   : > { %1801 = vst [vmem:[#allocation3 + $0x28] sm:$0xf] %v1407_v13 }
  0x4a   : > { %v6958_v27 = vld [vmem:[#allocation3 + $0x24] sm:$0xf0] }
  0x50   : > { %6637 = vmatmul.msk.bf16.gmra.mxu0 %vm554_vm0, %v533_v12  ;;  %v1397_v12 = vsel %vm8454_vm8, %v1392_v7, %v1396_v58 }
  0x51   : > { %1800 = vst [vmem:[#allocation3 + $0x4] sm:$0xf] %v1397_v12  ;;  %v400_v12 = vld [vmem:[#allocation2 + $0x30] sm:$0x1] }
  0x60   : > { %6638 = vmatmul.msk.bf16.gmra.mxu0 %vm554_vm0, %v534_v15  ;;  %v515_v15 = vld [vmem:[%s8346_s19 + $0x88] sm:$0xff] }
  0x61   : > { %v538_v19 = vpack.c.bf16 %v515_v15, %v514_v14  ;;  %v401_v14 = vsel %vm8371_vm3, 0, %v400_v12  ;;  %v8015_v15 = vld [vmem:[%s10468_s4 + $0xf0] sm:$0xff] }
  0x62   : > { %5519 = vmatpush.bf16.msrb.mxu0 %v8015_v15  ;;  %402 = vst [vmem:[#allocation2 + $0x30] sm:$0x1] %v401_v14 }
  0x70   : > { %6639 = vmatmul.msk.bf16.gmra.mxu0 %vm554_vm0, %v535_v18  ;;  %v8478_v18 = vld [vmem:[%s10467_s3] ss:$0 sm:$0xff] }
  0x80   : > { %6640 = vmatmul.msk.bf16.gmra.mxu0 %vm554_vm0, %v536_v26  ;;  %v7841_v26 = vld [vmem:[#allocation3 + $0x4] sm:$0xf] }
  0x81   : > { %v6961_v30 = vor.u32 %v7841_v26, %v6958_v27 }
  0x83   : > { %5348 = vmatmul.bf16.vlgmr.msra.gmra.mxu2 %v6961_v30 }
  0x90   : > { %6641 = vmatmul.msk.bf16.gmra.mxu0 %vm554_vm0, %v537_v44 }
  0x9d   : > { %v612_v23 = vpop.f32.mrf.mxu0 }
  0x9e   : > { %v696_v24 = vmul.f32 %v8472_v16, %v612_v23 }
  0xa0   : > { %v732_v25 = vadd.f32 %v8478_v18, %v696_v24  ;;  %6642 = vmatmul.msk.bf16.gmra.mxu0 %vm554_vm0, %v538_v19 }
  0xa2   : > { %v764_v28 = vmax.f32 %v732_v25, 0.0 }
  0xa4   : > { %v796_v33 = vpack.c.bf16 %v764_v28, %v764_v28  ;;  %v1160_v28 = vld [vmem:[#allocation2 + $0x18] sm:$0xf] }
  0xa5   : > { %v614_v37 = vpop.f32.mrf.mxu0 }
  0xa6   : > { %v831_v38 = vshrl.u32 %v796_v33, 16  ;;  %v697_v39 = vmul.f32 %v8472_v16, %v614_v37  ;;  %v834_v41 = vshll.u32 %v796_v33, 16  ;;  %v519_v33 = vld [vmem:[%s8346_s19 + $0xa8] sm:$0xff] }
  0xa7   : > { %v540_v46 = vpack.c.bf16 %v519_v33, %v518_v32 }
  0xa8   : > { %v833_v40 = vrot.slane %v831_v38, 7  ;;  %v733_v43 = vadd.f32 %v8478_v18, %v697_v39 }
  0xaa   : > { %v836_v48 = vor.u32 %v834_v41, %v833_v40  ;;  %v765_v49 = vmax.f32 %v733_v43, 0.0  ;;  %v837_v1 = vrot.slane %v833_v40, 4  ;;  %v8014_v41 = vld [vmem:[%s10468_s4 + $0xe8] sm:$0xff] }
  0xab   : > { %5520 = vmatpush.bf16.msrb.mxu0 %v8014_v41 }
  0xac   : > { %v1154_v51 = vsel %vm8496_vm10, %v836_v48, %v1153_v42  ;;  %v797_v52 = vpack.c.bf16 %v765_v49, %v765_v49 }
  0xad   : > { %1155 = vst [vmem:[#allocation2 + $0xc] sm:$0xf] %v1154_v51  ;;  %v617_v56 = vpop.f32.mrf.mxu0 }
  0xae   : > { %v839_v57 = vshrl.u32 %v797_v52, 16  ;;  %v698_v58 = vmul.f32 %v8472_v16, %v617_v56  ;;  %v842_v60 = vshll.u32 %v797_v52, 16 }
  0xb0   : > { %v841_v59 = vrot.slane %v839_v57, 7  ;;  %v734_v61 = vadd.f32 %v8478_v18, %v698_v58  ;;  %6643 = vmatmul.msk.bf16.gmra.mxu0 %vm554_vm0, %v539_v53 }
  0xb2   : > { %v844_v3 = vor.u32 %v842_v60, %v841_v59  ;;  %v846_v4 = vrot.slane %v841_v59, 4  ;;  %v766_v5 = vmax.f32 %v734_v61, 0.0 }
  0xb4   : > { %v845_v7 = vsel %vm8510_vm12, %v837_v1, %v844_v3  ;;  %v1158_v8 = vsel %vm8371_vm3, %v846_v4, %v1157_v63  ;;  %v798_v9 = vpack.c.bf16 %v766_v5, %v766_v5  ;;  %v1271_v10 = vld [vmem:[#allocation2 + $0xc] sm:$0xf]  ;;  %v456_v63 = vld [vmem:[#allocation2 + $0x38] sm:$0x1] }
  0xb5   : > { %1156 = vst [vmem:[#allocation2 + $0x10] sm:$0xf] %v845_v7  ;;  %v619_v13 = vpop.f32.mrf.mxu0  ;;  %v1336_v21 = vld [vmem:[#allocation2 + $0xc] sm:$0xf]  ;;  %v525_v1 = vld [vmem:[%s8346_s19 + $0xd8] sm:$0xff]  ;;  %v457_v7 = vsel %vm8404_vm5, 0, %v456_v63 }
  0xb6   : > { %1159 = vst [vmem:[#allocation2 + $0x14] sm:$0x1] %v1158_v8  ;;  %v848_v17 = vshrl.u32 %v798_v9, 16  ;;  %v699_v19 = vmul.f32 %v8472_v16, %v619_v13  ;;  %v1409_v23 = vshrl.u32 %v1336_v21, 16  ;;  %v1412_v24 = vshll.u32 %v1336_v21, 16  ;;  %v8013_v8 = vld [vmem:[%s10468_s4 + $0xe0] sm:$0xff] }
  0xb7   : > { %1303 = vst [vmem:[#allocation3 + $0x48] sm:$0xf] %v1271_v10  ;;  %v6666_v25 = vld [vmem:[#allocation2 + $0xc] sm:$0xf]  ;;  %v851_v27 = vshll.u32 %v798_v9, 16  ;;  %v543_v13 = vpack.c.bf16 %v525_v1, %v524_v0  ;;  %5521 = vmatpush.bf16.msrb.mxu0 %v8013_v8 }
  0xb8   : > { %v850_v26 = vrot.slane %v848_v17, 7  ;;  %v735_v30 = vadd.f32 %v8478_v18, %v699_v19  ;;  %v1411_v35 = vrot.slane %v1409_v23, 4  ;;  %v1414_v37 = vrot.slane %v1412_v24, 5  ;;  %2143 = vst [vmem:[#allocation3 + $0xc] sm:$0xf] %v6666_v25 }
  0xb9   : > { %458 = vst [vmem:[#allocation2 + $0x38] sm:$0x1] %v457_v7  ;;  %6647 = vmatmul.msk.bf16.vlgmr.msra.gmra.mxu3 %vm554_vm0, %v543_v13 }
  0xba   : > { %v853_v38 = vor.u32 %v851_v27, %v850_v26  ;;  %v767_v39 = vmax.f32 %v735_v30, 0.0  ;;  %v1415_v40 = vor.u32 %v1414_v37, %v1411_v35  ;;  %v854_v53 = vrot.slane %v850_v26, 4  ;;  %8067 = vmatpush.bf16.msra.mxu3 %v8388_v29  ;;  %v1167_v35 = vld [vmem:[#allocation2 + $0x24] sm:$0xf] }
  0xbc   : > { %v1161_v42 = vsel %vm8496_vm10, %v853_v38, %v1160_v28  ;;  %v799_v43 = vpack.c.bf16 %v767_v39, %v767_v39  ;;  %v1272_v47 = vld [vmem:[#allocation2 + $0x10] sm:$0xf]  ;;  %v1416_v56 = vrot.slane %v1415_v40, 4  ;;  %v403_v40 = vld [vmem:[#allocation2 + $0x3c] sm:$0x1] }
  0xbd   : > { %v1337_v48 = vld [vmem:[#allocation2 + $0x10] sm:$0xf]  ;;  %1162 = vst [vmem:[#allocation2 + $0x18] sm:$0xf] %v1161_v42  ;;  %v622_v49 = vpop.f32.mrf.mxu0  ;;  %v1338_v52 = vld [vmem:[#allocation2 + $0x14] sm:$0x1] }
  0xbe   : > { %v856_v50 = vshrl.u32 %v799_v43, 16  ;;  %v700_v51 = vmul.f32 %v8472_v16, %v622_v49  ;;  %1304 = vst [vmem:[#allocation3 + $0x6c] sm:$0xf] %v1272_v47  ;;  %v1418_v57 = vshll.u32 %v1337_v48, 16  ;;  %v1422_v58 = vshrl.u32 %v1337_v48, 16  ;;  %v521_v47 = vld [vmem:[%s8346_s19 + $0xb8] sm:$0xff]  ;;  %8068 = vmatpush.bf16.msra.mxu3 %v8398_v31 }
  0xbf   : > { %v859_v60 = vshll.u32 %v799_v43, 16  ;;  %v1428_v5 = vshll.u32 %v1338_v52, 16  ;;  %v6992_v24 = vld [vmem:[#allocation3 + $0x48] sm:$0xf]  ;;  %v6667_v32 = vld [vmem:[#allocation2 + $0x10] sm:$0xf] }
  0xc0   : > { %v858_v59 = vrot.slane %v856_v50, 7  ;;  %v736_v61 = vadd.f32 %v8478_v18, %v700_v51  ;;  %6644 = vmatmul.msk.bf16.gmra.mxu0 %vm554_vm0, %v540_v46  ;;  %v1420_v3 = vrot.slane %v1418_v57, 5  ;;  %v1424_v4 = vrot.slane %v1422_v58, 4  ;;  %v520_v46 = vld [vmem:[%s8346_s19 + $0xb0] sm:$0xff]  ;;  %v8012_v52 = vld [vmem:[%s10468_s4 + $0xd8] sm:$0xff] }
  0xc1   : > { %v1430_v26 = vrot.slane %v1428_v5, 5  ;;  %v404_v29 = vsel %vm8371_vm3, 0, %v403_v40  ;;  %2144 = vst [vmem:[#allocation3 + $0x30] sm:$0xf] %v6667_v32  ;;  %v541_v58 = vpack.c.bf16 %v521_v47, %v520_v46  ;;  %5522 = vmatpush.bf16.msrb.mxu0 %v8012_v52  ;;  %v8011_v31 = vld [vmem:[%s10468_s4 + $0xd0] sm:$0xff] }
  0xc2   : > { %v861_v9 = vor.u32 %v859_v60, %v858_v59  ;;  %v863_v10 = vrot.slane %v858_v59, 4  ;;  %v768_v12 = vmax.f32 %v736_v61, 0.0  ;;  %v1421_v14 = vsel %vm8454_vm8, %v1416_v56, %v1420_v3  ;;  %405 = vst [vmem:[#allocation2 + $0x3c] sm:$0x1] %v404_v29  ;;  %8069 = vmatpush.bf16.msra.mxu3 %v8415_v36 }
  0xc3   : > { %v1425_v15 = vor.u32 %v1424_v4, %v1420_v3  ;;  %1802 = vst [vmem:[#allocation3 + $0x4c] sm:$0xf] %v1421_v14 }
  0xc4   : > { %v862_v17 = vsel %vm8510_vm12, %v854_v53, %v861_v9  ;;  %v1165_v19 = vsel %vm8371_vm3, %v863_v10, %v1164_v55  ;;  %v800_v21 = vpack.c.bf16 %v768_v12, %v768_v12  ;;  %v1273_v39 = vld [vmem:[#allocation2 + $0x18] sm:$0xf]  ;;  %v1171_v10 = vld [vmem:[#allocation2 + $0x2c] sm:$0x1] }
  0xc5   : > { %1163 = vst [vmem:[#allocation2 + $0x1c] sm:$0xf] %v862_v17  ;;  %v624_v23 = vpop.f32.mrf.mxu0  ;;  %v1426_v25 = vrot.slane %v1425_v15, 4  ;;  %v7854_v30 = vld [vmem:[#allocation3 + $0x68] sm:$0xf0]  ;;  %5523 = vmatpush.bf16.msrb.mxu0 %v8011_v31 }
  0xc6   : > { %1166 = vst [vmem:[#allocation2 + $0x20] sm:$0x1] %v1165_v19  ;;  %v865_v27 = vshrl.u32 %v800_v21, 16  ;;  %v701_v28 = vmul.f32 %v8472_v16, %v624_v23  ;;  %v868_v33 = vshll.u32 %v800_v21, 16  ;;  %v6993_v37 = vor.u32 %v7854_v30, %v6992_v24  ;;  %v1339_v43 = vld [vmem:[#allocation2 + $0x18] sm:$0xf]  ;;  %8070 = vmatpush.bf16.msra.mxu3 %v8430_v45 }
  0xc7   : > { %v1431_v38 = vsel %vm8454_vm8, %v1426_v25, %v1430_v26  ;;  %1305 = vst [vmem:[#allocation3 + $0x90] sm:$0xf] %v1273_v39  ;;  %v1433_v48 = vshrl.u32 %v1339_v43, 16  ;;  %v1436_v49 = vshll.u32 %v1339_v43, 16  ;;  %v459_v21 = vld [vmem:[#allocation2 + $0x44] sm:$0x1] }
  0xc8   : > { %v867_v41 = vrot.slane %v865_v27, 7  ;;  %v737_v42 = vadd.f32 %v8478_v18, %v701_v28  ;;  %1803 = vst [vmem:[#allocation3 + $0x70] sm:$0xf] %v1431_v38  ;;  %5264 = vmatmul.bf16.gmra.mxu1 %v6993_v37  ;;  %v8010_v23 = vld [vmem:[%s10468_s4 + $0xc8] sm:$0xff]  ;;  %v460_v27 = vsel %vm8404_vm5, 0, %v459_v21  ;;  %v526_v28 = vld [vmem:[%s8346_s19 + $0xe0] sm:$0xff] }
  0xc9   : > { %v1435_v53 = vrot.slane %v1433_v48, 4  ;;  %v1438_v55 = vrot.slane %v1436_v49, 5  ;;  %v527_v30 = vld [vmem:[%s8346_s19 + $0xe8] sm:$0xff]  ;;  %461 = vst [vmem:[#allocation2 + $0x44] sm:$0x1] %v460_v27  ;;  %v8009_v37 = vld [vmem:[%s10468_s4 + $0xc0] sm:$0xff]  ;;  %5524 = vmatpush.bf16.msrb.mxu0 %v8010_v23 }
  0xca   : > { %v870_v50 = vor.u32 %v868_v33, %v867_v41  ;;  %v769_v51 = vmax.f32 %v737_v42, 0.0  ;;  %v7850_v1 = vld [vmem:[#allocation3 + $0x4c] sm:$0xf]  ;;  %v871_v9 = vrot.slane %v867_v41, 4  ;;  %v544_v42 = vpack.c.bf16 %v527_v30, %v526_v28  ;;  %8071 = vmatpush.bf16.msra.mxu3 %v8440_v54  ;;  %v406_v48 = vld [vmem:[#allocation2 + $0x48] sm:$0x1] }
  0xcb   : > { %v1439_v63 = vor.u32 %v1438_v55, %v1435_v53  ;;  %v407_v52 = vsel %vm8371_vm3, 0, %v406_v48  ;;  %v1174_v31 = vld [vmem:[#allocation2 + $0x30] sm:$0xf] }
  0xcc   : > { %v1168_v56 = vsel %vm8496_vm10, %v870_v50, %v1167_v35  ;;  %v801_v57 = vpack.c.bf16 %v769_v51, %v769_v51  ;;  %v1274_v59 = vld [vmem:[#allocation2 + $0x1c] sm:$0xf]  ;;  %6648 = vmatmul.msk.bf16.gmra.mxu3 %vm554_vm0, %v544_v42  ;;  %408 = vst [vmem:[#allocation2 + $0x48] sm:$0x1] %v407_v52  ;;  %v462_v30 = vld [vmem:[#allocation2 + $0x50] sm:$0x1] }
  0xcd   : > { %v627_v60 = vpop.f32.mrf.mxu0  ;;  %1169 = vst [vmem:[#allocation2 + $0x24] sm:$0xf] %v1168_v56  ;;  %v1340_v8 = vld [vmem:[#allocation2 + $0x1c] sm:$0xf]  ;;  %v1341_v36 = vld [vmem:[#allocation2 + $0x20] sm:$0x1]  ;;  %5525 = vmatpush.bf16.msrb.mxu0 %v8009_v37 }
  0xce   : > { %v873_v61 = vshrl.u32 %v801_v57, 16  ;;  %v702_v0 = vmul.f32 %v8472_v16, %v627_v60  ;;  %1306 = vst [vmem:[#allocation3 + $0xb4] sm:$0xf] %v1274_v59  ;;  %v876_v5 = vshll.u32 %v801_v57, 16  ;;  %v1442_v13 = vshll.u32 %v1340_v8, 16  ;;  %v522_v59 = vld [vmem:[%s8346_s19 + $0xc0] sm:$0xff]  ;;  %8072 = vmatpush.bf16.msra.mxu3 %v8451_v2 }
  0xcf   : > { %v6994_v3 = vld [vmem:[#allocation3 + $0x6c] sm:$0xf0]  ;;  %v1440_v17 = vrot.slane %v1439_v63, 4  ;;  %v1446_v19 = vshrl.u32 %v1340_v8, 16  ;;  %v1452_v26 = vshll.u32 %v1341_v36, 16 }
  0xd0   : > { %v875_v4 = vrot.slane %v873_v61, 7  ;;  %6645 = vmatmul.msk.bf16.gmra.mxu0 %vm554_vm0, %v541_v58  ;;  %v6997_v7 = vor.u32 %v7850_v1, %v6994_v3  ;;  %v738_v12 = vadd.f32 %v8478_v18, %v702_v0  ;;  %v1444_v25 = vrot.slane %v1442_v13, 5  ;;  %v7028_v33 = vld [vmem:[#allocation3 + $0x90] sm:$0xf]  ;;  %v6668_v2 = vld [vmem:[#allocation2 + $0x18] sm:$0xf] }
  0xd1   : > { %v1448_v35 = vrot.slane %v1446_v19, 4  ;;  %v1454_v51 = vrot.slane %v1452_v26, 5  ;;  %v523_v60 = vld [vmem:[%s8346_s19 + $0xc8] sm:$0xff]  ;;  %v1178_v19 = vld [vmem:[#allocation2 + $0x38] sm:$0x1] }
  0xd2   : > { %v878_v14 = vor.u32 %v876_v5, %v875_v4  ;;  %v880_v15 = vrot.slane %v875_v4, 4  ;;  %5353 = vmatmul.bf16.gmra.mxu2 %v6997_v7  ;;  %v770_v24 = vmax.f32 %v738_v12, 0.0  ;;  %v1445_v40 = vsel %vm8454_vm8, %v1440_v17, %v1444_v25  ;;  %8073 = vmatpush.bf16.msra.mxu3 %v8461_v11  ;;  %2145 = vst [vmem:[#allocation3 + $0x54] sm:$0xf] %v6668_v2 }
  0xd3   : > { %v1449_v47 = vor.u32 %v1448_v35, %v1444_v25  ;;  %1804 = vst [vmem:[#allocation3 + $0x94] sm:$0xf] %v1445_v40  ;;  %v542_v5 = vpack.c.bf16 %v523_v60, %v522_v59  ;;  %v463_v11 = vsel %vm8404_vm5, 0, %v462_v30 }
  0xd4   : > { %v879_v45 = vsel %vm8510_vm12, %v871_v9, %v878_v14  ;;  %v1172_v32 = vsel %vm8371_vm3, %v880_v15, %v1171_v10  ;;  %v802_v38 = vpack.c.bf16 %v770_v24, %v770_v24  ;;  %v1275_v41 = vld [vmem:[#allocation2 + $0x24] sm:$0xf]  ;;  %464 = vst [vmem:[#allocation2 + $0x50] sm:$0x1] %v463_v11  ;;  %v465_v11 = vld [vmem:[#allocation2 + $0x5c] sm:$0x1] }
  0xd5   : > { %1170 = vst [vmem:[#allocation2 + $0x28] sm:$0xf] %v879_v45  ;;  %v629_v39 = vpop.f32.mrf.mxu0  ;;  %v1342_v29 = vld [vmem:[#allocation2 + $0x24] sm:$0xf]  ;;  %v7863_v46 = vld [vmem:[#allocation3 + $0xb0] sm:$0xf0] }
  0xd6   : > { %1173 = vst [vmem:[#allocation2 + $0x2c] sm:$0x1] %v1172_v32  ;;  %v703_v43 = vmul.f32 %v8472_v16, %v629_v39  ;;  %v882_v49 = vshrl.u32 %v802_v38, 16  ;;  %v7029_v50 = vor.u32 %v7863_v46, %v7028_v33  ;;  %v1450_v54 = vrot.slane %v1449_v47, 4  ;;  %v6669_v45 = vld [vmem:[#allocation2 + $0x1c] sm:$0xf]  ;;  %8074 = vmatpush.bf16.msra.mxu3 %v8485_v22 }
  0xd7   : > { %1307 = vst [vmem:[#allocation3 + $0xd8] sm:$0xf] %v1275_v41  ;;  %v1457_v55 = vshrl.u32 %v1342_v29, 16  ;;  %v1460_v56 = vshll.u32 %v1342_v29, 16  ;;  %v885_v58 = vshll.u32 %v802_v38, 16 }
  0xd8   : > { %v739_v53 = vadd.f32 %v8478_v18, %v703_v43  ;;  %v884_v57 = vrot.slane %v882_v49, 7  ;;  %5269 = vmatmul.bf16.gmra.mxu1 %v7029_v50  ;;  %v1455_v63 = vsel %vm8454_vm8, %v1450_v54, %v1454_v51  ;;  %2146 = vst [vmem:[#allocation3 + $0x78] sm:$0xf] %v6669_v45 }
  0xd9   : > { %v1459_v0 = vrot.slane %v1457_v55, 4  ;;  %v1462_v1 = vrot.slane %v1460_v56, 5  ;;  %1805 = vst [vmem:[#allocation3 + $0xb8] sm:$0xf] %v1455_v63  ;;  %v6670_v55 = vld [vmem:[#allocation2 + $0x24] sm:$0xf] }
  0xda   : > { %v771_v61 = vmax.f32 %v739_v53, 0.0  ;;  %v887_v3 = vor.u32 %v885_v58, %v884_v57  ;;  %v888_v32 = vrot.slane %v884_v57, 4  ;;  %v7859_v33 = vld [vmem:[#allocation3 + $0x94] sm:$0xf]  ;;  %v409_v58 = vld [vmem:[#allocation2 + $0x54] sm:$0x1] }
  0xdb   : > { %v1463_v9 = vor.u32 %v1462_v1, %v1459_v0  ;;  %v410_v59 = vsel %vm8371_vm3, 0, %v409_v58  ;;  %2147 = vst [vmem:[#allocation3 + $0x9c] sm:$0xf] %v6670_v55 }
  0xdc   : > { %v803_v4 = vpack.c.bf16 %v771_v61, %v771_v61  ;;  %v1276_v7 = vld [vmem:[#allocation2 + $0x28] sm:$0xf]  ;;  %v1175_v10 = vsel %vm8496_vm10, %v887_v3, %v1174_v31  ;;  %v1181_v3 = vld [vmem:[#allocation2 + $0x3c] sm:$0xf]  ;;  %411 = vst [vmem:[#allocation2 + $0x54] sm:$0x1] %v410_v59 }
  0xdd   : > { %v1343_v8 = vld [vmem:[#allocation2 + $0x28] sm:$0xf]  ;;  %v632_v12 = vpop.f32.mrf.mxu0  ;;  %1308 = vst [vmem:[#allocation3 + $0xfc] sm:$0xf] %v1276_v7  ;;  %v1344_v36 = vld [vmem:[#allocation2 + $0x2c] sm:$0x1] }
  0xde   : > { %v1466_v13 = vshll.u32 %v1343_v8, 16  ;;  %v1470_v14 = vshrl.u32 %v1343_v8, 16  ;;  %1176 = vst [vmem:[#allocation2 + $0x30] sm:$0xf] %v1175_v10  ;;  %v890_v15 = vshrl.u32 %v803_v4, 16  ;;  %v704_v17 = vmul.f32 %v8472_v16, %v632_v12 }
  0xdf   : > { %v1464_v21 = vrot.slane %v1463_v9, 4  ;;  %v1476_v25 = vshll.u32 %v1344_v36, 16  ;;  %v893_v27 = vshll.u32 %v803_v4, 16  ;;  %v7064_v49 = vld [vmem:[#allocation3 + $0xd8] sm:$0xf] }
  0xe0   : > { %v1468_v23 = vrot.slane %v1466_v13, 5  ;;  %v1472_v24 = vrot.slane %v1470_v14, 4  ;;  %v892_v26 = vrot.slane %v890_v15, 7  ;;  %v740_v28 = vadd.f32 %v8478_v18, %v704_v17  ;;  %6646 = vmatmul.msk.bf16.gmra.mxu0 %vm554_vm0, %v542_v5  ;;  %v7030_v41 = vld [vmem:[#allocation3 + $0xb4] sm:$0xf0] }
  0xe1   : > { %v7033_v42 = vor.u32 %v7859_v33, %v7030_v41  ;;  %v1478_v43 = vrot.slane %v1476_v25, 5  ;;  %v6671_v1 = vld [vmem:[#allocation2 + $0x28] sm:$0xf]  ;;  %v7842_v13 = vld [vmem:[#allocation3 + $0xc] sm:$0xf] }
  0xe2   : > { %v1469_v35 = vsel %vm8454_vm8, %v1464_v21, %v1468_v23  ;;  %v1473_v37 = vor.u32 %v1472_v24, %v1468_v23  ;;  %v895_v38 = vor.u32 %v893_v27, %v892_v26  ;;  %v897_v39 = vrot.slane %v892_v26, 4  ;;  %v6966_v9 = vld [vmem:[#allocation3 + $0x2c] sm:$0xf0]  ;;  %2148 = vst [vmem:[#allocation3 + $0xc0] sm:$0xf] %v6671_v1 }
  0xe3   : > { %v772_v40 = vmax.f32 %v740_v28, 0.0  ;;  %1806 = vst [vmem:[#allocation3 + $0xdc] sm:$0xf] %v1469_v35  ;;  %5358 = vmatmul.bf16.gmra.mxu2 %v7033_v42  ;;  %v6969_v25 = vor.u32 %v7842_v13, %v6966_v9  ;;  %v8626_v26 = vld [vmem:[#allocation2 + $0xc] sm:$0xf]  ;;  %v466_v42 = vsel %vm8404_vm5, 0, %v465_v11 }
  0xe4   : > { %v1474_v29 = vrot.slane %v1473_v37, 4  ;;  %v896_v46 = vsel %vm8510_vm12, %v888_v32, %v895_v38  ;;  %v1179_v47 = vsel %vm8371_vm3, %v897_v39, %v1178_v19  ;;  %v7872_v50 = vld [vmem:[#allocation3 + $0xf8] sm:$0xf0]  ;;  %v1185_v38 = vld [vmem:[#allocation2 + $0x44] sm:$0x1] }
  0xe5   : > { %v804_v48 = vpack.c.bf16 %v772_v40, %v772_v40  ;;  %1177 = vst [vmem:[#allocation2 + $0x34] sm:$0xf] %v896_v46  ;;  %v634_v51 = vpop.f32.mrf.mxu0  ;;  %v7065_v52 = vor.u32 %v7872_v50, %v7064_v49  ;;  %v1277_v53 = vld [vmem:[#allocation2 + $0x30] sm:$0xf]  ;;  %v412_v1 = vld [vmem:[#allocation2 + $0x60] sm:$0x1] }
  0xe6   : > { %v1479_v22 = vsel %vm8454_vm8, %v1474_v29, %v1478_v43  ;;  %v1345_v54 = vld [vmem:[#allocation2 + $0x30] sm:$0xf]  ;;  %1180 = vst [vmem:[#allocation2 + $0x38] sm:$0x1] %v1179_v47  ;;  %v705_v57 = vmul.f32 %v8472_v16, %v634_v51  ;;  %v1188_v13 = vld [vmem:[#allocation2 + $0x48] sm:$0xf] }
  0xe7   : > { %v899_v56 = vshrl.u32 %v804_v48, 16  ;;  %1807 = vst [vmem:[#allocation3 + $0x100] sm:$0xf] %v1479_v22  ;;  %v1481_v60 = vshrl.u32 %v1345_v54, 16  ;;  %v1484_v31 = vshll.u32 %v1345_v54, 16  ;;  %v902_v63 = vshll.u32 %v804_v48, 16 }
  0xe8   : > { %v741_v0 = vadd.f32 %v8478_v18, %v705_v57  ;;  %1309 = vst [vmem:[#allocation3 + $0x120] sm:$0xf] %v1277_v53  ;;  %5274 = vmatmul.bf16.gmra.mxu1 %v7065_v52  ;;  %v6672_v29 = vld [vmem:[#allocation2 + $0x30] sm:$0xf]  ;;  %v2224_v52 = vshrl.u32 %v8626_v26, 16 }
  0xe9   : > { %v901_v61 = vrot.slane %v899_v56, 7  ;;  %v1483_v4 = vrot.slane %v1481_v60, 4  ;;  %v1486_v5 = vrot.slane %v1484_v31, 5  ;;  %467 = vst [vmem:[#allocation2 + $0x5c] sm:$0x1] %v466_v42 }
  0xea   : > { %v773_v8 = vmax.f32 %v741_v0, 0.0  ;;  %v7868_v37 = vld [vmem:[#allocation3 + $0xdc] sm:$0xf]  ;;  %2149 = vst [vmem:[#allocation3 + $0xe4] sm:$0xf] %v6672_v29 }
  0xeb   : > { %v904_v7 = vor.u32 %v902_v63, %v901_v61  ;;  %v1487_v10 = vor.u32 %v1486_v5, %v1483_v4  ;;  %v905_v43 = vrot.slane %v901_v61, 4  ;;  %v413_v5 = vsel %vm8371_vm3, 0, %v412_v1 }
  0xec   : > { %v805_v36 = vpack.c.bf16 %v773_v8, %v773_v8  ;;  %v1278_v14 = vld [vmem:[#allocation2 + $0x34] sm:$0xf]  ;;  %414 = vst [vmem:[#allocation2 + $0x60] sm:$0x1] %v413_v5 }
  0xed   : > { %v1182_v12 = vsel %vm8496_vm10, %v904_v7, %v1181_v3  ;;  %v1346_v15 = vld [vmem:[#allocation2 + $0x34] sm:$0xf]  ;;  %v637_v17 = vpop.f32.mrf.mxu0  ;;  %v1347_v2 = vld [vmem:[#allocation2 + $0x38] sm:$0x1]  ;;  %1310 = vst [vmem:[#allocation3 + $0x144] sm:$0xf] %v1278_v14 }
  0xee   : > { %1183 = vst [vmem:[#allocation2 + $0x3c] sm:$0xf] %v1182_v12  ;;  %v1490_v19 = vshll.u32 %v1346_v15, 16  ;;  %v907_v21 = vshrl.u32 %v805_v36, 16  ;;  %v706_v23 = vmul.f32 %v8472_v16, %v637_v17  ;;  %v7066_v24 = vld [vmem:[#allocation3 + $0xfc] sm:$0xf0] }
  0xef   : > { %v1488_v27 = vrot.slane %v1487_v10, 4  ;;  %v1494_v30 = vshrl.u32 %v1346_v15, 16  ;;  %v1500_v45 = vshll.u32 %v1347_v2, 16  ;;  %v910_v33 = vshll.u32 %v805_v36, 16  ;;  %v7100_v49 = vld [vmem:[#allocation3 + $0x120] sm:$0xf] }
  0xf0   : > { %v1492_v28 = vrot.slane %v1490_v19, 5  ;;  %v909_v32 = vrot.slane %v907_v21, 7  ;;  %v742_v35 = vadd.f32 %v8478_v18, %v706_v23  ;;  %5526 = vmatmul.bf16.vlgmr.msrb.gmra.mxu0 %v6969_v25  ;;  %v7069_v39 = vor.u32 %v7868_v37, %v7066_v24  ;;  %v6673_v31 = vld [vmem:[#allocation2 + $0x34] sm:$0xf]  ;;  %v8647_v15 = vld [vmem:[#allocation2 + $0x10] sm:$0xf] }
  0xf1   : > { %v1496_v41 = vrot.slane %v1494_v30, 4  ;;  %v1502_v51 = vrot.slane %v1500_v45, 5  ;;  %v2227_v3 = vshll.u32 %v8626_v26, 16  ;;  %2150 = vst [vmem:[#allocation3 + $0x108] sm:$0xf] %v6673_v31  ;;  %v2226_v23 = vrot.slane %v2224_v52, 4 }
  0xf2   : > { %v1493_v40 = vsel %vm8454_vm8, %v1488_v27, %v1492_v28  ;;  %v912_v46 = vor.u32 %v910_v33, %v909_v32  ;;  %v914_v47 = vrot.slane %v909_v32, 4  ;;  %v774_v48 = vmax.f32 %v742_v35, 0.0  ;;  %v7002_v19 = vld [vmem:[#allocation3 + $0x74] sm:$0xf0]  ;;  %v7851_v27 = vld [vmem:[#allocation3 + $0x54] sm:$0xf] }
  0xf3   : > { %1808 = vst [vmem:[#allocation3 + $0x124] sm:$0xf] %v1493_v40  ;;  %v1497_v50 = vor.u32 %v1496_v41, %v1492_v28  ;;  %5363 = vmatmul.bf16.gmra.mxu2 %v7069_v39  ;;  %v2229_v24 = vrot.slane %v2227_v3, 5  ;;  %v2237_v45 = vshrl.u32 %v8647_v15, 16  ;;  %v2233_v39 = vshll.u32 %v8647_v15, 16 }
  0xf4   : > { %v913_v22 = vsel %vm8510_vm12, %v905_v43, %v912_v46  ;;  %v1186_v53 = vsel %vm8371_vm3, %v914_v47, %v1185_v38  ;;  %v806_v54 = vpack.c.bf16 %v774_v48, %v774_v48  ;;  %v7881_v58 = vld [vmem:[#allocation3 + $0x140] sm:$0xf0]  ;;  %v7005_v38 = vor.u32 %v7851_v27, %v7002_v19  ;;  %v1192_v52 = vld [vmem:[#allocation2 + $0x50] sm:$0x1] }
  0xf5   : > { %v1279_v55 = vld [vmem:[#allocation2 + $0x3c] sm:$0xf]  ;;  %1184 = vst [vmem:[#allocation2 + $0x40] sm:$0xf] %v913_v22  ;;  %v639_v57 = vpop.f32.mrf.mxu0  ;;  %v1498_v59 = vrot.slane %v1497_v50, 4  ;;  %v7101_v0 = vor.u32 %v7881_v58, %v7100_v49 }
  0xf6   : > { %v1348_v56 = vld [vmem:[#allocation2 + $0x3c] sm:$0xf]  ;;  %1187 = vst [vmem:[#allocation2 + $0x44] sm:$0x1] %v1186_v53  ;;  %v916_v61 = vshrl.u32 %v806_v54, 16  ;;  %v707_v63 = vmul.f32 %v8472_v16, %v639_v57  ;;  %v919_v10 = vshll.u32 %v806_v54, 16 }
  0xf7   : > { %v1505_v60 = vshrl.u32 %v1348_v56, 16  ;;  %v1503_v4 = vsel %vm8454_vm8, %v1498_v59, %v1502_v51  ;;  %1311 = vst [vmem:[#allocation3 + $0x168] sm:$0xf] %v1279_v55  ;;  %v1508_v8 = vshll.u32 %v1348_v56, 16  ;;  %v6674_v36 = vld [vmem:[#allocation2 + $0x3c] sm:$0xf]  ;;  %v2230_v51 = vor.u32 %v2229_v24, %v2226_v23 }
  0xf8   : > { %v8644_v9 = vrot.slane %v916_v61, 7  ;;  %v743_v12 = vadd.f32 %v8478_v18, %v707_v63  ;;  %1809 = vst [vmem:[#allocation3 + $0x148] sm:$0xf] %v1503_v4  ;;  %5279 = vmatmul.bf16.gmra.mxu1 %v7101_v0  ;;  %v468_v50 = vld [vmem:[#allocation2 + $0x68] sm:$0x1]  ;;  %v8661_v0 = vrot.slane %v2233_v39, 5 }
  0xf9   : > { %v1507_v7 = vrot.slane %v1505_v60, 4  ;;  %v1510_v14 = vrot.slane %v1508_v8, 5  ;;  %2151 = vst [vmem:[#allocation3 + $0x12c] sm:$0xf] %v6674_v36  ;;  %v469_v55 = vsel %vm8404_vm5, 0, %v468_v50 }
  0xfa   : > { %v921_v17 = vor.u32 %v919_v10, %v8644_v9  ;;  %v775_v2 = vmax.f32 %v743_v12, 0.0  ;;  %v7877_v49 = vld [vmem:[#allocation3 + $0x124] sm:$0xf]  ;;  %v922_v57 = vrot.slane %v8644_v9, 4  ;;  %470 = vst [vmem:[#allocation2 + $0x68] sm:$0x1] %v469_v55 }
  0xfb   : > { %v1511_v21 = vor.u32 %v1510_v14, %v1507_v7 }
  0xfc   : > { %v1189_v25 = vsel %vm8496_vm10, %v921_v17, %v1188_v13  ;;  %v807_v26 = vpack.c.bf16 %v775_v2, %v775_v2  ;;  %v1280_v28 = vld [vmem:[#allocation2 + $0x40] sm:$0xf]  ;;  %v415_v17 = vld [vmem:[#allocation2 + $0x6c] sm:$0x1]  ;;  %v2231_v2 = vrot.slane %v2230_v51, 4 }
  0xfd   : > { %v1349_v30 = vld [vmem:[#allocation2 + $0x40] sm:$0xf]  ;;  %1190 = vst [vmem:[#allocation2 + $0x48] sm:$0xf] %v1189_v25  ;;  %v642_v32 = vpop.f32.mrf.mxu0  ;;  %v1350_v33 = vld [vmem:[#allocation2 + $0x44] sm:$0x1] }
  0xfe   : > { %v1514_v35 = vshll.u32 %v1349_v30, 16  ;;  %v924_v37 = vshrl.u32 %v807_v26, 16  ;;  %v708_v11 = vmul.f32 %v8472_v16, %v642_v32  ;;  %1312 = vst [vmem:[#allocation3 + $0x18c] sm:$0xf] %v1280_v28  ;;  %v1512_v41 = vrot.slane %v1511_v21, 4 }
  0xff   : > { %v7102_v40 = vld [vmem:[#allocation3 + $0x144] sm:$0xf0]  ;;  %v1518_v29 = vshrl.u32 %v1349_v30, 16  ;;  %v1524_v43 = vshll.u32 %v1350_v33, 16  ;;  %v927_v47 = vshll.u32 %v807_v26, 16  ;;  %v416_v21 = vsel %vm8371_vm3, 0, %v415_v17 }
 0x100   : > { %v1516_v42 = vrot.slane %v1514_v35, 5  ;;  %v926_v46 = vrot.slane %v924_v37, 7  ;;  %v744_v48 = vadd.f32 %v8478_v18, %v708_v11  ;;  %5531 = vmatmul.bf16.gmra.mxu0 %v7005_v38  ;;  %v7105_v22 = vor.u32 %v7877_v49, %v7102_v40  ;;  %v6675_v56 = vld [vmem:[#allocation2 + $0x40] sm:$0xf]  ;;  %v1195_v30 = vld [vmem:[#allocation2 + $0x54] sm:$0xf] }
 0x101   : > { %v1520_v54 = vrot.slane %v1518_v29, 4  ;;  %v7136_v31 = vld [vmem:[#allocation3 + $0x168] sm:$0xf]  ;;  %v1526_v63 = vrot.slane %v1524_v43, 5  ;;  %2152 = vst [vmem:[#allocation3 + $0x150] sm:$0xf] %v6675_v56 }
 0x102   : > { %v1517_v53 = vsel %vm8454_vm8, %v1512_v41, %v1516_v42  ;;  %v929_v58 = vor.u32 %v927_v47, %v926_v46  ;;  %v931_v59 = vrot.slane %v926_v46, 4  ;;  %v776_v60 = vmax.f32 %v744_v48, 0.0  ;;  %417 = vst [vmem:[#allocation2 + $0x6c] sm:$0x1] %v416_v21  ;;  %v7038_v11 = vld [vmem:[#allocation3 + $0xbc] sm:$0xf0] }
 0x103   : > { %1810 = vst [vmem:[#allocation3 + $0x16c] sm:$0xf] %v1517_v53  ;;  %v1521_v61 = vor.u32 %v1520_v54, %v1516_v42  ;;  %5368 = vmatmul.bf16.gmra.mxu2 %v7105_v22  ;;  %v2239_v33 = vrot.slane %v2237_v45, 4  ;;  %v7860_v41 = vld [vmem:[#allocation3 + $0x9c] sm:$0xf] }
 0x104   : > { %v930_v1 = vsel %vm8510_vm12, %v922_v57, %v929_v58  ;;  %v1193_v3 = vsel %vm8371_vm3, %v931_v59, %v1192_v52  ;;  %v808_v4 = vpack.c.bf16 %v776_v60, %v776_v60  ;;  %v1281_v5 = vld [vmem:[#allocation2 + $0x48] sm:$0xf]  ;;  %v8688_v47 = vld [vmem:[%s10466_s2] ss:$0 sm:$0xff]  ;;  %v7041_v50 = vor.u32 %v7860_v41, %v7038_v11 }
 0x105   : > { %v1351_v7 = vld [vmem:[#allocation2 + $0x48] sm:$0xf]  ;;  %1191 = vst [vmem:[#allocation2 + $0x4c] sm:$0xf] %v930_v1  ;;  %v644_v8 = vpop.f32.mrf.mxu0  ;;  %v7890_v9 = vld [vmem:[#allocation3 + $0x188] sm:$0xf0]  ;;  %v2240_v52 = vor.u32 %v2239_v33, %v8661_v0 }
 0x106   : > { %v1522_v10 = vrot.slane %v1521_v61, 4  ;;  %v1529_v12 = vshrl.u32 %v1351_v7, 16  ;;  %1194 = vst [vmem:[#allocation2 + $0x50] sm:$0x1] %v1193_v3  ;;  %v933_v36 = vshrl.u32 %v808_v4, 16  ;;  %v709_v13 = vmul.f32 %v8472_v16, %v644_v8 }
 0x107   : > { %v7137_v14 = vor.u32 %v7890_v9, %v7136_v31  ;;  %1313 = vst [vmem:[#allocation3 + $0x1b0] sm:$0xf] %v1281_v5  ;;  %v1532_v24 = vshll.u32 %v1351_v7, 16  ;;  %v936_v26 = vshll.u32 %v808_v4, 16  ;;  %v6676_v28 = vld [vmem:[#allocation2 + $0x48] sm:$0xf]  ;;  %v2236_v16 = vsel %vm8454_vm8, %v2231_v2, %v8661_v0 }
 0x108   : > { %v1527_v19 = vsel %vm8454_vm8, %v1522_v10, %v1526_v63  ;;  %v1531_v23 = vrot.slane %v1529_v12, 4  ;;  %v8672_v25 = vrot.slane %v933_v36, 7  ;;  %v745_v27 = vadd.f32 %v8478_v18, %v709_v13  ;;  %2153 = vst [vmem:[#allocation3 + $0x174] sm:$0xf] %v6676_v28  ;;  %v8681_v18 = vld [vmem:[#allocation2 + $0x14] sm:$0x1] }
 0x109   : > { %1811 = vst [vmem:[#allocation3 + $0x190] sm:$0xf] %v1527_v19  ;;  %5284 = vmatmul.bf16.gmra.mxu1 %v7137_v14  ;;  %v1534_v32 = vrot.slane %v1532_v24, 5  ;;  %v2243_v56 = vshll.u32 %v8681_v18, 16  ;;  %v8696_v59 = vld [vmem:[%s10467_s3] ss:$0 sm:$0xff] }
 0x10a   : > { %v938_v35 = vor.u32 %v936_v26, %v8672_v25  ;;  %v777_v37 = vmax.f32 %v745_v27, 0.0  ;;  %2639 = vst [vmem:[#allocation3 + $0x10] sm:$0xf] %v2236_v16  ;;  %v7886_v49 = vld [vmem:[#allocation3 + $0x16c] sm:$0xf]  ;;  %v939_v5 = vrot.slane %v8672_v25, 4 }
 0x10b   : > { %v1535_v38 = vor.u32 %v1534_v32, %v1531_v23  ;;  %v471_v61 = vld [vmem:[#allocation2 + $0x74] sm:$0x1]  ;;  %v1199_v63 = vld [vmem:[#allocation2 + $0x5c] sm:$0x1]  ;;  %v2241_v36 = vrot.slane %v2240_v52, 4  ;;  %v2245_v33 = vrot.slane %v2243_v56, 5 }
 0x10c   : > { %v1196_v39 = vsel %vm8496_vm10, %v938_v35, %v1195_v30  ;;  %v809_v40 = vpack.c.bf16 %v777_v37, %v777_v37  ;;  %v1282_v42 = vld [vmem:[#allocation2 + $0x4c] sm:$0xf]  ;;  %v472_v4 = vsel %vm8404_vm5, 0, %v471_v61  ;;  %v418_v32 = vld [vmem:[#allocation2 + $0x78] sm:$0x1] }
 0x10d   : > { %v1352_v29 = vld [vmem:[#allocation2 + $0x4c] sm:$0xf]  ;;  %1197 = vst [vmem:[#allocation2 + $0x54] sm:$0xf] %v1196_v39  ;;  %v647_v43 = vpop.f32.mrf.mxu0  ;;  %v1353_v15 = vld [vmem:[#allocation2 + $0x50] sm:$0x1]  ;;  %v2246_v41 = vsel %vm8454_vm8, %v2241_v36, %v2245_v33 }
 0x10e   : > { %v1538_v45 = vshll.u32 %v1352_v29, 16  ;;  %v941_v46 = vshrl.u32 %v809_v40, 16  ;;  %v710_v48 = vmul.f32 %v8688_v47, %v647_v43  ;;  %1314 = vst [vmem:[#allocation3 + $0x1d4] sm:$0xf] %v1282_v42  ;;  %v6677_v51 = vld [vmem:[#allocation2 + $0x4c] sm:$0xf] }
 0x10f   : > { %v1536_v53 = vrot.slane %v1535_v38, 4  ;;  %v1542_v55 = vshrl.u32 %v1352_v29, 16  ;;  %v944_v58 = vshll.u32 %v809_v40, 16  ;;  %v1548_v31 = vshll.u32 %v1353_v15, 16  ;;  %2154 = vst [vmem:[#allocation3 + $0x198] sm:$0xf] %v6677_v51 }
 0x110   : > { %v7138_v22 = vld [vmem:[#allocation3 + $0x18c] sm:$0xf0]  ;;  %v1540_v54 = vrot.slane %v1538_v45, 5  ;;  %v943_v57 = vrot.slane %v941_v46, 7  ;;  %v746_v60 = vadd.f32 %v8696_v59, %v710_v48  ;;  %5536 = vmatmul.bf16.gmra.mxu0 %v7041_v50  ;;  %473 = vst [vmem:[#allocation2 + $0x74] sm:$0x1] %v472_v4 }
 0x111   : > { %v7141_v0 = vor.u32 %v7886_v49, %v7138_v22  ;;  %v1544_v3 = vrot.slane %v1542_v55, 4  ;;  %v7172_v10 = vld [vmem:[#allocation3 + $0x1b0] sm:$0xf]  ;;  %v1550_v2 = vrot.slane %v1548_v31, 5  ;;  %v419_v37 = vsel %vm8371_vm3, 0, %v418_v32  ;;  %v528_v4 = vld [vmem:[%s8346_s19 + $0xf0] sm:$0xff] }
 0x112   : > { %v1541_v1 = vsel %vm8454_vm8, %v1536_v53, %v1540_v54  ;;  %v946_v7 = vor.u32 %v944_v58, %v943_v57  ;;  %v948_v8 = vrot.slane %v943_v57, 4  ;;  %v778_v9 = vmax.f32 %v746_v60, 0.0  ;;  %v1202_v42 = vld [vmem:[#allocation2 + $0x60] sm:$0xf]  ;;  %420 = vst [vmem:[#allocation2 + $0x78] sm:$0x1] %v419_v37 }
 0x113   : > { %1812 = vst [vmem:[#allocation3 + $0x1b4] sm:$0xf] %v1541_v1  ;;  %v1545_v12 = vor.u32 %v1544_v3, %v1540_v54  ;;  %5373 = vmatmul.bf16.gmra.mxu2 %v7141_v0  ;;  %v7074_v45 = vld [vmem:[#allocation3 + $0x104] sm:$0xf0]  ;;  %v7869_v50 = vld [vmem:[#allocation3 + $0xe4] sm:$0xf] }
 0x114   : > { %v947_v13 = vsel %vm8510_vm12, %v939_v5, %v946_v7  ;;  %v1200_v14 = vsel %vm8371_vm3, %v948_v8, %v1199_v63  ;;  %v810_v17 = vpack.c.bf16 %v778_v9, %v778_v9  ;;  %v1283_v19 = vld [vmem:[#allocation2 + $0x54] sm:$0xf]  ;;  %2640 = vst [vmem:[#allocation3 + $0x34] sm:$0xf] %v2246_v41  ;;  %v7077_v60 = vor.u32 %v7869_v50, %v7074_v45  ;;  %v8723_v61 = vld [vmem:[#allocation2 + $0x10] sm:$0xf] }
 0x115   : > { %v1354_v21 = vld [vmem:[#allocation2 + $0x54] sm:$0xf]  ;;  %1198 = vst [vmem:[#allocation2 + $0x58] sm:$0xf] %v947_v13  ;;  %v649_v23 = vpop.f32.mrf.mxu0  ;;  %v7899_v24 = vld [vmem:[#allocation3 + $0x1d0] sm:$0xf0] }
 0x116   : > { %v1546_v25 = vrot.slane %v1545_v12, 4  ;;  %v1553_v26 = vshrl.u32 %v1354_v21, 16  ;;  %v6678_v27 = vld [vmem:[#allocation2 + $0x54] sm:$0xf]  ;;  %1201 = vst [vmem:[#allocation2 + $0x5c] sm:$0x1] %v1200_v14  ;;  %v711_v16 = vmul.f32 %v8688_v47, %v649_v23  ;;  %v7173_v30 = vor.u32 %v7899_v24, %v7172_v10 }
 0x117   : > { %v950_v28 = vshrl.u32 %v810_v17, 16  ;;  %1315 = vst [vmem:[#allocation3 + $0x1f8] sm:$0xf] %v1283_v19  ;;  %v1556_v38 = vshll.u32 %v1354_v21, 16  ;;  %v953_v39 = vshll.u32 %v810_v17, 16  ;;  %v529_v10 = vld [vmem:[%s8346_s19 + $0xf8] sm:$0xff] }
 0x118   : > { %v1551_v35 = vsel %vm8454_vm8, %v1546_v25, %v1550_v2  ;;  %v1555_v11 = vrot.slane %v1553_v26, 4  ;;  %v747_v40 = vadd.f32 %v8696_v59, %v711_v16  ;;  %2155 = vst [vmem:[#allocation3 + $0x1bc] sm:$0xf] %v6678_v27  ;;  %v474_v12 = vld [vmem:[#allocation2 + $0x80] sm:$0x1]  ;;  %v545_v2 = vpack.c.bf16 %v529_v10, %v528_v4 }
 0x119   : > { %v8713_v18 = vrot.slane %v950_v28, 7  ;;  %1813 = vst [vmem:[#allocation3 + $0x1d8] sm:$0xf] %v1551_v35  ;;  %5289 = vmatmul.bf16.gmra.mxu1 %v7173_v30  ;;  %v1558_v29 = vrot.slane %v1556_v38, 5  ;;  %v1206_v36 = vld [vmem:[#allocation2 + $0x68] sm:$0x1] }
 0x11a   : > { %v779_v15 = vmax.f32 %v747_v40, 0.0  ;;  %v7895_v58 = vld [vmem:[#allocation3 + $0x1b4] sm:$0xf]  ;;  %v475_v25 = vsel %vm8404_vm5, 0, %v474_v12  ;;  %6649 = vmatmul.msk.bf16.gmra.mxu3 %vm554_vm0, %v545_v2  ;;  %v2769_v28 = vrot.slane %v8723_v61, 5 }
 0x11b   : > { %v955_v43 = vor.u32 %v953_v39, %v8713_v18  ;;  %v1559_v46 = vor.u32 %v1558_v29, %v1555_v11  ;;  %v956_v55 = vrot.slane %v8713_v18, 4  ;;  %v6746_v19 = vld [vmem:[#allocation2 + $0xc] sm:$0xe]  ;;  %476 = vst [vmem:[#allocation2 + $0x80] sm:$0x1] %v475_v25 }
 0x11c   : > { %v811_v49 = vpack.c.bf16 %v779_v15, %v779_v15  ;;  %v1284_v51 = vld [vmem:[#allocation2 + $0x58] sm:$0xf]  ;;  %v421_v15 = vld [vmem:[#allocation2 + $0x84] sm:$0x1]  ;;  %v6794_v45 = vrot.slane %v6746_v19, 9 }
 0x11d   : > { %v1203_v48 = vsel %vm8496_vm10, %v955_v43, %v1202_v42  ;;  %v1355_v52 = vld [vmem:[#allocation2 + $0x58] sm:$0xf]  ;;  %v652_v22 = vpop.f32.mrf.mxu0  ;;  %v1356_v53 = vld [vmem:[#allocation2 + $0x5c] sm:$0x1]  ;;  %1316 = vst [vmem:[#allocation3 + $0x21c] sm:$0xf] %v1284_v51 }
 0x11e   : > { %1204 = vst [vmem:[#allocation2 + $0x60] sm:$0xf] %v1203_v48  ;;  %v1562_v54 = vshll.u32 %v1355_v52, 16  ;;  %v958_v56 = vshrl.u32 %v811_v49, 16  ;;  %v712_v57 = vmul.f32 %v8688_v47, %v652_v22  ;;  %v6679_v31 = vld [vmem:[#allocation2 + $0x58] sm:$0xf] }
 0x11f   : > { %v1560_v0 = vrot.slane %v1559_v46, 4  ;;  %v1566_v3 = vshrl.u32 %v1355_v52, 16  ;;  %v961_v7 = vshll.u32 %v811_v49, 16  ;;  %v1572_v9 = vshll.u32 %v1356_v53, 16  ;;  %2156 = vst [vmem:[#allocation3 + $0x1e0] sm:$0xf] %v6679_v31 }
 0x120   : > { %v7174_v63 = vld [vmem:[#allocation3 + $0x1d4] sm:$0xf0]  ;;  %v1564_v1 = vrot.slane %v1562_v54, 5  ;;  %v960_v5 = vrot.slane %v958_v56, 7  ;;  %v748_v8 = vadd.f32 %v8696_v59, %v712_v57  ;;  %5541 = vmatmul.bf16.gmra.mxu0 %v7077_v60  ;;  %v422_v48 = vsel %vm8371_vm3, 0, %v421_v15 }
 0x121   : > { %v7177_v13 = vor.u32 %v7895_v58, %v7174_v63  ;;  %v1568_v17 = vrot.slane %v1566_v3, 4  ;;  %v7208_v26 = vld [vmem:[#allocation3 + $0x1f8] sm:$0xf]  ;;  %v1574_v33 = vrot.slane %v1572_v9, 5  ;;  %v1209_v22 = vld [vmem:[#allocation2 + $0x6c] sm:$0xf]  ;;  %v2770_v54 = vsel %vm8740_vm15, %v6794_v45, %v2769_v28  ;;  %v5260_v3 = vpop.f32.mrf.mxu1 }
 0x122   : > { %v1565_v14 = vsel %vm8454_vm8, %v1560_v0, %v1564_v1  ;;  %v963_v21 = vor.u32 %v961_v7, %v960_v5  ;;  %v965_v23 = vrot.slane %v960_v5, 4  ;;  %v780_v24 = vmax.f32 %v748_v8, 0.0  ;;  %423 = vst [vmem:[#allocation2 + $0x84] sm:$0x1] %v422_v48  ;;  %v6701_v56 = vld [vmem:[#allocation2 + $0x18] sm:$0xf] }
 0x123   : > { %1814 = vst [vmem:[#allocation3 + $0x1fc] sm:$0xf] %v1565_v14  ;;  %v1569_v27 = vor.u32 %v1568_v17, %v1564_v1  ;;  %5378 = vmatmul.bf16.gmra.mxu2 %v7177_v13  ;;  %v7110_v60 = vld [vmem:[#allocation3 + $0x14c] sm:$0xf0]  ;;  %v7878_v31 = vld [vmem:[#allocation3 + $0x12c] sm:$0xf] }
 0x124   : > { %v964_v16 = vsel %vm8510_vm12, %v956_v55, %v963_v21  ;;  %v1207_v30 = vsel %vm8371_vm3, %v965_v23, %v1206_v36  ;;  %v812_v32 = vpack.c.bf16 %v780_v24, %v780_v24  ;;  %v7908_v38 = vld [vmem:[#allocation3 + $0x218] sm:$0xf0]  ;;  %2911 = vst [vmem:[#allocation3 + $0x14] sm:$0xf] %v2770_v54  ;;  %v2248_v7 = vshrl.u32 %v6701_v56, 16  ;;  %v5349_v36 = vpop.f32.mrf.mxu2 }
 0x125   : > { %v1285_v35 = vld [vmem:[#allocation2 + $0x60] sm:$0xf]  ;;  %1205 = vst [vmem:[#allocation2 + $0x64] sm:$0xf] %v964_v16  ;;  %v654_v11 = vpop.f32.mrf.mxu0  ;;  %v1570_v18 = vrot.slane %v1569_v27, 4  ;;  %v7209_v43 = vor.u32 %v7908_v38, %v7208_v26  ;;  %v7113_v9 = vor.u32 %v7878_v31, %v7110_v60  ;;  %v2251_v13 = vshll.u32 %v6701_v56, 16 }
 0x126   : > { %v1357_v37 = vld [vmem:[#allocation2 + $0x60] sm:$0xf]  ;;  %1208 = vst [vmem:[#allocation2 + $0x68] sm:$0x1] %v1207_v30  ;;  %v967_v42 = vshrl.u32 %v812_v32, 16  ;;  %v713_v29 = vmul.f32 %v8688_v47, %v654_v11  ;;  %v970_v52 = vshll.u32 %v812_v32, 16  ;;  %v8761_v21 = vadd.f32 %v5349_v36, %v5260_v3 }
 0x127   : > { %v1577_v39 = vshrl.u32 %v1357_v37, 16  ;;  %v6680_v40 = vld [vmem:[#allocation2 + $0x60] sm:$0xf]  ;;  %v1575_v46 = vsel %vm8454_vm8, %v1570_v18, %v1574_v33  ;;  %1317 = vst [vmem:[#allocation3 + $0x240] sm:$0xf] %v1285_v35  ;;  %v1580_v50 = vshll.u32 %v1357_v37, 16 }
 0x128   : > { %v8749_v51 = vrot.slane %v967_v42, 7  ;;  %v749_v53 = vadd.f32 %v8696_v59, %v713_v29  ;;  %1815 = vst [vmem:[#allocation3 + $0x220] sm:$0xf] %v1575_v46  ;;  %v8024_v16 = vld [vmem:[%s10468_s4 + $0x138] sm:$0xff]  ;;  %v477_v37 = vld [vmem:[#allocation2 + $0x8c] sm:$0x1] }
 0x129   : > { %v1579_v49 = vrot.slane %v1577_v39, 4  ;;  %5294 = vmatmul.bf16.gmra.mxu1 %v7209_v43  ;;  %v1582_v55 = vrot.slane %v1580_v50, 5  ;;  %2157 = vst [vmem:[#allocation3 + $0x204] sm:$0xf] %v6680_v40  ;;  %v1213_v11 = vld [vmem:[#allocation2 + $0x74] sm:$0x1] }
 0x12a   : > { %v972_v57 = vor.u32 %v970_v52, %v8749_v51  ;;  %v781_v58 = vmax.f32 %v749_v53, 0.0  ;;  %v973_v14 = vrot.slane %v8749_v51, 4  ;;  %v7904_v19 = vld [vmem:[#allocation3 + $0x1fc] sm:$0xf]  ;;  %5607 = vmatpush.bf16.msrb.mxu1 %v8024_v16  ;;  %v478_v40 = vsel %vm8404_vm5, 0, %v477_v37 }
 0x12b   : > { %v1583_v63 = vor.u32 %v1582_v55, %v1579_v49  ;;  %v8771_v15 = vld [vmem:[#allocation2 + $0x1c] sm:$0xf]  ;;  %479 = vst [vmem:[#allocation2 + $0x8c] sm:$0x1] %v478_v40  ;;  %v2250_v48 = vrot.slane %v2248_v7, 4  ;;  %v2253_v49 = vrot.slane %v2251_v13, 5 }
 0x12c   : > { %v1210_v0 = vsel %vm8496_vm10, %v972_v57, %v1209_v22  ;;  %v813_v1 = vpack.c.bf16 %v781_v58, %v781_v58  ;;  %v1286_v4 = vld [vmem:[#allocation2 + $0x64] sm:$0xf]  ;;  %v6748_v55 = vld [vmem:[#allocation2 + $0x14] sm:$0x1]  ;;  %v2257_v3 = vshll.u32 %v8771_v15, 16 }
 0x12d   : > { %v1358_v5 = vld [vmem:[#allocation2 + $0x64] sm:$0xf]  ;;  %1211 = vst [vmem:[#allocation2 + $0x6c] sm:$0xf] %v1210_v0  ;;  %v657_v8 = vpop.f32.mrf.mxu0  ;;  %v1359_v10 = vld [vmem:[#allocation2 + $0x68] sm:$0x1] }
 0x12e   : > { %v1586_v12 = vshll.u32 %v1358_v5, 16  ;;  %v975_v17 = vshrl.u32 %v813_v1, 16  ;;  %v714_v2 = vmul.f32 %v8688_v47, %v657_v8  ;;  %1318 = vst [vmem:[#allocation3 + $0x264] sm:$0xf] %v1286_v4  ;;  %v6681_v23 = vld [vmem:[#allocation2 + $0x64] sm:$0xf] }
 0x12f   : > { %v7210_v24 = vld [vmem:[#allocation3 + $0x21c] sm:$0xf0]  ;;  %v1584_v25 = vrot.slane %v1583_v63, 4  ;;  %v1590_v27 = vshrl.u32 %v1358_v5, 16  ;;  %v978_v32 = vshll.u32 %v813_v1, 16  ;;  %v1596_v35 = vshll.u32 %v1359_v10, 16 }
 0x130   : > { %v1588_v26 = vrot.slane %v1586_v12, 5  ;;  %v977_v30 = vrot.slane %v975_v17, 7  ;;  %v750_v33 = vadd.f32 %v8696_v59, %v714_v2  ;;  %5546 = vmatmul.bf16.gmra.mxu0 %v7113_v9  ;;  %v7213_v38 = vor.u32 %v7904_v19, %v7210_v24  ;;  %2158 = vst [vmem:[#allocation3 + $0x228] sm:$0xf] %v6681_v23  ;;  %v7244_v45 = vld [vmem:[#allocation3 + $0x240] sm:$0xf] }
 0x131   : > { %v1592_v39 = vrot.slane %v1590_v27, 4  ;;  %v1598_v22 = vrot.slane %v1596_v35, 5  ;;  %v424_v1 = vld [vmem:[#allocation2 + $0x90] sm:$0x1]  ;;  %v2254_v9 = vor.u32 %v2253_v49, %v2250_v48  ;;  %v2771_v17 = vrot.slane %v2769_v28, 4  ;;  %v8794_v35 = vpop.f32.mrf.mxu1 }
 0x132   : > { %v1589_v18 = vsel %vm8454_vm8, %v1584_v25, %v1588_v26  ;;  %v980_v42 = vor.u32 %v978_v32, %v977_v30  ;;  %v982_v29 = vrot.slane %v977_v30, 4  ;;  %v782_v43 = vmax.f32 %v750_v33, 0.0  ;;  %v7146_v27 = vld [vmem:[#allocation3 + $0x194] sm:$0xf0]  ;;  %v8802_v49 = vld [vmem:[#allocation2 + $0x1c] sm:$0xf] }
 0x133   : > { %1816 = vst [vmem:[#allocation3 + $0x244] sm:$0xf] %v1589_v18  ;;  %v1593_v46 = vor.u32 %v1592_v39, %v1588_v26  ;;  %5383 = vmatmul.bf16.gmra.mxu2 %v7213_v38  ;;  %v425_v7 = vsel %vm8371_vm3, 0, %v424_v1  ;;  %v2772_v2 = vrot.slane %v6748_v55, 5  ;;  %v8789_v25 = vrot.slane %v2257_v3, 5 }
 0x134   : > { %v981_v50 = vsel %vm8510_vm12, %v973_v14, %v980_v42  ;;  %v1214_v51 = vsel %vm8371_vm3, %v982_v29, %v1213_v11  ;;  %v814_v52 = vpack.c.bf16 %v782_v43, %v782_v43  ;;  %v1287_v53 = vld [vmem:[#allocation2 + $0x6c] sm:$0xf]  ;;  %v1216_v14 = vld [vmem:[#allocation2 + $0x78] sm:$0xf]  ;;  %426 = vst [vmem:[#allocation2 + $0x90] sm:$0x1] %v425_v7 }
 0x135   : > { %v1360_v54 = vld [vmem:[#allocation2 + $0x6c] sm:$0xf]  ;;  %1212 = vst [vmem:[#allocation2 + $0x70] sm:$0xf] %v981_v50  ;;  %v659_v56 = vpop.f32.mrf.mxu0  ;;  %v7917_v57 = vld [vmem:[#allocation3 + $0x260] sm:$0xf0]  ;;  %v2773_v42 = vsel %vm8740_vm15, %v2771_v17, %v2772_v2 }
 0x136   : > { %v1594_v58 = vrot.slane %v1593_v46, 4  ;;  %v1601_v60 = vshrl.u32 %v1360_v54, 16  ;;  %1215 = vst [vmem:[#allocation2 + $0x74] sm:$0x1] %v1214_v51  ;;  %v984_v31 = vshrl.u32 %v814_v52, 16  ;;  %v715_v63 = vmul.f32 %v8688_v47, %v659_v56 }
 0x137   : > { %v7245_v0 = vor.u32 %v7917_v57, %v7244_v45  ;;  %v987_v4 = vshll.u32 %v814_v52, 16  ;;  %1319 = vst [vmem:[#allocation3 + $0x288] sm:$0xf] %v1287_v53  ;;  %v6682_v8 = vld [vmem:[#allocation2 + $0x6c] sm:$0xf]  ;;  %v1604_v13 = vshll.u32 %v1360_v54, 16 }
 0x138   : > { %v1599_v5 = vsel %vm8454_vm8, %v1594_v58, %v1598_v22  ;;  %v8783_v10 = vrot.slane %v984_v31, 7  ;;  %v751_v12 = vadd.f32 %v8696_v59, %v715_v63  ;;  %v1603_v36 = vrot.slane %v1601_v60, 4  ;;  %v7887_v26 = vld [vmem:[#allocation3 + $0x174] sm:$0xf]  ;;  %2159 = vst [vmem:[#allocation3 + $0x24c] sm:$0xf] %v6682_v8 }
 0x139   : > { %1817 = vst [vmem:[#allocation3 + $0x268] sm:$0xf] %v1599_v5  ;;  %5299 = vmatmul.bf16.gmra.mxu1 %v7245_v0  ;;  %v1606_v24 = vrot.slane %v1604_v13, 5  ;;  %v2255_v16 = vrot.slane %v2254_v9, 4  ;;  %v2261_v30 = vshrl.u32 %v8771_v15, 16  ;;  %v7149_v46 = vor.u32 %v7887_v26, %v7146_v27 }
 0x13a   : > { %v989_v19 = vor.u32 %v987_v4, %v8783_v10  ;;  %v783_v23 = vmax.f32 %v751_v12, 0.0  ;;  %v6703_v29 = vld [vmem:[#allocation2 + $0x20] sm:$0x1]  ;;  %v7913_v45 = vld [vmem:[#allocation3 + $0x244] sm:$0xf]  ;;  %v990_v60 = vrot.slane %v8783_v10, 4 }
 0x13b   : > { %v1607_v37 = vor.u32 %v1606_v24, %v1603_v36  ;;  %v2260_v48 = vsel %vm8454_vm8, %v2255_v16, %v8789_v25  ;;  %v1220_v50 = vld [vmem:[#allocation2 + $0x80] sm:$0x1]  ;;  %v2263_v58 = vrot.slane %v2261_v30, 4  ;;  %2912 = vst [vmem:[#allocation3 + $0x38] sm:$0xf] %v2773_v42  ;;  %v2267_v7 = vshll.u32 %v6703_v29, 16 }
 0x13c   : > { %v1217_v32 = vsel %vm8496_vm10, %v989_v19, %v1216_v14  ;;  %v815_v33 = vpack.c.bf16 %v783_v23, %v783_v23  ;;  %v1288_v61 = vld [vmem:[#allocation2 + $0x70] sm:$0xf]  ;;  %v6749_v1 = vld [vmem:[#allocation2 + $0x18] sm:$0xe]  ;;  %2641 = vst [vmem:[#allocation3 + $0x58] sm:$0xf] %v2260_v48 }
 0x13d   : > { %v1361_v28 = vld [vmem:[#allocation2 + $0x70] sm:$0xf]  ;;  %1218 = vst [vmem:[#allocation2 + $0x78] sm:$0xf] %v1217_v32  ;;  %v662_v38 = vpop.f32.mrf.mxu0  ;;  %v1362_v18 = vld [vmem:[#allocation2 + $0x74] sm:$0x1]  ;;  %v2264_v36 = vor.u32 %v2263_v58, %v8789_v25 }
 0x13e   : > { %v6683_v11 = vld [vmem:[#allocation2 + $0x70] sm:$0xf]  ;;  %v1610_v39 = vshll.u32 %v1361_v28, 16  ;;  %v1614_v40 = vshrl.u32 %v1361_v28, 16  ;;  %v992_v43 = vshrl.u32 %v815_v33, 16  ;;  %v716_v15 = vmul.f32 %v8688_v47, %v662_v38 }
 0x13f   : > { %1320 = vst [vmem:[#allocation3 + $0x2ac] sm:$0xf] %v1288_v61  ;;  %v1608_v52 = vrot.slane %v1607_v37, 4  ;;  %v1620_v54 = vshll.u32 %v1362_v18, 16  ;;  %v995_v56 = vshll.u32 %v815_v33, 16  ;;  %v2776_v10 = vrot.slane %v8802_v49, 5 }
 0x140   : > { %v7246_v51 = vld [vmem:[#allocation3 + $0x264] sm:$0xf0]  ;;  %v1612_v22 = vrot.slane %v1610_v39, 5  ;;  %v1616_v53 = vrot.slane %v1614_v40, 4  ;;  %v994_v55 = vrot.slane %v992_v43, 7  ;;  %v752_v57 = vadd.f32 %v8696_v59, %v716_v15  ;;  %5551 = vmatmul.bf16.gmra.mxu0 %v7149_v46 }
 0x141   : > { %2160 = vst [vmem:[#allocation3 + $0x270] sm:$0xf] %v6683_v11  ;;  %v7249_v31 = vor.u32 %v7913_v45, %v7246_v51  ;;  %v7280_v8 = vld [vmem:[#allocation3 + $0x288] sm:$0xf]  ;;  %v1622_v12 = vrot.slane %v1620_v54, 5  ;;  %v6795_v24 = vrot.slane %v6749_v1, 9 }
 0x142   : > { %v1613_v63 = vsel %vm8454_vm8, %v1608_v52, %v1612_v22  ;;  %v1617_v0 = vor.u32 %v1616_v53, %v1612_v22  ;;  %v997_v3 = vor.u32 %v995_v56, %v994_v55  ;;  %v999_v4 = vrot.slane %v994_v55, 4  ;;  %v480_v2 = vld [vmem:[#allocation2 + $0x98] sm:$0x1]  ;;  %v6751_v23 = vld [vmem:[#allocation2 + $0x20] sm:$0x1]  ;;  %v8829_v52 = vpop.f32.mrf.mxu2 }
 0x143   : > { %v784_v5 = vmax.f32 %v752_v57, 0.0  ;;  %1818 = vst [vmem:[#allocation3 + $0x28c] sm:$0xf] %v1613_v63  ;;  %5388 = vmatmul.bf16.gmra.mxu2 %v7249_v31  ;;  %v481_v16 = vsel %vm8404_vm5, 0, %v480_v2  ;;  %v1223_v11 = vld [vmem:[#allocation2 + $0x84] sm:$0xf]  ;;  %v2777_v40 = vsel %vm8740_vm15, %v6795_v24, %v2776_v10 }
 0x144   : > { %v1618_v9 = vrot.slane %v1617_v0, 4  ;;  %v998_v13 = vsel %vm8510_vm12, %v990_v60, %v997_v3  ;;  %v1221_v14 = vsel %vm8371_vm3, %v999_v4, %v1220_v50  ;;  %v1363_v19 = vld [vmem:[#allocation2 + $0x78] sm:$0xf]  ;;  %v2269_v39 = vrot.slane %v2267_v7, 5  ;;  %482 = vst [vmem:[#allocation2 + $0x98] sm:$0x1] %v481_v16 }
 0x145   : > { %v816_v17 = vpack.c.bf16 %v784_v5, %v784_v5  ;;  %1219 = vst [vmem:[#allocation2 + $0x7c] sm:$0xf] %v998_v13  ;;  %v664_v26 = vpop.f32.mrf.mxu0  ;;  %v1625_v30 = vshrl.u32 %v1363_v19, 16  ;;  %v8818_v33 = vpop.f32.mrf.mxu1  ;;  %v1289_v37 = vld [vmem:[#allocation2 + $0x78] sm:$0xf]  ;;  %v1628_v18 = vshll.u32 %v1363_v19, 16 }
 0x146   : > { %v7926_v27 = vld [vmem:[#allocation3 + $0x2a8] sm:$0xf0]  ;;  %v1623_v25 = vsel %vm8454_vm8, %v1618_v9, %v1622_v12  ;;  %1222 = vst [vmem:[#allocation2 + $0x80] sm:$0x1] %v1221_v14  ;;  %v717_v61 = vmul.f32 %v8688_v47, %v664_v26  ;;  %v2265_v15 = vrot.slane %v2264_v36, 4  ;;  %v2778_v46 = vrot.slane %v2776_v10, 4  ;;  %v677_v14 = vpop.f32.mrf.mxu3 }
 0x147   : > { %v1001_v32 = vshrl.u32 %v816_v17, 16  ;;  %v7281_v28 = vor.u32 %v7926_v27, %v7280_v8  ;;  %1819 = vst [vmem:[#allocation3 + $0x2b0] sm:$0xf] %v1623_v25  ;;  %v1627_v38 = vrot.slane %v1625_v30, 4  ;;  %v1004_v29 = vshll.u32 %v816_v17, 16  ;;  %v8023_v10 = vld [vmem:[%s10468_s4 + $0x130] sm:$0xff] }
 0x148   : > { %v753_v43 = vadd.f32 %v8696_v59, %v717_v61  ;;  %1321 = vst [vmem:[#allocation3 + $0x2d0] sm:$0xf] %v1289_v37  ;;  %v1630_v45 = vrot.slane %v1628_v18, 5  ;;  %v2779_v48 = vrot.slane %v6751_v23, 5  ;;  %v2270_v51 = vsel %vm8454_vm8, %v2265_v15, %v2269_v39  ;;  %v7896_v22 = vld [vmem:[#allocation3 + $0x1bc] sm:$0xf]  ;;  %5608 = vmatpush.bf16.msrb.mxu1 %v8023_v10 }
 0x149   : > { %v8823_v42 = vrot.slane %v1001_v32, 7  ;;  %5304 = vmatmul.bf16.gmra.mxu1 %v7281_v28  ;;  %2913 = vst [vmem:[#allocation3 + $0x5c] sm:$0xf] %v2777_v40  ;;  %v7182_v53 = vld [vmem:[#allocation3 + $0x1dc] sm:$0xf0]  ;;  %v722_v25 = vmul.f32 %v8688_v47, %v677_v14  ;;  %v8022_v28 = vld [vmem:[%s10468_s4 + $0x128] sm:$0xff] }
 0x14a   : > { %v785_v50 = vmax.f32 %v753_v43, 0.0  ;;  %10495 = vst [vmem:[#allocation9_spill] sm:$0xff] %v8829_v52  ;;  %v1631_v54 = vor.u32 %v1630_v45, %v1627_v38  ;;  %v2780_v55 = vsel %vm8740_vm15, %v2778_v46, %v2779_v48  ;;  %v7922_v58 = vld [vmem:[#allocation3 + $0x28c] sm:$0xf]  ;;  %v7185_v9 = vor.u32 %v7896_v22, %v7182_v53  ;;  %v427_v13 = vld [vmem:[#allocation2 + $0x9c] sm:$0x1] }
 0x14b   : > { %v1006_v49 = vor.u32 %v1004_v29, %v8823_v42  ;;  %2642 = vst [vmem:[#allocation3 + $0x7c] sm:$0xf] %v2270_v51  ;;  %v1007_v3 = vrot.slane %v8823_v42, 4  ;;  %v1227_v23 = vld [vmem:[#allocation2 + $0x8c] sm:$0x1]  ;;  %v428_v26 = vsel %vm8371_vm3, 0, %v427_v13  ;;  %v758_v18 = vadd.f32 %v8696_v59, %v722_v25 }
 0x14c   : > { %v817_v57 = vpack.c.bf16 %v785_v50, %v785_v50  ;;  %v1290_v60 = vld [vmem:[#allocation2 + $0x7c] sm:$0xf]  ;;  %2914 = vst [vmem:[#allocation3 + $0x80] sm:$0xf] %v2780_v55  ;;  %v1632_v17 = vrot.slane %v1631_v54, 4  ;;  %v8021_v48 = vld [vmem:[%s10468_s4 + $0x120] sm:$0xff]  ;;  %5609 = vmatpush.bf16.msrb.mxu1 %v8022_v28 }
 0x14d   : > { %v1224_v56 = vsel %vm8496_vm10, %v1006_v49, %v1223_v11  ;;  %v1364_v31 = vld [vmem:[#allocation2 + $0x7c] sm:$0xf]  ;;  %v667_v63 = vpop.f32.mrf.mxu0  ;;  %v1365_v0 = vld [vmem:[#allocation2 + $0x80] sm:$0x1]  ;;  %v8836_v5 = vpop.f32.mrf.mxu1  ;;  %1322 = vst [vmem:[#allocation3 + $0x2f4] sm:$0xf] %v1290_v60 }
 0x14e   : > { %1225 = vst [vmem:[#allocation2 + $0x84] sm:$0xf] %v1224_v56  ;;  %v1634_v1 = vshll.u32 %v1364_v31, 16  ;;  %v1009_v4 = vshrl.u32 %v817_v57, 16  ;;  %v718_v7 = vmul.f32 %v8688_v47, %v667_v63  ;;  %v7282_v8 = vld [vmem:[#allocation3 + $0x2ac] sm:$0xf0] }
 0x14f   : > { %v1012_v12 = vshll.u32 %v817_v57, 16  ;;  %v7285_v36 = vor.u32 %v7922_v58, %v7282_v8  ;;  %v430_v27 = vld [vmem:[#allocation2 + $0xa8] sm:$0x1]  ;;  %429 = vst [vmem:[#allocation2 + $0x9c] sm:$0x1] %v428_v26  ;;  %v1638_v32 = vshrl.u32 %v1364_v31, 16 }
 0x150   : > { %v1636_v2 = vrot.slane %v1634_v1, 5  ;;  %v1011_v19 = vrot.slane %v1009_v4, 7  ;;  %v754_v24 = vadd.f32 %v8696_v59, %v718_v7  ;;  %5556 = vmatmul.bf16.gmra.mxu0 %v7185_v9  ;;  %v431_v16 = vsel %vm8371_vm3, 0, %v430_v27  ;;  %v8032_v39 = vld [vmem:[%s10468_s4 + $0x178] sm:$0xff]  ;;  %v483_v42 = vld [vmem:[#allocation2 + $0xa4] sm:$0x1]  ;;  %v679_v9 = vpop.f32.mrf.mxu3  ;;  %5610 = vmatpush.bf16.msrb.mxu1 %v8021_v48 }
 0x151   : > { %v1644_v61 = vshll.u32 %v1365_v0, 16  ;;  %432 = vst [vmem:[#allocation2 + $0xa8] sm:$0x1] %v431_v16  ;;  %v1640_v40 = vrot.slane %v1638_v32, 4  ;;  %v7316_v45 = vld [vmem:[#allocation3 + $0x2d0] sm:$0xf]  ;;  %5696 = vmatpush.bf16.msrb.mxu2 %v8032_v39  ;;  %v723_v14 = vmul.f32 %v8688_v47, %v679_v9 }
 0x152   : > { %v1637_v30 = vsel %vm8454_vm8, %v1632_v17, %v1636_v2  ;;  %v1014_v37 = vor.u32 %v1012_v12, %v1011_v19  ;;  %v1016_v11 = vrot.slane %v1011_v19, 4  ;;  %v786_v38 = vmax.f32 %v754_v24, 0.0  ;;  %v8872_v31 = vld [vmem:[#allocation3 + $0x224] sm:$0xf0]  ;;  %v8031_v63 = vld [vmem:[%s10468_s4 + $0x170] sm:$0xff]  ;;  %v8030_v17 = vld [vmem:[%s10468_s4 + $0x168] sm:$0xff] }
 0x153   : > { %1820 = vst [vmem:[#allocation3 + $0x2d4] sm:$0xf] %v1637_v30  ;;  %v790_v46 = vmax.f32 %v758_v18, 0.0  ;;  %5393 = vmatmul.bf16.gmra.mxu2 %v7285_v36  ;;  %v1641_v53 = vor.u32 %v1640_v40, %v1636_v2  ;;  %v1646_v54 = vrot.slane %v1644_v61, 5  ;;  %v484_v55 = vsel %vm8404_vm5, 0, %v483_v42  ;;  %v8020_v30 = vld [vmem:[%s10468_s4 + $0x118] sm:$0xff] }
 0x154   : > { %v1015_v29 = vsel %vm8510_vm12, %v1007_v3, %v1014_v37  ;;  %v1228_v43 = vsel %vm8371_vm3, %v1016_v11, %v1227_v23  ;;  %v818_v15 = vpack.c.bf16 %v786_v38, %v786_v38  ;;  %v7935_v22 = vld [vmem:[#allocation3 + $0x2f0] sm:$0xf0]  ;;  %v1230_v3 = vld [vmem:[#allocation2 + $0x90] sm:$0xf]  ;;  %485 = vst [vmem:[#allocation2 + $0xa4] sm:$0x1] %v484_v55  ;;  %v759_v16 = vadd.f32 %v8696_v59, %v723_v14 }
 0x155   : > { %v1291_v49 = vld [vmem:[#allocation2 + $0x84] sm:$0xf]  ;;  %1226 = vst [vmem:[#allocation2 + $0x88] sm:$0xf] %v1015_v29  ;;  %v5354_v50 = vpop.f32.mrf.mxu2  ;;  %v669_v51 = vpop.f32.mrf.mxu0  ;;  %v7317_v4 = vor.u32 %v7935_v22, %v7316_v45  ;;  %v822_v7 = vpack.c.bf16 %v790_v46, %v790_v46  ;;  %v1642_v8 = vrot.slane %v1641_v53, 4  ;;  %5697 = vmatpush.bf16.msrb.mxu2 %v8031_v63  ;;  %5611 = vmatpush.bf16.msrb.mxu1 %v8020_v30  ;;  %v8019_v55 = vld [vmem:[%s10468_s4 + $0x110] sm:$0xff] }
 0x156   : > { %1229 = vst [vmem:[#allocation2 + $0x8c] sm:$0x1] %v1228_v43  ;;  %v1018_v56 = vshrl.u32 %v818_v15, 16  ;;  %v8867_v57 = vadd.f32 %v5354_v50, %v8818_v33  ;;  %v8869_v58 = vpop.f32.mrf.mxu1  ;;  %v719_v60 = vmul.f32 %v8688_v47, %v669_v51  ;;  %v8877_v0 = vld [vmem:[#allocation2 + $0x84] sm:$0xf]  ;;  %v1021_v1 = vshll.u32 %v818_v15, 16 }
 0x157   : > { %v486_v33 = vld [vmem:[#allocation2 + $0xb0] sm:$0x1]  ;;  %v7905_v10 = vld [vmem:[#allocation3 + $0x204] sm:$0xf]  ;;  %1323 = vst [vmem:[#allocation3 + $0x318] sm:$0xf] %v1291_v49  ;;  %v1647_v23 = vsel %vm8454_vm8, %v1642_v8, %v1646_v54 }
 0x158   : > { %v8879_v12 = vrot.slane %v1018_v56, 7  ;;  %v755_v36 = vadd.f32 %v8696_v59, %v719_v60  ;;  %v487_v13 = vsel %vm8404_vm5, 0, %v486_v33  ;;  %v1052_v2 = vshrl.u32 %v822_v7, 16  ;;  %v1244_v25 = vld [vmem:[#allocation2 + $0xa8] sm:$0xf]  ;;  %v8029_v37 = vld [vmem:[%s10468_s4 + $0x160] sm:$0xff] }
 0x159   : > { %5309 = vmatmul.bf16.gmra.mxu1 %v7317_v4  ;;  %v1055_v19 = vshll.u32 %v822_v7, 16  ;;  %488 = vst [vmem:[#allocation2 + $0xb0] sm:$0x1] %v487_v13  ;;  %v1649_v24 = vshrl.u32 %v8877_v0, 16  ;;  %v7221_v28 = vor.u32 %v7905_v10, %v8872_v31  ;;  %v433_v11 = vld [vmem:[#allocation2 + $0xb4] sm:$0x1]  ;;  %5698 = vmatpush.bf16.msrb.mxu2 %v8030_v17 }
 0x15a   : > { %v1023_v26 = vor.u32 %v1021_v1, %v8879_v12  ;;  %v787_v27 = vmax.f32 %v755_v36, 0.0  ;;  %1821 = vst [vmem:[#allocation3 + $0x2f8] sm:$0xf] %v1647_v23  ;;  %v1024_v32 = vrot.slane %v8879_v12, 4  ;;  %v8897_v61 = vrot.slane %v1052_v2, 7  ;;  %5612 = vmatpush.bf16.msrb.mxu1 %v8019_v55  ;;  %v8018_v23 = vld [vmem:[%s10468_s4 + $0x108] sm:$0xff] }
 0x15b   : > { %v791_v39 = vmax.f32 %v759_v16, 0.0  ;;  %v434_v42 = vsel %vm8371_vm3, 0, %v433_v11  ;;  %v1651_v48 = vrot.slane %v1649_v24, 4  ;;  %v1652_v49 = vshll.u32 %v8877_v0, 16  ;;  %v1234_v56 = vld [vmem:[#allocation2 + $0x98] sm:$0x1]  ;;  %v682_v0 = vpop.f32.mrf.mxu3 }
 0x15c   : > { %v1231_v38 = vsel %vm8496_vm10, %v1023_v26, %v1230_v3  ;;  %v819_v18 = vpack.c.bf16 %v787_v27, %v787_v27  ;;  %v1292_v40 = vld [vmem:[#allocation2 + $0x88] sm:$0xf]  ;;  %v1057_v45 = vor.u32 %v1055_v19, %v8897_v61  ;;  %v1058_v46 = vrot.slane %v8897_v61, 4  ;;  %v7931_v31 = vld [vmem:[#allocation3 + $0x2d4] sm:$0xf] }
 0x15d   : > { %v1367_v29 = vld [vmem:[#allocation2 + $0x88] sm:$0xf]  ;;  %1232 = vst [vmem:[#allocation2 + $0x90] sm:$0xf] %v1231_v38  ;;  %v5356_v43 = vpop.f32.mrf.mxu2  ;;  %v672_v15 = vpop.f32.mrf.mxu0  ;;  %v823_v63 = vpack.c.bf16 %v791_v39, %v791_v39  ;;  %5699 = vmatpush.bf16.msrb.mxu2 %v8029_v37  ;;  %v724_v7 = vmul.f32 %v8688_v47, %v682_v0  ;;  %v1368_v8 = vld [vmem:[#allocation2 + $0x8c] sm:$0x1] }
 0x15e   : > { %v1026_v50 = vshrl.u32 %v819_v18, 16  ;;  %v1029_v51 = vshll.u32 %v819_v18, 16  ;;  %v8911_v22 = vadd.f32 %v5356_v43, %v8836_v5  ;;  %v8913_v53 = vpop.f32.mrf.mxu1  ;;  %v720_v54 = vmul.f32 %v8688_v47, %v672_v15  ;;  %1324 = vst [vmem:[#allocation3 + $0x33c] sm:$0xf] %v1292_v40  ;;  %v8028_v47 = vld [vmem:[%s10468_s4 + $0x158] sm:$0xff]  ;;  %v8027_v18 = vld [vmem:[%s10468_s4 + $0x150] sm:$0xff]  ;;  %5613 = vmatpush.bf16.msrb.mxu1 %v8018_v23 }
 0x15f   : > { %v1245_v60 = vsel %vm8496_vm10, %v1057_v45, %v1244_v25  ;;  %435 = vst [vmem:[#allocation2 + $0xb4] sm:$0x1] %v434_v42  ;;  %v1654_v5 = vrot.slane %v1652_v49, 5  ;;  %v1658_v1 = vshll.u32 %v1367_v29, 16  ;;  %v1662_v33 = vshrl.u32 %v1367_v29, 16  ;;  %v8025_v23 = vld [vmem:[%s10468_s4 + $0x140] sm:$0xff] }
 0x160   : > { %v1028_v3 = vrot.slane %v1026_v50, 7  ;;  %v756_v4 = vadd.f32 %v8696_v59, %v720_v54  ;;  %1246 = vst [vmem:[#allocation2 + $0xa8] sm:$0xf] %v1245_v60  ;;  %5561 = vmatmul.bf16.gmra.mxu0 %v7221_v28  ;;  %v1060_v12 = vshrl.u32 %v823_v63, 16  ;;  %v1063_v36 = vshll.u32 %v823_v63, 16  ;;  %v8017_v54 = vld [vmem:[%s10468_s4 + $0x100] sm:$0xff] }
 0x161   : > { %v7318_v9 = vld [vmem:[#allocation3 + $0x2f4] sm:$0xf0]  ;;  %v1655_v10 = vor.u32 %v1654_v5, %v1651_v48  ;;  %v1660_v13 = vrot.slane %v1658_v1, 5  ;;  %v760_v27 = vadd.f32 %v8696_v59, %v724_v7  ;;  %v1664_v16 = vrot.slane %v1662_v33, 4  ;;  %5700 = vmatpush.bf16.msrb.mxu2 %v8028_v47  ;;  %v489_v39 = vld [vmem:[#allocation2 + $0xbc] sm:$0x1] }
 0x162   : > { %v1031_v14 = vor.u32 %v1029_v51, %v1028_v3  ;;  %v1033_v17 = vrot.slane %v1028_v3, 4  ;;  %v788_v2 = vmax.f32 %v756_v4, 0.0  ;;  %v7321_v19 = vor.u32 %v7931_v31, %v7318_v9  ;;  %v7352_v26 = vld [vmem:[#allocation3 + $0x318] sm:$0xf]  ;;  %v8944_v49 = vld [vmem:[%s10466_s2] ss:$0 sm:$0xff]  ;;  %5614 = vmatpush.bf16.msrb.mxu1 %v8017_v54 }
 0x163   : > { %v1062_v24 = vrot.slane %v1060_v12, 7  ;;  %v1656_v25 = vrot.slane %v1655_v10, 4  ;;  %v1248_v11 = vld [vmem:[#allocation2 + $0xb0] sm:$0x1]  ;;  %v1668_v38 = vshll.u32 %v1368_v8, 16  ;;  %v792_v43 = vmax.f32 %v760_v27, 0.0  ;;  %v684_v0 = vpop.f32.mrf.mxu3 }
 0x164   : > { %v1032_v30 = vsel %vm8510_vm12, %v1024_v32, %v1031_v14  ;;  %v1235_v28 = vsel %vm8371_vm3, %v1033_v17, %v1234_v56  ;;  %v820_v37 = vpack.c.bf16 %v788_v2, %v788_v2  ;;  %5398 = vmatmul.bf16.gmra.mxu2 %v7321_v19  ;;  %v1237_v55 = vld [vmem:[#allocation2 + $0x9c] sm:$0xf]  ;;  %v1665_v63 = vor.u32 %v1664_v16, %v1660_v13  ;;  %v1293_v5 = vld [vmem:[#allocation2 + $0x90] sm:$0xf]  ;;  %v8961_v4 = vld [vmem:[%s10467_s3] ss:$0 sm:$0xff] }
 0x165   : > { %1233 = vst [vmem:[#allocation2 + $0x94] sm:$0xf] %v1032_v30  ;;  %v674_v59 = vpop.f32.mrf.mxu0  ;;  %v1065_v40 = vor.u32 %v1063_v36, %v1062_v24  ;;  %v1067_v42 = vrot.slane %v1062_v24, 4  ;;  %v7944_v29 = vld [vmem:[#allocation3 + $0x338] sm:$0xf0]  ;;  %v1661_v32 = vsel %vm8454_vm8, %v1656_v25, %v1660_v13  ;;  %v824_v31 = vpack.c.bf16 %v792_v43, %v792_v43  ;;  %5701 = vmatpush.bf16.msrb.mxu2 %v8027_v18  ;;  %v8026_v8 = vld [vmem:[%s10468_s4 + $0x148] sm:$0xff] }
 0x166   : > { %1236 = vst [vmem:[#allocation2 + $0x98] sm:$0x1] %v1235_v28  ;;  %v1035_v15 = vshrl.u32 %v820_v37, 16  ;;  %v1038_v45 = vshll.u32 %v820_v37, 16  ;;  %v8939_v48 = vpop.f32.mrf.mxu1  ;;  %v721_v50 = vmul.f32 %v8944_v49, %v674_v59  ;;  %v7353_v51 = vor.u32 %v7944_v29, %v7352_v26  ;;  %v5359_v3 = vpop.f32.mrf.mxu2  ;;  %v8974_v17 = vld [vmem:[#allocation2 + $0x24] sm:$0xf] }
 0x167   : > { %v1066_v56 = vsel %vm8510_vm12, %v1058_v46, %v1065_v40  ;;  %v1249_v60 = vsel %vm8371_vm3, %v1067_v42, %v1248_v11  ;;  %1822 = vst [vmem:[#allocation3 + $0x31c] sm:$0xf] %v1661_v32  ;;  %v1670_v46 = vrot.slane %v1668_v38, 5  ;;  %v490_v7 = vsel %vm8404_vm5, 0, %v489_v39  ;;  %v7254_v19 = vld [vmem:[#allocation3 + $0x26c] sm:$0xf0] }
 0x168   : > { %v8956_v1 = vrot.slane %v1035_v15, 7  ;;  %v757_v61 = vadd.f32 %v8961_v4, %v721_v50  ;;  %1247 = vst [vmem:[#allocation2 + $0xac] sm:$0xf] %v1066_v56  ;;  %v8970_v33 = vadd.f32 %v5359_v3, %v8869_v58  ;;  %v1069_v9 = vshrl.u32 %v824_v31, 16  ;;  %v1251_v26 = vld [vmem:[#allocation2 + $0xb4] sm:$0xf] }
 0x169   : > { %1250 = vst [vmem:[#allocation2 + $0xb0] sm:$0x1] %v1249_v60  ;;  %5314 = vmatmul.bf16.gmra.mxu1 %v7353_v51  ;;  %v1072_v12 = vshll.u32 %v824_v31, 16  ;;  %v1666_v36 = vrot.slane %v1665_v63, 4  ;;  %v725_v14 = vmul.f32 %v8944_v49, %v684_v0  ;;  %5702 = vmatpush.bf16.msrb.mxu2 %v8026_v8  ;;  %v7914_v28 = vld [vmem:[#allocation3 + $0x24c] sm:$0xf] }
 0x16a   : > { %v1040_v10 = vor.u32 %v1038_v45, %v8956_v1  ;;  %v789_v13 = vmax.f32 %v757_v61, 0.0  ;;  %491 = vst [vmem:[#allocation2 + $0xbc] sm:$0x1] %v490_v7  ;;  %v8976_v2 = vrot.slane %v1069_v9, 7  ;;  %v2272_v37 = vshrl.u32 %v8974_v17, 16 }
 0x16b   : > { %v1671_v58 = vsel %vm8454_vm8, %v1666_v36, %v1670_v46  ;;  %1325 = vst [vmem:[#allocation3 + $0x360] sm:$0xf] %v1293_v5  ;;  %v761_v27 = vadd.f32 %v8961_v4, %v725_v14  ;;  %v7257_v18 = vor.u32 %v7914_v28, %v7254_v19  ;;  %v6684_v59 = vld [vmem:[#allocation2 + $0x78] sm:$0xf]  ;;  %v1041_v40 = vrot.slane %v8956_v1, 4 }
 0x16c   : > { %v1238_v47 = vsel %vm8496_vm10, %v1040_v10, %v1237_v55  ;;  %v821_v24 = vpack.c.bf16 %v789_v13, %v789_v13  ;;  %1823 = vst [vmem:[#allocation3 + $0x340] sm:$0xf] %v1671_v58  ;;  %v1294_v25 = vld [vmem:[#allocation2 + $0x94] sm:$0xf]  ;;  %v1074_v30 = vor.u32 %v1072_v12, %v8976_v2  ;;  %v1241_v42 = vld [vmem:[#allocation2 + $0xa4] sm:$0x1] }
 0x16d   : > { %1239 = vst [vmem:[#allocation2 + $0x9c] sm:$0xf] %v1238_v47  ;;  %v8986_v16 = vpop.f32.mrf.mxu0  ;;  %v793_v39 = vmax.f32 %v761_v27, 0.0  ;;  %v1075_v29 = vrot.slane %v8976_v2, 4  ;;  %v6685_v32 = vld [vmem:[#allocation2 + $0x7c] sm:$0xf]  ;;  %5703 = vmatpush.bf16.msrb.mxu2 %v8025_v23 }
 0x16e   : > { %v1043_v11 = vshrl.u32 %v821_v24, 16  ;;  %v8990_v38 = vpop.f32.mrf.mxu1  ;;  %v1252_v43 = vsel %vm8496_vm10, %v1074_v30, %v1251_v26  ;;  %1326 = vst [vmem:[#allocation3 + $0x384] sm:$0xf] %v1294_v25  ;;  %v1046_v45 = vshll.u32 %v821_v24, 16  ;;  %v5361_v50 = vpop.f32.mrf.mxu2  ;;  %v6705_v54 = vld [vmem:[#allocation2 + $0x28] sm:$0xf] }
 0x16f   : > { %1253 = vst [vmem:[#allocation2 + $0xb4] sm:$0xf] %v1252_v43  ;;  %v825_v51 = vpack.c.bf16 %v793_v39, %v793_v39  ;;  %v8997_v55 = vadd.f32 %v5361_v50, %v8913_v53  ;;  %v7940_v56 = vld [vmem:[#allocation3 + $0x31c] sm:$0xf]  ;;  %v7847_v60 = vld [vmem:[#allocation3 + $0x30] sm:$0xf0] }
 0x170   : > { %v1045_v15 = vrot.slane %v1043_v11, 7  ;;  %5566 = vmatmul.bf16.gmra.mxu0 %v7257_v18  ;;  %2161 = vst [vmem:[#allocation3 + $0x294] sm:$0xf] %v6684_v59  ;;  %v6686_v31 = vld [vmem:[#allocation2 + $0x84] sm:$0xf]  ;;  %v2274_v63 = vrot.slane %v2272_v37, 4 }
 0x171   : > { %v2275_v0 = vshll.u32 %v8974_v17, 16  ;;  %v1077_v3 = vshrl.u32 %v825_v51, 16  ;;  %v1080_v61 = vshll.u32 %v825_v51, 16  ;;  %v6706_v46 = vld [vmem:[#allocation2 + $0x2c] sm:$0x1]  ;;  %v2281_v19 = vshll.u32 %v6705_v54, 16 }
 0x172   : > { %v1048_v5 = vor.u32 %v1046_v45, %v1045_v15  ;;  %v1050_v1 = vrot.slane %v1045_v15, 4  ;;  %v1255_v8 = vld [vmem:[#allocation2 + $0xbc] sm:$0x1]  ;;  %v6972_v9 = vld [vmem:[#allocation3 + $0x10] sm:$0xf]  ;;  %v2285_v23 = vshrl.u32 %v6705_v54, 16 }
 0x173   : > { %v7354_v7 = vld [vmem:[#allocation3 + $0x33c] sm:$0xf0]  ;;  %2162 = vst [vmem:[#allocation3 + $0x2b8] sm:$0xf] %v6685_v32  ;;  %v6687_v12 = vld [vmem:[#allocation2 + $0x88] sm:$0xf]  ;;  %v6973_v25 = vor.u32 %v7847_v60, %v6972_v9 }
 0x174   : > { %v1049_v53 = vsel %vm8510_vm12, %v1041_v40, %v1048_v5  ;;  %v1242_v36 = vsel %vm8371_vm3, %v1050_v1, %v1241_v42  ;;  %v7357_v10 = vor.u32 %v7940_v56, %v7354_v7  ;;  %v1079_v13 = vrot.slane %v1077_v3, 7  ;;  %v7388_v14 = vld [vmem:[#allocation3 + $0x360] sm:$0xf]  ;;  %v1295_v17 = vld [vmem:[#allocation2 + $0x9c] sm:$0xf] }
 0x175   : > { %2163 = vst [vmem:[#allocation3 + $0x2dc] sm:$0xf] %v6686_v31  ;;  %v9004_v2 = vpop.f32.mrf.mxu0  ;;  %v2277_v58 = vrot.slane %v2275_v0, 5  ;;  %v7953_v27 = vld [vmem:[#allocation3 + $0x380] sm:$0xf0]  ;;  %v2291_v30 = vshll.u32 %v6706_v46, 16 }
 0x176   : > { %1240 = vst [vmem:[#allocation2 + $0xa0] sm:$0xf] %v1049_v53  ;;  %5403 = vmatmul.bf16.gmra.mxu2 %v7357_v10  ;;  %v9006_v47 = vpop.f32.mrf.mxu1  ;;  %v1082_v24 = vor.u32 %v1080_v61, %v1079_v13  ;;  %v1084_v26 = vrot.slane %v1079_v13, 4  ;;  %v7389_v28 = vor.u32 %v7953_v27, %v7388_v14  ;;  %v2283_v11 = vrot.slane %v2281_v19, 5  ;;  %v5364_v39 = vpop.f32.mrf.mxu2  ;;  %v1297_v43 = vld [vmem:[#allocation2 + $0xa8] sm:$0xf] }
 0x177   : > { %10496 = vst [vmem:[#allocation10_spill] sm:$0xff] %v9004_v2  ;;  %v2278_v37 = vor.u32 %v2277_v58, %v2274_v63  ;;  %v2287_v18 = vrot.slane %v2285_v23, 4  ;;  %v9013_v42 = vadd.f32 %v5364_v39, %v8939_v48  ;;  %v1298_v32 = vld [vmem:[#allocation2 + $0xac] sm:$0xf]  ;;  %v6752_v50 = vld [vmem:[#allocation2 + $0x24] sm:$0xe] }
 0x178   : > { %1243 = vst [vmem:[#allocation2 + $0xa4] sm:$0x1] %v1242_v36  ;;  %v1083_v59 = vsel %vm8510_vm12, %v1075_v29, %v1082_v24  ;;  %v1256_v40 = vsel %vm8371_vm3, %v1084_v26, %v1255_v8  ;;  %5319 = vmatmul.bf16.vlgmr.msrb.gmra.mxu3 %v7389_v28  ;;  %v7923_v51 = vld [vmem:[#allocation3 + $0x294] sm:$0xf]  ;;  %v2293_v56 = vrot.slane %v2291_v30, 5  ;;  %v6796_v1 = vrot.slane %v6752_v50, 9 }
 0x179   : > { %1327 = vst [vmem:[#allocation3 + $0x3a8] sm:$0xf] %v1295_v17  ;;  %5615 = vmatmul.bf16.vlgmr.msrb.gmra.mxu1 %v6973_v25  ;;  %v2288_v15 = vor.u32 %v2287_v18, %v2283_v11  ;;  %v2279_v45 = vrot.slane %v2278_v37, 4  ;;  %v6753_v31 = vld [vmem:[#allocation2 + $0x28] sm:$0xf] }
 0x17a   : > { %2164 = vst [vmem:[#allocation3 + $0x300] sm:$0xf] %v6687_v12  ;;  %v7290_v54 = vld [vmem:[#allocation3 + $0x2b4] sm:$0xf0]  ;;  %v6754_v5 = vld [vmem:[#allocation2 + $0x2c] sm:$0x1] }
 0x17b   : > { %1254 = vst [vmem:[#allocation2 + $0xb8] sm:$0xf] %v1083_v59  ;;  %v2289_v29 = vrot.slane %v2288_v15, 4  ;;  %v2284_v48 = vsel %vm8454_vm8, %v2279_v45, %v2283_v11  ;;  %v2783_v3 = vrot.slane %v6753_v31, 5  ;;  %v7293_v46 = vor.u32 %v7923_v51, %v7290_v54  ;;  %v6707_v53 = vld [vmem:[#allocation2 + $0x30] sm:$0xf] }
 0x17c   : > { %1257 = vst [vmem:[#allocation2 + $0xbc] sm:$0x1] %v1256_v40  ;;  %v2786_v9 = vrot.slane %v6754_v5, 5  ;;  %v6708_v36 = vld [vmem:[#allocation2 + $0x34] sm:$0xf]  ;;  %v2296_v26 = vshrl.u32 %v6707_v53, 16 }
 0x17d   : > { %1329 = vst [vmem:[#allocation3 + $0x3f0] sm:$0xf] %v1297_v43  ;;  %v1296_v60 = vld [vmem:[#allocation2 + $0xa0] sm:$0xf]  ;;  %v9017_v63 = vpop.f32.mrf.mxu0  ;;  %v2294_v0 = vsel %vm8454_vm8, %v2289_v29, %v2293_v56  ;;  %v2784_v7 = vsel %vm8740_vm15, %v6796_v1, %v2783_v3  ;;  %v2785_v8 = vrot.slane %v2783_v3, 4  ;;  %v2299_v27 = vshll.u32 %v6707_v53, 16 }
 0x17e   : > { %1330 = vst [vmem:[#allocation3 + $0x414] sm:$0xf] %v1298_v32  ;;  %v9021_v61 = vpop.f32.mrf.mxu1  ;;  %v5366_v12 = vpop.f32.mrf.mxu2  ;;  %v7843_v13 = vld [vmem:[#allocation3 + $0x14] sm:$0xf]  ;;  %v6974_v14 = vld [vmem:[#allocation3 + $0x34] sm:$0xf0] }
 0x17f   : > { %10497 = vst [vmem:[#allocation11_spill] sm:$0xff] %v9017_v63  ;;  %v9026_v10 = vadd.f32 %v5366_v12, %v8990_v38  ;;  %v6688_v17 = vld [vmem:[#allocation2 + $0x90] sm:$0xf]  ;;  %v6689_v58 = vld [vmem:[#allocation2 + $0x94] sm:$0xf]  ;;  %v2787_v19 = vsel %vm8740_vm15, %v2785_v8, %v2786_v9  ;;  %v2305_v30 = vshll.u32 %v6708_v36, 16  ;;  %v6977_v37 = vor.u32 %v7843_v13, %v6974_v14 }
 0x180   : > { %1328 = vst [vmem:[#allocation3 + $0x3cc] sm:$0xf] %v1296_v60  ;;  %5571 = vmatmul.bf16.gmra.mxu0 %v7293_v46  ;;  %v7856_v23 = vld [vmem:[#allocation3 + $0x78] sm:$0xf0]  ;;  %v6709_v24 = vld [vmem:[#allocation2 + $0x38] sm:$0x1] }
 0x181   : > { %2643 = vst [vmem:[#allocation3 + $0xa0] sm:$0xf] %v2284_v48  ;;  %v7424_v25 = vld [vmem:[#allocation3 + $0x3a8] sm:$0xf]  ;;  %v2309_v28 = vshrl.u32 %v6708_v36, 16  ;;  %v2298_v38 = vrot.slane %v2296_v26, 4 }
 0x182   : > { %2644 = vst [vmem:[#allocation3 + $0xc4] sm:$0xf] %v2294_v0  ;;  %v2301_v18 = vrot.slane %v2299_v27, 5  ;;  %v2307_v40 = vrot.slane %v2305_v30, 5  ;;  %v2315_v32 = vshll.u32 %v6709_v24, 16 }
 0x183   : > { %2915 = vst [vmem:[#allocation3 + $0xa4] sm:$0xf] %v2784_v7  ;;  %v2311_v43 = vrot.slane %v2309_v28, 4  ;;  %v7008_v45 = vld [vmem:[#allocation3 + $0x58] sm:$0xf] }
 0x184   : > { %2165 = vst [vmem:[#allocation3 + $0x324] sm:$0xf] %v6688_v17  ;;  %v2302_v50 = vor.u32 %v2301_v18, %v2298_v38  ;;  %v6755_v51 = vld [vmem:[#allocation2 + $0x30] sm:$0xe]  ;;  %v6756_v54 = vld [vmem:[#allocation2 + $0x34] sm:$0xf]  ;;  %v7009_v29 = vor.u32 %v7856_v23, %v7008_v45 }
 0x185   : > { %2166 = vst [vmem:[#allocation3 + $0x348] sm:$0xf] %v6689_v58  ;;  %v9030_v39 = vpop.f32.mrf.mxu0  ;;  %v2312_v56 = vor.u32 %v2311_v43, %v2307_v40  ;;  %v6757_v60 = vld [vmem:[#allocation2 + $0x38] sm:$0x1]  ;;  %v2317_v0 = vrot.slane %v2315_v32, 5  ;;  %v6797_v5 = vrot.slane %v6755_v51, 9 }
 0x186   : > { %2916 = vst [vmem:[#allocation3 + $0xc8] sm:$0xf] %v2787_v19  ;;  %5704 = vmatmul.bf16.vlgmr.msrb.gmra.mxu2 %v6977_v37  ;;  %v9032_v15 = vpop.f32.mrf.mxu1  ;;  %v5369_v48 = vpop.f32.mrf.mxu2  ;;  %v2303_v31 = vrot.slane %v2302_v50, 4  ;;  %v2790_v1 = vrot.slane %v6756_v54, 5  ;;  %v1299_v46 = vld [vmem:[#allocation2 + $0xb4] sm:$0xf] }
 0x187   : > { %v7962_v11 = vld [vmem:[#allocation3 + $0x3c8] sm:$0xf0]  ;;  %10498 = vst [vmem:[#allocation12_spill] sm:$0xff] %v9030_v39  ;;  %v9035_v3 = vadd.f32 %v5369_v48, %v9006_v47  ;;  %v1300_v7 = vld [vmem:[#allocation2 + $0xb8] sm:$0xf]  ;;  %v2313_v12 = vrot.slane %v2312_v56, 4 }
 0x188   : > { %v7425_v59 = vor.u32 %v7962_v11, %v7424_v25  ;;  %v6710_v8 = vld [vmem:[#allocation2 + $0x3c] sm:$0xf]  ;;  %1331 = vst [vmem:[#allocation3 + $0x438] sm:$0xf] %v1299_v46  ;;  %v2308_v9 = vsel %vm8454_vm8, %v2303_v31, %v2307_v40  ;;  %v2792_v53 = vrot.slane %v2790_v1, 4  ;;  %v2793_v36 = vrot.slane %v6757_v60, 5 }
 0x189   : > { %5620 = vmatmul.bf16.gmra.mxu1 %v7009_v29  ;;  %v7932_v13 = vld [vmem:[#allocation3 + $0x2dc] sm:$0xf]  ;;  %v7326_v14 = vld [vmem:[#allocation3 + $0x2fc] sm:$0xf0]  ;;  %1332 = vst [vmem:[#allocation3 + $0x45c] sm:$0xf] %v1300_v7  ;;  %v2791_v17 = vsel %vm8740_vm15, %v6797_v5, %v2790_v1  ;;  %v2318_v58 = vsel %vm8454_vm8, %v2313_v12, %v2317_v0 }
 0x18a   : > { %5324 = vmatmul.bf16.gmra.mxu3 %v7425_v59  ;;  %v6711_v47 = vld [vmem:[#allocation2 + $0x40] sm:$0xf]  ;;  %2645 = vst [vmem:[#allocation3 + $0xe8] sm:$0xf] %v2308_v9  ;;  %v2794_v19 = vsel %vm8740_vm15, %v2792_v53, %v2793_v36  ;;  %v6712_v23 = vld [vmem:[#allocation2 + $0x44] sm:$0x1]  ;;  %v7329_v37 = vor.u32 %v7932_v13, %v7326_v14 }
 0x18b   : > { %v2320_v24 = vshrl.u32 %v6710_v8, 16  ;;  %2646 = vst [vmem:[#allocation3 + $0x10c] sm:$0xf] %v2318_v58  ;;  %v2323_v27 = vshll.u32 %v6710_v8, 16  ;;  %v2329_v25 = vshll.u32 %v6711_v47, 16  ;;  %v2333_v30 = vshrl.u32 %v6711_v47, 16 }
 0x18c   : > { %2917 = vst [vmem:[#allocation3 + $0xec] sm:$0xf] %v2791_v17  ;;  %v6758_v38 = vld [vmem:[#allocation2 + $0x3c] sm:$0xe]  ;;  %v2339_v43 = vshll.u32 %v6712_v23, 16 }
 0x18d   : > { %v9045_v26 = vpop.f32.mrf.mxu0  ;;  %v2322_v11 = vrot.slane %v2320_v24, 4  ;;  %2918 = vst [vmem:[#allocation3 + $0x110] sm:$0xf] %v2794_v19  ;;  %v2325_v18 = vrot.slane %v2323_v27, 5  ;;  %v2331_v59 = vrot.slane %v2329_v25, 5  ;;  %v2335_v40 = vrot.slane %v2333_v30, 4 }
 0x18e   : > { %10499 = vst [vmem:[#allocation13_spill] sm:$0xff] %v9045_v26  ;;  %v9047_v28 = vpop.f32.mrf.mxu1  ;;  %v9049_v32 = vld [vmem:[#allocation2 + $0x94] sm:$0xf]  ;;  %v5371_v45 = vpop.f32.mrf.mxu2  ;;  %v7010_v50 = vld [vmem:[#allocation3 + $0x7c] sm:$0xf0]  ;;  %v6798_v46 = vrot.slane %v6758_v38, 9 }
 0x18f   : > { %v6759_v51 = vld [vmem:[#allocation2 + $0x40] sm:$0xf]  ;;  %v9052_v54 = vadd.f32 %v5371_v45, %v9021_v61  ;;  %v7852_v29 = vld [vmem:[#allocation3 + $0x5c] sm:$0xf]  ;;  %v6690_v56 = vld [vmem:[#allocation2 + $0x9c] sm:$0xf]  ;;  %v2326_v48 = vor.u32 %v2325_v18, %v2322_v11  ;;  %v2336_v31 = vor.u32 %v2335_v40, %v2331_v59 }
 0x190   : > { %5576 = vmatmul.bf16.gmra.mxu0 %v7329_v37  ;;  %v6691_v60 = vld [vmem:[#allocation2 + $0xa0] sm:$0xf]  ;;  %v6760_v0 = vld [vmem:[#allocation2 + $0x44] sm:$0x1]  ;;  %v7460_v5 = vld [vmem:[#allocation3 + $0x3f0] sm:$0xf]  ;;  %v7013_v36 = vor.u32 %v7852_v29, %v7010_v50 }
 0x191   : > { %v7971_v1 = vld [vmem:[#allocation3 + $0x410] sm:$0xf0]  ;;  %2167 = vst [vmem:[#allocation3 + $0x36c] sm:$0xf] %v6690_v56  ;;  %v2797_v7 = vrot.slane %v6759_v51, 5  ;;  %v1686_v8 = vshrl.u32 %v9049_v32, 16 }
 0x192   : > { %2168 = vst [vmem:[#allocation3 + $0x390] sm:$0xf] %v6691_v60  ;;  %v2327_v9 = vrot.slane %v2326_v48, 4  ;;  %v2337_v12 = vrot.slane %v2336_v31, 4  ;;  %v2341_v53 = vrot.slane %v2339_v43, 5  ;;  %v2800_v17 = vrot.slane %v6760_v0, 5 }
 0x193   : > { %v7865_v61 = vld [vmem:[#allocation3 + $0xc0] sm:$0xf0]  ;;  %v2798_v13 = vsel %vm8740_vm15, %v6798_v46, %v2797_v7  ;;  %v2799_v14 = vrot.slane %v2797_v7, 4  ;;  %v6713_v47 = vld [vmem:[#allocation2 + $0x48] sm:$0xf]  ;;  %v7461_v38 = vor.u32 %v7971_v1, %v7460_v5  ;;  %v1688_v45 = vrot.slane %v1686_v8, 4 }
 0x194   : > { %v6842_v58 = vld [vmem:[#allocation2 + $0x18] sm:$0xf]  ;;  %v2332_v23 = vsel %vm8454_vm8, %v2327_v9, %v2331_v59  ;;  %v2342_v24 = vsel %vm8454_vm8, %v2337_v12, %v2341_v53  ;;  %2919 = vst [vmem:[#allocation3 + $0x134] sm:$0xf] %v2798_v13  ;;  %v6714_v37 = vld [vmem:[#allocation2 + $0x4c] sm:$0xf] }
 0x195   : > { %v9057_v19 = vpop.f32.mrf.mxu0  ;;  %v7044_v25 = vld [vmem:[#allocation3 + $0xa0] sm:$0xf]  ;;  %2647 = vst [vmem:[#allocation3 + $0x130] sm:$0xf] %v2332_v23  ;;  %v2801_v30 = vsel %vm8740_vm15, %v2799_v14, %v2800_v17  ;;  %v1369_v11 = vld [vmem:[#allocation2 + $0x90] sm:$0xf] }
 0x196   : > { %10500 = vst [vmem:[#allocation14_spill] sm:$0xff] %v9057_v19  ;;  %5709 = vmatmul.bf16.gmra.mxu2 %v7013_v36  ;;  %v9063_v27 = vpop.f32.mrf.mxu1  ;;  %v7045_v18 = vor.u32 %v7865_v61, %v7044_v25  ;;  %v2344_v40 = vshrl.u32 %v6713_v47, 16  ;;  %v2347_v43 = vshll.u32 %v6713_v47, 16  ;;  %v3060_v59 = vshrl.u32 %v6842_v58, 16  ;;  %v5374_v50 = vpop.f32.mrf.mxu2  ;;  %v436_v29 = vld [vmem:[#allocation2 + $0xc0] sm:$0x1] }
 0x197   : > { %2648 = vst [vmem:[#allocation3 + $0x154] sm:$0xf] %v2342_v24  ;;  %v9068_v51 = vadd.f32 %v5374_v50, %v9032_v15  ;;  %v1371_v56 = vld [vmem:[#allocation2 + $0x98] sm:$0x1]  ;;  %v2353_v60 = vshll.u32 %v6714_v37, 16  ;;  %v2357_v48 = vshrl.u32 %v6714_v37, 16 }
 0x198   : > { %2920 = vst [vmem:[#allocation3 + $0x158] sm:$0xf] %v2801_v30  ;;  %v7362_v31 = vld [vmem:[#allocation3 + $0x344] sm:$0xf0]  ;;  %v437_v0 = vsel %vm8371_vm3, 0, %v436_v29  ;;  %v1673_v5 = vshrl.u32 %v1369_v11, 16 }
 0x199   : > { %5625 = vmatmul.bf16.gmra.mxu1 %v7045_v18  ;;  %v1676_v1 = vshll.u32 %v1369_v11, 16  ;;  %v1682_v46 = vshll.u32 %v9049_v32, 16  ;;  %v3063_v7 = vshll.u32 %v6842_v58, 16  ;;  %438 = vst [vmem:[#allocation2 + $0xc0] sm:$0x1] %v437_v0  ;;  %v8008_v15 = vld [vmem:[%s10468_s4 + $0xb8] sm:$0xff] }
 0x19a   : > { %5329 = vmatmul.bf16.gmra.mxu3 %v7461_v38  ;;  %v2346_v8 = vrot.slane %v2344_v40, 4  ;;  %v2349_v9 = vrot.slane %v2347_v43, 5  ;;  %v1675_v12 = vrot.slane %v1673_v5, 4  ;;  %v1692_v61 = vshll.u32 %v1371_v56, 16  ;;  %v7941_v14 = vld [vmem:[#allocation3 + $0x324] sm:$0xf] }
 0x19b   : > { %v1678_v53 = vrot.slane %v1676_v1, 5  ;;  %v1684_v36 = vrot.slane %v1682_v46, 5  ;;  %5429 = vmatpush.bf16.msrb.mxu3 %v8008_v15  ;;  %v6715_v17 = vld [vmem:[#allocation2 + $0x50] sm:$0x1]  ;;  %v9078_v23 = vrot.slane %v2353_v60, 5  ;;  %v2359_v32 = vrot.slane %v2357_v48, 4 }
 0x19c   : > { %v2350_v47 = vor.u32 %v2349_v9, %v2346_v8  ;;  %v7365_v24 = vor.u32 %v7941_v14, %v7362_v31  ;;  %v9082_v37 = vrot.slane %v3060_v59, 4  ;;  %v9084_v11 = vrot.slane %v3063_v7, 5  ;;  %v7046_v38 = vld [vmem:[#allocation3 + $0xc4] sm:$0xf0]  ;;  %v9086_v18 = vld [vmem:[#allocation2 + $0x4c] sm:$0xf] }
 0x19d   : > { %v9076_v13 = vpop.f32.mrf.mxu0  ;;  %v1679_v25 = vor.u32 %v1678_v53, %v1675_v12  ;;  %v1689_v30 = vor.u32 %v1688_v45, %v1684_v36  ;;  %v9088_v40 = vld [vmem:[#allocation2 + $0x1c] sm:$0xf]  ;;  %v1694_v60 = vrot.slane %v1692_v61, 5  ;;  %v2363_v48 = vshll.u32 %v6715_v17, 16  ;;  %v6716_v0 = vld [vmem:[#allocation2 + $0x54] sm:$0xf] }
 0x19e   : > { %10501 = vst [vmem:[#allocation15_spill] sm:$0xff] %v9076_v13  ;;  %v9080_v58 = vpop.f32.mrf.mxu1  ;;  %v5376_v43 = vpop.f32.mrf.mxu2  ;;  %v7861_v50 = vld [vmem:[#allocation3 + $0xa4] sm:$0xf]  ;;  %v7496_v59 = vld [vmem:[#allocation3 + $0x438] sm:$0xf]  ;;  %v2351_v1 = vrot.slane %v2350_v47, 4  ;;  %v2360_v46 = vor.u32 %v2359_v32, %v9078_v23 }
 0x19f   : > { %v1680_v29 = vrot.slane %v1679_v25, 4  ;;  %v1690_v56 = vrot.slane %v1689_v30, 4  ;;  %v9091_v31 = vadd.f32 %v5376_v43, %v9047_v28  ;;  %v492_v45 = vld [vmem:[#allocation2 + $0xc8] sm:$0x1]  ;;  %v8007_v5 = vld [vmem:[%s10468_s4 + $0xb0] sm:$0xff]  ;;  %v2804_v53 = vrot.slane %v9086_v18, 5 }
 0x1a0   : > { %5581 = vmatmul.bf16.gmra.mxu0 %v7365_v24  ;;  %v6717_v7 = vld [vmem:[#allocation2 + $0x58] sm:$0xf]  ;;  %v7980_v15 = vld [vmem:[#allocation3 + $0x458] sm:$0xf0]  ;;  %v7874_v8 = vld [vmem:[#allocation3 + $0x108] sm:$0xf0]  ;;  %v7049_v61 = vor.u32 %v7861_v50, %v7046_v38  ;;  %5430 = vmatpush.bf16.msrb.mxu3 %v8007_v5  ;;  %v2356_v18 = vsel %vm8454_vm8, %v2351_v1, %v9078_v23 }
 0x1a1   : > { %v1685_v9 = vsel %vm8454_vm8, %v1680_v29, %v1684_v36  ;;  %v1695_v12 = vsel %vm8454_vm8, %v1690_v56, %v1694_v60  ;;  %v493_v28 = vsel %vm8404_vm5, 0, %v492_v45  ;;  %v6692_v14 = vld [vmem:[#allocation2 + $0xa8] sm:$0xf]  ;;  %v6693_v17 = vld [vmem:[#allocation2 + $0xac] sm:$0xf]  ;;  %v2368_v32 = vshrl.u32 %v6716_v0, 16  ;;  %v687_v60 = vpop.f32.mrf.mxu3 }
 0x1a2   : > { %1824 = vst [vmem:[#allocation3 + $0x364] sm:$0xf] %v1685_v9  ;;  %v7080_v47 = vld [vmem:[#allocation3 + $0xe8] sm:$0xf]  ;;  %v2371_v24 = vshll.u32 %v6716_v0, 16  ;;  %v2377_v25 = vshll.u32 %v6717_v7, 16  ;;  %v7497_v56 = vor.u32 %v7980_v15, %v7496_v59  ;;  %v726_v9 = vmul.f32 %v8944_v49, %v687_v60 }
 0x1a3   : > { %1825 = vst [vmem:[#allocation3 + $0x388] sm:$0xf] %v1695_v12  ;;  %v2381_v30 = vshrl.u32 %v6717_v7, 16  ;;  %v2361_v38 = vrot.slane %v2360_v46, 4  ;;  %v6761_v50 = vld [vmem:[#allocation2 + $0x48] sm:$0xe]  ;;  %v7081_v7 = vor.u32 %v7874_v8, %v7080_v47 }
 0x1a4   : > { %494 = vst [vmem:[#allocation2 + $0xc8] sm:$0x1] %v493_v28  ;;  %v6763_v0 = vld [vmem:[#allocation2 + $0x50] sm:$0x1]  ;;  %v2370_v45 = vrot.slane %v2368_v32, 4  ;;  %v2373_v5 = vrot.slane %v2371_v24, 5  ;;  %v762_v15 = vadd.f32 %v8961_v4, %v726_v9 }
 0x1a5   : > { %v9105_v43 = vpop.f32.mrf.mxu0  ;;  %2169 = vst [vmem:[#allocation3 + $0x3b4] sm:$0xf] %v6692_v14  ;;  %v2365_v12 = vrot.slane %v2363_v48, 5  ;;  %v2806_v28 = vrot.slane %v2804_v53, 4  ;;  %v6799_v23 = vrot.slane %v6761_v50, 9  ;;  %v2379_v46 = vrot.slane %v2377_v25, 5 }
 0x1a6   : > { %10502 = vst [vmem:[#allocation16_spill] sm:$0xff] %v9105_v43  ;;  %5714 = vmatmul.bf16.gmra.mxu2 %v7049_v61  ;;  %v9110_v29 = vpop.f32.mrf.mxu1  ;;  %v5379_v36 = vpop.f32.mrf.mxu2  ;;  %v2374_v1 = vor.u32 %v2373_v5, %v2370_v45  ;;  %v2383_v61 = vrot.slane %v2381_v30, 4  ;;  %v7398_v59 = vld [vmem:[#allocation3 + $0x38c] sm:$0xf0]  ;;  %v1372_v8 = vld [vmem:[#allocation2 + $0x9c] sm:$0xf] }
 0x1a7   : > { %2170 = vst [vmem:[#allocation3 + $0x3d8] sm:$0xf] %v6693_v17  ;;  %v9114_v34 = vadd.f32 %v5379_v36, %v9063_v27  ;;  %v1373_v14 = vld [vmem:[#allocation2 + $0xa0] sm:$0xf]  ;;  %v2366_v48 = vsel %vm8454_vm8, %v2361_v38, %v2365_v12  ;;  %v2807_v17 = vrot.slane %v6763_v0, 5  ;;  %v1697_v47 = vshrl.u32 %v1372_v8, 16 }
 0x1a8   : > { %2649 = vst [vmem:[#allocation3 + $0x178] sm:$0xf] %v2356_v18  ;;  %v1700_v32 = vshll.u32 %v1372_v8, 16  ;;  %v1706_v24 = vshll.u32 %v1373_v14, 16  ;;  %v1710_v18 = vshrl.u32 %v1373_v14, 16  ;;  %v794_v30 = vmax.f32 %v762_v15, 0.0 }
 0x1a9   : > { %5630 = vmatmul.bf16.gmra.mxu1 %v7081_v7  ;;  %v6718_v25 = vld [vmem:[#allocation2 + $0x5c] sm:$0x1]  ;;  %v1374_v50 = vld [vmem:[#allocation2 + $0xa4] sm:$0x1]  ;;  %v8006_v27 = vld [vmem:[%s10468_s4 + $0xa8] sm:$0xff]  ;;  %v2805_v36 = vsel %vm8740_vm15, %v6799_v23, %v2804_v53  ;;  %v2375_v60 = vrot.slane %v2374_v1, 4  ;;  %v2384_v5 = vor.u32 %v2383_v61, %v2379_v46 }
 0x1aa   : > { %5334 = vmatmul.bf16.gmra.mxu3 %v7497_v56  ;;  %v2808_v56 = vsel %vm8740_vm15, %v2806_v28, %v2807_v17  ;;  %v1699_v38 = vrot.slane %v1697_v47, 4  ;;  %v1702_v0 = vrot.slane %v1700_v32, 5  ;;  %v1708_v45 = vrot.slane %v1706_v24, 5  ;;  %v9126_v7 = vld [vmem:[#allocation2 + $0x58] sm:$0xf]  ;;  %v689_v17 = vpop.f32.mrf.mxu3 }
 0x1ab   : > { %v7950_v15 = vld [vmem:[#allocation3 + $0x36c] sm:$0xf]  ;;  %v826_v8 = vpack.c.bf16 %v794_v30, %v794_v30  ;;  %v1712_v14 = vrot.slane %v1710_v18, 4  ;;  %5431 = vmatpush.bf16.msrb.mxu3 %v8006_v27  ;;  %2650 = vst [vmem:[#allocation3 + $0x19c] sm:$0xf] %v2366_v48  ;;  %v2380_v53 = vsel %vm8454_vm8, %v2375_v60, %v2379_v46  ;;  %v1716_v47 = vshll.u32 %v1374_v50, 16 }
 0x1ac   : > { %v7401_v23 = vor.u32 %v7950_v15, %v7398_v59  ;;  %v7082_v1 = vld [vmem:[#allocation3 + $0x10c] sm:$0xf0]  ;;  %v1703_v61 = vor.u32 %v1702_v0, %v1699_v38  ;;  %2921 = vst [vmem:[#allocation3 + $0x17c] sm:$0xf] %v2805_v36  ;;  %v2387_v32 = vshll.u32 %v6718_v25, 16  ;;  %v727_v30 = vmul.f32 %v8944_v49, %v689_v17  ;;  %v8005_v49 = vld [vmem:[%s10468_s4 + $0xa0] sm:$0xff] }
 0x1ad   : > { %v9129_v12 = vpop.f32.mrf.mxu0  ;;  %v6764_v24 = vld [vmem:[#allocation2 + $0x54] sm:$0xe]  ;;  %v1086_v9 = vshrl.u32 %v826_v8, 16  ;;  %2922 = vst [vmem:[#allocation3 + $0x1a0] sm:$0xf] %v2808_v56  ;;  %v2811_v48 = vrot.slane %v9126_v7, 5  ;;  %v1713_v59 = vor.u32 %v1712_v14, %v1708_v45 }
 0x1ae   : > { %10503 = vst [vmem:[#allocation17_spill] sm:$0xff] %v9129_v12  ;;  %v9133_v28 = vpop.f32.mrf.mxu1  ;;  %v1089_v12 = vshll.u32 %v826_v8, 16  ;;  %v5381_v18 = vpop.f32.mrf.mxu2  ;;  %v7870_v46 = vld [vmem:[#allocation3 + $0xec] sm:$0xf]  ;;  %v1258_v27 = vld [vmem:[#allocation2 + $0xc0] sm:$0xf]  ;;  %v763_v36 = vadd.f32 %v8961_v4, %v727_v30 }
 0x1af   : > { %v1704_v60 = vrot.slane %v1703_v61, 4  ;;  %v2385_v15 = vrot.slane %v2384_v5, 4  ;;  %2651 = vst [vmem:[#allocation3 + $0x1c0] sm:$0xf] %v2380_v53  ;;  %v6719_v38 = vld [vmem:[#allocation2 + $0x60] sm:$0xf]  ;;  %v9138_v50 = vadd.f32 %v5381_v18, %v9080_v58  ;;  %v7085_v58 = vor.u32 %v7870_v46, %v7082_v1  ;;  %5432 = vmatpush.bf16.msrb.mxu3 %v8005_v49 }
 0x1b0   : > { %5586 = vmatmul.bf16.gmra.mxu0 %v7401_v23  ;;  %v9140_v25 = vrot.slane %v1086_v9, 7  ;;  %v6694_v56 = vld [vmem:[#allocation2 + $0xb4] sm:$0xf]  ;;  %v6695_v0 = vld [vmem:[#allocation2 + $0xb8] sm:$0xf]  ;;  %v1714_v5 = vrot.slane %v1713_v59, 4 }
 0x1b1   : > { %v7883_v7 = vld [vmem:[#allocation3 + $0x150] sm:$0xf0]  ;;  %v1709_v8 = vsel %vm8454_vm8, %v1704_v60, %v1708_v45  ;;  %v1718_v14 = vrot.slane %v1716_v47, 5  ;;  %2171 = vst [vmem:[#allocation3 + $0x3fc] sm:$0xf] %v6694_v56  ;;  %v2389_v53 = vrot.slane %v2387_v32, 5 }
 0x1b2   : > { %v1091_v9 = vor.u32 %v1089_v12, %v9140_v25  ;;  %v795_v23 = vmax.f32 %v763_v36, 0.0  ;;  %1826 = vst [vmem:[#allocation3 + $0x3ac] sm:$0xf] %v1709_v8  ;;  %v6766_v4 = vld [vmem:[#allocation2 + $0x5c] sm:$0x1]  ;;  %v6800_v17 = vrot.slane %v6764_v24, 9 }
 0x1b3   : > { %v7390_v61 = vld [vmem:[#allocation3 + $0x384] sm:$0xf0]  ;;  %v7116_v30 = vld [vmem:[#allocation3 + $0x130] sm:$0xf]  ;;  %v1719_v18 = vsel %vm8454_vm8, %v1714_v5, %v1718_v14  ;;  %2172 = vst [vmem:[#allocation3 + $0x420] sm:$0xf] %v6695_v0  ;;  %v2390_v45 = vsel %vm8454_vm8, %v2385_v15, %v2389_v53 }
 0x1b4   : > { %v2392_v47 = vshrl.u32 %v6719_v38, 16  ;;  %v2395_v60 = vshll.u32 %v6719_v38, 16  ;;  %v1259_v1 = vsel %vm8496_vm10, %v1091_v9, %v1258_v27  ;;  %v7949_v12 = vld [vmem:[#allocation3 + $0x364] sm:$0xf]  ;;  %v827_v32 = vpack.c.bf16 %v795_v23, %v795_v23  ;;  %v9155_v46 = vld [vmem:[#allocation3 + $0x3b4] sm:$0xf] }
 0x1b5   : > { %1827 = vst [vmem:[#allocation3 + $0x3d0] sm:$0xf] %v1719_v18  ;;  %v2812_v24 = vsel %vm8740_vm15, %v6800_v17, %v2811_v48  ;;  %v7434_v36 = vld [vmem:[#allocation3 + $0x3d4] sm:$0xf0]  ;;  %v8048_v15 = vld [vmem:[%s10468_s4 + $0x1f8] sm:$0xff]  ;;  %v2813_v38 = vrot.slane %v2811_v48, 4  ;;  %v7393_v44 = vor.u32 %v7949_v12, %v7390_v61  ;;  %v7117_v27 = vor.u32 %v7883_v7, %v7116_v30  ;;  %v9170_v53 = vpop.f32.mrf.mxu0 }
 0x1b6   : > { %5719 = vmatmul.bf16.gmra.mxu2 %v7085_v58  ;;  %v9159_v59 = vpop.f32.mrf.mxu1  ;;  %1260 = vst [vmem:[#allocation2 + $0xc0] sm:$0xf] %v1259_v1  ;;  %v1094_v49 = vshrl.u32 %v827_v32, 16  ;;  %v1097_v56 = vshll.u32 %v827_v32, 16  ;;  %v9164_v0 = vld [vmem:[#allocation2 + $0x64] sm:$0xf]  ;;  %v5384_v14 = vpop.f32.mrf.mxu2  ;;  %5874 = vmatpush.bf16.msra.mxu0 %v8048_v15 }
 0x1b7   : > { %2652 = vst [vmem:[#allocation3 + $0x1e4] sm:$0xf] %v2390_v45  ;;  %v10504_v8 = vshll.u32 %v9088_v40, 16  ;;  %v1262_v58 = vld [vmem:[#allocation2 + $0xc8] sm:$0x1]  ;;  %v2814_v9 = vrot.slane %v6766_v4, 5  ;;  %v9177_v61 = vadd.f32 %v5384_v14, %v9110_v29 }
 0x1b8   : > { %10505 = vst [vmem:[#allocation18_spill] sm:$0xff] %v9170_v53  ;;  %v2394_v23 = vrot.slane %v2392_v47, 4  ;;  %v2397_v48 = vrot.slane %v2395_v60, 5  ;;  %v10506_v7 = vshrl.u32 %v9088_v40, 16  ;;  %v1092_v30 = vrot.slane %v9140_v25, 4  ;;  %v8047_v45 = vld [vmem:[%s10468_s4 + $0x1f0] sm:$0xff] }
 0x1b9   : > { %v9168_v5 = vrot.slane %v10504_v8, 5  ;;  %2923 = vst [vmem:[#allocation3 + $0x1c4] sm:$0xf] %v2812_v24  ;;  %5635 = vmatmul.bf16.gmra.mxu1 %v7117_v27  ;;  %v1096_v18 = vrot.slane %v1094_v49, 7  ;;  %v1375_v4 = vld [vmem:[#allocation2 + $0xa8] sm:$0xf]  ;;  %v7437_v47 = vor.u32 %v9155_v46, %v7434_v36  ;;  %v2815_v40 = vsel %vm8740_vm15, %v2813_v38, %v2814_v9 }
 0x1ba   : > { %v9174_v17 = vrot.slane %v10506_v7, 4  ;;  %5408 = vmatmul.bf16.vlgmr.msra.gmra.mxu3 %v7393_v44  ;;  %v1376_v60 = vld [vmem:[#allocation2 + $0xac] sm:$0xf]  ;;  %v1377_v1 = vld [vmem:[#allocation2 + $0xb0] sm:$0x1]  ;;  %v2401_v29 = vshll.u32 %v9164_v0, 16  ;;  %v3066_v25 = vor.u32 %v9084_v11, %v9082_v37  ;;  %5875 = vmatpush.bf16.msra.mxu0 %v8047_v45  ;;  %v2398_v8 = vor.u32 %v2397_v48, %v2394_v23 }
 0x1bb   : > { %v9189_v12 = vld [vmem:[#allocation2 + $0x20] sm:$0x1]  ;;  %v1099_v32 = vor.u32 %v1097_v56, %v1096_v18  ;;  %v1101_v24 = vrot.slane %v1096_v18, 4  ;;  %v1721_v15 = vshrl.u32 %v1375_v4, 16  ;;  %v1724_v44 = vshll.u32 %v1375_v4, 16  ;;  %v8004_v46 = vld [vmem:[%s10468_s4 + $0x98] sm:$0xff] }
 0x1bc   : > { %v1730_v36 = vshll.u32 %v1376_v60, 16  ;;  %v1734_v27 = vshrl.u32 %v1376_v60, 16  ;;  %v1740_v49 = vshll.u32 %v1377_v1, 16  ;;  %v6721_v38 = vld [vmem:[#allocation2 + $0x68] sm:$0x1]  ;;  %5433 = vmatpush.bf16.msrb.mxu3 %v8004_v46  ;;  %v2405_v9 = vshrl.u32 %v9164_v0, 16 }
 0x1bd   : > { %v1100_v14 = vsel %vm8510_vm12, %v1092_v30, %v1099_v32  ;;  %v1263_v37 = vsel %vm8371_vm3, %v1101_v24, %v1262_v58  ;;  %v1723_v11 = vrot.slane %v1721_v15, 4  ;;  %v8046_v56 = vld [vmem:[%s10468_s4 + $0x1e8] sm:$0xff]  ;;  %2924 = vst [vmem:[#allocation3 + $0x1e8] sm:$0xf] %v2815_v40  ;;  %v1726_v18 = vrot.slane %v1724_v44, 5 }
 0x1be   : > { %v9202_v7 = vpop.f32.mrf.mxu1  ;;  %1261 = vst [vmem:[#allocation2 + $0xc4] sm:$0xf] %v1100_v14  ;;  %v1732_v23 = vrot.slane %v1730_v36, 5  ;;  %v1736_v48 = vrot.slane %v1734_v27, 4  ;;  %v2403_v62 = vrot.slane %v2401_v29, 5  ;;  %v3076_v30 = vor.u32 %v9174_v17, %v9168_v5  ;;  %v5386_v4 = vpop.f32.mrf.mxu2  ;;  %5876 = vmatpush.bf16.msra.mxu0 %v8046_v56  ;;  %v8045_v17 = vld [vmem:[%s10468_s4 + $0x1e0] sm:$0xff] }
 0x1bf   : > { %v3079_v58 = vshll.u32 %v9189_v12, 16  ;;  %1264 = vst [vmem:[#allocation2 + $0xc8] sm:$0x1] %v1263_v37  ;;  %v3067_v45 = vrot.slane %v3066_v25, 4  ;;  %v7118_v60 = vld [vmem:[#allocation3 + $0x154] sm:$0xf0]  ;;  %v1727_v1 = vor.u32 %v1726_v18, %v1723_v11  ;;  %v9210_v15 = vadd.f32 %v5386_v4, %v9133_v28 }
 0x1c0   : > { %5591 = vmatmul.bf16.gmra.mxu0 %v7437_v47  ;;  %v1737_v40 = vor.u32 %v1736_v48, %v1732_v23  ;;  %v1742_v0 = vrot.slane %v1740_v49, 5  ;;  %v2399_v32 = vrot.slane %v2398_v8, 4  ;;  %v9207_v24 = vld [vmem:[#allocation2 + $0x64] sm:$0xf]  ;;  %v7879_v29 = vld [vmem:[#allocation3 + $0x134] sm:$0xf]  ;;  %v9221_v49 = vpop.f32.mrf.mxu0 }
 0x1c1   : > { %v7426_v44 = vld [vmem:[#allocation3 + $0x3cc] sm:$0xf0]  ;;  %v7892_v46 = vld [vmem:[#allocation3 + $0x198] sm:$0xf0]  ;;  %v6696_v25 = vld [vmem:[#allocation2 + $0xc0] sm:$0xf]  ;;  %v3072_v28 = vsel %vm8454_vm8, %v3067_v45, %v9168_v5  ;;  %v7121_v5 = vor.u32 %v7879_v29, %v7118_v60 }
 0x1c2   : > { %v8003_v47 = vld [vmem:[%s10468_s4 + $0x90] sm:$0xff]  ;;  %v2407_v36 = vrot.slane %v2405_v9, 4  ;;  %v2411_v27 = vshll.u32 %v6721_v38, 16  ;;  %10507 = vst [vmem:[#allocation19_spill] sm:$0xff] %v9221_v49  ;;  %v1728_v8 = vrot.slane %v1727_v1, 4  ;;  %v1738_v14 = vrot.slane %v1737_v40, 4  ;;  %5877 = vmatpush.bf16.msra.mxu0 %v8045_v17 }
 0x1c3   : > { %2173 = vst [vmem:[#allocation3 + $0x444] sm:$0xf] %v6696_v25  ;;  %v2404_v37 = vsel %vm8454_vm8, %v2399_v32, %v2403_v62  ;;  %v6767_v11 = vld [vmem:[#allocation2 + $0x60] sm:$0xe]  ;;  %v9225_v56 = vrot.slane %v3076_v30, 4  ;;  %5434 = vmatpush.bf16.msrb.mxu3 %v8003_v47  ;;  %v2818_v38 = vrot.slane %v9207_v24, 5 }
 0x1c4   : > { %v7958_v18 = vld [vmem:[#allocation3 + $0x3ac] sm:$0xf]  ;;  %v7152_v48 = vld [vmem:[#allocation3 + $0x178] sm:$0xf]  ;;  %v2408_v9 = vor.u32 %v2407_v36, %v2403_v62  ;;  %2653 = vst [vmem:[#allocation3 + $0x208] sm:$0xf] %v2404_v37  ;;  %v1733_v45 = vsel %vm8454_vm8, %v1728_v8, %v1732_v23  ;;  %v1743_v1 = vsel %vm8454_vm8, %v1738_v14, %v1742_v0 }
 0x1c5   : > { %v6845_v4 = vld [vmem:[#allocation2 + $0x24] sm:$0xf]  ;;  %v6769_v40 = vld [vmem:[#allocation2 + $0x68] sm:$0x1]  ;;  %3475 = vst [vmem:[#allocation3 + $0x1c] sm:$0xf] %v3072_v28  ;;  %v7429_v24 = vor.u32 %v7958_v18, %v7426_v44  ;;  %v7153_v60 = vor.u32 %v7892_v46, %v7152_v48 }
 0x1c6   : > { %v9232_v32 = vld [vmem:[#allocation2 + $0x28] sm:$0xf]  ;;  %1828 = vst [vmem:[#allocation3 + $0x3f4] sm:$0xf] %v1733_v45  ;;  %v6697_v30 = vld [vmem:[#allocation2 + $0xc4] sm:$0xf]  ;;  %5724 = vmatmul.bf16.gmra.mxu2 %v7121_v5  ;;  %v9234_v25 = vpop.f32.mrf.mxu1 }
 0x1c7   : > { %v2409_v47 = vrot.slane %v2408_v9, 4  ;;  %v2413_v62 = vrot.slane %v2411_v27, 5  ;;  %1829 = vst [vmem:[#allocation3 + $0x418] sm:$0xf] %v1743_v1  ;;  %v8044_v23 = vld [vmem:[%s10468_s4 + $0x1d8] sm:$0xff]  ;;  %v2820_v0 = vrot.slane %v2818_v38, 4  ;;  %v5389_v27 = vpop.f32.mrf.mxu2 }
 0x1c8   : > { %v3084_v29 = vshrl.u32 %v6845_v4, 16  ;;  %2174 = vst [vmem:[#allocation3 + $0x468] sm:$0xf] %v6697_v30  ;;  %v6801_v17 = vrot.slane %v6767_v11, 9  ;;  %v2821_v28 = vrot.slane %v6769_v40, 5  ;;  %v3087_v8 = vshll.u32 %v6845_v4, 16  ;;  %5878 = vmatpush.bf16.msra.mxu0 %v8044_v23  ;;  %v9258_v23 = vpop.f32.mrf.mxu0 }
 0x1c9   : > { %v2414_v36 = vsel %vm8454_vm8, %v2409_v47, %v2413_v62  ;;  %v6847_v14 = vld [vmem:[#allocation2 + $0x2c] sm:$0x1]  ;;  %v3093_v44 = vshll.u32 %v9232_v32, 16  ;;  %v9243_v46 = vadd.f32 %v5389_v27, %v9159_v59  ;;  %5640 = vmatmul.bf16.gmra.mxu1 %v7153_v60  ;;  %v7968_v18 = vld [vmem:[#allocation3 + $0x3fc] sm:$0xf]  ;;  %v3081_v4 = vrot.slane %v3079_v58, 5 }
 0x1ca   : > { %2654 = vst [vmem:[#allocation3 + $0x22c] sm:$0xf] %v2414_v36  ;;  %v3086_v37 = vrot.slane %v3084_v29, 4  ;;  %5413 = vmatmul.bf16.gmra.mxu3 %v7429_v24  ;;  %v7470_v48 = vld [vmem:[#allocation3 + $0x41c] sm:$0xf0]  ;;  %v8043_v9 = vld [vmem:[%s10468_s4 + $0x1d0] sm:$0xff]  ;;  %v2819_v47 = vsel %vm8740_vm15, %v6801_v17, %v2818_v38  ;;  %v2822_v62 = vsel %vm8740_vm15, %v2820_v0, %v2821_v28 }
 0x1cb   : > { %v1378_v11 = vld [vmem:[#allocation2 + $0xb4] sm:$0xf]  ;;  %v3089_v5 = vrot.slane %v3087_v8, 5  ;;  %v3097_v45 = vshrl.u32 %v9232_v32, 16  ;;  %v1379_v1 = vld [vmem:[#allocation2 + $0xb8] sm:$0xf]  ;;  %v3082_v0 = vsel %vm8454_vm8, %v9225_v56, %v3081_v4 }
 0x1cc   : > { %v1380_v40 = vld [vmem:[#allocation2 + $0xbc] sm:$0x1]  ;;  %v1745_v59 = vshrl.u32 %v1378_v11, 16  ;;  %v1748_v30 = vshll.u32 %v1378_v11, 16  ;;  %v1754_v24 = vshll.u32 %v1379_v1, 16  ;;  %v1758_v60 = vshrl.u32 %v1379_v1, 16  ;;  %5879 = vmatpush.bf16.msra.mxu0 %v8043_v9 }
 0x1cd   : > { %v1764_v29 = vshll.u32 %v1380_v40, 16  ;;  %v8002_v12 = vld [vmem:[%s10468_s4 + $0x88] sm:$0xff]  ;;  %v3090_v58 = vor.u32 %v3089_v5, %v3086_v37  ;;  %10508 = vst [vmem:[#allocation20_spill] sm:$0xff] %v9258_v23  ;;  %v3095_v27 = vrot.slane %v3093_v44, 5  ;;  %v3103_v11 = vshll.u32 %v6847_v14, 16 }
 0x1ce   : > { %v1835_v32 = vld [vmem:[#allocation2 + $0xc] sm:$0xe]  ;;  %v1747_v36 = vrot.slane %v1745_v59, 4  ;;  %v1750_v8 = vrot.slane %v1748_v30, 5  ;;  %v1756_v20 = vrot.slane %v1754_v24, 5  ;;  %v1760_v38 = vrot.slane %v1758_v60, 4  ;;  %5435 = vmatpush.bf16.msrb.mxu3 %v8002_v12  ;;  %v9263_v28 = vpop.f32.mrf.mxu1 }
 0x1cf   : > { %v3091_v17 = vrot.slane %v3090_v58, 4  ;;  %v7473_v1 = vor.u32 %v7968_v18, %v7470_v48  ;;  %v8042_v5 = vld [vmem:[%s10468_s4 + $0x1c8] sm:$0xff]  ;;  %2925 = vst [vmem:[#allocation3 + $0x20c] sm:$0xf] %v2819_v47  ;;  %v6651_v44 = vrot.slane %v1835_v32, 9  ;;  %v1766_v59 = vrot.slane %v1764_v29, 5  ;;  %v5391_v4 = vpop.f32.mrf.mxu2 }
 0x1d0   : > { %v1751_v37 = vor.u32 %v1750_v8, %v1747_v36  ;;  %v7154_v14 = vld [vmem:[#allocation3 + $0x19c] sm:$0xf0]  ;;  %v1761_v40 = vor.u32 %v1760_v38, %v1756_v20  ;;  %2926 = vst [vmem:[#allocation3 + $0x230] sm:$0xf] %v2822_v62  ;;  %v3099_v56 = vrot.slane %v3097_v45, 4  ;;  %v3105_v18 = vrot.slane %v3103_v11, 5  ;;  %5880 = vmatpush.bf16.msra.mxu0 %v8042_v5 }
 0x1d1   : > { %v3096_v30 = vsel %vm8454_vm8, %v3091_v17, %v3095_v27  ;;  %5596 = vmatmul.bf16.gmra.mxu0 %v7473_v1  ;;  %3476 = vst [vmem:[#allocation3 + $0x40] sm:$0xf] %v3082_v0  ;;  %v1836_v48 = vld [vmem:[#allocation2 + $0x10] sm:$0xf]  ;;  %v9271_v9 = vadd.f32 %v5391_v4, %v9202_v7  ;;  %v7888_v60 = vld [vmem:[#allocation3 + $0x17c] sm:$0xf]  ;;  %v9287_v4 = vpop.f32.mrf.mxu0 }
 0x1d2   : > { %v1752_v24 = vrot.slane %v1751_v37, 4  ;;  %v1762_v47 = vrot.slane %v1761_v40, 4  ;;  %v8041_v29 = vld [vmem:[%s10468_s4 + $0x1c0] sm:$0xff]  ;;  %v3100_v45 = vor.u32 %v3099_v56, %v3095_v27  ;;  %3477 = vst [vmem:[#allocation3 + $0x64] sm:$0xf] %v3096_v30  ;;  %v1940_v12 = vrot.slane %v1836_v48, 5 }
 0x1d3   : > { %v8001_v62 = vld [vmem:[%s10468_s4 + $0x80] sm:$0xff]  ;;  %v7967_v58 = vld [vmem:[#allocation3 + $0x3f4] sm:$0xf]  ;;  %v7462_v32 = vld [vmem:[#allocation3 + $0x414] sm:$0xf0]  ;;  %v7157_v40 = vor.u32 %v7888_v60, %v7154_v14  ;;  %10509 = vst [vmem:[#allocation21_spill] sm:$0xff] %v9287_v4 }
 0x1d4   : > { %v7901_v36 = vld [vmem:[#allocation3 + $0x1e0] sm:$0xf0]  ;;  %v1757_v7 = vsel %vm8454_vm8, %v1752_v24, %v1756_v20  ;;  %v1837_v8 = vld [vmem:[#allocation2 + $0x14] sm:$0x1]  ;;  %v1838_v11 = vld [vmem:[#allocation2 + $0x18] sm:$0xe]  ;;  %v1767_v0 = vsel %vm8454_vm8, %v1762_v47, %v1766_v59  ;;  %5436 = vmatpush.bf16.msrb.mxu3 %v8001_v62  ;;  %v1941_v27 = vsel %vm8740_vm15, %v6651_v44, %v1940_v12  ;;  %5881 = vmatpush.bf16.msra.mxu0 %v8041_v29 }
 0x1d5   : > { %v1839_v38 = vld [vmem:[#allocation2 + $0x1c] sm:$0xf]  ;;  %1830 = vst [vmem:[#allocation3 + $0x43c] sm:$0xf] %v1757_v7  ;;  %v3101_v17 = vrot.slane %v3100_v45, 4  ;;  %v1942_v1 = vrot.slane %v1940_v12, 4  ;;  %v7465_v47 = vor.u32 %v7967_v58, %v7462_v32 }
 0x1d6   : > { %v1840_v37 = vld [vmem:[#allocation2 + $0x20] sm:$0x1]  ;;  %1831 = vst [vmem:[#allocation3 + $0x460] sm:$0xf] %v1767_v0  ;;  %v1943_v30 = vrot.slane %v1837_v8, 5  ;;  %v6652_v56 = vrot.slane %v1838_v11, 9  ;;  %5729 = vmatmul.bf16.gmra.mxu2 %v7157_v40  ;;  %v9289_v59 = vpop.f32.mrf.mxu1 }
 0x1d7   : > { %v1947_v20 = vrot.slane %v1839_v38, 5  ;;  %v3106_v5 = vsel %vm8454_vm8, %v3101_v17, %v3105_v18  ;;  %2077 = vst [vmem:[#allocation3 + $0x50] sm:$0xf] %v1941_v27  ;;  %v7188_v24 = vld [vmem:[#allocation3 + $0x1c0] sm:$0xf]  ;;  %v1950_v60 = vrot.slane %v1840_v37, 5  ;;  %v5394_v18 = vpop.f32.mrf.mxu2 }
 0x1d8   : > { %3478 = vst [vmem:[#allocation3 + $0x88] sm:$0xf] %v3106_v5  ;;  %v1944_v44 = vsel %vm8740_vm15, %v1942_v1, %v1943_v30  ;;  %v7189_v62 = vor.u32 %v7901_v36, %v7188_v24  ;;  %v9298_v12 = vadd.f32 %v5394_v18, %v9234_v25  ;;  %v7977_v29 = vld [vmem:[#allocation3 + $0x444] sm:$0xf]  ;;  %v7506_v7 = vld [vmem:[#allocation3 + $0x464] sm:$0xf0] }
 0x1d9   : > { %v1948_v14 = vsel %vm8740_vm15, %v6652_v56, %v1947_v20  ;;  %v1949_v48 = vrot.slane %v1947_v20, 4  ;;  %2078 = vst [vmem:[#allocation3 + $0x74] sm:$0xf] %v1944_v44  ;;  %v1832_v8 = vld [vmem:[#allocation2] sm:$0xe]  ;;  %v7509_v17 = vor.u32 %v7977_v29, %v7506_v7  ;;  %v8040_v25 = vld [vmem:[%s10468_s4 + $0x1b8] sm:$0xff]  ;;  %v9311_v29 = vpop.f32.mrf.mxu0 }
 0x1da   : > { %2079 = vst [vmem:[#allocation3 + $0x98] sm:$0xf] %v1948_v14  ;;  %5418 = vmatmul.bf16.gmra.mxu3 %v7465_v47  ;;  %5645 = vmatmul.bf16.gmra.mxu1 %v7189_v62  ;;  %v1833_v11 = vld [vmem:[#allocation2 + $0x4] sm:$0xf]  ;;  %v1834_v38 = vld [vmem:[#allocation2 + $0x8] sm:$0x1] }
 0x1db   : > { %v1951_v45 = vsel %vm8740_vm15, %v1949_v48, %v1950_v60  ;;  %v6650_v0 = vrot.slane %v1832_v8, 9  ;;  %v1933_v58 = vrot.slane %v1833_v11, 5  ;;  %v1841_v32 = vld [vmem:[#allocation2 + $0x24] sm:$0xe]  ;;  %v1842_v36 = vld [vmem:[#allocation2 + $0x28] sm:$0xf]  ;;  %5785 = vmatpush.bf16.msra.mxu3 %v8040_v25 }
 0x1dc   : > { %2080 = vst [vmem:[#allocation3 + $0xbc] sm:$0xf] %v1951_v45  ;;  %v1936_v27 = vrot.slane %v1834_v38, 5  ;;  %v6722_v1 = vld [vmem:[#allocation2 + $0x6c] sm:$0xf]  ;;  %v1954_v60 = vrot.slane %v1842_v36, 5 }
 0x1dd   : > { %v6723_v37 = vld [vmem:[#allocation2 + $0x70] sm:$0xf]  ;;  %v9303_v40 = vld [vmem:[#allocation2 + $0x2c] sm:$0x1]  ;;  %v1934_v30 = vsel %vm8740_vm15, %v6650_v0, %v1933_v58  ;;  %v1935_v56 = vrot.slane %v1933_v58, 4  ;;  %v2416_v5 = vshrl.u32 %v6722_v1, 16 }
 0x1de   : > { %v6724_v20 = vld [vmem:[#allocation2 + $0x74] sm:$0x1]  ;;  %v2419_v24 = vshll.u32 %v6722_v1, 16  ;;  %v9307_v44 = vpop.f32.mrf.mxu1  ;;  %2075 = vst [vmem:[#allocation3 + $0x8] sm:$0xf] %v1934_v30  ;;  %v2425_v14 = vshll.u32 %v6723_v37, 16 }
 0x1df   : > { %v2429_v48 = vshrl.u32 %v6723_v37, 16  ;;  %v7190_v47 = vld [vmem:[#allocation3 + $0x1e4] sm:$0xf0]  ;;  %v1937_v62 = vsel %vm8740_vm15, %v1935_v56, %v1936_v27  ;;  %v2418_v18 = vrot.slane %v2416_v5, 4  ;;  %10510 = vst [vmem:[#allocation22_spill] sm:$0xff] %v9311_v29  ;;  %v5396_v7 = vpop.f32.mrf.mxu2  ;;  %v2435_v38 = vshll.u32 %v6724_v20, 16 }
 0x1e0   : > { %v2421_v45 = vrot.slane %v2419_v24, 5  ;;  %2076 = vst [vmem:[#allocation3 + $0x2c] sm:$0xf] %v1937_v62  ;;  %v2427_v8 = vrot.slane %v2425_v14, 5  ;;  %v6653_v0 = vrot.slane %v1841_v32, 9  ;;  %v9314_v58 = vadd.f32 %v5396_v7, %v9263_v28 }
 0x1e1   : > { %5601 = vmatmul.bf16.gmra.mxu0 %v7509_v17  ;;  %v2431_v11 = vrot.slane %v2429_v48, 4  ;;  %v7897_v1 = vld [vmem:[#allocation3 + $0x1c4] sm:$0xf]  ;;  %v6848_v37 = vld [vmem:[#allocation2 + $0x30] sm:$0xf]  ;;  %v1957_v25 = vrot.slane %v9303_v40, 5 }
 0x1e2   : > { %v2422_v36 = vor.u32 %v2421_v45, %v2418_v18  ;;  %v7193_v27 = vor.u32 %v7897_v1, %v7190_v47  ;;  %v7976_v30 = vld [vmem:[#allocation3 + $0x43c] sm:$0xf]  ;;  %v7910_v56 = vld [vmem:[#allocation3 + $0x228] sm:$0xf0]  ;;  %v6770_v24 = vld [vmem:[#allocation2 + $0x6c] sm:$0xe]  ;;  %v1955_v14 = vsel %vm8740_vm15, %v6653_v0, %v1954_v60 }
 0x1e3   : > { %v2432_v5 = vor.u32 %v2431_v11, %v2427_v8  ;;  %v6771_v29 = vld [vmem:[#allocation2 + $0x70] sm:$0xf]  ;;  %v6772_v17 = vld [vmem:[#allocation2 + $0x74] sm:$0x1]  ;;  %v7498_v20 = vld [vmem:[#allocation3 + $0x45c] sm:$0xf0] }
 0x1e4   : > { %v2423_v32 = vrot.slane %v2422_v36, 4  ;;  %v6802_v48 = vrot.slane %v6770_v24, 9  ;;  %v2825_v28 = vrot.slane %v6771_v29, 5  ;;  %v1956_v62 = vrot.slane %v1954_v60, 4  ;;  %v7224_v7 = vld [vmem:[#allocation3 + $0x208] sm:$0xf] }
 0x1e5   : > { %v2433_v18 = vrot.slane %v2432_v5, 4  ;;  %v2437_v45 = vrot.slane %v2435_v38, 5  ;;  %v2828_v4 = vrot.slane %v6772_v17, 5  ;;  %v6849_v40 = vld [vmem:[#allocation2 + $0x34] sm:$0xf]  ;;  %v3108_v47 = vshrl.u32 %v6848_v37, 16 }
 0x1e6   : > { %v2428_v11 = vsel %vm8454_vm8, %v2423_v32, %v2427_v8  ;;  %v2826_v1 = vsel %vm8740_vm15, %v6802_v48, %v2825_v28  ;;  %v2827_v23 = vrot.slane %v2825_v28, 4  ;;  %v6850_v49 = vld [vmem:[#allocation2 + $0x38] sm:$0x1]  ;;  %v3111_v0 = vshll.u32 %v6848_v37, 16  ;;  %2081 = vst [vmem:[#allocation3 + $0xe0] sm:$0xf] %v1955_v14  ;;  %5734 = vmatmul.bf16.gmra.mxu2 %v7193_v27  ;;  %v9323_v36 = vpop.f32.mrf.mxu1 }
 0x1e7   : > { %v2438_v60 = vsel %vm8454_vm8, %v2433_v18, %v2437_v45  ;;  %2655 = vst [vmem:[#allocation3 + $0x250] sm:$0xf] %v2428_v11  ;;  %v8056_v29 = vld [vmem:[%s10468_s4 + $0x238] sm:$0xff]  ;;  %v3110_v38 = vrot.slane %v3108_v47, 4  ;;  %v3117_v8 = vshll.u32 %v6849_v40, 16  ;;  %v3121_v5 = vshrl.u32 %v6849_v40, 16  ;;  %v5399_v14 = vpop.f32.mrf.mxu2 }
 0x1e8   : > { %v7501_v24 = vor.u32 %v7976_v30, %v7498_v20  ;;  %v7225_v17 = vor.u32 %v7910_v56, %v7224_v7  ;;  %2656 = vst [vmem:[#allocation3 + $0x274] sm:$0xf] %v2438_v60  ;;  %v2829_v37 = vsel %vm8740_vm15, %v2827_v23, %v2828_v4  ;;  %v3113_v27 = vrot.slane %v3111_v0, 5  ;;  %5963 = vmatpush.bf16.msra.mxu1 %v8056_v29  ;;  %v6725_v30 = vld [vmem:[#allocation2 + $0x78] sm:$0xf]  ;;  %v9337_v23 = vpop.f32.mrf.mxu0 }
 0x1e9   : > { %2927 = vst [vmem:[#allocation3 + $0x254] sm:$0xf] %v2826_v1  ;;  %v3119_v32 = vrot.slane %v3117_v8, 5  ;;  %v3123_v48 = vrot.slane %v3121_v5, 4  ;;  %v3127_v28 = vshll.u32 %v6850_v49, 16  ;;  %v1958_v18 = vsel %vm8740_vm15, %v1956_v62, %v1957_v25 }
 0x1ea   : > { %v9335_v45 = vadd.f32 %v5399_v14, %v9289_v59  ;;  %5423 = vmatmul.bf16.gmra.mxu3 %v7501_v24  ;;  %5650 = vmatmul.bf16.gmra.mxu1 %v7225_v17  ;;  %2928 = vst [vmem:[#allocation3 + $0x278] sm:$0xf] %v2829_v37  ;;  %v6726_v56 = vld [vmem:[#allocation2 + $0x7c] sm:$0xf]  ;;  %v3114_v20 = vor.u32 %v3113_v27, %v3110_v38  ;;  %v6727_v4 = vld [vmem:[#allocation2 + $0x80] sm:$0x1] }
 0x1eb   : > { %10511 = vst [vmem:[#allocation23_spill] sm:$0xff] %v9337_v23  ;;  %v2440_v7 = vshrl.u32 %v6725_v30, 16  ;;  %v2443_v40 = vshll.u32 %v6725_v30, 16  ;;  %v2449_v47 = vshll.u32 %v6726_v56, 16  ;;  %v2453_v11 = vshrl.u32 %v6726_v56, 16 }
 0x1ec   : > { %v6982_v49 = vld [vmem:[#allocation3 + $0x3c] sm:$0xf0]  ;;  %v2459_v1 = vshll.u32 %v6727_v4, 16  ;;  %v3115_v0 = vrot.slane %v3114_v20, 4  ;;  %v3124_v25 = vor.u32 %v3123_v48, %v3119_v32  ;;  %2082 = vst [vmem:[#allocation3 + $0x104] sm:$0xf] %v1958_v18 }
 0x1ed   : > { %v2442_v59 = vrot.slane %v2440_v7, 4  ;;  %v2445_v62 = vrot.slane %v2443_v40, 5  ;;  %v2451_v60 = vrot.slane %v2449_v47, 5  ;;  %v2455_v29 = vrot.slane %v2453_v11, 4  ;;  %v6851_v8 = vld [vmem:[#allocation2 + $0x3c] sm:$0xf] }
 0x1ee   : > { %v7844_v5 = vld [vmem:[#allocation3 + $0x1c] sm:$0xf]  ;;  %v3120_v38 = vsel %vm8454_vm8, %v3115_v0, %v3119_v32  ;;  %v3125_v24 = vrot.slane %v3124_v25, 4  ;;  %v3129_v17 = vrot.slane %v3127_v28, 5  ;;  %v3132_v37 = vshrl.u32 %v6851_v8, 16  ;;  %v9341_v27 = vpop.f32.mrf.mxu1 }
 0x1ef   : > { %v6985_v14 = vor.u32 %v7844_v5, %v6982_v49  ;;  %v2446_v30 = vor.u32 %v2445_v62, %v2442_v59  ;;  %v2456_v56 = vor.u32 %v2455_v29, %v2451_v60  ;;  %3479 = vst [vmem:[#allocation3 + $0xac] sm:$0xf] %v3120_v38  ;;  %v7226_v48 = vld [vmem:[#allocation3 + $0x22c] sm:$0xf0]  ;;  %v3135_v20 = vshll.u32 %v6851_v8, 16  ;;  %v5401_v4 = vpop.f32.mrf.mxu2 }
 0x1f0   : > { %v3130_v18 = vsel %vm8454_vm8, %v3125_v24, %v3129_v17  ;;  %v6964_v7 = vld [vmem:[#allocation3 + $0x8] sm:$0xf]  ;;  %v7846_v40 = vld [vmem:[#allocation3 + $0x28] sm:$0xf0]  ;;  %v2461_v11 = vrot.slane %v2459_v1, 5  ;;  %v3134_v28 = vrot.slane %v3132_v37, 4  ;;  %v9346_v0 = vadd.f32 %v5401_v4, %v9307_v44  ;;  %v9352_v44 = vpop.f32.mrf.mxu0 }
 0x1f1   : > { %5882 = vmatmul.bf16.vlgmr.msra.gmra.mxu0 %v6985_v14  ;;  %v2447_v47 = vrot.slane %v2446_v30, 4  ;;  %v2457_v32 = vrot.slane %v2456_v56, 4  ;;  %3480 = vst [vmem:[#allocation3 + $0xd0] sm:$0xf] %v3130_v18  ;;  %v7906_v49 = vld [vmem:[#allocation3 + $0x20c] sm:$0xf] }
 0x1f2   : > { %v6773_v25 = vld [vmem:[#allocation2 + $0x78] sm:$0xe]  ;;  %v6774_v59 = vld [vmem:[#allocation2 + $0x7c] sm:$0xf]  ;;  %v6775_v62 = vld [vmem:[#allocation2 + $0x80] sm:$0x1]  ;;  %v7229_v30 = vor.u32 %v7906_v49, %v7226_v48 }
 0x1f3   : > { %v2452_v29 = vsel %vm8454_vm8, %v2447_v47, %v2451_v60  ;;  %v2462_v8 = vsel %vm8454_vm8, %v2457_v32, %v2461_v11  ;;  %v6803_v5 = vrot.slane %v6773_v25, 9  ;;  %v2832_v38 = vrot.slane %v6774_v59, 5  ;;  %v1844_v24 = vld [vmem:[#allocation2 + $0x30] sm:$0xe]  ;;  %v1845_v17 = vld [vmem:[#allocation2 + $0x34] sm:$0xf] }
 0x1f4   : > { %v7919_v1 = vld [vmem:[#allocation3 + $0x270] sm:$0xf0]  ;;  %2657 = vst [vmem:[#allocation3 + $0x298] sm:$0xf] %v2452_v29  ;;  %v2835_v37 = vrot.slane %v6775_v62, 5  ;;  %v3137_v14 = vrot.slane %v3135_v20, 5  ;;  %v6965_v47 = vor.u32 %v7846_v40, %v6964_v7 }
 0x1f5   : > { %10512 = vst [vmem:[#allocation24_spill] sm:$0xff] %v9352_v44  ;;  %v2833_v56 = vsel %vm8740_vm15, %v6803_v5, %v2832_v38  ;;  %v2834_v18 = vrot.slane %v2832_v38, 4  ;;  %v6852_v60 = vld [vmem:[#allocation2 + $0x40] sm:$0xf]  ;;  %v1961_v4 = vrot.slane %v1845_v17, 5  ;;  %v6654_v25 = vrot.slane %v1844_v24, 9 }
 0x1f6   : > { %2658 = vst [vmem:[#allocation3 + $0x2bc] sm:$0xf] %v2462_v8  ;;  %v6853_v32 = vld [vmem:[#allocation2 + $0x44] sm:$0x1]  ;;  %v3138_v11 = vor.u32 %v3137_v14, %v3134_v28  ;;  %5739 = vmatmul.bf16.gmra.mxu2 %v7229_v30  ;;  %v9356_v59 = vpop.f32.mrf.mxu1  ;;  %v7260_v62 = vld [vmem:[#allocation3 + $0x250] sm:$0xf] }
 0x1f7   : > { %2929 = vst [vmem:[#allocation3 + $0x29c] sm:$0xf] %v2833_v56  ;;  %v2836_v20 = vsel %vm8740_vm15, %v2834_v18, %v2835_v37  ;;  %v3141_v48 = vshll.u32 %v6852_v60, 16  ;;  %v3145_v49 = vshrl.u32 %v6852_v60, 16  ;;  %v7261_v29 = vor.u32 %v7919_v1, %v7260_v62  ;;  %v6728_v24 = vld [vmem:[#allocation2 + $0x84] sm:$0xf] }
 0x1f8   : > { %10513 = vst [vmem:[#allocation25_spill] sm:$0xff] %v9356_v59  ;;  %v1962_v8 = vsel %vm8740_vm15, %v6654_v25, %v1961_v4  ;;  %v3139_v5 = vrot.slane %v3138_v11, 4  ;;  %v3151_v38 = vshll.u32 %v6853_v32, 16  ;;  %v6729_v17 = vld [vmem:[#allocation2 + $0x88] sm:$0xf]  ;;  %v2464_v30 = vshrl.u32 %v6728_v24, 16  ;;  %v9372_v23 = vpop.f32.mrf.mxu0 }
 0x1f9   : > { %2930 = vst [vmem:[#allocation3 + $0x2c0] sm:$0xf] %v2836_v20  ;;  %v3143_v7 = vrot.slane %v3141_v48, 5  ;;  %v3147_v40 = vrot.slane %v3145_v49, 4  ;;  %v5404_v28 = vpop.f32.mrf.mxu2  ;;  %v6730_v14 = vld [vmem:[#allocation2 + $0x8c] sm:$0x1] }
 0x1fa   : > { %2083 = vst [vmem:[#allocation3 + $0x128] sm:$0xf] %v1962_v8  ;;  %5437 = vmatmul.bf16.vlgmr.msrb.gmra.mxu3 %v6965_v47  ;;  %5655 = vmatmul.bf16.gmra.mxu1 %v7261_v29  ;;  %v9363_v37 = vadd.f32 %v5404_v28, %v9323_v36  ;;  %v2467_v1 = vshll.u32 %v6728_v24, 16  ;;  %v2473_v56 = vshll.u32 %v6729_v17, 16  ;;  %v8039_v18 = vld [vmem:[%s10468_s4 + $0x1b0] sm:$0xff]  ;;  %v2477_v11 = vshrl.u32 %v6729_v17, 16 }
 0x1fb   : > { %v7018_v60 = vld [vmem:[#allocation3 + $0x84] sm:$0xf0]  ;;  %v3144_v32 = vsel %vm8454_vm8, %v3139_v5, %v3143_v7  ;;  %v3148_v47 = vor.u32 %v3147_v40, %v3143_v7  ;;  %v1846_v25 = vld [vmem:[#allocation2 + $0x38] sm:$0x1]  ;;  %v1963_v62 = vrot.slane %v1961_v4, 4  ;;  %v9370_v20 = vpop.f32.mrf.mxu3  ;;  %v2466_v36 = vrot.slane %v2464_v30, 4  ;;  %5786 = vmatpush.bf16.msra.mxu3 %v8039_v18 }
 0x1fc   : > { %v7853_v48 = vld [vmem:[#allocation3 + $0x64] sm:$0xf]  ;;  %v2469_v49 = vrot.slane %v2467_v1, 5  ;;  %v2475_v29 = vrot.slane %v2473_v56, 5  ;;  %v2483_v8 = vshll.u32 %v6730_v14, 16  ;;  %v2479_v28 = vrot.slane %v2477_v11, 4 }
 0x1fd   : > { %v3149_v24 = vrot.slane %v3148_v47, 4  ;;  %v3153_v44 = vrot.slane %v3151_v38, 5  ;;  %3481 = vst [vmem:[#allocation3 + $0xf4] sm:$0xf] %v3144_v32  ;;  %v7021_v5 = vor.u32 %v7853_v48, %v7018_v60  ;;  %v6854_v40 = vld [vmem:[#allocation2 + $0x48] sm:$0xf] }
 0x1fe   : > { %10514 = vst [vmem:[#allocation26_spill] sm:$0xff] %v9372_v23  ;;  %v9374_v17 = vpop.f32.mrf.mxu1  ;;  %v2470_v7 = vor.u32 %v2469_v49, %v2466_v36  ;;  %v1964_v4 = vrot.slane %v1846_v25, 5  ;;  %v7262_v53 = vld [vmem:[#allocation3 + $0x274] sm:$0xf0]  ;;  %v2480_v43 = vor.u32 %v2479_v28, %v2475_v29  ;;  %v3156_v1 = vshrl.u32 %v6854_v40, 16 }
 0x1ff   : > { %10515 = vst [vmem:[#allocation27_spill] sm:$0xff] %v9374_v17  ;;  %v3154_v30 = vsel %vm8454_vm8, %v3149_v24, %v3153_v44  ;;  %v1847_v14 = vld [vmem:[#allocation2 + $0x3c] sm:$0xe]  ;;  %v1848_v56 = vld [vmem:[#allocation2 + $0x40] sm:$0xf]  ;;  %v2485_v38 = vrot.slane %v2483_v8, 5 }
 0x200   : > { %v2471_v18 = vrot.slane %v2470_v7, 4  ;;  %3482 = vst [vmem:[#allocation3 + $0x118] sm:$0xf] %v3154_v30  ;;  %v3159_v11 = vshll.u32 %v6854_v40, 16  ;;  %v1965_v32 = vsel %vm8740_vm15, %v1963_v62, %v1964_v4  ;;  %v7915_v47 = vld [vmem:[#allocation3 + $0x254] sm:$0xf] }
 0x201   : > { %5887 = vmatmul.bf16.gmra.mxu0 %v7021_v5  ;;  %v5406_v60 = vpop.f32.mrf.mxu2  ;;  %v2481_v48 = vrot.slane %v2480_v43, 4  ;;  %v6776_v25 = vld [vmem:[#allocation2 + $0x84] sm:$0xe]  ;;  %v6777_v36 = vld [vmem:[#allocation2 + $0x88] sm:$0xf]  ;;  %v3158_v49 = vrot.slane %v3156_v1, 4  ;;  %v7265_v1 = vor.u32 %v7915_v47, %v7262_v53 }
 0x202   : > { %v9381_v28 = vadd.f32 %v5406_v60, %v9341_v27  ;;  %v7855_v44 = vld [vmem:[#allocation3 + $0x70] sm:$0xf0]  ;;  %v7928_v24 = vld [vmem:[#allocation3 + $0x2b8] sm:$0xf0]  ;;  %v2476_v5 = vsel %vm8454_vm8, %v2471_v18, %v2475_v29  ;;  %v6804_v7 = vrot.slane %v6776_v25, 9  ;;  %v2839_v40 = vrot.slane %v6777_v36, 5 }
 0x203   : > { %v6778_v8 = vld [vmem:[#allocation2 + $0x8c] sm:$0x1]  ;;  %2084 = vst [vmem:[#allocation3 + $0x14c] sm:$0xf] %v1965_v32  ;;  %v2486_v62 = vsel %vm8454_vm8, %v2481_v48, %v2485_v38  ;;  %v3161_v43 = vrot.slane %v3159_v11, 5  ;;  %v6655_v4 = vrot.slane %v1847_v14, 9  ;;  %v9387_v23 = vpop.f32.mrf.mxu3 }
 0x204   : > { %2659 = vst [vmem:[#allocation3 + $0x2e0] sm:$0xf] %v2476_v5  ;;  %v1968_v30 = vrot.slane %v1848_v56, 5  ;;  %v7000_v27 = vld [vmem:[#allocation3 + $0x50] sm:$0xf]  ;;  %v2840_v29 = vsel %vm8740_vm15, %v6804_v7, %v2839_v40  ;;  %v2841_v18 = vrot.slane %v2839_v40, 4  ;;  %v9400_v40 = vpop.f32.mrf.mxu0 }
 0x205   : > { %v7296_v60 = vld [vmem:[#allocation3 + $0x298] sm:$0xf]  ;;  %2660 = vst [vmem:[#allocation3 + $0x304] sm:$0xf] %v2486_v62  ;;  %v2842_v25 = vrot.slane %v6778_v8, 5  ;;  %v3162_v38 = vor.u32 %v3161_v43, %v3158_v49  ;;  %v7001_v5 = vor.u32 %v7855_v44, %v7000_v27 }
 0x206   : > { %v1849_v36 = vld [vmem:[#allocation2 + $0x44] sm:$0x1]  ;;  %2931 = vst [vmem:[#allocation3 + $0x2e4] sm:$0xf] %v2840_v29  ;;  %v6855_v32 = vld [vmem:[#allocation2 + $0x4c] sm:$0xf]  ;;  %v1969_v14 = vsel %vm8740_vm15, %v6655_v4, %v1968_v30  ;;  %5744 = vmatmul.bf16.gmra.mxu2 %v7265_v1  ;;  %v9393_v53 = vpop.f32.mrf.mxu1  ;;  %v7297_v8 = vor.u32 %v7928_v24, %v7296_v60 }
 0x207   : > { %v6856_v13 = vld [vmem:[#allocation2 + $0x50] sm:$0x1]  ;;  %10516 = vst [vmem:[#allocation28_spill] sm:$0xff] %v9393_v53  ;;  %v2843_v56 = vsel %vm8740_vm15, %v2841_v18, %v2842_v25  ;;  %v3165_v47 = vshll.u32 %v6855_v32, 16  ;;  %v3169_v48 = vshrl.u32 %v6855_v32, 16  ;;  %v1970_v7 = vrot.slane %v1968_v30, 4 }
 0x208   : > { %v8055_v11 = vld [vmem:[%s10468_s4 + $0x230] sm:$0xff]  ;;  %2085 = vst [vmem:[#allocation3 + $0x170] sm:$0xf] %v1969_v14  ;;  %v3175_v49 = vshll.u32 %v6856_v13, 16  ;;  %v3163_v62 = vrot.slane %v3162_v38, 4  ;;  %v1971_v1 = vrot.slane %v1849_v36, 5 }
 0x209   : > { %2932 = vst [vmem:[#allocation3 + $0x308] sm:$0xf] %v2843_v56  ;;  %5964 = vmatpush.bf16.msra.mxu1 %v8055_v11  ;;  %v3167_v43 = vrot.slane %v3165_v47, 5  ;;  %v3171_v4 = vrot.slane %v3169_v48, 4  ;;  %v6731_v29 = vld [vmem:[#allocation2 + $0x90] sm:$0xf] }
 0x20a   : > { %10517 = vst [vmem:[#allocation29_spill] sm:$0xff] %v9400_v40  ;;  %5442 = vmatmul.bf16.gmra.mxu3 %v7001_v5  ;;  %5660 = vmatmul.bf16.gmra.mxu1 %v7297_v8  ;;  %v6732_v18 = vld [vmem:[#allocation2 + $0x94] sm:$0xf]  ;;  %v6733_v25 = vld [vmem:[#allocation2 + $0x98] sm:$0x1]  ;;  %v2488_v19 = vshrl.u32 %v6731_v29, 16  ;;  %v1972_v60 = vsel %vm8740_vm15, %v1970_v7, %v1971_v1 }
 0x20b   : > { %v2491_v32 = vshll.u32 %v6731_v29, 16  ;;  %v2497_v14 = vshll.u32 %v6732_v18, 16  ;;  %v2501_v44 = vshrl.u32 %v6732_v18, 16  ;;  %v7054_v24 = vld [vmem:[#allocation3 + $0xcc] sm:$0xf0]  ;;  %v3168_v13 = vsel %vm8454_vm8, %v3163_v62, %v3167_v43 }
 0x20c   : > { %v3172_v30 = vor.u32 %v3171_v4, %v3167_v43  ;;  %v3177_v27 = vrot.slane %v3175_v49, 5  ;;  %v7862_v36 = vld [vmem:[#allocation3 + $0xac] sm:$0xf]  ;;  %v2490_v56 = vrot.slane %v2488_v19, 4  ;;  %v2507_v48 = vshll.u32 %v6733_v25, 16 }
 0x20d   : > { %v9406_v38 = vpop.f32.mrf.mxu3  ;;  %v2493_v11 = vrot.slane %v2491_v32, 5  ;;  %v2499_v47 = vrot.slane %v2497_v14, 5  ;;  %v2503_v5 = vrot.slane %v2501_v44, 4  ;;  %3483 = vst [vmem:[#allocation3 + $0x13c] sm:$0xf] %v3168_v13  ;;  %v7057_v40 = vor.u32 %v7862_v36, %v7054_v24 }
 0x20e   : > { %v3173_v8 = vrot.slane %v3172_v30, 4  ;;  %v1851_v29 = vld [vmem:[#allocation2 + $0x4c] sm:$0xf]  ;;  %v9408_v18 = vpop.f32.mrf.mxu1  ;;  %v6857_v43 = vld [vmem:[#allocation2 + $0x54] sm:$0xf]  ;;  %v2509_v14 = vrot.slane %v2507_v48, 5 }
 0x20f   : > { %10518 = vst [vmem:[#allocation30_spill] sm:$0xff] %v9408_v18  ;;  %v2494_v62 = vor.u32 %v2493_v11, %v2490_v56  ;;  %v7298_v49 = vld [vmem:[#allocation3 + $0x2bc] sm:$0xf0]  ;;  %v2504_v4 = vor.u32 %v2503_v5, %v2499_v47  ;;  %v3180_v1 = vshrl.u32 %v6857_v43, 16  ;;  %v1850_v19 = vld [vmem:[#allocation2 + $0x48] sm:$0xe]  ;;  %v9412_v56 = vpop.f32.mrf.mxu0 }
 0x210   : > { %2086 = vst [vmem:[#allocation3 + $0x194] sm:$0xf] %v1972_v60  ;;  %v3178_v7 = vsel %vm8454_vm8, %v3173_v8, %v3177_v27  ;;  %v7924_v32 = vld [vmem:[#allocation3 + $0x29c] sm:$0xf]  ;;  %v3183_v44 = vshll.u32 %v6857_v43, 16  ;;  %v1975_v13 = vrot.slane %v1851_v29, 5 }
 0x211   : > { %5892 = vmatmul.bf16.gmra.mxu0 %v7057_v40  ;;  %v2495_v25 = vrot.slane %v2494_v62, 4  ;;  %3484 = vst [vmem:[#allocation3 + $0x160] sm:$0xf] %v3178_v7  ;;  %v2505_v30 = vrot.slane %v2504_v4, 4  ;;  %v6779_v26 = vld [vmem:[#allocation2 + $0x90] sm:$0xe]  ;;  %v7301_v40 = vor.u32 %v7924_v32, %v7298_v49 }
 0x212   : > { %v6780_v24 = vld [vmem:[#allocation2 + $0x94] sm:$0xf]  ;;  %v3182_v36 = vrot.slane %v3180_v1, 4  ;;  %10519 = vst [vmem:[#allocation31_spill] sm:$0xff] %v9412_v56  ;;  %v6781_v27 = vld [vmem:[#allocation2 + $0x98] sm:$0x1] }
 0x213   : > { %v7864_v60 = vld [vmem:[#allocation3 + $0xb8] sm:$0xf0]  ;;  %v2500_v11 = vsel %vm8454_vm8, %v2495_v25, %v2499_v47  ;;  %v6805_v5 = vrot.slane %v6779_v26, 9  ;;  %v2846_v8 = vrot.slane %v6780_v24, 5  ;;  %v3185_v18 = vrot.slane %v3183_v44, 5 }
 0x214   : > { %v7937_v62 = vld [vmem:[#allocation3 + $0x300] sm:$0xf0]  ;;  %v2510_v48 = vsel %vm8454_vm8, %v2505_v30, %v2509_v14  ;;  %2661 = vst [vmem:[#allocation3 + $0x328] sm:$0xf] %v2500_v11  ;;  %v6656_v29 = vrot.slane %v1850_v19, 9  ;;  %v2849_v1 = vrot.slane %v6781_v27, 5 }
 0x215   : > { %v9418_v43 = vpop.f32.mrf.mxu3  ;;  %2662 = vst [vmem:[#allocation3 + $0x34c] sm:$0xf] %v2510_v48  ;;  %v2847_v4 = vsel %vm8740_vm15, %v6805_v5, %v2846_v8  ;;  %v2848_v7 = vrot.slane %v2846_v8, 4  ;;  %v3186_v47 = vor.u32 %v3185_v18, %v3182_v36  ;;  %v1852_v25 = vld [vmem:[#allocation2 + $0x50] sm:$0x1]  ;;  %v1977_v18 = vrot.slane %v1975_v13, 4 }
 0x216   : > { %2933 = vst [vmem:[#allocation3 + $0x32c] sm:$0xf] %v2847_v4  ;;  %v6858_v26 = vld [vmem:[#allocation2 + $0x58] sm:$0xf]  ;;  %v6859_v44 = vld [vmem:[#allocation2 + $0x5c] sm:$0x1]  ;;  %v1976_v49 = vsel %vm8740_vm15, %v6656_v29, %v1975_v13  ;;  %5749 = vmatmul.bf16.gmra.mxu2 %v7301_v40  ;;  %v9424_v32 = vpop.f32.mrf.mxu1 }
 0x217   : > { %10520 = vst [vmem:[#allocation32_spill] sm:$0xff] %v9424_v32  ;;  %v7036_v19 = vld [vmem:[#allocation3 + $0x98] sm:$0xf]  ;;  %v7332_v14 = vld [vmem:[#allocation3 + $0x2e0] sm:$0xf]  ;;  %v2850_v30 = vsel %vm8740_vm15, %v2848_v7, %v2849_v1  ;;  %v3189_v24 = vshll.u32 %v6858_v26, 16 }
 0x218   : > { %v3193_v11 = vshrl.u32 %v6858_v26, 16  ;;  %v7037_v5 = vor.u32 %v7864_v60, %v7036_v19  ;;  %v7333_v27 = vor.u32 %v7937_v62, %v7332_v14  ;;  %2934 = vst [vmem:[#allocation3 + $0x350] sm:$0xf] %v2850_v30  ;;  %v1978_v36 = vrot.slane %v1852_v25, 5  ;;  %v6734_v40 = vld [vmem:[#allocation2 + $0x9c] sm:$0xf] }
 0x219   : > { %v3187_v8 = vrot.slane %v3186_v47, 4  ;;  %v3191_v48 = vrot.slane %v3189_v24, 5  ;;  %v3199_v56 = vshll.u32 %v6859_v44, 16  ;;  %2087 = vst [vmem:[#allocation3 + $0x1b8] sm:$0xf] %v1976_v49  ;;  %v2512_v39 = vshrl.u32 %v6734_v40, 16  ;;  %v9435_v49 = vpop.f32.mrf.mxu0 }
 0x21a   : > { %v3195_v4 = vrot.slane %v3193_v11, 4  ;;  %5447 = vmatmul.bf16.gmra.mxu3 %v7037_v5  ;;  %5665 = vmatmul.bf16.gmra.mxu1 %v7333_v27  ;;  %v6735_v29 = vld [vmem:[#allocation2 + $0xa0] sm:$0xf]  ;;  %v6736_v32 = vld [vmem:[#allocation2 + $0xa4] sm:$0x1]  ;;  %v2515_v53 = vshll.u32 %v6734_v40, 16  ;;  %v1979_v44 = vsel %vm8740_vm15, %v1977_v18, %v1978_v36 }
 0x21b   : > { %v2521_v7 = vshll.u32 %v6735_v29, 16  ;;  %v2525_v1 = vshrl.u32 %v6735_v29, 16  ;;  %v7871_v26 = vld [vmem:[#allocation3 + $0xf4] sm:$0xf]  ;;  %v7090_v60 = vld [vmem:[#allocation3 + $0x114] sm:$0xf0]  ;;  %v3192_v47 = vsel %vm8454_vm8, %v3187_v8, %v3191_v48 }
 0x21c   : > { %v2531_v62 = vshll.u32 %v6736_v32, 16  ;;  %v8038_v13 = vld [vmem:[%s10468_s4 + $0x1a8] sm:$0xff]  ;;  %v3196_v25 = vor.u32 %v3195_v4, %v3191_v48  ;;  %10521 = vst [vmem:[#allocation33_spill] sm:$0xff] %v9435_v49  ;;  %v7334_v14 = vld [vmem:[#allocation3 + $0x304] sm:$0xf0]  ;;  %v2514_v30 = vrot.slane %v2512_v39, 4  ;;  %v7093_v8 = vor.u32 %v7871_v26, %v7090_v60 }
 0x21d   : > { %v9437_v19 = vpop.f32.mrf.mxu3  ;;  %v2517_v24 = vrot.slane %v2515_v53, 5  ;;  %v2523_v11 = vrot.slane %v2521_v7, 5  ;;  %v1854_v32 = vld [vmem:[#allocation2 + $0x58] sm:$0xf]  ;;  %v2527_v5 = vrot.slane %v2525_v1, 4  ;;  %5787 = vmatpush.bf16.msra.mxu3 %v8038_v13  ;;  %v3201_v40 = vrot.slane %v3199_v56, 5 }
 0x21e   : > { %v3197_v27 = vrot.slane %v3196_v25, 4  ;;  %3485 = vst [vmem:[#allocation3 + $0x184] sm:$0xf] %v3192_v47  ;;  %v9439_v29 = vpop.f32.mrf.mxu1  ;;  %v2533_v4 = vrot.slane %v2531_v62, 5  ;;  %v6860_v18 = vld [vmem:[#allocation2 + $0x60] sm:$0xf] }
 0x21f   : > { %10522 = vst [vmem:[#allocation34_spill] sm:$0xff] %v9439_v29  ;;  %v2518_v48 = vor.u32 %v2517_v24, %v2514_v30  ;;  %v7933_v36 = vld [vmem:[#allocation3 + $0x2e4] sm:$0xf]  ;;  %v2528_v49 = vor.u32 %v2527_v5, %v2523_v11  ;;  %v3204_v53 = vshrl.u32 %v6860_v18, 16  ;;  %v1853_v7 = vld [vmem:[#allocation2 + $0x54] sm:$0xe] }
 0x220   : > { %2088 = vst [vmem:[#allocation3 + $0x1dc] sm:$0xf] %v1979_v44  ;;  %v3202_v39 = vsel %vm8454_vm8, %v3197_v27, %v3201_v40  ;;  %v1982_v63 = vrot.slane %v1854_v32, 5  ;;  %v3207_v56 = vshll.u32 %v6860_v18, 16  ;;  %v1855_v13 = vld [vmem:[#allocation2 + $0x5c] sm:$0x1]  ;;  %v7337_v26 = vor.u32 %v7933_v36, %v7334_v14 }
 0x221   : > { %5897 = vmatmul.bf16.gmra.mxu0 %v7093_v8  ;;  %v2519_v1 = vrot.slane %v2518_v48, 4  ;;  %3486 = vst [vmem:[#allocation3 + $0x1a8] sm:$0xf] %v3202_v39  ;;  %v9443_v47 = vld [vmem:[#allocation2 + $0x18] sm:$0xe]  ;;  %v2529_v60 = vrot.slane %v2528_v49, 4 }
 0x222   : > { %v6782_v62 = vld [vmem:[#allocation2 + $0x9c] sm:$0xe]  ;;  %v6783_v25 = vld [vmem:[#allocation2 + $0xa0] sm:$0xf]  ;;  %v3206_v44 = vrot.slane %v3204_v53, 4  ;;  %v3209_v8 = vrot.slane %v3207_v56, 5 }
 0x223   : > { %v9445_v30 = vld [vmem:[#allocation2 + $0x1c] sm:$0xf]  ;;  %v2524_v5 = vsel %vm8454_vm8, %v2519_v1, %v2523_v11  ;;  %v6784_v27 = vld [vmem:[#allocation2 + $0xa4] sm:$0x1]  ;;  %v6806_v32 = vrot.slane %v6782_v62, 9  ;;  %v2853_v40 = vrot.slane %v6783_v25, 5  ;;  %v2534_v48 = vsel %vm8454_vm8, %v2529_v60, %v2533_v4  ;;  %v9458_v60 = vpop.f32.mrf.mxu0 }
 0x224   : > { %v7873_v24 = vld [vmem:[#allocation3 + $0x100] sm:$0xf0]  ;;  %2663 = vst [vmem:[#allocation3 + $0x370] sm:$0xf] %v2524_v5  ;;  %v2856_v18 = vrot.slane %v6784_v27, 5  ;;  %v6657_v14 = vrot.slane %v1853_v7, 9  ;;  %v3210_v1 = vor.u32 %v3209_v8, %v3206_v44 }
 0x225   : > { %v1984_v49 = vrot.slane %v1982_v63, 4  ;;  %v9451_v36 = vpop.f32.mrf.mxu3  ;;  %v7072_v39 = vld [vmem:[#allocation3 + $0xe0] sm:$0xf]  ;;  %v7946_v53 = vld [vmem:[#allocation3 + $0x348] sm:$0xf0]  ;;  %v2854_v29 = vsel %vm8740_vm15, %v6806_v32, %v2853_v40  ;;  %v2855_v11 = vrot.slane %v2853_v40, 4 }
 0x226   : > { %2664 = vst [vmem:[#allocation3 + $0x394] sm:$0xf] %v2534_v48  ;;  %v1985_v62 = vrot.slane %v1855_v13, 5  ;;  %v6861_v56 = vld [vmem:[#allocation2 + $0x64] sm:$0xf]  ;;  %v1983_v4 = vsel %vm8740_vm15, %v6657_v14, %v1982_v63  ;;  %v6938_v7 = vrot.slane %v9443_v47, 9  ;;  %5754 = vmatmul.bf16.gmra.mxu2 %v7337_v26  ;;  %v9460_v5 = vpop.f32.mrf.mxu1  ;;  %v7073_v63 = vor.u32 %v7873_v24, %v7072_v39 }
 0x227   : > { %2935 = vst [vmem:[#allocation3 + $0x374] sm:$0xf] %v2854_v29  ;;  %v6862_v25 = vld [vmem:[#allocation2 + $0x68] sm:$0x1]  ;;  %v7368_v27 = vld [vmem:[#allocation3 + $0x328] sm:$0xf]  ;;  %v2857_v32 = vsel %vm8740_vm15, %v2855_v11, %v2856_v18 }
 0x228   : > { %10523 = vst [vmem:[#allocation35_spill] sm:$0xff] %v9458_v60  ;;  %v8054_v29 = vld [vmem:[%s10468_s4 + $0x228] sm:$0xff]  ;;  %v3213_v13 = vshll.u32 %v6861_v56, 16  ;;  %v3217_v44 = vshrl.u32 %v6861_v56, 16  ;;  %v7369_v8 = vor.u32 %v7946_v53, %v7368_v27  ;;  %v1986_v47 = vsel %vm8740_vm15, %v1984_v49, %v1985_v62  ;;  %v1857_v39 = vld [vmem:[#allocation2 + $0x64] sm:$0xf] }
 0x229   : > { %10524 = vst [vmem:[#allocation36_spill] sm:$0xff] %v9460_v5  ;;  %5965 = vmatpush.bf16.msra.mxu1 %v8054_v29  ;;  %v3211_v26 = vrot.slane %v3210_v1, 4  ;;  %v3223_v60 = vshll.u32 %v6862_v25, 16  ;;  %v6737_v18 = vld [vmem:[#allocation2 + $0xa8] sm:$0xf] }
 0x22a   : > { %2936 = vst [vmem:[#allocation3 + $0x398] sm:$0xf] %v2857_v32  ;;  %v3215_v48 = vrot.slane %v3213_v13, 5  ;;  %v3219_v14 = vrot.slane %v3217_v44, 4  ;;  %5452 = vmatmul.bf16.gmra.mxu3 %v7073_v63  ;;  %5670 = vmatmul.bf16.gmra.mxu1 %v7369_v8  ;;  %v6738_v11 = vld [vmem:[#allocation2 + $0xac] sm:$0xf] }
 0x22b   : > { %2089 = vst [vmem:[#allocation3 + $0x200] sm:$0xf] %v1983_v4  ;;  %v6739_v5 = vld [vmem:[#allocation2 + $0xb0] sm:$0x1]  ;;  %v2536_v56 = vshrl.u32 %v6737_v18, 16  ;;  %v2539_v17 = vshll.u32 %v6737_v18, 16 }
 0x22c   : > { %v2545_v40 = vshll.u32 %v6738_v11, 16  ;;  %v2549_v24 = vshrl.u32 %v6738_v11, 16  ;;  %v7880_v53 = vld [vmem:[#allocation3 + $0x13c] sm:$0xf]  ;;  %v7126_v27 = vld [vmem:[#allocation3 + $0x15c] sm:$0xf0]  ;;  %v3216_v49 = vsel %vm8454_vm8, %v3211_v26, %v3215_v48  ;;  %v3220_v1 = vor.u32 %v3219_v14, %v3215_v48  ;;  %v9480_v14 = vpop.f32.mrf.mxu2 }
 0x22d   : > { %v2555_v32 = vshll.u32 %v6739_v5, 16  ;;  %2090 = vst [vmem:[#allocation3 + $0x224] sm:$0xf] %v1986_v47  ;;  %v9472_v62 = vpop.f32.mrf.mxu3  ;;  %v2538_v25 = vrot.slane %v2536_v56, 4  ;;  %v2541_v4 = vrot.slane %v2539_v17, 5  ;;  %v10525_v44 = vrot.slane %v9445_v30, 5 }
 0x22e   : > { %v2547_v29 = vrot.slane %v2545_v40, 5  ;;  %v1856_v13 = vld [vmem:[#allocation2 + $0x60] sm:$0xe]  ;;  %v2551_v8 = vrot.slane %v2549_v24, 4  ;;  %v3221_v18 = vrot.slane %v3220_v1, 4  ;;  %v3225_v11 = vrot.slane %v3223_v60, 5  ;;  %v9478_v2 = vpop.f32.mrf.mxu1  ;;  %v9484_v24 = vpop.f32.mrf.mxu0 }
 0x22f   : > { %v3606_v63 = vsel %vm8740_vm15, %v6938_v7, %v10525_v44  ;;  %3487 = vst [vmem:[#allocation3 + $0x1cc] sm:$0xf] %v3216_v49  ;;  %v1989_v5 = vrot.slane %v1857_v39, 5  ;;  %v7129_v26 = vor.u32 %v7880_v53, %v7126_v27  ;;  %v2542_v47 = vor.u32 %v2541_v4, %v2538_v25  ;;  %v6863_v48 = vld [vmem:[#allocation2 + $0x6c] sm:$0xf] }
 0x230   : > { %10526 = vst [vmem:[#allocation37_spill] sm:$0xff] %v9478_v2  ;;  %v7370_v17 = vld [vmem:[#allocation3 + $0x34c] sm:$0xf0]  ;;  %v2552_v40 = vor.u32 %v2551_v8, %v2547_v29  ;;  %v2557_v56 = vrot.slane %v2555_v32, 5  ;;  %v3226_v59 = vsel %vm8454_vm8, %v3221_v18, %v3225_v11  ;;  %v3228_v52 = vshrl.u32 %v6863_v48, 16 }
 0x231   : > { %10527 = vst [vmem:[#allocation38_spill] sm:$0xff] %v9480_v14  ;;  %v1858_v7 = vld [vmem:[#allocation2 + $0x68] sm:$0x1]  ;;  %5902 = vmatmul.bf16.gmra.mxu0 %v7129_v26  ;;  %v2543_v60 = vrot.slane %v2542_v47, 4  ;;  %v3231_v39 = vshll.u32 %v6863_v48, 16  ;;  %v6658_v53 = vrot.slane %v1856_v13, 9 }
 0x232   : > { %3747 = vst [vmem:[#allocation3 + $0x20] sm:$0xf] %v3606_v63  ;;  %v1991_v27 = vrot.slane %v1989_v5, 4  ;;  %v2553_v49 = vrot.slane %v2552_v40, 4  ;;  %v6785_v1 = vld [vmem:[#allocation2 + $0xa8] sm:$0xe] }
 0x233   : > { %10528 = vst [vmem:[#allocation39_spill] sm:$0xff] %v9484_v24  ;;  %v6786_v25 = vld [vmem:[#allocation2 + $0xac] sm:$0xf]  ;;  %v3230_v4 = vrot.slane %v3228_v52, 4  ;;  %v9486_v44 = vld [vmem:[#allocation2 + $0x20] sm:$0x1]  ;;  %v2548_v8 = vsel %vm8454_vm8, %v2543_v60, %v2547_v29  ;;  %v1990_v47 = vsel %vm8740_vm15, %v6658_v53, %v1989_v5 }
 0x234   : > { %3488 = vst [vmem:[#allocation3 + $0x1f0] sm:$0xf] %v3226_v59  ;;  %v7882_v32 = vld [vmem:[#allocation3 + $0x148] sm:$0xf0]  ;;  %v6787_v18 = vld [vmem:[#allocation2 + $0xb0] sm:$0x1]  ;;  %v2558_v59 = vsel %vm8454_vm8, %v2553_v49, %v2557_v56 }
 0x235   : > { %v6807_v63 = vrot.slane %v6785_v1, 9  ;;  %v2860_v11 = vrot.slane %v6786_v25, 5  ;;  %v3233_v24 = vrot.slane %v3231_v39, 5  ;;  %v7942_v26 = vld [vmem:[#allocation3 + $0x32c] sm:$0xf]  ;;  %v2863_v13 = vrot.slane %v6787_v18, 5  ;;  %v9494_v40 = vpop.f32.mrf.mxu3 }
 0x236   : > { %2665 = vst [vmem:[#allocation3 + $0x3b8] sm:$0xf] %v2548_v8  ;;  %v1992_v52 = vrot.slane %v1858_v7, 5  ;;  %v7373_v48 = vor.u32 %v7942_v26, %v7370_v17  ;;  %v7108_v2 = vld [vmem:[#allocation3 + $0x128] sm:$0xf]  ;;  %v10529_v25 = vrot.slane %v9445_v30, 5  ;;  %v9504_v18 = vpop.f32.mrf.mxu1 }
 0x237   : > { %v7955_v14 = vld [vmem:[#allocation3 + $0x390] sm:$0xf0]  ;;  %2666 = vst [vmem:[#allocation3 + $0x3dc] sm:$0xf] %v2558_v59  ;;  %v2861_v29 = vsel %vm8740_vm15, %v6807_v63, %v2860_v11  ;;  %v2862_v60 = vrot.slane %v2860_v11, 4  ;;  %v3234_v39 = vor.u32 %v3233_v24, %v3230_v4  ;;  %v7109_v24 = vor.u32 %v7882_v32, %v7108_v2 }
 0x238   : > { %2937 = vst [vmem:[#allocation3 + $0x3bc] sm:$0xf] %v2861_v29  ;;  %v6864_v1 = vld [vmem:[#allocation2 + $0x70] sm:$0xf]  ;;  %v6865_v56 = vld [vmem:[#allocation2 + $0x74] sm:$0x1]  ;;  %v1993_v49 = vsel %vm8740_vm15, %v1991_v27, %v1992_v52  ;;  %5759 = vmatmul.bf16.gmra.mxu2 %v7373_v48  ;;  %v9507_v52 = vpop.f32.mrf.mxu2  ;;  %v9509_v48 = vpop.f32.mrf.mxu0 }
 0x239   : > { %v7404_v5 = vld [vmem:[#allocation3 + $0x370] sm:$0xf]  ;;  %v2864_v17 = vsel %vm8740_vm15, %v2862_v60, %v2863_v13  ;;  %v3237_v7 = vshll.u32 %v6864_v1, 16  ;;  %v3241_v53 = vshrl.u32 %v6864_v1, 16  ;;  %2091 = vst [vmem:[#allocation3 + $0x248] sm:$0xf] %v1990_v47 }
 0x23a   : > { %v3607_v8 = vrot.slane %v10529_v25, 4  ;;  %10530 = vst [vmem:[#allocation40_spill] sm:$0xff] %v9504_v18  ;;  %v7405_v4 = vor.u32 %v7955_v14, %v7404_v5  ;;  %v3608_v63 = vrot.slane %v9486_v44, 5  ;;  %v3235_v11 = vrot.slane %v3234_v39, 4  ;;  %5457 = vmatmul.bf16.gmra.mxu3 %v7109_v24  ;;  %v6740_v13 = vld [vmem:[#allocation2 + $0xb4] sm:$0xf] }
 0x23b   : > { %2938 = vst [vmem:[#allocation3 + $0x3e0] sm:$0xf] %v2864_v17  ;;  %v3239_v27 = vrot.slane %v3237_v7, 5  ;;  %v3243_v26 = vrot.slane %v3241_v53, 4  ;;  %v3247_v59 = vshll.u32 %v6865_v56, 16  ;;  %v2560_v29 = vshrl.u32 %v6740_v13, 16 }
 0x23c   : > { %2092 = vst [vmem:[#allocation3 + $0x26c] sm:$0xf] %v1993_v49  ;;  %5675 = vmatmul.bf16.gmra.mxu1 %v7405_v4  ;;  %v6741_v47 = vld [vmem:[#allocation2 + $0xb8] sm:$0xf]  ;;  %v6742_v30 = vld [vmem:[#allocation2 + $0xbc] sm:$0x1]  ;;  %v3609_v25 = vsel %vm8740_vm15, %v3607_v8, %v3608_v63 }
 0x23d   : > { %10531 = vst [vmem:[#allocation41_spill] sm:$0xff] %v9509_v48  ;;  %v2563_v2 = vshll.u32 %v6740_v13, 16  ;;  %v2569_v14 = vshll.u32 %v6741_v47, 16  ;;  %v2573_v32 = vshrl.u32 %v6741_v47, 16  ;;  %v7162_v60 = vld [vmem:[#allocation3 + $0x1a4] sm:$0xf0]  ;;  %v3240_v1 = vsel %vm8454_vm8, %v3235_v11, %v3239_v27  ;;  %v5409_v49 = vpop.f32.mrf.mxu3 }
 0x23e   : > { %v2579_v44 = vshll.u32 %v6742_v30, 16  ;;  %v8037_v39 = vld [vmem:[%s10468_s4 + $0x1a0] sm:$0xff]  ;;  %v3244_v56 = vor.u32 %v3243_v26, %v3239_v27  ;;  %v7889_v5 = vld [vmem:[#allocation3 + $0x184] sm:$0xf]  ;;  %v2562_v17 = vrot.slane %v2560_v29, 4  ;;  %v9519_v24 = vadd.f32 %v5409_v49, %v9370_v20 }
 0x23f   : > { %v2565_v7 = vrot.slane %v2563_v2, 5  ;;  %v2571_v53 = vrot.slane %v2569_v14, 5  ;;  %v2575_v4 = vrot.slane %v2573_v32, 4  ;;  %5788 = vmatpush.bf16.msra.mxu3 %v8037_v39  ;;  %v3249_v47 = vrot.slane %v3247_v59, 5  ;;  %3489 = vst [vmem:[#allocation3 + $0x214] sm:$0xf] %v3240_v1  ;;  %v9523_v32 = vpop.f32.mrf.mxu1 }
 0x240   : > { %v3245_v13 = vrot.slane %v3244_v56, 4  ;;  %v7165_v30 = vor.u32 %v7889_v5, %v7162_v60  ;;  %v6866_v11 = vld [vmem:[#allocation2 + $0x78] sm:$0xf]  ;;  %v7406_v27 = vld [vmem:[#allocation3 + $0x394] sm:$0xf0]  ;;  %v2581_v18 = vrot.slane %v2579_v44, 5 }
 0x241   : > { %v2566_v48 = vor.u32 %v2565_v7, %v2562_v17  ;;  %v2576_v26 = vor.u32 %v2575_v4, %v2571_v53  ;;  %v3252_v2 = vshrl.u32 %v6866_v11, 16  ;;  %3748 = vst [vmem:[#allocation3 + $0x44] sm:$0xf] %v3609_v25  ;;  %v7951_v8 = vld [vmem:[#allocation3 + $0x374] sm:$0xf]  ;;  %v3255_v63 = vshll.u32 %v6866_v11, 16  ;;  %v9527_v4 = vpop.f32.mrf.mxu2 }
 0x242   : > { %v3250_v29 = vsel %vm8454_vm8, %v3245_v13, %v3249_v47  ;;  %5907 = vmatmul.bf16.gmra.mxu0 %v7165_v30  ;;  %v6893_v14 = vld [vmem:[#allocation2 + $0x24] sm:$0xe]  ;;  %10532 = vst [vmem:[#allocation42_spill] sm:$0xff] %v9523_v32  ;;  %v6788_v60 = vld [vmem:[#allocation2 + $0xb4] sm:$0xe] }
 0x243   : > { %v2567_v20 = vrot.slane %v2566_v48, 4  ;;  %3490 = vst [vmem:[#allocation3 + $0x238] sm:$0xf] %v3250_v29  ;;  %v2577_v59 = vrot.slane %v2576_v26, 4  ;;  %v6789_v39 = vld [vmem:[#allocation2 + $0xb8] sm:$0xf]  ;;  %v7409_v48 = vor.u32 %v7951_v8, %v7406_v27  ;;  %v9531_v26 = vpop.f32.mrf.mxu0 }
 0x244   : > { %v3254_v1 = vrot.slane %v3252_v2, 4  ;;  %v7891_v56 = vld [vmem:[#allocation3 + $0x190] sm:$0xf0]  ;;  %v7440_v49 = vld [vmem:[#allocation3 + $0x3b8] sm:$0xf]  ;;  %v6808_v17 = vrot.slane %v6788_v60, 9 }
 0x245   : > { %v2572_v44 = vsel %vm8454_vm8, %v2567_v20, %v2571_v53  ;;  %v6790_v5 = vld [vmem:[#allocation2 + $0xbc] sm:$0x1]  ;;  %v2867_v7 = vrot.slane %v6789_v39, 5  ;;  %v3257_v25 = vrot.slane %v3255_v63, 5  ;;  %10533 = vst [vmem:[#allocation43_spill] sm:$0xff] %v9527_v4  ;;  %v2582_v13 = vsel %vm8454_vm8, %v2577_v59, %v2581_v18  ;;  %v5411_v29 = vpop.f32.mrf.mxu3  ;;  %v8053_v39 = vld [vmem:[%s10468_s4 + $0x220] sm:$0xff] }
 0x246   : > { %2667 = vst [vmem:[#allocation3 + $0x400] sm:$0xf] %v2572_v44  ;;  %v2870_v47 = vrot.slane %v6790_v5, 5  ;;  %v6894_v30 = vld [vmem:[#allocation2 + $0x28] sm:$0xf]  ;;  %v6939_v11 = vrot.slane %v6893_v14, 9  ;;  %v9536_v27 = vadd.f32 %v5411_v29, %v9387_v23  ;;  %5966 = vmatpush.bf16.msra.mxu1 %v8053_v39 }
 0x247   : > { %10534 = vst [vmem:[#allocation44_spill] sm:$0xff] %v9531_v26  ;;  %v7964_v2 = vld [vmem:[#allocation3 + $0x3d8] sm:$0xf0]  ;;  %v2868_v53 = vsel %vm8740_vm15, %v6808_v17, %v2867_v7  ;;  %v2869_v20 = vrot.slane %v2867_v7, 4  ;;  %v3258_v63 = vor.u32 %v3257_v25, %v3254_v1  ;;  %v3612_v60 = vrot.slane %v6894_v30, 5 }
 0x248   : > { %2668 = vst [vmem:[#allocation3 + $0x424] sm:$0xf] %v2582_v13  ;;  %v6867_v18 = vld [vmem:[#allocation2 + $0x7c] sm:$0xf]  ;;  %v6868_v8 = vld [vmem:[#allocation2 + $0x80] sm:$0x1]  ;;  %5764 = vmatmul.bf16.gmra.mxu2 %v7409_v48  ;;  %v7441_v1 = vor.u32 %v7964_v2, %v7440_v49  ;;  %v9545_v49 = vpop.f32.mrf.mxu1 }
 0x249   : > { %2939 = vst [vmem:[#allocation3 + $0x404] sm:$0xf] %v2868_v53  ;;  %v7144_v59 = vld [vmem:[#allocation3 + $0x170] sm:$0xf]  ;;  %v2871_v14 = vsel %vm8740_vm15, %v2869_v20, %v2870_v47  ;;  %v3261_v44 = vshll.u32 %v6867_v18, 16  ;;  %v3265_v5 = vshrl.u32 %v6867_v18, 16  ;;  %v3613_v23 = vsel %vm8740_vm15, %v6939_v11, %v3612_v60 }
 0x24a   : > { %v7145_v17 = vor.u32 %v7891_v56, %v7144_v59  ;;  %2940 = vst [vmem:[#allocation3 + $0x428] sm:$0xf] %v2871_v14  ;;  %v3259_v7 = vrot.slane %v3258_v63, 4  ;;  %v3271_v13 = vshll.u32 %v6868_v8, 16  ;;  %v6743_v47 = vld [vmem:[#allocation2 + $0xc0] sm:$0xf] }
 0x24b   : > { %v3263_v25 = vrot.slane %v3261_v44, 5  ;;  %v3267_v48 = vrot.slane %v3265_v5, 4  ;;  %3749 = vst [vmem:[#allocation3 + $0x68] sm:$0xf] %v3613_v23  ;;  %v6744_v30 = vld [vmem:[#allocation2 + $0xc4] sm:$0xf]  ;;  %v9557_v32 = vpop.f32.mrf.mxu0 }
 0x24c   : > { %5462 = vmatmul.bf16.gmra.mxu3 %v7145_v17  ;;  %5680 = vmatmul.bf16.gmra.mxu1 %v7441_v1  ;;  %v6745_v29 = vld [vmem:[#allocation2 + $0xc8] sm:$0x1]  ;;  %v2584_v53 = vshrl.u32 %v6743_v47, 16  ;;  %v2587_v20 = vshll.u32 %v6743_v47, 16  ;;  %v2593_v18 = vshll.u32 %v6744_v30, 16  ;;  %v2597_v56 = vshrl.u32 %v6744_v30, 16  ;;  %v9552_v47 = vpop.f32.mrf.mxu2 }
 0x24d   : > { %10535 = vst [vmem:[#allocation45_spill] sm:$0xff] %v9545_v49  ;;  %v7198_v2 = vld [vmem:[#allocation3 + $0x1ec] sm:$0xf0]  ;;  %v2603_v59 = vshll.u32 %v6745_v29, 16  ;;  %v8052_v11 = vld [vmem:[%s10468_s4 + $0x218] sm:$0xff]  ;;  %v3264_v63 = vsel %vm8454_vm8, %v3259_v7, %v3263_v25  ;;  %v3268_v8 = vor.u32 %v3267_v48, %v3263_v25  ;;  %v5414_v39 = vpop.f32.mrf.mxu3  ;;  %v3614_v23 = vrot.slane %v3612_v60, 4 }
 0x24e   : > { %v6895_v14 = vld [vmem:[#allocation2 + $0x2c] sm:$0x1]  ;;  %v7898_v44 = vld [vmem:[#allocation3 + $0x1cc] sm:$0xf]  ;;  %v2586_v5 = vrot.slane %v2584_v53, 4  ;;  %v2589_v17 = vrot.slane %v2587_v20, 5  ;;  %v9555_v30 = vadd.f32 %v5414_v39, %v9406_v38  ;;  %5967 = vmatpush.bf16.msra.mxu1 %v8052_v11 }
 0x24f   : > { %v2595_v1 = vrot.slane %v2593_v18, 5  ;;  %10536 = vst [vmem:[#allocation46_spill] sm:$0xff] %v9552_v47  ;;  %v2599_v29 = vrot.slane %v2597_v56, 4  ;;  %v3269_v26 = vrot.slane %v3268_v8, 4  ;;  %v3273_v49 = vrot.slane %v3271_v13, 5  ;;  %v8051_v8 = vld [vmem:[%s10468_s4 + $0x210] sm:$0xff] }
 0x250   : > { %3491 = vst [vmem:[#allocation3 + $0x25c] sm:$0xf] %v3264_v63  ;;  %v7201_v7 = vor.u32 %v7898_v44, %v7198_v2  ;;  %v2590_v25 = vor.u32 %v2589_v17, %v2586_v5  ;;  %v3615_v48 = vrot.slane %v6895_v14, 5  ;;  %v6896_v4 = vld [vmem:[#allocation2 + $0x30] sm:$0xe]  ;;  %v2605_v60 = vrot.slane %v2603_v59, 5 }
 0x251   : > { %10537 = vst [vmem:[#allocation47_spill] sm:$0xff] %v9557_v32  ;;  %v7960_v53 = vld [vmem:[#allocation3 + $0x3bc] sm:$0xf]  ;;  %v7442_v20 = vld [vmem:[#allocation3 + $0x3dc] sm:$0xf0]  ;;  %v2600_v18 = vor.u32 %v2599_v29, %v2595_v1  ;;  %v3274_v47 = vsel %vm8454_vm8, %v3269_v26, %v3273_v49  ;;  %v6940_v11 = vrot.slane %v6896_v4, 9 }
 0x252   : > { %v6897_v38 = vld [vmem:[#allocation2 + $0x34] sm:$0xf]  ;;  %v6898_v39 = vld [vmem:[#allocation2 + $0x38] sm:$0x1]  ;;  %5912 = vmatmul.bf16.gmra.mxu0 %v7201_v7  ;;  %v2591_v56 = vrot.slane %v2590_v25, 4  ;;  %v3616_v13 = vsel %vm8740_vm15, %v3614_v23, %v3615_v48  ;;  %5968 = vmatpush.bf16.msra.mxu1 %v8051_v8  ;;  %v7445_v48 = vor.u32 %v7960_v53, %v7442_v20  ;;  %v8050_v20 = vld [vmem:[%s10468_s4 + $0x208] sm:$0xff] }
 0x253   : > { %3492 = vst [vmem:[#allocation3 + $0x280] sm:$0xf] %v3274_v47  ;;  %v3619_v2 = vrot.slane %v6897_v38, 5  ;;  %v2601_v63 = vrot.slane %v2600_v18, 4  ;;  %v6791_v14 = vld [vmem:[#allocation2 + $0xc0] sm:$0xe] }
 0x254   : > { %v6792_v59 = vld [vmem:[#allocation2 + $0xc4] sm:$0xf]  ;;  %v7900_v44 = vld [vmem:[#allocation3 + $0x1d8] sm:$0xf0]  ;;  %v7476_v5 = vld [vmem:[#allocation3 + $0x400] sm:$0xf]  ;;  %v2596_v26 = vsel %vm8454_vm8, %v2591_v56, %v2595_v1  ;;  %v9586_v8 = vpop.f32.mrf.mxu2 }
 0x255   : > { %v6793_v49 = vld [vmem:[#allocation2 + $0xc8] sm:$0x1]  ;;  %v6809_v17 = vrot.slane %v6791_v14, 9  ;;  %v2874_v47 = vrot.slane %v6792_v59, 5  ;;  %3750 = vst [vmem:[#allocation3 + $0x8c] sm:$0xf] %v3616_v13  ;;  %v3620_v4 = vsel %vm8740_vm15, %v6940_v11, %v3619_v2  ;;  %v2606_v23 = vsel %vm8454_vm8, %v2601_v63, %v2605_v60  ;;  %v5416_v18 = vpop.f32.mrf.mxu3  ;;  %v9574_v13 = vpop.f32.mrf.mxu1 }
 0x256   : > { %2669 = vst [vmem:[#allocation3 + $0x448] sm:$0xf] %v2596_v26  ;;  %v2877_v29 = vrot.slane %v6793_v49, 5  ;;  %v3621_v7 = vrot.slane %v3619_v2, 4  ;;  %v3622_v25 = vrot.slane %v6898_v39, 5  ;;  %v9577_v11 = vadd.f32 %v5416_v18, %v9418_v43  ;;  %v9588_v49 = vpop.f32.mrf.mxu0  ;;  %5969 = vmatpush.bf16.msra.mxu1 %v8050_v20 }
 0x257   : > { %v7180_v38 = vld [vmem:[#allocation3 + $0x1b8] sm:$0xf]  ;;  %v7973_v32 = vld [vmem:[#allocation3 + $0x420] sm:$0xf0]  ;;  %2670 = vst [vmem:[#allocation3 + $0x46c] sm:$0xf] %v2606_v23  ;;  %v2875_v1 = vsel %vm8740_vm15, %v6809_v17, %v2874_v47 }
 0x258   : > { %v2876_v56 = vrot.slane %v2874_v47, 4  ;;  %10538 = vst [vmem:[#allocation48_spill] sm:$0xff] %v9574_v13  ;;  %v3623_v60 = vsel %vm8740_vm15, %v3621_v7, %v3622_v25  ;;  %v6899_v2 = vld [vmem:[#allocation2 + $0x3c] sm:$0xe]  ;;  %v6900_v39 = vld [vmem:[#allocation2 + $0x40] sm:$0xf]  ;;  %5769 = vmatmul.bf16.gmra.mxu2 %v7445_v48  ;;  %v7181_v43 = vor.u32 %v7900_v44, %v7180_v38  ;;  %v7477_v14 = vor.u32 %v7973_v32, %v7476_v5 }
 0x259   : > { %2941 = vst [vmem:[#allocation3 + $0x44c] sm:$0xf] %v2875_v1  ;;  %v6901_v63 = vld [vmem:[#allocation2 + $0x44] sm:$0x1]  ;;  %v6941_v59 = vrot.slane %v6899_v2, 9  ;;  %v3626_v26 = vrot.slane %v6900_v39, 5 }
 0x25a   : > { %v2878_v53 = vsel %vm8740_vm15, %v2876_v56, %v2877_v29  ;;  %3751 = vst [vmem:[#allocation3 + $0xb0] sm:$0xf] %v3620_v4  ;;  %v6810_v17 = vld [vmem:[#allocation2 + $0x18] sm:$0xf]  ;;  %v8049_v47 = vld [vmem:[%s10468_s4 + $0x200] sm:$0xff]  ;;  %v3629_v5 = vrot.slane %v6901_v63, 5 }
 0x25b   : > { %2942 = vst [vmem:[#allocation3 + $0x470] sm:$0xf] %v2878_v53  ;;  %v8036_v4 = vld [vmem:[%s10468_s4 + $0x198] sm:$0xff]  ;;  %v3627_v32 = vsel %vm8740_vm15, %v6941_v59, %v3626_v26  ;;  %v3628_v44 = vrot.slane %v3626_v26, 4  ;;  %v7234_v23 = vld [vmem:[#allocation3 + $0x234] sm:$0xf0]  ;;  %5970 = vmatpush.bf16.msra.mxu1 %v8049_v47 }
 0x25c   : > { %10539 = vst [vmem:[#allocation49_spill] sm:$0xff] %v9588_v49  ;;  %5467 = vmatmul.bf16.gmra.mxu3 %v7181_v43  ;;  %5685 = vmatmul.bf16.gmra.mxu1 %v7477_v14  ;;  %v6902_v7 = vld [vmem:[#allocation2 + $0x48] sm:$0xe]  ;;  %v6811_v25 = vld [vmem:[#allocation2 + $0x1c] sm:$0xf] }
 0x25d   : > { %3752 = vst [vmem:[#allocation3 + $0xd4] sm:$0xf] %v3623_v60  ;;  %5789 = vmatpush.bf16.msra.mxu3 %v8036_v4  ;;  %v3630_v29 = vsel %vm8740_vm15, %v3628_v44, %v3629_v5  ;;  %v5419_v48 = vpop.f32.mrf.mxu3  ;;  %v7907_v18 = vld [vmem:[#allocation3 + $0x214] sm:$0xf]  ;;  %v6812_v38 = vld [vmem:[#allocation2 + $0x24] sm:$0xf]  ;;  %v9603_v63 = vpop.f32.mrf.mxu1 }
 0x25e   : > { %3753 = vst [vmem:[#allocation3 + $0xf8] sm:$0xf] %v3627_v32  ;;  %v9601_v1 = vadd.f32 %v5419_v48, %v9437_v19  ;;  %v6903_v56 = vld [vmem:[#allocation2 + $0x4c] sm:$0xf]  ;;  %v6904_v60 = vld [vmem:[#allocation2 + $0x50] sm:$0x1]  ;;  %v7237_v39 = vor.u32 %v7907_v18, %v7234_v23  ;;  %v9607_v19 = vpop.f32.mrf.mxu2  ;;  %v9609_v44 = vpop.f32.mrf.mxu0 }
 0x25f   : > { %2979 = vst [vmem:[#allocation3 + $0x18] sm:$0xf] %v6810_v17  ;;  %v6813_v2 = vld [vmem:[#allocation2 + $0x28] sm:$0xf]  ;;  %v6942_v53 = vrot.slane %v6902_v7, 9  ;;  %v3633_v20 = vrot.slane %v6903_v56, 5 }
 0x260   : > { %3754 = vst [vmem:[#allocation3 + $0x11c] sm:$0xf] %v3630_v29  ;;  %v7969_v43 = vld [vmem:[#allocation3 + $0x404] sm:$0xf]  ;;  %v7478_v14 = vld [vmem:[#allocation3 + $0x424] sm:$0xf0] }
 0x261   : > { %2980 = vst [vmem:[#allocation3 + $0x3c] sm:$0xf] %v6811_v25  ;;  %v3634_v59 = vsel %vm8740_vm15, %v6942_v53, %v3633_v20  ;;  %v3635_v26 = vrot.slane %v3633_v20, 4  ;;  %v3636_v17 = vrot.slane %v6904_v60, 5  ;;  %v6869_v47 = vld [vmem:[#allocation2 + $0x84] sm:$0xf] }
 0x262   : > { %10540 = vst [vmem:[#allocation50_spill] sm:$0xff] %v9603_v63  ;;  %5917 = vmatmul.bf16.gmra.mxu0 %v7237_v39  ;;  %v6870_v4 = vld [vmem:[#allocation2 + $0x88] sm:$0xf]  ;;  %v6871_v32 = vld [vmem:[#allocation2 + $0x8c] sm:$0x1]  ;;  %v3276_v7 = vshrl.u32 %v6869_v47, 16 }
 0x263   : > { %2981 = vst [vmem:[#allocation3 + $0x60] sm:$0xf] %v6812_v38  ;;  %v7909_v5 = vld [vmem:[#allocation3 + $0x220] sm:$0xf0]  ;;  %v7512_v23 = vld [vmem:[#allocation3 + $0x448] sm:$0xf]  ;;  %v7481_v38 = vor.u32 %v7969_v43, %v7478_v14  ;;  %v3637_v60 = vsel %vm8740_vm15, %v3635_v26, %v3636_v17 }
 0x264   : > { %2982 = vst [vmem:[#allocation3 + $0x84] sm:$0xf] %v6813_v2  ;;  %v7982_v29 = vld [vmem:[#allocation3 + $0x468] sm:$0xf0]  ;;  %v3279_v25 = vshll.u32 %v6869_v47, 16  ;;  %v3285_v48 = vshll.u32 %v6870_v4, 16 }
 0x265   : > { %10541 = vst [vmem:[#allocation51_spill] sm:$0xff] %v9607_v19  ;;  %v3289_v18 = vshrl.u32 %v6870_v4, 16  ;;  %v3295_v56 = vshll.u32 %v6871_v32, 16  ;;  %v6814_v2 = vld [vmem:[#allocation2 + $0x30] sm:$0xf]  ;;  %v5421_v39 = vpop.f32.mrf.mxu3  ;;  %v3278_v53 = vrot.slane %v3276_v7, 4  ;;  %v7513_v14 = vor.u32 %v7982_v29, %v7512_v23  ;;  %v9616_v7 = vpop.f32.mrf.mxu1 }
 0x266   : > { %10542 = vst [vmem:[#allocation52_spill] sm:$0xff] %v9609_v44  ;;  %v3281_v20 = vrot.slane %v3279_v25, 5  ;;  %v3287_v49 = vrot.slane %v3285_v48, 5  ;;  %v9614_v44 = vadd.f32 %v5421_v39, %v9451_v36  ;;  %v7216_v47 = vld [vmem:[#allocation3 + $0x200] sm:$0xf]  ;;  %v9622_v29 = vpop.f32.mrf.mxu2 }
 0x267   : > { %3755 = vst [vmem:[#allocation3 + $0x140] sm:$0xf] %v3634_v59  ;;  %v3291_v63 = vrot.slane %v3289_v18, 4  ;;  %v7217_v43 = vor.u32 %v7909_v5, %v7216_v47  ;;  %v6815_v32 = vld [vmem:[#allocation2 + $0x34] sm:$0xf]  ;;  %v3297_v17 = vrot.slane %v3295_v56, 5  ;;  %v9624_v56 = vpop.f32.mrf.mxu0 }
 0x268   : > { %3756 = vst [vmem:[#allocation3 + $0x164] sm:$0xf] %v3637_v60  ;;  %5774 = vmatmul.bf16.gmra.mxu2 %v7481_v38  ;;  %v3282_v13 = vor.u32 %v3281_v20, %v3278_v53  ;;  %v1859_v25 = vld [vmem:[#allocation2 + $0x6c] sm:$0xe]  ;;  %v1860_v48 = vld [vmem:[#allocation2 + $0x70] sm:$0xf] }
 0x269   : > { %v3292_v4 = vor.u32 %v3291_v63, %v3287_v49  ;;  %2983 = vst [vmem:[#allocation3 + $0xa8] sm:$0xf] %v6814_v2  ;;  %v1861_v36 = vld [vmem:[#allocation2 + $0x74] sm:$0x1]  ;;  %v6659_v5 = vrot.slane %v1859_v25, 9  ;;  %v1996_v23 = vrot.slane %v1860_v48, 5 }
 0x26a   : > { %v3283_v26 = vrot.slane %v3282_v13, 4  ;;  %2984 = vst [vmem:[#allocation3 + $0xcc] sm:$0xf] %v6815_v32  ;;  %v7916_v13 = vld [vmem:[#allocation3 + $0x25c] sm:$0xf]  ;;  %v1999_v53 = vrot.slane %v1861_v36, 5 }
 0x26b   : > { %v3293_v59 = vrot.slane %v3292_v4, 4  ;;  %10543 = vst [vmem:[#allocation53_spill] sm:$0xff] %v9616_v7  ;;  %v7270_v38 = vld [vmem:[#allocation3 + $0x27c] sm:$0xf0]  ;;  %v1997_v2 = vsel %vm8740_vm15, %v6659_v5, %v1996_v23  ;;  %v1998_v39 = vrot.slane %v1996_v23, 4 }
 0x26c   : > { %5472 = vmatmul.bf16.gmra.mxu3 %v7217_v43  ;;  %5690 = vmatmul.bf16.gmra.mxu1 %v7513_v14  ;;  %v3288_v18 = vsel %vm8454_vm8, %v3283_v26, %v3287_v49  ;;  %10544 = vst [vmem:[#allocation54_spill] sm:$0xff] %v9622_v29  ;;  %v6905_v49 = vld [vmem:[#allocation2 + $0x54] sm:$0xe]  ;;  %v6906_v47 = vld [vmem:[#allocation2 + $0x58] sm:$0xf]  ;;  %v7273_v43 = vor.u32 %v7916_v13, %v7270_v38 }
 0x26d   : > { %v3298_v63 = vsel %vm8454_vm8, %v3293_v59, %v3297_v17  ;;  %3493 = vst [vmem:[#allocation3 + $0x2a4] sm:$0xf] %v3288_v18  ;;  %v5424_v60 = vpop.f32.mrf.mxu3  ;;  %v6907_v4 = vld [vmem:[#allocation2 + $0x5c] sm:$0x1]  ;;  %v2000_v14 = vsel %vm8740_vm15, %v1998_v39, %v1999_v53  ;;  %v3640_v32 = vrot.slane %v6906_v47, 5  ;;  %v6943_v17 = vrot.slane %v6905_v49, 9 }
 0x26e   : > { %10545 = vst [vmem:[#allocation55_spill] sm:$0xff] %v9624_v56  ;;  %v9629_v20 = vadd.f32 %v5424_v60, %v9472_v62  ;;  %v6816_v26 = vld [vmem:[#allocation2 + $0x3c] sm:$0xf]  ;;  %v7978_v59 = vld [vmem:[#allocation3 + $0x44c] sm:$0xf]  ;;  %v3643_v36 = vrot.slane %v6907_v4, 5 }
 0x26f   : > { %3494 = vst [vmem:[#allocation3 + $0x2c8] sm:$0xf] %v3298_v63  ;;  %v7514_v25 = vld [vmem:[#allocation3 + $0x46c] sm:$0xf0]  ;;  %v3642_v48 = vrot.slane %v3640_v32, 4  ;;  %v3641_v5 = vsel %vm8740_vm15, %v6943_v17, %v3640_v32  ;;  %v9647_v56 = vpop.f32.mrf.mxu0 }
 0x270   : > { %2093 = vst [vmem:[#allocation3 + $0x290] sm:$0xf] %v1997_v2  ;;  %v6872_v18 = vld [vmem:[#allocation2 + $0x90] sm:$0xf]  ;;  %v6873_v62 = vld [vmem:[#allocation2 + $0x94] sm:$0xf]  ;;  %v9635_v2 = vpop.f32.mrf.mxu1  ;;  %v7517_v39 = vor.u32 %v7978_v59, %v7514_v25  ;;  %v9645_v25 = vpop.f32.mrf.mxu2 }
 0x271   : > { %2094 = vst [vmem:[#allocation3 + $0x2b4] sm:$0xf] %v2000_v14  ;;  %v6874_v63 = vld [vmem:[#allocation2 + $0x98] sm:$0x1]  ;;  %v3300_v23 = vshrl.u32 %v6872_v18, 16  ;;  %v3303_v13 = vshll.u32 %v6872_v18, 16  ;;  %v3644_v47 = vsel %vm8740_vm15, %v3642_v48, %v3643_v36 }
 0x272   : > { %5922 = vmatmul.bf16.gmra.mxu0 %v7273_v43  ;;  %2985 = vst [vmem:[#allocation3 + $0xf0] sm:$0xf] %v6816_v26  ;;  %v3309_v38 = vshll.u32 %v6873_v62, 16  ;;  %v3313_v60 = vshrl.u32 %v6873_v62, 16  ;;  %v7918_v53 = vld [vmem:[#allocation3 + $0x268] sm:$0xf0] }
 0x273   : > { %10546 = vst [vmem:[#allocation56_spill] sm:$0xff] %v9635_v2  ;;  %v6172_v49 = vld [vmem:[%s10471_s7] sm:$0x3]  ;;  %v7849_v43 = vld [vmem:[#allocation3 + $0x40] sm:$0xf0]  ;;  %v3302_v14 = vrot.slane %v3300_v23, 4 }
 0x274   : > { %v3305_v32 = vrot.slane %v3303_v13, 5  ;;  %v3311_v26 = vrot.slane %v3309_v38, 5  ;;  %v3319_v17 = vshll.u32 %v6874_v63, 16  ;;  %v3315_v62 = vrot.slane %v3313_v60, 4  ;;  %3757 = vst [vmem:[#allocation3 + $0x188] sm:$0xf] %v3641_v5 }
 0x275   : > { %v5426_v4 = vpop.f32.mrf.mxu3  ;;  %v6224_v59 = vsel %vm6222_vm1, %v6172_v49, 0  ;;  %10547 = vst [vmem:[#allocation57_spill] sm:$0xff] %v9645_v25  ;;  %v7252_v2 = vld [vmem:[#allocation3 + $0x248] sm:$0xf]  ;;  %v6988_v7 = vld [vmem:[#allocation3 + $0x20] sm:$0xf] }
 0x276   : > { %v9643_v18 = vadd.f32 %v5426_v4, %v9494_v40  ;;  %10548 = vst [vmem:[#allocation58_spill] sm:$0xff] %v9647_v56  ;;  %v3306_v48 = vor.u32 %v3305_v32, %v3302_v14  ;;  %v7253_v36 = vor.u32 %v7918_v53, %v7252_v2  ;;  %v6989_v23 = vor.u32 %v7849_v43, %v6988_v7  ;;  %v6817_v63 = vld [vmem:[#allocation2 + $0x40] sm:$0xf]  ;;  %v1862_v60 = vld [vmem:[#allocation2 + $0x78] sm:$0xe] }
 0x277   : > { %3758 = vst [vmem:[#allocation3 + $0x1ac] sm:$0xf] %v3644_v47  ;;  %v3316_v13 = vor.u32 %v3315_v62, %v3311_v26  ;;  %6233 = vmatpush.bf16.msra.mxu2 %v6224_v59  ;;  %v3321_v40 = vrot.slane %v3319_v17, 5  ;;  %v1863_v49 = vld [vmem:[#allocation2 + $0x7c] sm:$0xf]  ;;  %v6660_v7 = vrot.slane %v1862_v60, 9 }
 0x278   : > { %5779 = vmatmul.bf16.gmra.mxu2 %v7517_v39  ;;  %v3307_v38 = vrot.slane %v3306_v48, 4  ;;  %2986 = vst [vmem:[#allocation3 + $0x114] sm:$0xf] %v6817_v63  ;;  %v8035_v39 = vld [vmem:[%s10468_s4 + $0x190] sm:$0xff]  ;;  %v1864_v2 = vld [vmem:[#allocation2 + $0x80] sm:$0x1]  ;;  %v9658_v48 = vpop.f32.mrf.mxu1 }
 0x279   : > { %v3317_v5 = vrot.slane %v3316_v13, 4  ;;  %v2003_v53 = vrot.slane %v1863_v49, 5  ;;  %v7306_v4 = vld [vmem:[#allocation3 + $0x2c4] sm:$0xf0]  ;;  %5790 = vmatpush.bf16.msra.mxu3 %v8035_v39  ;;  %v2006_v59 = vrot.slane %v1864_v2, 5  ;;  %10549 = vst [vmem:[#allocation59_spill] sm:$0xff] %v9658_v48  ;;  %v9665_v49 = vpop.f32.mrf.mxu0 }
 0x27a   : > { %v3312_v47 = vsel %vm8454_vm8, %v3307_v38, %v3311_v26  ;;  %v6908_v14 = vld [vmem:[#allocation2 + $0x60] sm:$0xe]  ;;  %v6910_v38 = vld [vmem:[#allocation2 + $0x68] sm:$0x1]  ;;  %10550 = vst [vmem:[#allocation60_spill] sm:$0xff] %v9665_v49 }
 0x27b   : > { %v3322_v43 = vsel %vm8454_vm8, %v3317_v5, %v3321_v40  ;;  %3495 = vst [vmem:[#allocation3 + $0x2ec] sm:$0xf] %v3312_v47  ;;  %v2004_v17 = vsel %vm8740_vm15, %v6660_v7, %v2003_v53  ;;  %v2005_v62 = vrot.slane %v2003_v53, 4  ;;  %v6944_v40 = vrot.slane %v6908_v14, 9  ;;  %v6818_v60 = vld [vmem:[#allocation2 + $0x48] sm:$0xf] }
 0x27c   : > { %5477 = vmatmul.bf16.gmra.mxu3 %v7253_v36  ;;  %5971 = vmatmul.bf16.vlgmr.msra.gmra.mxu1 %v6989_v23  ;;  %3496 = vst [vmem:[#allocation3 + $0x310] sm:$0xf] %v3322_v43  ;;  %v7925_v36 = vld [vmem:[#allocation3 + $0x2a4] sm:$0xf]  ;;  %v6909_v23 = vld [vmem:[#allocation2 + $0x64] sm:$0xf] }
 0x27d   : > { %v5438_v32 = vpop.f32.mrf.mxu3  ;;  %2095 = vst [vmem:[#allocation3 + $0x2d8] sm:$0xf] %v2004_v17  ;;  %v7309_v13 = vor.u32 %v7925_v36, %v7306_v4  ;;  %v2007_v63 = vsel %vm8740_vm15, %v2005_v62, %v2006_v59  ;;  %v3647_v5 = vrot.slane %v6909_v23, 5  ;;  %v6875_v47 = vld [vmem:[#allocation2 + $0x9c] sm:$0xf]  ;;  %v3650_v7 = vrot.slane %v6910_v38, 5 }
 0x27e   : > { %v9661_v26 = vadd.f32 %v5438_v32, %v8761_v21  ;;  %2096 = vst [vmem:[#allocation3 + $0x2fc] sm:$0xf] %v2007_v63  ;;  %v6876_v2 = vld [vmem:[#allocation2 + $0xa0] sm:$0xf]  ;;  %v6877_v53 = vld [vmem:[#allocation2 + $0xa4] sm:$0x1] }
 0x27f   : > { %v3648_v39 = vsel %vm8740_vm15, %v6944_v40, %v3647_v5  ;;  %v3649_v21 = vrot.slane %v3647_v5, 4  ;;  %2987 = vst [vmem:[#allocation3 + $0x138] sm:$0xf] %v6818_v60  ;;  %v3324_v4 = vshrl.u32 %v6875_v47, 16  ;;  %v3327_v43 = vshll.u32 %v6875_v47, 16 }
 0x280   : > { %v3333_v32 = vshll.u32 %v6876_v2, 16  ;;  %v3337_v17 = vshrl.u32 %v6876_v2, 16  ;;  %v7858_v14 = vld [vmem:[#allocation3 + $0x88] sm:$0xf0]  ;;  %3759 = vst [vmem:[#allocation3 + $0x1d0] sm:$0xf] %v3648_v39  ;;  %v9673_v56 = vpop.f32.mrf.mxu1 }
 0x281   : > { %v3651_v62 = vsel %vm8740_vm15, %v3649_v21, %v3650_v7  ;;  %v7927_v36 = vld [vmem:[#allocation3 + $0x2b0] sm:$0xf0]  ;;  %v3326_v23 = vrot.slane %v3324_v4, 4  ;;  %v3343_v5 = vshll.u32 %v6877_v53, 16  ;;  %v7288_v38 = vld [vmem:[#allocation3 + $0x290] sm:$0xf] }
 0x282   : > { %5927 = vmatmul.bf16.gmra.mxu0 %v7309_v13  ;;  %v3329_v13 = vrot.slane %v3327_v43, 5  ;;  %v3335_v63 = vrot.slane %v3333_v32, 5  ;;  %v3339_v40 = vrot.slane %v3337_v17, 4  ;;  %3760 = vst [vmem:[#allocation3 + $0x1f4] sm:$0xf] %v3651_v62  ;;  %v7289_v2 = vor.u32 %v7927_v36, %v7288_v38  ;;  %v9675_v32 = vpop.f32.mrf.mxu0 }
 0x283   : > { %v7024_v60 = vld [vmem:[#allocation3 + $0x68] sm:$0xf]  ;;  %v6819_v47 = vld [vmem:[#allocation2 + $0x4c] sm:$0xf]  ;;  %10551 = vst [vmem:[#allocation61_spill] sm:$0xff] %v9673_v56  ;;  %v3345_v7 = vrot.slane %v3343_v5, 5 }
 0x284   : > { %v3330_v49 = vor.u32 %v3329_v13, %v3326_v23  ;;  %v7025_v48 = vor.u32 %v7858_v14, %v7024_v60  ;;  %v3340_v25 = vor.u32 %v3339_v40, %v3335_v63  ;;  %2988 = vst [vmem:[#allocation3 + $0x15c] sm:$0xf] %v6819_v47  ;;  %v1865_v4 = vld [vmem:[#allocation2 + $0x84] sm:$0xe]  ;;  %v1866_v43 = vld [vmem:[#allocation2 + $0x88] sm:$0xf] }
 0x285   : > { %v9671_v59 = vpop.f32.mrf.mxu3  ;;  %10552 = vst [vmem:[#allocation62_spill] sm:$0xff] %v9675_v32  ;;  %v1867_v17 = vld [vmem:[#allocation2 + $0x8c] sm:$0x1]  ;;  %v6661_v62 = vrot.slane %v1865_v4, 9  ;;  %v2010_v23 = vrot.slane %v1866_v43, 5 }
 0x286   : > { %v3331_v39 = vrot.slane %v3330_v49, 4  ;;  %v3341_v21 = vrot.slane %v3340_v25, 4  ;;  %v7342_v13 = vld [vmem:[#allocation3 + $0x30c] sm:$0xf0]  ;;  %v6911_v49 = vld [vmem:[#allocation2 + $0x6c] sm:$0xe] }
 0x287   : > { %v2011_v25 = vsel %vm8740_vm15, %v6661_v62, %v2010_v23  ;;  %v2012_v40 = vrot.slane %v2010_v23, 4  ;;  %v2013_v5 = vrot.slane %v1867_v17, 5  ;;  %v6913_v60 = vld [vmem:[#allocation2 + $0x74] sm:$0x1]  ;;  %v6878_v17 = vld [vmem:[#allocation2 + $0xa8] sm:$0xf] }
 0x288   : > { %v3336_v53 = vsel %vm8454_vm8, %v3331_v39, %v3335_v63  ;;  %v3346_v14 = vsel %vm8454_vm8, %v3341_v21, %v3345_v7  ;;  %2097 = vst [vmem:[#allocation3 + $0x320] sm:$0xf] %v2011_v25  ;;  %v6912_v63 = vld [vmem:[#allocation2 + $0x70] sm:$0xf]  ;;  %v6945_v39 = vrot.slane %v6911_v49, 9 }
 0x289   : > { %3497 = vst [vmem:[#allocation3 + $0x334] sm:$0xf] %v3336_v53  ;;  %v3654_v21 = vrot.slane %v6912_v63, 5  ;;  %v6820_v7 = vld [vmem:[#allocation2 + $0x54] sm:$0xf]  ;;  %v3657_v53 = vrot.slane %v6913_v60, 5 }
 0x28a   : > { %3498 = vst [vmem:[#allocation3 + $0x358] sm:$0xf] %v3346_v14  ;;  %v6879_v62 = vld [vmem:[#allocation2 + $0xac] sm:$0xf]  ;;  %v6880_v23 = vld [vmem:[#allocation2 + $0xb0] sm:$0x1] }
 0x28b   : > { %v3655_v4 = vsel %vm8740_vm15, %v6945_v39, %v3654_v21  ;;  %v3656_v43 = vrot.slane %v3654_v21, 4  ;;  %2989 = vst [vmem:[#allocation3 + $0x180] sm:$0xf] %v6820_v7  ;;  %v3351_v14 = vshll.u32 %v6878_v17, 16  ;;  %v7867_v49 = vld [vmem:[#allocation3 + $0xd0] sm:$0xf0] }
 0x28c   : > { %5482 = vmatmul.bf16.gmra.mxu3 %v7289_v2  ;;  %5976 = vmatmul.bf16.gmra.mxu1 %v7025_v48  ;;  %v7934_v48 = vld [vmem:[#allocation3 + $0x2ec] sm:$0xf]  ;;  %v2014_v2 = vsel %vm8740_vm15, %v2012_v40, %v2013_v5  ;;  %v3367_v25 = vshll.u32 %v6880_v23, 16  ;;  %3761 = vst [vmem:[#allocation3 + $0x218] sm:$0xf] %v3655_v4  ;;  %v9694_v5 = vpop.f32.mrf.mxu0 }
 0x28d   : > { %v5443_v36 = vpop.f32.mrf.mxu3  ;;  %v7345_v47 = vor.u32 %v7934_v48, %v7342_v13  ;;  %2098 = vst [vmem:[#allocation3 + $0x344] sm:$0xf] %v2014_v2  ;;  %v3348_v13 = vshrl.u32 %v6878_v17, 16  ;;  %v3361_v48 = vshrl.u32 %v6879_v62, 16  ;;  %v3658_v40 = vsel %vm8740_vm15, %v3656_v43, %v3657_v53  ;;  %v7936_v60 = vld [vmem:[#allocation3 + $0x2f8] sm:$0xf0] }
 0x28e   : > { %v9684_v38 = vadd.f32 %v5443_v36, %v8867_v57  ;;  %v9690_v57 = vpop.f32.mrf.mxu1  ;;  %v3357_v36 = vshll.u32 %v6879_v62, 16  ;;  %10554 = vst [vmem:[#allocation64_spill] sm:$0xff] %v9694_v5  ;;  %v3353_v2 = vrot.slane %v3351_v14, 5  ;;  %v6821_v17 = vld [vmem:[#allocation2 + $0x58] sm:$0xf]  ;;  %v3369_v53 = vrot.slane %v3367_v25, 5 }
 0x28f   : > { %10553 = vst [vmem:[#allocation63_spill] sm:$0xff] %v9690_v57  ;;  %v3363_v7 = vrot.slane %v3361_v48, 4  ;;  %v7324_v62 = vld [vmem:[#allocation3 + $0x2d8] sm:$0xf]  ;;  %v7060_v32 = vld [vmem:[#allocation3 + $0xb0] sm:$0xf] }
 0x290   : > { %v3359_v39 = vrot.slane %v3357_v36, 5  ;;  %3762 = vst [vmem:[#allocation3 + $0x23c] sm:$0xf] %v3658_v40  ;;  %v7325_v57 = vor.u32 %v7936_v60, %v7324_v62  ;;  %v7061_v43 = vor.u32 %v7867_v49, %v7060_v32  ;;  %v1868_v14 = vld [vmem:[#allocation2 + $0x90] sm:$0xe] }
 0x291   : > { %2990 = vst [vmem:[#allocation3 + $0x1a4] sm:$0xf] %v6821_v17  ;;  %v1869_v36 = vld [vmem:[#allocation2 + $0x94] sm:$0xf]  ;;  %v1870_v40 = vld [vmem:[#allocation2 + $0x98] sm:$0x1] }
 0x292   : > { %5932 = vmatmul.bf16.gmra.mxu0 %v7345_v47  ;;  %v3350_v47 = vrot.slane %v3348_v13, 4  ;;  %v3364_v4 = vor.u32 %v3363_v7, %v3359_v39  ;;  %v7378_v32 = vld [vmem:[#allocation3 + $0x354] sm:$0xf0]  ;;  %v2020_v7 = vrot.slane %v1870_v40, 5  ;;  %v6822_v17 = vld [vmem:[#allocation2 + $0x60] sm:$0xf] }
 0x293   : > { %2991 = vst [vmem:[#allocation3 + $0x1c8] sm:$0xf] %v6822_v17  ;;  %v7360_v17 = vld [vmem:[#allocation3 + $0x320] sm:$0xf] }
 0x294   : > { %v3354_v23 = vor.u32 %v3353_v2, %v3350_v47  ;;  %v3365_v13 = vrot.slane %v3364_v4, 4  ;;  %v2017_v47 = vrot.slane %v1869_v36, 5  ;;  %v9713_v62 = vpop.f32.mrf.mxu0  ;;  %v6881_v4 = vld [vmem:[#allocation2 + $0xb4] sm:$0xf] }
 0x295   : > { %v5445_v63 = vpop.f32.mrf.mxu3  ;;  %v3375_v36 = vshll.u32 %v6881_v4, 16 }
 0x296   : > { %v9697_v21 = vadd.f32 %v5445_v63, %v8911_v22  ;;  %v3355_v5 = vrot.slane %v3354_v23, 4  ;;  %v8034_v22 = vld [vmem:[%s10468_s4 + $0x188] sm:$0xff]  ;;  %v6662_v63 = vrot.slane %v1868_v14, 9  ;;  %v9704_v60 = vpop.f32.mrf.mxu1  ;;  %v2019_v2 = vrot.slane %v2017_v47, 4 }
 0x297   : > { %10555 = vst [vmem:[#allocation65_spill] sm:$0xff] %v9704_v60  ;;  %5791 = vmatpush.bf16.msra.mxu3 %v8034_v22  ;;  %v3372_v14 = vshrl.u32 %v6881_v4, 16 }
 0x298   : > { %v3360_v48 = vsel %vm8454_vm8, %v3355_v5, %v3359_v39  ;;  %v2018_v25 = vsel %vm8740_vm15, %v6662_v63, %v2017_v47  ;;  %v7943_v39 = vld [vmem:[#allocation3 + $0x334] sm:$0xf]  ;;  %v7945_v47 = vld [vmem:[#allocation3 + $0x340] sm:$0xf0] }
 0x299   : > { %3499 = vst [vmem:[#allocation3 + $0x37c] sm:$0xf] %v3360_v48  ;;  %v7381_v23 = vor.u32 %v7943_v39, %v7378_v32  ;;  %v7876_v48 = vld [vmem:[#allocation3 + $0x118] sm:$0xf0]  ;;  %v6823_v39 = vld [vmem:[#allocation2 + $0x64] sm:$0xf]  ;;  %v7361_v4 = vor.u32 %v7945_v47, %v7360_v17 }
 0x29a   : > { %2099 = vst [vmem:[#allocation3 + $0x368] sm:$0xf] %v2018_v25 }
 0x29b   : > { %2992 = vst [vmem:[#allocation3 + $0x1ec] sm:$0xf] %v6823_v39 }
 0x29c   : > { %5487 = vmatmul.bf16.gmra.mxu3 %v7325_v57  ;;  %5981 = vmatmul.bf16.gmra.mxu1 %v7061_v43  ;;  %v3370_v57 = vsel %vm8454_vm8, %v3365_v13, %v3369_v53  ;;  %v2021_v43 = vsel %vm8740_vm15, %v2019_v2, %v2020_v7  ;;  %v6882_v53 = vld [vmem:[#allocation2 + $0xb8] sm:$0xf]  ;;  %v6883_v13 = vld [vmem:[#allocation2 + $0xbc] sm:$0x1]  ;;  %v9722_v56 = vpop.f32.mrf.mxu0 }
 0x29d   : > { %v5448_v49 = vpop.f32.mrf.mxu3  ;;  %3500 = vst [vmem:[#allocation3 + $0x3a0] sm:$0xf] %v3370_v57  ;;  %v3381_v22 = vshll.u32 %v6882_v53, 16  ;;  %v3391_v40 = vshll.u32 %v6883_v13, 16  ;;  %v3374_v57 = vrot.slane %v3372_v14, 4 }
 0x29e   : > { %v9711_v5 = vadd.f32 %v5448_v49, %v8970_v33  ;;  %2100 = vst [vmem:[#allocation3 + $0x38c] sm:$0xf] %v2021_v43  ;;  %v3385_v33 = vshrl.u32 %v6882_v53, 16  ;;  %v3377_v49 = vrot.slane %v3375_v36, 5  ;;  %v9717_v25 = vpop.f32.mrf.mxu1 }
 0x29f   : > { %v3383_v32 = vrot.slane %v3381_v22, 5  ;;  %10556 = vst [vmem:[#allocation66_spill] sm:$0xff] %v9717_v25  ;;  %v3393_v13 = vrot.slane %v3391_v40, 5  ;;  %v1871_v22 = vld [vmem:[#allocation2 + $0x9c] sm:$0xe] }
 0x2a0   : > { %v3387_v7 = vrot.slane %v3385_v33, 4  ;;  %v3378_v43 = vor.u32 %v3377_v49, %v3374_v57  ;;  %v1872_v25 = vld [vmem:[#allocation2 + $0xa0] sm:$0xf]  ;;  %v1873_v33 = vld [vmem:[#allocation2 + $0xa4] sm:$0x1] }
 0x2a1   : > { %v2024_v29 = vrot.slane %v1872_v25, 5  ;;  %v7952_v57 = vld [vmem:[#allocation3 + $0x37c] sm:$0xf] }
 0x2a2   : > { %5937 = vmatmul.bf16.gmra.mxu0 %v7381_v23  ;;  %v7096_v23 = vld [vmem:[#allocation3 + $0xf8] sm:$0xf]  ;;  %v3388_v60 = vor.u32 %v3387_v7, %v3383_v32  ;;  %v3379_v14 = vrot.slane %v3378_v43, 4  ;;  %v2027_v7 = vrot.slane %v1873_v33, 5  ;;  %v6884_v43 = vld [vmem:[#allocation2 + $0xc0] sm:$0xf] }
 0x2a3   : > { %v7097_v53 = vor.u32 %v7876_v48, %v7096_v23 }
 0x2a4   : > { %v3389_v36 = vrot.slane %v3388_v60, 4  ;;  %v7414_v49 = vld [vmem:[#allocation3 + $0x39c] sm:$0xf0]  ;;  %v2026_v60 = vrot.slane %v2024_v29, 4 }
 0x2a5   : > { %v5450_v63 = vpop.f32.mrf.mxu3  ;;  %v7417_v17 = vor.u32 %v7952_v57, %v7414_v49 }
 0x2a6   : > { %v9720_v2 = vadd.f32 %v5450_v63, %v8997_v55  ;;  %v3384_v55 = vsel %vm8454_vm8, %v3379_v14, %v3383_v32  ;;  %v6663_v63 = vrot.slane %v1871_v22, 9  ;;  %v3394_v48 = vsel %vm8454_vm8, %v3389_v36, %v3393_v13  ;;  %v6824_v32 = vld [vmem:[#allocation2 + $0x6c] sm:$0xf]  ;;  %v9735_v23 = vpop.f32.mrf.mxu1  ;;  %v9737_v13 = vpop.f32.mrf.mxu0  ;;  %v7885_v22 = vld [vmem:[#allocation3 + $0x160] sm:$0xf0] }
 0x2a7   : > { %3501 = vst [vmem:[#allocation3 + $0x3c4] sm:$0xf] %v3384_v55  ;;  %v2028_v25 = vsel %vm8740_vm15, %v2026_v60, %v2027_v7  ;;  %v3399_v14 = vshll.u32 %v6884_v43, 16  ;;  %v6825_v60 = vld [vmem:[#allocation2 + $0x70] sm:$0xf] }
 0x2a8   : > { %3502 = vst [vmem:[#allocation3 + $0x3e8] sm:$0xf] %v3394_v48  ;;  %v2025_v47 = vsel %vm8740_vm15, %v6663_v63, %v2024_v29  ;;  %v3396_v29 = vshrl.u32 %v6884_v43, 16  ;;  %v7954_v63 = vld [vmem:[#allocation3 + $0x388] sm:$0xf0] }
 0x2a9   : > { %2101 = vst [vmem:[#allocation3 + $0x3b0] sm:$0xf] %v2025_v47  ;;  %v3401_v49 = vrot.slane %v3399_v14, 5  ;;  %v7396_v7 = vld [vmem:[#allocation3 + $0x368] sm:$0xf] }
 0x2aa   : > { %2993 = vst [vmem:[#allocation3 + $0x210] sm:$0xf] %v6824_v32  ;;  %v3398_v57 = vrot.slane %v3396_v29, 4  ;;  %v7132_v32 = vld [vmem:[#allocation3 + $0x140] sm:$0xf] }
 0x2ab   : > { %10557 = vst [vmem:[#allocation67_spill] sm:$0xff] %v9735_v23  ;;  %v7133_v43 = vor.u32 %v7885_v22, %v7132_v32  ;;  %v1874_v14 = vld [vmem:[#allocation2 + $0xa8] sm:$0xe] }
 0x2ac   : > { %5492 = vmatmul.bf16.gmra.mxu3 %v7361_v4  ;;  %5986 = vmatmul.bf16.gmra.mxu1 %v7097_v53  ;;  %2102 = vst [vmem:[#allocation3 + $0x3d4] sm:$0xf] %v2028_v25  ;;  %v6885_v4 = vld [vmem:[#allocation2 + $0xc4] sm:$0xf]  ;;  %v6886_v53 = vld [vmem:[#allocation2 + $0xc8] sm:$0x1]  ;;  %v7397_v25 = vor.u32 %v7954_v63, %v7396_v7 }
 0x2ad   : > { %v5453_v40 = vpop.f32.mrf.mxu3  ;;  %v3409_v36 = vshrl.u32 %v6885_v4, 16  ;;  %v3415_v55 = vshll.u32 %v6886_v53, 16  ;;  %2994 = vst [vmem:[#allocation3 + $0x234] sm:$0xf] %v6825_v60  ;;  %v1876_v63 = vld [vmem:[#allocation2 + $0xb0] sm:$0x1] }
 0x2ae   : > { %v9731_v39 = vadd.f32 %v5453_v40, %v9013_v42  ;;  %v3405_v42 = vshll.u32 %v6885_v4, 16  ;;  %v9742_v53 = vpop.f32.mrf.mxu1  ;;  %v6664_v22 = vrot.slane %v1874_v14, 9 }
 0x2af   : > { %v3411_v47 = vrot.slane %v3409_v36, 4  ;;  %v3417_v4 = vrot.slane %v3415_v55, 5  ;;  %10558 = vst [vmem:[#allocation68_spill] sm:$0xff] %v9742_v53  ;;  %v7961_v36 = vld [vmem:[#allocation3 + $0x3c4] sm:$0xf] }
 0x2b0   : > { %v3407_v48 = vrot.slane %v3405_v42, 5  ;;  %v1875_v42 = vld [vmem:[#allocation2 + $0xac] sm:$0xf]  ;;  %v7450_v55 = vld [vmem:[#allocation3 + $0x3e4] sm:$0xf0] }
 0x2b2   : > { %5942 = vmatmul.bf16.gmra.mxu0 %v7417_v17  ;;  %v3402_v17 = vor.u32 %v3401_v49, %v3398_v57  ;;  %v3412_v23 = vor.u32 %v3411_v47, %v3407_v48  ;;  %v2031_v57 = vrot.slane %v1875_v42, 5  ;;  %v2034_v47 = vrot.slane %v1876_v63, 5  ;;  %v7168_v42 = vld [vmem:[#allocation3 + $0x188] sm:$0xf] }
 0x2b3   : > { %v7963_v14 = vld [vmem:[#allocation3 + $0x3d0] sm:$0xf0]  ;;  %v6916_v63 = vld [vmem:[#allocation2 + $0x80] sm:$0x1] }
 0x2b4   : > { %v3403_v19 = vrot.slane %v3402_v17, 4  ;;  %v3413_v29 = vrot.slane %v3412_v23, 4  ;;  %v9751_v23 = vpop.f32.mrf.mxu0  ;;  %v2032_v7 = vsel %vm8740_vm15, %v6664_v22, %v2031_v57  ;;  %v2033_v32 = vrot.slane %v2031_v57, 4  ;;  %v7432_v57 = vld [vmem:[#allocation3 + $0x3b0] sm:$0xf] }
 0x2b5   : > { %v5455_v33 = vpop.f32.mrf.mxu3  ;;  %2103 = vst [vmem:[#allocation3 + $0x3f8] sm:$0xf] %v2032_v7 }
 0x2b6   : > { %v9740_v40 = vadd.f32 %v5455_v33, %v9026_v10  ;;  %v8033_v10 = vld [vmem:[%s10468_s4 + $0x180] sm:$0xff]  ;;  %v3408_v33 = vsel %vm8454_vm8, %v3403_v19, %v3407_v48  ;;  %v3418_v49 = vsel %vm8454_vm8, %v3413_v29, %v3417_v4  ;;  %v7453_v48 = vor.u32 %v7961_v36, %v7450_v55  ;;  %v6914_v4 = vld [vmem:[#allocation2 + $0x78] sm:$0xe]  ;;  %v6827_v36 = vld [vmem:[#allocation2 + $0x7c] sm:$0xf] }
 0x2b7   : > { %3503 = vst [vmem:[#allocation3 + $0x40c] sm:$0xf] %v3408_v33  ;;  %5792 = vmatpush.bf16.msra.mxu3 %v8033_v10  ;;  %v2035_v17 = vsel %vm8740_vm15, %v2033_v32, %v2034_v47  ;;  %v7894_v10 = vld [vmem:[#allocation3 + $0x1a8] sm:$0xf0]  ;;  %v6946_v55 = vrot.slane %v6914_v4, 9  ;;  %v7433_v47 = vor.u32 %v7963_v14, %v7432_v57 }
 0x2b8   : > { %3504 = vst [vmem:[#allocation3 + $0x430] sm:$0xf] %v3418_v49 }
 0x2b9   : > { %2104 = vst [vmem:[#allocation3 + $0x41c] sm:$0xf] %v2035_v17  ;;  %v1878_v17 = vld [vmem:[#allocation2 + $0xb8] sm:$0xf] }
 0x2ba   : > { %2996 = vst [vmem:[#allocation3 + $0x27c] sm:$0xf] %v6827_v36 }
 0x2bc   : > { %5497 = vmatmul.bf16.gmra.mxu3 %v7397_v25  ;;  %5991 = vmatmul.bf16.gmra.mxu1 %v7133_v43  ;;  %v6826_v25 = vld [vmem:[#allocation2 + $0x78] sm:$0xf]  ;;  %v9760_v43 = vpop.f32.mrf.mxu1  ;;  %v9765_v22 = vpop.f32.mrf.mxu0 }
 0x2bd   : > { %v5458_v60 = vpop.f32.mrf.mxu3  ;;  %2995 = vst [vmem:[#allocation3 + $0x258] sm:$0xf] %v6826_v25  ;;  %v1879_v25 = vld [vmem:[#allocation2 + $0xbc] sm:$0x1] }
 0x2be   : > { %v9756_v19 = vadd.f32 %v5458_v60, %v9035_v3  ;;  %10559 = vst [vmem:[#allocation69_spill] sm:$0xff] %v9760_v43  ;;  %v6915_v3 = vld [vmem:[#allocation2 + $0x7c] sm:$0xf]  ;;  %v7169_v60 = vor.u32 %v7894_v10, %v7168_v42  ;;  %v2038_v43 = vrot.slane %v1878_v17, 5  ;;  %v2041_v53 = vrot.slane %v1879_v25, 5 }
 0x2bf   : > { %v3661_v49 = vrot.slane %v6915_v3, 5  ;;  %v7970_v3 = vld [vmem:[#allocation3 + $0x40c] sm:$0xf]  ;;  %v7486_v14 = vld [vmem:[#allocation3 + $0x42c] sm:$0xf0] }
 0x2c0   : > { %v6919_v25 = vld [vmem:[#allocation2 + $0x8c] sm:$0x1] }
 0x2c1   : > { %v3662_v7 = vsel %vm8740_vm15, %v6946_v55, %v3661_v49  ;;  %v3663_v32 = vrot.slane %v3661_v49, 4  ;;  %v7489_v55 = vor.u32 %v7970_v3, %v7486_v14 }
 0x2c2   : > { %5947 = vmatmul.bf16.gmra.mxu0 %v7453_v48  ;;  %v3664_v48 = vrot.slane %v6916_v63, 5  ;;  %3763 = vst [vmem:[#allocation3 + $0x260] sm:$0xf] %v3662_v7  ;;  %v2040_v63 = vrot.slane %v2038_v43, 4  ;;  %v6917_v7 = vld [vmem:[#allocation2 + $0x84] sm:$0xe] }
 0x2c3   : > { %v6947_v3 = vrot.slane %v6917_v7, 9 }
 0x2c4   : > { %v3665_v4 = vsel %vm8740_vm15, %v3663_v32, %v3664_v48  ;;  %v9773_v36 = vpop.f32.mrf.mxu1  ;;  %v2042_v49 = vsel %vm8740_vm15, %v2040_v63, %v2041_v53  ;;  %v7468_v48 = vld [vmem:[#allocation3 + $0x3f8] sm:$0xf] }
 0x2c5   : > { %v5460_v29 = vpop.f32.mrf.mxu3  ;;  %3764 = vst [vmem:[#allocation3 + $0x284] sm:$0xf] %v3665_v4  ;;  %v7204_v4 = vld [vmem:[#allocation3 + $0x1d0] sm:$0xf] }
 0x2c6   : > { %v9763_v33 = vadd.f32 %v5460_v29, %v9052_v54  ;;  %v1877_v54 = vld [vmem:[#allocation2 + $0xb4] sm:$0xe]  ;;  %10560 = vst [vmem:[#allocation70_spill] sm:$0xff] %v9773_v36 }
 0x2c7   : > { %v6665_v29 = vrot.slane %v1877_v54, 9  ;;  %2106 = vst [vmem:[#allocation3 + $0x464] sm:$0xf] %v2042_v49  ;;  %v7903_v54 = vld [vmem:[#allocation3 + $0x1f0] sm:$0xf0]  ;;  %v3671_v49 = vrot.slane %v6919_v25, 5 }
 0x2c8   : > { %v7912_v25 = vld [vmem:[#allocation3 + $0x238] sm:$0xf0] }
 0x2c9   : > { %v2039_v10 = vsel %vm8740_vm15, %v6665_v29, %v2038_v43  ;;  %v7972_v43 = vld [vmem:[#allocation3 + $0x418] sm:$0xf0]  ;;  %v6829_v29 = vld [vmem:[#allocation2 + $0x88] sm:$0xf] }
 0x2ca   : > { %2105 = vst [vmem:[#allocation3 + $0x440] sm:$0xf] %v2039_v10  ;;  %v7205_v10 = vor.u32 %v7903_v54, %v7204_v4 }
 0x2cb   : > { %2998 = vst [vmem:[#allocation3 + $0x2c4] sm:$0xf] %v6829_v29 }
 0x2cc   : > { %5502 = vmatmul.bf16.gmra.mxu3 %v7433_v47  ;;  %5996 = vmatmul.bf16.gmra.mxu1 %v7169_v60  ;;  %v6828_v47 = vld [vmem:[#allocation2 + $0x84] sm:$0xf]  ;;  %v9780_v60 = vpop.f32.mrf.mxu0  ;;  %v9785_v14 = vpop.f32.mrf.mxu1 }
 0x2cd   : > { %2997 = vst [vmem:[#allocation3 + $0x2a0] sm:$0xf] %v6828_v47 }
 0x2ce   : > { %10561 = vst [vmem:[#allocation71_spill] sm:$0xff] %v9785_v14  ;;  %v7981_v29 = vld [vmem:[#allocation3 + $0x460] sm:$0xf0]  ;;  %v6926_v14 = vld [vmem:[#allocation2 + $0xa8] sm:$0xe] }
 0x2cf   : > { %v5463_v42 = vpop.f32.mrf.mxu3 }
 0x2d0   : > { %v9776_v57 = vadd.f32 %v5463_v42, %v9068_v51  ;;  %v6918_v51 = vld [vmem:[#allocation2 + $0x88] sm:$0xf]  ;;  %v7469_v42 = vor.u32 %v7972_v43, %v7468_v48  ;;  %v6920_v43 = vld [vmem:[#allocation2 + $0x90] sm:$0xe] }
 0x2d1   : > { %v3668_v53 = vrot.slane %v6918_v51, 5  ;;  %v7504_v51 = vld [vmem:[#allocation3 + $0x440] sm:$0xf] }
 0x2d2   : > { %5952 = vmatmul.bf16.gmra.mxu0 %v7489_v55 }
 0x2d3   : > { %v3669_v63 = vsel %vm8740_vm15, %v6947_v3, %v3668_v53  ;;  %v3670_v55 = vrot.slane %v3668_v53, 4  ;;  %v6921_v3 = vld [vmem:[#allocation2 + $0x94] sm:$0xf]  ;;  %v6922_v53 = vld [vmem:[#allocation2 + $0x98] sm:$0x1] }
 0x2d4   : > { %3765 = vst [vmem:[#allocation3 + $0x2a8] sm:$0xf] %v3669_v63  ;;  %v9794_v48 = vpop.f32.mrf.mxu1  ;;  %v6948_v63 = vrot.slane %v6920_v43, 9 }
 0x2d5   : > { %10562 = vst [vmem:[#allocation72_spill] sm:$0xff] %v9794_v48 }
 0x2d7   : > { %v5465_v32 = vpop.f32.mrf.mxu3 }
 0x2d8   : > { %v9783_v17 = vadd.f32 %v5465_v32, %v9091_v31  ;;  %v3672_v31 = vsel %vm8740_vm15, %v3670_v55, %v3671_v49  ;;  %v6830_v32 = vld [vmem:[#allocation2 + $0x90] sm:$0xf]  ;;  %v3675_v55 = vrot.slane %v6921_v3, 5 }
 0x2d9   : > { %3766 = vst [vmem:[#allocation3 + $0x2cc] sm:$0xf] %v3672_v31  ;;  %v6980_v3 = vld [vmem:[#allocation3 + $0x18] sm:$0xf] }
 0x2da   : > { %2999 = vst [vmem:[#allocation3 + $0x2e8] sm:$0xf] %v6830_v32  ;;  %v3676_v31 = vsel %vm8740_vm15, %v6948_v63, %v3675_v55  ;;  %v3678_v32 = vrot.slane %v6922_v53, 5  ;;  %v7921_v53 = vld [vmem:[#allocation3 + $0x280] sm:$0xf0] }
 0x2db   : > { %3767 = vst [vmem:[#allocation3 + $0x2f0] sm:$0xf] %v3676_v31  ;;  %v7276_v31 = vld [vmem:[#allocation3 + $0x260] sm:$0xf] }
 0x2dc   : > { %5507 = vmatmul.bf16.gmra.mxu3 %v7469_v42  ;;  %6001 = vmatmul.bf16.gmra.mxu1 %v7205_v10  ;;  %v6831_v42 = vld [vmem:[#allocation2 + $0x94] sm:$0xf]  ;;  %v7240_v10 = vld [vmem:[#allocation3 + $0x218] sm:$0xf] }
 0x2dd   : > { %3000 = vst [vmem:[#allocation3 + $0x30c] sm:$0xf] %v6831_v42  ;;  %v7241_v49 = vor.u32 %v7912_v25, %v7240_v10  ;;  %v7848_v42 = vld [vmem:[#allocation3 + $0x38] sm:$0xf0] }
 0x2df   : > { %v5468_v47 = vpop.f32.mrf.mxu3 }
 0x2e0   : > { %v9792_v7 = vadd.f32 %v5468_v47, %v9114_v34  ;;  %v7505_v34 = vor.u32 %v7981_v29, %v7504_v51  ;;  %v3677_v47 = vrot.slane %v3675_v55, 4  ;;  %v6832_v51 = vld [vmem:[#allocation2 + $0x9c] sm:$0xf]  ;;  %v6924_v55 = vld [vmem:[#allocation2 + $0xa0] sm:$0xf] }
 0x2e1   : > { %3001 = vst [vmem:[#allocation3 + $0x330] sm:$0xf] %v6832_v51  ;;  %v6923_v29 = vld [vmem:[#allocation2 + $0x9c] sm:$0xe] }
 0x2e7   : > { %v5470_v54 = vpop.f32.mrf.mxu3 }
 0x2e8   : > { %v9797_v4 = vadd.f32 %v5470_v54, %v9138_v50  ;;  %v3679_v50 = vsel %vm8740_vm15, %v3677_v47, %v3678_v32  ;;  %v9803_v54 = vpop.f32.mrf.mxu1  ;;  %v6949_v47 = vrot.slane %v6923_v29, 9  ;;  %v3682_v32 = vrot.slane %v6924_v55, 5  ;;  %v6928_v29 = vld [vmem:[#allocation2 + $0xb0] sm:$0x1] }
 0x2e9   : > { %10563 = vst [vmem:[#allocation73_spill] sm:$0xff] %v9803_v54 }
 0x2ea   : > { %3768 = vst [vmem:[#allocation3 + $0x314] sm:$0xf] %v3679_v50  ;;  %v3683_v50 = vsel %vm8740_vm15, %v6949_v47, %v3682_v32  ;;  %v3684_v51 = vrot.slane %v3682_v32, 4  ;;  %v7857_v32 = vld [vmem:[#allocation3 + $0x80] sm:$0xf0] }
 0x2eb   : > { %3769 = vst [vmem:[#allocation3 + $0x338] sm:$0xf] %v3683_v50  ;;  %v7312_v50 = vld [vmem:[#allocation3 + $0x2a8] sm:$0xf] }
 0x2ec   : > { %5512 = vmatmul.bf16.gmra.mxu3 %v7505_v34  ;;  %6006 = vmatmul.bf16.gmra.mxu1 %v7241_v49  ;;  %v6925_v34 = vld [vmem:[#allocation2 + $0xa4] sm:$0x1]  ;;  %v6833_v49 = vld [vmem:[#allocation2 + $0xa0] sm:$0xf] }
 0x2ed   : > { %3002 = vst [vmem:[#allocation3 + $0x354] sm:$0xf] %v6833_v49  ;;  %v3685_v54 = vrot.slane %v6925_v34, 5  ;;  %v6950_v49 = vrot.slane %v6926_v14, 9  ;;  %v6835_v34 = vld [vmem:[#allocation2 + $0xac] sm:$0xf] }
 0x2ee   : > { %3004 = vst [vmem:[#allocation3 + $0x39c] sm:$0xf] %v6835_v34 }
 0x2ef   : > { %v5473_v48 = vpop.f32.mrf.mxu3 }
 0x2f0   : > { %v9806_v43 = vadd.f32 %v5473_v48, %v9177_v61  ;;  %v9808_v10 = vpop.f32.mrf.mxu1  ;;  %v6981_v61 = vor.u32 %v7848_v42, %v6980_v3  ;;  %v7277_v48 = vor.u32 %v7921_v53, %v7276_v31  ;;  %v3692_v42 = vrot.slane %v6928_v29, 5  ;;  %v6834_v53 = vld [vmem:[#allocation2 + $0xa8] sm:$0xf] }
 0x2f1   : > { %10564 = vst [vmem:[#allocation74_spill] sm:$0xff] %v9808_v10  ;;  %v6927_v10 = vld [vmem:[#allocation2 + $0xac] sm:$0xf] }
 0x2f2   : > { %3003 = vst [vmem:[#allocation3 + $0x378] sm:$0xf] %v6834_v53 }
 0x2f7   : > { %v5475_v25 = vpop.f32.mrf.mxu3 }
 0x2f8   : > { %v9811_v63 = vadd.f32 %v5475_v25, %v9210_v15  ;;  %v3686_v15 = vsel %vm8740_vm15, %v3684_v51, %v3685_v54  ;;  %v3689_v25 = vrot.slane %v6927_v10, 5  ;;  %v9824_v10 = vpop.f32.mrf.mxu1 }
 0x2f9   : > { %3770 = vst [vmem:[#allocation3 + $0x35c] sm:$0xf] %v3686_v15 }
 0x2fa   : > { %v3691_v3 = vrot.slane %v3689_v25, 4  ;;  %v3690_v47 = vsel %vm8740_vm15, %v6950_v49, %v3689_v25  ;;  %10565 = vst [vmem:[#allocation75_spill] sm:$0xff] %v9824_v10  ;;  %v6930_v25 = vld [vmem:[#allocation2 + $0xb8] sm:$0xf]  ;;  %v6929_v49 = vld [vmem:[#allocation2 + $0xb4] sm:$0xe] }
 0x2fb   : > { %3771 = vst [vmem:[#allocation3 + $0x380] sm:$0xf] %v3690_v47  ;;  %v6951_v34 = vrot.slane %v6929_v49, 9  ;;  %v6837_v10 = vld [vmem:[#allocation2 + $0xb8] sm:$0xf] }
 0x2fc   : > { %5793 = vmatmul.bf16.vlgmr.msra.gmra.mxu3 %v6981_v61  ;;  %6011 = vmatmul.bf16.gmra.mxu1 %v7277_v48  ;;  %v3693_v54 = vsel %vm8740_vm15, %v3691_v3, %v3692_v42  ;;  %v7930_v61 = vld [vmem:[#allocation3 + $0x2c8] sm:$0xf0]  ;;  %v6931_v3 = vld [vmem:[#allocation2 + $0xbc] sm:$0x1]  ;;  %v6836_v42 = vld [vmem:[#allocation2 + $0xb4] sm:$0xf] }
 0x2fd   : > { %3772 = vst [vmem:[#allocation3 + $0x3a4] sm:$0xf] %v3693_v54  ;;  %v7313_v15 = vor.u32 %v7930_v61, %v7312_v50  ;;  %v3699_v54 = vrot.slane %v6931_v3, 5  ;;  %v7866_v50 = vld [vmem:[#allocation3 + $0xc8] sm:$0xf0] }
 0x2fe   : > { %3005 = vst [vmem:[#allocation3 + $0x3c0] sm:$0xf] %v6836_v42 }
 0x2ff   : > { %v5478_v55 = vpop.f32.mrf.mxu3  ;;  %3006 = vst [vmem:[#allocation3 + $0x3e4] sm:$0xf] %v6837_v10 }
 0x300   : > { %v9818_v31 = vadd.f32 %v5478_v55, %v9243_v46  ;;  %v7016_v46 = vld [vmem:[#allocation3 + $0x60] sm:$0xf]  ;;  %v9829_v29 = vpop.f32.mrf.mxu1  ;;  %v3696_v55 = vrot.slane %v6930_v25, 5  ;;  %v7348_v25 = vld [vmem:[#allocation3 + $0x2f0] sm:$0xf] }
 0x301   : > { %v7017_v51 = vor.u32 %v7857_v32, %v7016_v46  ;;  %10566 = vst [vmem:[#allocation76_spill] sm:$0xff] %v9829_v29 }
 0x302   : > { %v3698_v47 = vrot.slane %v3696_v55, 4 }
 0x304   : > { %v3700_v32 = vsel %vm8740_vm15, %v3698_v47, %v3699_v54  ;;  %v7948_v47 = vld [vmem:[#allocation3 + $0x358] sm:$0xf0] }
 0x305   : > { %3774 = vst [vmem:[#allocation3 + $0x3ec] sm:$0xf] %v3700_v32 }
 0x307   : > { %v5480_v14 = vpop.f32.mrf.mxu3 }
 0x308   : > { %v9827_v48 = vadd.f32 %v5480_v14, %v9271_v9  ;;  %v3697_v14 = vsel %vm8740_vm15, %v6951_v34, %v3696_v55  ;;  %v9838_v61 = vpop.f32.mrf.mxu1  ;;  %v7875_v34 = vld [vmem:[#allocation3 + $0x110] sm:$0xf0] }
 0x309   : > { %3773 = vst [vmem:[#allocation3 + $0x3c8] sm:$0xf] %v3697_v14  ;;  %v7384_v14 = vld [vmem:[#allocation3 + $0x338] sm:$0xf] }
 0x30a   : > { %10567 = vst [vmem:[#allocation77_spill] sm:$0xff] %v9838_v61 }
 0x30c   : > { %5798 = vmatmul.bf16.gmra.mxu3 %v7017_v51  ;;  %6016 = vmatmul.bf16.gmra.mxu1 %v7313_v15  ;;  %v7939_v51 = vld [vmem:[#allocation3 + $0x310] sm:$0xf0] }
 0x30d   : > { %v7349_v3 = vor.u32 %v7939_v51, %v7348_v25  ;;  %v9853_v51 = vpop.f32.mrf.mxu2 }
 0x30f   : > { %v5483_v53 = vpop.f32.mrf.mxu3 }
 0x310   : > { %v9832_v9 = vadd.f32 %v5483_v53, %v9298_v12  ;;  %v7052_v12 = vld [vmem:[#allocation3 + $0xa8] sm:$0xf]  ;;  %v9843_v42 = vpop.f32.mrf.mxu1 }
 0x311   : > { %v7053_v49 = vor.u32 %v7866_v50, %v7052_v12  ;;  %10568 = vst [vmem:[#allocation78_spill] sm:$0xff] %v9843_v42  ;;  %v7385_v50 = vor.u32 %v7948_v47, %v7384_v14  ;;  %v6932_v14 = vld [vmem:[#allocation2 + $0xc0] sm:$0xe] }
 0x317   : > { %v5485_v46 = vpop.f32.mrf.mxu3 }
 0x318   : > { %v9841_v15 = vadd.f32 %v5485_v46, %v9314_v58  ;;  %v7088_v58 = vld [vmem:[#allocation3 + $0xf0] sm:$0xf]  ;;  %v9851_v32 = vpop.f32.mrf.mxu1 }
 0x319   : > { %v7089_v46 = vor.u32 %v7875_v34, %v7088_v58  ;;  %v7124_v34 = vld [vmem:[#allocation3 + $0x138] sm:$0xf] }
 0x31c   : > { %5803 = vmatmul.bf16.gmra.mxu3 %v7053_v49  ;;  %6021 = vmatmul.bf16.gmra.mxu1 %v7349_v3  ;;  %v9860_v49 = vpop.f32.mrf.mxu2  ;;  %v7884_v3 = vld [vmem:[#allocation3 + $0x158] sm:$0xf0] }
 0x31d   : > { %v7125_v47 = vor.u32 %v7884_v3, %v7124_v34  ;;  %v7893_v34 = vld [vmem:[#allocation3 + $0x1a0] sm:$0xf0] }
 0x31f   : > { %v5488_v55 = vpop.f32.mrf.mxu3 }
 0x320   : > { %v9846_v10 = vadd.f32 %v5488_v55, %v9335_v45  ;;  %v9858_v25 = vpop.f32.mrf.mxu1  ;;  %v7420_v55 = vld [vmem:[#allocation3 + $0x380] sm:$0xf] }
 0x324   : > { %v9867_v36 = vpop.f32.mrf.mxu2 }
 0x327   : > { %v5490_v53 = vpop.f32.mrf.mxu3 }
 0x328   : > { %v9849_v54 = vadd.f32 %v5490_v53, %v9346_v0  ;;  %v7957_v53 = vld [vmem:[#allocation3 + $0x3a0] sm:$0xf0]  ;;  %v9865_v29 = vpop.f32.mrf.mxu1 }
 0x329   : > { %v7421_v58 = vor.u32 %v7957_v53, %v7420_v55 }
 0x32c   : > { %5808 = vmatmul.bf16.gmra.mxu3 %v7089_v46  ;;  %6026 = vmatmul.bf16.gmra.mxu1 %v7385_v50  ;;  %v6933_v46 = vld [vmem:[#allocation2 + $0xc4] sm:$0xf]  ;;  %v6952_v50 = vrot.slane %v6932_v14, 9 }
 0x32f   : > { %v5493_v12 = vpop.f32.mrf.mxu3 }
 0x330   : > { %v9856_v45 = vadd.f32 %v5493_v12, %v9363_v37  ;;  %v6934_v37 = vld [vmem:[#allocation2 + $0xc8] sm:$0x1]  ;;  %v3703_v12 = vrot.slane %v6933_v46, 5  ;;  %v9876_v14 = vpop.f32.mrf.mxu1 }
 0x331   : > { %v3706_v61 = vrot.slane %v6934_v37, 5  ;;  %v9881_v37 = vpop.f32.mrf.mxu2 }
 0x332   : > { %10569 = vst [vmem:[#allocation79_spill] sm:$0xff] %v9856_v45 }
 0x337   : > { %v5495_v0 = vpop.f32.mrf.mxu3 }
 0x338   : > { %v9863_v42 = vadd.f32 %v5495_v0, %v9381_v28  ;;  %v3704_v28 = vsel %vm8740_vm15, %v6952_v50, %v3703_v12  ;;  %v3705_v0 = vrot.slane %v3703_v12, 4  ;;  %v7160_v50 = vld [vmem:[#allocation3 + $0x180] sm:$0xf] }
 0x339   : > { %3775 = vst [vmem:[#allocation3 + $0x410] sm:$0xf] %v3704_v28  ;;  %v7161_v12 = vor.u32 %v7893_v34, %v7160_v50  ;;  %v9886_v28 = vpop.f32.mrf.mxu1 }
 0x33a   : > { %10570 = vst [vmem:[#allocation80_spill] sm:$0xff] %v9863_v42  ;;  %v3707_v55 = vsel %vm8740_vm15, %v3705_v0, %v3706_v61  ;;  %v9888_v0 = vpop.f32.mrf.mxu2 }
 0x33b   : > { %3776 = vst [vmem:[#allocation3 + $0x434] sm:$0xf] %v3707_v55 }
 0x33c   : > { %5813 = vmatmul.bf16.gmra.mxu3 %v7125_v47  ;;  %6031 = vmatmul.bf16.gmra.mxu1 %v7421_v58  ;;  %v7456_v47 = vld [vmem:[#allocation3 + $0x3c8] sm:$0xf]  ;;  %v7966_v58 = vld [vmem:[#allocation3 + $0x3e8] sm:$0xf0] }
 0x33f   : > { %v5498_v45 = vpop.f32.mrf.mxu3 }
 0x340   : > { %v9872_v3 = vadd.f32 %v5498_v45, %v9519_v24  ;;  %v7457_v24 = vor.u32 %v7966_v58, %v7456_v47  ;;  %v7492_v42 = vld [vmem:[#allocation3 + $0x410] sm:$0xf] }
 0x341   : > { %v9893_v58 = vpop.f32.mrf.mxu1 }
 0x342   : > { %10571 = vst [vmem:[#allocation81_spill] sm:$0xff] %v9872_v3  ;;  %v7902_v3 = vld [vmem:[#allocation3 + $0x1e8] sm:$0xf0] }
 0x347   : > { %v5500_v53 = vpop.f32.mrf.mxu3 }
 0x348   : > { %v9879_v46 = vadd.f32 %v5500_v53, %v9536_v27  ;;  %v7975_v27 = vld [vmem:[#allocation3 + $0x430] sm:$0xf0] }
 0x349   : > { %v7493_v47 = vor.u32 %v7975_v27, %v7492_v42 }
 0x34a   : > { %10572 = vst [vmem:[#allocation82_spill] sm:$0xff] %v9879_v46  ;;  %v7196_v46 = vld [vmem:[#allocation3 + $0x1c8] sm:$0xf] }
 0x34b   : > { %v7197_v34 = vor.u32 %v7902_v3, %v7196_v46 }
 0x34c   : > { %5818 = vmatmul.bf16.gmra.mxu3 %v7161_v12  ;;  %6036 = vmatmul.bf16.gmra.mxu1 %v7457_v24 }
 0x34f   : > { %v5503_v45 = vpop.f32.mrf.mxu3 }
 0x350   : > { %v9884_v61 = vadd.f32 %v5503_v45, %v9555_v30  ;;  %v9895_v30 = vpop.f32.mrf.mxu2 }
 0x352   : > { %10573 = vst [vmem:[#allocation83_spill] sm:$0xff] %v9884_v61  ;;  %v7911_v61 = vld [vmem:[#allocation3 + $0x230] sm:$0xf0] }
 0x357   : > { %v5505_v55 = vpop.f32.mrf.mxu3 }
 0x358   : > { %v9891_v53 = vadd.f32 %v5505_v55, %v9577_v11  ;;  %v9900_v24 = vpop.f32.mrf.mxu2  ;;  %v7232_v55 = vld [vmem:[#allocation3 + $0x210] sm:$0xf] }
 0x359   : > { %v7233_v3 = vor.u32 %v7911_v61, %v7232_v55 }
 0x35a   : > { %10574 = vst [vmem:[#allocation84_spill] sm:$0xff] %v9891_v53  ;;  %v10582_v53 = vld [vmem:[#allocation38_spill] sm:$0xff] }
 0x35c   : > { %5823 = vmatmul.bf16.gmra.mxu3 %v7197_v34  ;;  %6041 = vmatmul.bf16.gmra.mxu1 %v7493_v47  ;;  %v7920_v47 = vld [vmem:[#allocation3 + $0x278] sm:$0xf0] }
 0x35f   : > { %v5508_v50 = vpop.f32.mrf.mxu3 }
 0x360   : > { %v9898_v12 = vadd.f32 %v5508_v50, %v9601_v1  ;;  %v9908_v27 = vpop.f32.mrf.mxu2  ;;  %v5528_v1 = vadd.f32 %v8986_v16, %v9661_v26  ;;  %v10578_v50 = vld [vmem:[#allocation9_spill] sm:$0xff]  ;;  %v10581_v16 = vld [vmem:[#allocation10_spill] sm:$0xff] }
 0x362   : > { %10575 = vst [vmem:[#allocation85_spill] sm:$0xff] %v9898_v12  ;;  %v5352_v12 = vadd.f32 %v10578_v50, %v8794_v35 }
 0x364   : > { %v5441_v61 = vadd.f32 %v9671_v59, %v5352_v12  ;;  %v10583_v12 = vld [vmem:[#allocation27_spill] sm:$0xff] }
 0x366   : > { %v5530_v26 = vadd.f32 %v10581_v16, %v5441_v61  ;;  %v7304_v16 = vld [vmem:[#allocation3 + $0x2a0] sm:$0xf] }
 0x367   : > { %v5510_v45 = vpop.f32.mrf.mxu3 }
 0x368   : > { %v9903_v11 = vadd.f32 %v5510_v45, %v9614_v44  ;;  %v7268_v45 = vld [vmem:[#allocation3 + $0x258] sm:$0xf] }
 0x369   : > { %v7269_v55 = vor.u32 %v7920_v47, %v7268_v45  ;;  %v5619_v47 = vadd.f32 %v10583_v12, %v5530_v26 }
 0x36a   : > { %10576 = vst [vmem:[#allocation86_spill] sm:$0xff] %v9903_v11  ;;  %v6839_v11 = vld [vmem:[#allocation2 + $0xc4] sm:$0xf] }
 0x36b   : > { %3008 = vst [vmem:[#allocation3 + $0x42c] sm:$0xf] %v6839_v11  ;;  %v5708_v61 = vadd.f32 %v9507_v52, %v5619_v47  ;;  %v10586_v47 = vld [vmem:[#allocation12_spill] sm:$0xff] }
 0x36c   : > { %5828 = vmatmul.bf16.gmra.mxu3 %v7233_v3  ;;  %v10580_v3 = vld [vmem:[#allocation25_spill] sm:$0xff] }
 0x36f   : > { %v5513_v42 = vpop.f32.mrf.mxu3 }
 0x370   : > { %v9906_v46 = vadd.f32 %v5513_v42, %v9629_v20  ;;  %v5617_v20 = vadd.f32 %v10580_v3, %v5528_v1  ;;  %v9919_v42 = vpop.f32.mrf.mxu2  ;;  %v9927_v1 = vpop.f32.mrf.mxu1 }
 0x372   : > { %10577 = vst [vmem:[#allocation87_spill] sm:$0xff] %v9906_v46  ;;  %v6838_v46 = vld [vmem:[#allocation2 + $0xc0] sm:$0xf]  ;;  %v5706_v35 = vadd.f32 %v10582_v53, %v5617_v20 }
 0x373   : > { %3007 = vst [vmem:[#allocation3 + $0x408] sm:$0xf] %v6838_v46  ;;  %v9937_v53 = vld [vmem:[%s10469_s5] ss:$0 sm:$0xff] }
 0x377   : > { %v5515_v34 = vpop.f32.mrf.mxu3 }
 0x378   : > { %v9915_v44 = vadd.f32 %v5515_v34, %v9643_v18  ;;  %v9923_v34 = vpop.f32.mrf.mxu0  ;;  %v9929_v45 = vpop.f32.mrf.mxu2 }
 0x379   : > { %v9951_v12 = vpop.f32.mrf.mxu1 }
 0x37a   : > { %10579 = vst [vmem:[#allocation9_spill] sm:$0xff] %v9915_v44 }
 0x37c   : > { %5833 = vmatmul.bf16.gmra.mxu3 %v7269_v55  ;;  %v10584_v55 = vld [vmem:[#allocation11_spill] sm:$0xff] }
 0x37d   : > { %v5533_v46 = vadd.f32 %v10584_v55, %v9684_v38  ;;  %v5535_v55 = vadd.f32 %v10586_v47, %v9697_v21 }
 0x37f   : > { %v5794_v50 = vpop.f32.mrf.mxu3 }
 0x380   : > { %v5795_v18 = vadd.f32 %v5794_v50, %v5706_v35  ;;  %v9944_v35 = vld [vmem:[%s10470_s6] ss:$0 sm:$0xff] }
 0x381   : > { %v10585_v50 = vld [vmem:[#allocation28_spill] sm:$0xff] }
 0x382   : > { %v5884_v59 = vadd.f32 %v9713_v62, %v5795_v18  ;;  %v7929_v62 = vld [vmem:[#allocation3 + $0x2c0] sm:$0xf0]  ;;  %v5622_v18 = vadd.f32 %v10585_v50, %v5533_v46 }
 0x384   : > { %v5973_v11 = vadd.f32 %v9851_v32, %v5884_v59  ;;  %v7305_v32 = vor.u32 %v7929_v62, %v7304_v16  ;;  %v9948_v59 = vpop.f32.mrf.mxu0 }
 0x386   : > { %v6056_v26 = vmul.f32 %v9937_v53, %v5973_v11 }
 0x387   : > { %v5796_v3 = vpop.f32.mrf.mxu3 }
 0x388   : > { %v5797_v20 = vadd.f32 %v5796_v3, %v5708_v61  ;;  %v6092_v11 = vadd.f32 %v9944_v35, %v6056_v26  ;;  %v10587_v3 = vld [vmem:[#allocation43_spill] sm:$0xff]  ;;  %v10589_v26 = vld [vmem:[#allocation13_spill] sm:$0xff] }
 0x389   : > { %v5711_v44 = vadd.f32 %v10587_v3, %v5622_v18  ;;  %v10590_v3 = vld [vmem:[#allocation46_spill] sm:$0xff] }
 0x38a   : > { %v5886_v38 = vadd.f32 %v9722_v56, %v5797_v20  ;;  %v9958_v56 = vpop.f32.mrf.mxu2  ;;  %v6124_v16 = vmax.f32 %v6092_v11, 0.0 }
 0x38c   : > { %v5975_v52 = vadd.f32 %v9858_v25, %v5886_v38  ;;  %5838 = vmatmul.bf16.gmra.mxu3 %v7305_v32  ;;  %v10588_v32 = vld [vmem:[#allocation30_spill] sm:$0xff]  ;;  %v9963_v47 = vpop.f32.mrf.mxu0 }
 0x38d   : > { %v5624_v50 = vadd.f32 %v10588_v32, %v5535_v55  ;;  %v7340_v55 = vld [vmem:[#allocation3 + $0x2e8] sm:$0xf] }
 0x38e   : > { %v6057_v61 = vmul.f32 %v9937_v53, %v5975_v52  ;;  %v5538_v52 = vadd.f32 %v10589_v26, %v9711_v5  ;;  %v10591_v5 = vld [vmem:[#allocation32_spill] sm:$0xff] }
 0x38f   : > { %v5799_v62 = vpop.f32.mrf.mxu3 }
 0x390   : > { %v6093_v46 = vadd.f32 %v9944_v35, %v6057_v61  ;;  %v5800_v20 = vadd.f32 %v5799_v62, %v5711_v44  ;;  %v5713_v61 = vadd.f32 %v10590_v3, %v5624_v50  ;;  %v9970_v44 = vpop.f32.mrf.mxu1  ;;  %v7938_v62 = vld [vmem:[#allocation3 + $0x308] sm:$0xf0]  ;;  %v5627_v32 = vadd.f32 %v10591_v5, %v5538_v52 }
 0x392   : > { %v6125_v25 = vmax.f32 %v6093_v46, 0.0  ;;  %v5889_v38 = vadd.f32 %v9737_v13, %v5800_v20  ;;  %v9972_v46 = vpop.f32.mrf.mxu2  ;;  %v5716_v3 = vadd.f32 %v9586_v8, %v5627_v32  ;;  %v10595_v32 = vld [vmem:[#allocation51_spill] sm:$0xff] }
 0x394   : > { %v6156_v21 = vpack.c.bf16 %v6125_v25, %v6124_v16  ;;  %v5978_v18 = vadd.f32 %v9865_v29, %v5889_v38  ;;  %v7341_v25 = vor.u32 %v7938_v62, %v7340_v55  ;;  %v10592_v38 = vld [vmem:[#allocation14_spill] sm:$0xff] }
 0x395   : > { %v5540_v50 = vadd.f32 %v10592_v38, %v9720_v2  ;;  %v10593_v55 = vld [vmem:[#allocation34_spill] sm:$0xff] }
 0x396   : > { %7818 = vmatmul.msk.bf16.vlgmr.msra.gmra.mxu2 %vm6173_vm2, %v6156_v21  ;;  %v6058_v20 = vmul.f32 %v9937_v53, %v5978_v18 }
 0x397   : > { %v5801_v11 = vpop.f32.mrf.mxu3  ;;  %v5629_v2 = vadd.f32 %v10593_v55, %v5540_v50 }
 0x398   : > { %v5802_v13 = vadd.f32 %v5801_v11, %v5713_v61  ;;  %v6094_v21 = vadd.f32 %v9944_v35, %v6058_v20  ;;  %v9983_v61 = vpop.f32.mrf.mxu0  ;;  %v9986_v62 = vpop.f32.mrf.mxu1 }
 0x39a   : > { %v5891_v16 = vadd.f32 %v9751_v23, %v5802_v13  ;;  %v6126_v52 = vmax.f32 %v6094_v21, 0.0 }
 0x39c   : > { %v5980_v29 = vadd.f32 %v9876_v14, %v5891_v16  ;;  %5843 = vmatmul.bf16.gmra.mxu3 %v7341_v25  ;;  %v9990_v16 = vpop.f32.mrf.mxu2  ;;  %v10594_v25 = vld [vmem:[#allocation15_spill] sm:$0xff] }
 0x39d   : > { %v5543_v8 = vadd.f32 %v10594_v25, %v9731_v39  ;;  %v10598_v25 = vld [vmem:[#allocation54_spill] sm:$0xff] }
 0x39e   : > { %v6059_v26 = vmul.f32 %v9937_v53, %v5980_v29  ;;  %v5718_v29 = vadd.f32 %v10595_v32, %v5629_v2 }
 0x39f   : > { %v5804_v18 = vpop.f32.mrf.mxu3 }
 0x3a0   : > { %v6095_v23 = vadd.f32 %v9944_v35, %v6059_v26  ;;  %v5805_v11 = vadd.f32 %v5804_v18, %v5716_v3  ;;  %v7947_v26 = vld [vmem:[#allocation3 + $0x350] sm:$0xf0]  ;;  %v9997_v3 = vpop.f32.mrf.mxu0  ;;  %v10002_v39 = vpop.f32.mrf.mxu1 }
 0x3a2   : > { %v5894_v14 = vadd.f32 %v9765_v22, %v5805_v11  ;;  %v6127_v13 = vmax.f32 %v6095_v23, 0.0  ;;  %v7376_v22 = vld [vmem:[#allocation3 + $0x330] sm:$0xf]  ;;  %v10596_v11 = vld [vmem:[#allocation36_spill] sm:$0xff] }
 0x3a3   : > { %v7377_v23 = vor.u32 %v7947_v26, %v7376_v22  ;;  %v10599_v26 = vld [vmem:[#allocation37_spill] sm:$0xff] }
 0x3a4   : > { %v6157_v20 = vpack.c.bf16 %v6127_v13, %v6126_v52  ;;  %v5983_v5 = vadd.f32 %v9886_v28, %v5894_v14  ;;  %v5632_v52 = vadd.f32 %v10596_v11, %v5543_v8  ;;  %v10005_v14 = vpop.f32.mrf.mxu2  ;;  %v10597_v13 = vld [vmem:[#allocation16_spill] sm:$0xff] }
 0x3a5   : > { %v5545_v55 = vadd.f32 %v10597_v13, %v9740_v40 }
 0x3a6   : > { %7819 = vmatmul.msk.bf16.gmra.mxu2 %vm6173_vm2, %v6157_v20  ;;  %v6060_v50 = vmul.f32 %v9937_v53, %v5983_v5  ;;  %v5721_v5 = vadd.f32 %v10598_v25, %v5632_v52  ;;  %v10601_v52 = vld [vmem:[#allocation57_spill] sm:$0xff] }
 0x3a7   : > { %v5806_v38 = vpop.f32.mrf.mxu3 }
 0x3a8   : > { %v5807_v21 = vadd.f32 %v5806_v38, %v5718_v29  ;;  %v6096_v2 = vadd.f32 %v9944_v35, %v6060_v50  ;;  %v10015_v22 = vpop.f32.mrf.mxu0  ;;  %v10017_v40 = vpop.f32.mrf.mxu1  ;;  %v10600_v50 = vld [vmem:[#allocation17_spill] sm:$0xff] }
 0x3aa   : > { %v5896_v18 = vadd.f32 %v9780_v60, %v5807_v21  ;;  %v6128_v29 = vmax.f32 %v6096_v2, 0.0  ;;  %v5634_v21 = vadd.f32 %v10599_v26, %v5545_v55  ;;  %v7412_v2 = vld [vmem:[#allocation3 + $0x378] sm:$0xf] }
 0x3ac   : > { %v5985_v28 = vadd.f32 %v9893_v58, %v5896_v18  ;;  %5848 = vmatmul.bf16.gmra.mxu3 %v7377_v23  ;;  %v5548_v23 = vadd.f32 %v10600_v50, %v9756_v19  ;;  %v10024_v13 = vpop.f32.mrf.mxu2 }
 0x3ae   : > { %v6061_v20 = vmul.f32 %v9937_v53, %v5985_v28  ;;  %v5723_v28 = vadd.f32 %v10601_v52, %v5634_v21 }
 0x3af   : > { %v5809_v60 = vpop.f32.mrf.mxu3 }
 0x3b0   : > { %v6097_v32 = vadd.f32 %v9944_v35, %v6061_v20  ;;  %v5810_v8 = vadd.f32 %v5809_v60, %v5721_v5  ;;  %v7956_v20 = vld [vmem:[#allocation3 + $0x398] sm:$0xf0] }
 0x3b1   : > { %v7413_v60 = vor.u32 %v7956_v20, %v7412_v2  ;;  %v10605_v20 = vld [vmem:[#allocation19_spill] sm:$0xff] }
 0x3b2   : > { %v5899_v38 = vadd.f32 %v9923_v34, %v5810_v8  ;;  %v6129_v58 = vmax.f32 %v6097_v32, 0.0  ;;  %v10602_v32 = vld [vmem:[#allocation40_spill] sm:$0xff] }
 0x3b3   : > { %v5637_v8 = vadd.f32 %v10602_v32, %v5548_v23  ;;  %v7448_v32 = vld [vmem:[#allocation3 + $0x3c0] sm:$0xf] }
 0x3b4   : > { %v6158_v18 = vpack.c.bf16 %v6129_v58, %v6128_v29  ;;  %v5988_v11 = vadd.f32 %v9927_v1, %v5899_v38  ;;  %v10030_v1 = vpop.f32.mrf.mxu0  ;;  %v10603_v29 = vld [vmem:[#allocation18_spill] sm:$0xff] }
 0x3b5   : > { %v5550_v38 = vadd.f32 %v10603_v29, %v9763_v33  ;;  %v5726_v21 = vadd.f32 %v9853_v51, %v5637_v8  ;;  %v7965_v8 = vld [vmem:[#allocation3 + $0x3e0] sm:$0xf0] }
 0x3b6   : > { %7820 = vmatmul.msk.bf16.gmra.mxu2 %vm6173_vm2, %v6158_v18  ;;  %v6062_v25 = vmul.f32 %v9937_v53, %v5988_v11  ;;  %v10037_v18 = vpop.f32.mrf.mxu1  ;;  %v10040_v11 = vpop.f32.mrf.mxu2 }
 0x3b7   : > { %v5811_v34 = vpop.f32.mrf.mxu3 }
 0x3b8   : > { %v5812_v55 = vadd.f32 %v5811_v34, %v5723_v28  ;;  %v6098_v58 = vadd.f32 %v9944_v35, %v6062_v25  ;;  %v10604_v34 = vld [vmem:[#allocation42_spill] sm:$0xff] }
 0x3b9   : > { %v5639_v33 = vadd.f32 %v10604_v34, %v5550_v38 }
 0x3ba   : > { %v5901_v5 = vadd.f32 %v9948_v59, %v5812_v55  ;;  %v5553_v55 = vadd.f32 %v10605_v20, %v9776_v57  ;;  %v10606_v57 = vld [vmem:[#allocation45_spill] sm:$0xff]  ;;  %v10608_v20 = vld [vmem:[#allocation48_spill] sm:$0xff] }
 0x3bb   : > { %v5728_v25 = vadd.f32 %v9860_v49, %v5639_v33  ;;  %v10607_v49 = vld [vmem:[#allocation20_spill] sm:$0xff] }
 0x3bc   : > { %v5990_v19 = vadd.f32 %v9951_v12, %v5901_v5  ;;  %5853 = vmatmul.bf16.gmra.mxu3 %v7413_v60  ;;  %v6130_v12 = vmax.f32 %v6098_v58, 0.0  ;;  %v10049_v5 = vpop.f32.mrf.mxu0  ;;  %v7449_v58 = vor.u32 %v7965_v8, %v7448_v32 }
 0x3be   : > { %v6063_v26 = vmul.f32 %v9937_v53, %v5990_v19 }
 0x3bf   : > { %v5814_v59 = vpop.f32.mrf.mxu3 }
 0x3c0   : > { %v6099_v50 = vadd.f32 %v9944_v35, %v6063_v26  ;;  %v5815_v23 = vadd.f32 %v5814_v59, %v5726_v21  ;;  %v5642_v26 = vadd.f32 %v10606_v57, %v5553_v55  ;;  %v5555_v59 = vadd.f32 %v10607_v49, %v9783_v17  ;;  %v6841_v17 = vld [vmem:[#allocation2 + $0xd0] sm:$0xf] }
 0x3c1   : > { %3010 = vst [vmem:[#allocation3 + $0x474] sm:$0xf] %v6841_v17 }
 0x3c2   : > { %v5904_v52 = vadd.f32 %v9963_v47, %v5815_v23  ;;  %v6131_v28 = vmax.f32 %v6099_v50, 0.0  ;;  %v10051_v47 = vpop.f32.mrf.mxu1  ;;  %v5644_v55 = vadd.f32 %v10608_v20, %v5555_v59  ;;  %v6935_v59 = vld [vmem:[#allocation2 + $0xcc] sm:$0xe] }
 0x3c4   : > { %v6159_v2 = vpack.c.bf16 %v6131_v28, %v6130_v12  ;;  %v5993_v51 = vadd.f32 %v9970_v44, %v5904_v52  ;;  %v10056_v44 = vpop.f32.mrf.mxu2  ;;  %v5731_v12 = vadd.f32 %v9867_v36, %v5642_v26  ;;  %v10065_v34 = vpop.f32.mrf.mxu0  ;;  %v495_v36 = vld [vmem:[#allocation2 + $0xd4] sm:$0x1] }
 0x3c6   : > { %7821 = vmatmul.msk.bf16.gmra.mxu2 %vm6173_vm2, %v6159_v2  ;;  %v6064_v29 = vmul.f32 %v9937_v53, %v5993_v51  ;;  %v439_v51 = vld [vmem:[#allocation2 + $0xcc] sm:$0x1] }
 0x3c7   : > { %v5816_v60 = vpop.f32.mrf.mxu3  ;;  %v440_v32 = vsel %vm8371_vm3, 0, %v439_v51 }
 0x3c8   : > { %v5817_v19 = vadd.f32 %v5816_v60, %v5728_v25  ;;  %v6100_v50 = vadd.f32 %v9944_v35, %v6064_v29  ;;  %441 = vst [vmem:[#allocation2 + $0xcc] sm:$0x1] %v440_v32  ;;  %v496_v29 = vsel %vm8404_vm5, 0, %v495_v36 }
 0x3c9   : > { %497 = vst [vmem:[#allocation2 + $0xd4] sm:$0x1] %v496_v29  ;;  %v10613_v29 = vld [vmem:[#allocation22_spill] sm:$0xff] }
 0x3ca   : > { %v5906_v38 = vadd.f32 %v9983_v61, %v5817_v19  ;;  %v6132_v33 = vmax.f32 %v6100_v50, 0.0  ;;  %v10069_v25 = vpop.f32.mrf.mxu1  ;;  %v5733_v50 = vadd.f32 %v9881_v37, %v5644_v55 }
 0x3cc   : > { %v5995_v21 = vadd.f32 %v9986_v62, %v5906_v38  ;;  %5858 = vmatmul.bf16.gmra.mxu3 %v7449_v58  ;;  %v6888_v38 = vld [vmem:[#allocation2 + $0xd0] sm:$0xf]  ;;  %v10075_v58 = vpop.f32.mrf.mxu2  ;;  %v10087_v55 = vpop.f32.mrf.mxu0 }
 0x3cd   : > { %v3433_v49 = vshrl.u32 %v6888_v38, 16 }
 0x3ce   : > { %v6065_v23 = vmul.f32 %v9937_v53, %v5995_v21  ;;  %v3429_v21 = vshll.u32 %v6888_v38, 16  ;;  %v5560_v38 = vadd.f32 %v10613_v29, %v9797_v4 }
 0x3cf   : > { %v5819_v52 = vpop.f32.mrf.mxu3  ;;  %v6840_v36 = vld [vmem:[#allocation2 + $0xcc] sm:$0xf] }
 0x3d0   : > { %v6101_v61 = vadd.f32 %v9944_v35, %v6065_v23  ;;  %v5820_v28 = vadd.f32 %v5819_v52, %v5731_v12  ;;  %v7484_v23 = vld [vmem:[#allocation3 + $0x408] sm:$0xf]  ;;  %v6936_v12 = vld [vmem:[#allocation2 + $0xd0] sm:$0xf]  ;;  %v6953_v52 = vrot.slane %v6935_v59, 9 }
 0x3d1   : > { %v3710_v20 = vrot.slane %v6936_v12, 5  ;;  %3009 = vst [vmem:[#allocation3 + $0x450] sm:$0xf] %v6840_v36  ;;  %v6937_v12 = vld [vmem:[#allocation2 + $0xd4] sm:$0x1] }
 0x3d2   : > { %v6133_v2 = vmax.f32 %v6101_v61, 0.0  ;;  %v5909_v62 = vadd.f32 %v9997_v3, %v5820_v28  ;;  %v10611_v3 = vld [vmem:[#allocation21_spill] sm:$0xff]  ;;  %v7974_v28 = vld [vmem:[#allocation3 + $0x428] sm:$0xf0] }
 0x3d3   : > { %v5558_v57 = vadd.f32 %v10611_v3, %v9792_v7  ;;  %v3711_v60 = vsel %vm8740_vm15, %v6953_v52, %v3710_v20  ;;  %v7485_v37 = vor.u32 %v7974_v28, %v7484_v23  ;;  %v3712_v19 = vrot.slane %v3710_v20, 4 }
 0x3d4   : > { %v6160_v8 = vpack.c.bf16 %v6133_v2, %v6132_v33  ;;  %v5998_v26 = vadd.f32 %v10002_v39, %v5909_v62  ;;  %v3431_v33 = vrot.slane %v3429_v21, 5  ;;  %v3435_v2 = vrot.slane %v3433_v49, 4  ;;  %v10612_v39 = vld [vmem:[#allocation50_spill] sm:$0xff]  ;;  %3777 = vst [vmem:[#allocation3 + $0x458] sm:$0xf] %v3711_v60  ;;  %v10092_v49 = vpop.f32.mrf.mxu1 }
 0x3d5   : > { %v5647_v62 = vadd.f32 %v10612_v39, %v5558_v57  ;;  %v6889_v57 = vld [vmem:[#allocation2 + $0xd4] sm:$0x1]  ;;  %v3713_v28 = vrot.slane %v6937_v12, 5 }
 0x3d6   : > { %7822 = vmatmul.msk.bf16.gmra.mxu2 %vm6173_vm2, %v6160_v8  ;;  %v6066_v7 = vmul.f32 %v9937_v53, %v5998_v26  ;;  %v3436_v17 = vor.u32 %v3435_v2, %v3431_v33  ;;  %v6887_v8 = vld [vmem:[#allocation2 + $0xcc] sm:$0xf]  ;;  %v3439_v23 = vshll.u32 %v6889_v57, 16  ;;  %v10108_v57 = vpop.f32.mrf.mxu0 }
 0x3d7   : > { %v5821_v61 = vpop.f32.mrf.mxu3  ;;  %v3420_v26 = vshrl.u32 %v6887_v8, 16  ;;  %v3423_v21 = vshll.u32 %v6887_v8, 16  ;;  %v5736_v59 = vadd.f32 %v9888_v0, %v5647_v62  ;;  %v10614_v0 = vld [vmem:[#allocation53_spill] sm:$0xff] }
 0x3d8   : > { %v5822_v51 = vadd.f32 %v5821_v61, %v5733_v50  ;;  %v3437_v50 = vrot.slane %v3436_v17, 4  ;;  %v3441_v20 = vrot.slane %v3439_v23, 5  ;;  %v5649_v62 = vadd.f32 %v10614_v0, %v5560_v38  ;;  %v7520_v41 = vld [vmem:[#allocation3 + $0x450] sm:$0xf]  ;;  %v10615_v38 = vld [vmem:[#allocation23_spill] sm:$0xff] }
 0x3d9   : > { %v3422_v61 = vrot.slane %v3420_v26, 4  ;;  %v3425_v4 = vrot.slane %v3423_v21, 5  ;;  %v5563_v26 = vadd.f32 %v10615_v38, %v9806_v43 }
 0x3da   : > { %v5911_v32 = vadd.f32 %v10015_v22, %v5822_v51  ;;  %v6102_v22 = vadd.f32 %v9944_v35, %v6066_v7  ;;  %v3714_v7 = vsel %vm8740_vm15, %v3712_v19, %v3713_v28  ;;  %v3442_v17 = vsel %vm8454_vm8, %v3437_v50, %v3441_v20  ;;  %v7983_v19 = vld [vmem:[#allocation3 + $0x470] sm:$0xf0]  ;;  %v10616_v28 = vld [vmem:[#allocation56_spill] sm:$0xff] }
 0x3db   : > { %v3426_v60 = vor.u32 %v3425_v4, %v3422_v61  ;;  %3778 = vst [vmem:[#allocation3 + $0x47c] sm:$0xf] %v3714_v7  ;;  %v7521_v6 = vor.u32 %v7983_v19, %v7520_v41  ;;  %v10619_v19 = vld [vmem:[#allocation26_spill] sm:$0xff] }
 0x3dc   : > { %v6000_v3 = vadd.f32 %v10017_v40, %v5911_v32  ;;  %5863 = vmatmul.bf16.gmra.mxu3 %v7485_v37  ;;  %v10097_v40 = vpop.f32.mrf.mxu2  ;;  %v6134_v32 = vmax.f32 %v6102_v22, 0.0  ;;  %3506 = vst [vmem:[#allocation3 + $0x478] sm:$0xf] %v3442_v17  ;;  %v7528_v22 = vld [vmem:[#allocation3 + $0x458] sm:$0xf]  ;;  %v5568_v38 = vadd.f32 %v10619_v19, %v9818_v31  ;;  %v10621_v31 = vld [vmem:[#allocation29_spill] sm:$0xff] }
 0x3dd   : > { %v3427_v8 = vrot.slane %v3426_v60, 4  ;;  %v10625_v19 = vld [vmem:[#allocation33_spill] sm:$0xff] }
 0x3de   : > { %v6067_v52 = vmul.f32 %v9937_v53, %v6000_v3 }
 0x3df   : > { %v5824_v2 = vpop.f32.mrf.mxu3  ;;  %v3432_v3 = vsel %vm8454_vm8, %v3427_v8, %v3431_v33 }
 0x3e0   : > { %v6103_v51 = vadd.f32 %v9944_v35, %v6067_v52  ;;  %v5825_v39 = vadd.f32 %v5824_v2, %v5736_v59  ;;  %3505 = vst [vmem:[#allocation3 + $0x454] sm:$0xf] %v3432_v3  ;;  %v6012_v59 = vpop.f32.mrf.mxu1 }
 0x3e2   : > { %v6135_v37 = vmax.f32 %v6103_v51, 0.0  ;;  %v5914_v36 = vadd.f32 %v10030_v1, %v5825_v39  ;;  %v5738_v1 = vadd.f32 %v9895_v30, %v5649_v62  ;;  %v7984_v33 = vld [vmem:[#allocation3 + $0x478] sm:$0xf0]  ;;  %v10617_v51 = vld [vmem:[#allocation24_spill] sm:$0xff]  ;;  %v5925_v62 = vpop.f32.mrf.mxu0 }
 0x3e3   : > { %v7529_v52 = vor.u32 %v7984_v33, %v7528_v22  ;;  %v7522_v43 = vld [vmem:[#allocation3 + $0x474] sm:$0xf0]  ;;  %v5565_v39 = vadd.f32 %v10617_v51, %v9811_v63 }
 0x3e4   : > { %v6161_v29 = vpack.c.bf16 %v6135_v37, %v6134_v32  ;;  %v6003_v21 = vadd.f32 %v10037_v18, %v5914_v36  ;;  %v10115_v12 = vpop.f32.mrf.mxu2  ;;  %v5652_v18 = vadd.f32 %v10616_v28, %v5563_v26 }
 0x3e5   : > { %6046 = vmatmul.bf16.gmra.mxu1 %v7529_v52 }
 0x3e6   : > { %7823 = vmatmul.msk.bf16.gmra.mxu2 %vm6173_vm2, %v6161_v29  ;;  %v6068_v61 = vmul.f32 %v9937_v53, %v6003_v21  ;;  %v5741_v0 = vadd.f32 %v9900_v24, %v5652_v18  ;;  %v10618_v29 = vld [vmem:[#allocation59_spill] sm:$0xff] }
 0x3e7   : > { %v5826_v50 = vpop.f32.mrf.mxu3  ;;  %v7979_v30 = vld [vmem:[#allocation3 + $0x454] sm:$0xf]  ;;  %v5654_v3 = vadd.f32 %v10618_v29, %v5565_v39 }
 0x3e8   : > { %v5827_v23 = vadd.f32 %v5826_v50, %v5738_v1  ;;  %v7525_v20 = vor.u32 %v7979_v30, %v7522_v43  ;;  %v6104_v60 = vadd.f32 %v9944_v35, %v6068_v61  ;;  %v6014_v37 = vpop.f32.mrf.mxu1 }
 0x3e9   : > { %v5743_v26 = vadd.f32 %v9908_v27, %v5654_v3 }
 0x3ea   : > { %v5916_v4 = vadd.f32 %v10049_v5, %v5827_v23  ;;  %5957 = vmatmul.bf16.gmra.mxu0 %v7525_v20  ;;  %v5928_v22 = vpop.f32.mrf.mxu0  ;;  %v10620_v23 = vld [vmem:[#allocation61_spill] sm:$0xff] }
 0x3ec   : > { %v6005_v2 = vadd.f32 %v10051_v47, %v5916_v4  ;;  %5868 = vmatmul.bf16.gmra.mxu3 %v7521_v6  ;;  %v6136_v47 = vmax.f32 %v6104_v60, 0.0  ;;  %v10129_v63 = vpop.f32.mrf.mxu2  ;;  %v5657_v6 = vadd.f32 %v10620_v23, %v5568_v38  ;;  %v5575_v38 = vadd.f32 %v10625_v19, %v9841_v15  ;;  %v10626_v23 = vld [vmem:[#allocation66_spill] sm:$0xff] }
 0x3ee   : > { %v6069_v7 = vmul.f32 %v9937_v53, %v6005_v2  ;;  %v5746_v43 = vadd.f32 %v9919_v42, %v5657_v6  ;;  %v5664_v6 = vadd.f32 %v10626_v23, %v5575_v38 }
 0x3ef   : > { %v5829_v5 = vpop.f32.mrf.mxu3 }
 0x3f0   : > { %v6105_v17 = vadd.f32 %v9944_v35, %v6069_v7  ;;  %v5830_v32 = vadd.f32 %v5829_v5, %v5741_v0  ;;  %v6017_v33 = vpop.f32.mrf.mxu1 }
 0x3f2   : > { %v6137_v36 = vmax.f32 %v6105_v17, 0.0  ;;  %v5919_v8 = vadd.f32 %v10065_v34, %v5830_v32  ;;  %v5930_v39 = vpop.f32.mrf.mxu0 }
 0x3f4   : > { %v6162_v41 = vpack.c.bf16 %v6137_v36, %v6136_v47  ;;  %v6008_v24 = vadd.f32 %v10069_v25, %v5919_v8  ;;  %v10140_v61 = vpop.f32.mrf.mxu2  ;;  %v5570_v25 = vadd.f32 %v10621_v31, %v9827_v48  ;;  %v10623_v48 = vld [vmem:[#allocation31_spill] sm:$0xff]  ;;  %v10624_v8 = vld [vmem:[#allocation65_spill] sm:$0xff] }
 0x3f5   : > { %v5573_v0 = vadd.f32 %v10623_v48, %v9832_v9 }
 0x3f6   : > { %7824 = vmatmul.msk.bf16.gmra.mxu2 %vm6173_vm2, %v6162_v41  ;;  %v6070_v50 = vmul.f32 %v9937_v53, %v6008_v24 }
 0x3f7   : > { %v5831_v21 = vpop.f32.mrf.mxu3  ;;  %v5662_v29 = vadd.f32 %v10624_v8, %v5573_v0 }
 0x3f8   : > { %v5832_v1 = vadd.f32 %v5831_v21, %v5743_v26  ;;  %v6106_v4 = vadd.f32 %v9944_v35, %v6070_v50  ;;  %v6019_v7 = vpop.f32.mrf.mxu1 }
 0x3fa   : > { %v5921_v34 = vadd.f32 %v10087_v55, %v5832_v1  ;;  %v6138_v2 = vmax.f32 %v6106_v4, 0.0  ;;  %v5933_v41 = vpop.f32.mrf.mxu0  ;;  %v10174_v4 = vld [vmem:[%s10472_s8] ss:$0 sm:$0xff] }
 0x3fc   : > { %v6010_v52 = vadd.f32 %v10092_v49, %v5921_v34  ;;  %v10622_v49 = vld [vmem:[#allocation63_spill] sm:$0xff]  ;;  %v10154_v17 = vpop.f32.mrf.mxu2 }
 0x3fd   : > { %v5659_v51 = vadd.f32 %v10622_v49, %v5570_v25 }
 0x3fe   : > { %v6071_v27 = vmul.f32 %v9937_v53, %v6010_v52  ;;  %v10627_v52 = vld [vmem:[#allocation35_spill] sm:$0xff] }
 0x3ff   : > { %v5834_v28 = vpop.f32.mrf.mxu3  ;;  %v5748_v42 = vadd.f32 %v9929_v45, %v5659_v51  ;;  %v5751_v45 = vadd.f32 %v9958_v56, %v5662_v29  ;;  %v5578_v31 = vadd.f32 %v10627_v52, %v9846_v10  ;;  %v5753_v56 = vadd.f32 %v9972_v46, %v5664_v6  ;;  %v10630_v29 = vld [vmem:[#allocation68_spill] sm:$0xff] }
 0x400   : > { %v6107_v18 = vadd.f32 %v9944_v35, %v6071_v27  ;;  %v5835_v55 = vadd.f32 %v5834_v28, %v5746_v43  ;;  %v6022_v24 = vpop.f32.mrf.mxu1  ;;  %v10179_v28 = vld [vmem:[%s10473_s9] ss:$0 sm:$0xff] }
 0x402   : > { %v6139_v30 = vmax.f32 %v6107_v18, 0.0  ;;  %v5924_v20 = vadd.f32 %v10108_v57, %v5835_v55  ;;  %v5935_v27 = vpop.f32.mrf.mxu0 }
 0x404   : > { %v6163_v60 = vpack.c.bf16 %v6139_v30, %v6138_v2  ;;  %v6013_v5 = vadd.f32 %v6012_v59, %v5924_v20  ;;  %v10164_v50 = vpop.f32.mrf.mxu2  ;;  %v10628_v2 = vld [vmem:[#allocation67_spill] sm:$0xff]  ;;  %v6389_v20 = vld [vmem:[%s8346_s19] sm:$0xff] }
 0x405   : > { %v5667_v30 = vadd.f32 %v10628_v2, %v5578_v31 }
 0x406   : > { %7825 = vmatmul.msk.bf16.gmra.mxu2 %vm6173_vm2, %v6163_v60  ;;  %v6072_v36 = vmul.f32 %v9937_v53, %v6013_v5  ;;  %v10629_v60 = vld [vmem:[#allocation39_spill] sm:$0xff] }
 0x407   : > { %v5836_v32 = vpop.f32.mrf.mxu3  ;;  %v5580_v48 = vadd.f32 %v10629_v60, %v9849_v54 }
 0x408   : > { %v5837_v47 = vadd.f32 %v5836_v32, %v5748_v42  ;;  %v6108_v9 = vadd.f32 %v9944_v35, %v6072_v36  ;;  %v6024_v10 = vpop.f32.mrf.mxu1 }
 0x40a   : > { %v5926_v57 = vadd.f32 %v5925_v62, %v5837_v47  ;;  %v6140_v62 = vmax.f32 %v6108_v9, 0.0 }
 0x40c   : > { %v6015_v3 = vadd.f32 %v6014_v37, %v5926_v57  ;;  %v5938_v57 = vpop.f32.mrf.mxu0 }
 0x40e   : > { %v6073_v59 = vmul.f32 %v9937_v53, %v6015_v3  ;;  %v5669_v3 = vadd.f32 %v10630_v29, %v5580_v48 }
 0x40f   : > { %v5839_v26 = vpop.f32.mrf.mxu3 }
 0x410   : > { %v6109_v21 = vadd.f32 %v9944_v35, %v6073_v59  ;;  %v5840_v1 = vadd.f32 %v5839_v26, %v5751_v45  ;;  %v6027_v9 = vpop.f32.mrf.mxu1  ;;  %v6390_v59 = vld [vmem:[%s8346_s19 + $0x8] sm:$0xff]  ;;  %v5758_v23 = vadd.f32 %v10005_v14, %v5669_v3  ;;  %v10634_v14 = vld [vmem:[#allocation80_spill] sm:$0xff] }
 0x412   : > { %v6141_v37 = vmax.f32 %v6109_v21, 0.0  ;;  %v5929_v34 = vadd.f32 %v5928_v22, %v5840_v1  ;;  %v10631_v21 = vld [vmem:[#allocation79_spill] sm:$0xff]  ;;  %v10632_v1 = vld [vmem:[#allocation41_spill] sm:$0xff] }
 0x414   : > { %v6164_v15 = vpack.c.bf16 %v6141_v37, %v6140_v62  ;;  %v6018_v25 = vadd.f32 %v6017_v33, %v5929_v34  ;;  %v5583_v62 = vadd.f32 %v10632_v1, %v10631_v21 }
 0x416   : > { %7826 = vmatmul.msk.bf16.gmra.mxu2 %vm6173_vm2, %v6164_v15  ;;  %v6074_v18 = vmul.f32 %v9937_v53, %v6018_v25 }
 0x417   : > { %v5841_v22 = vpop.f32.mrf.mxu3 }
 0x418   : > { %v5842_v43 = vadd.f32 %v5841_v22, %v5753_v56  ;;  %v6110_v0 = vadd.f32 %v9944_v35, %v6074_v18  ;;  %v10633_v22 = vld [vmem:[#allocation69_spill] sm:$0xff] }
 0x419   : > { %v6235_v33 = vpop.f32.mrf.mxu2 }
 0x41a   : > { %v5931_v55 = vadd.f32 %v5930_v39, %v5842_v43  ;;  %v6319_v46 = vmul.f32 %v10174_v4, %v6235_v33  ;;  %v5756_v39 = vadd.f32 %v9990_v16, %v5667_v30  ;;  %v6142_v19 = vmax.f32 %v6110_v0, 0.0  ;;  %v5940_v33 = vpop.f32.mrf.mxu0  ;;  %v6029_v30 = vpop.f32.mrf.mxu1 }
 0x41b   : > { %v5672_v43 = vadd.f32 %v10633_v22, %v5583_v62 }
 0x41c   : > { %v6020_v49 = vadd.f32 %v6019_v7, %v5931_v55  ;;  %v6355_v51 = vadd.f32 %v10179_v28, %v6319_v46  ;;  %v10635_v46 = vld [vmem:[#allocation44_spill] sm:$0xff] }
 0x41d   : > { %v5585_v2 = vadd.f32 %v10635_v46, %v10634_v14 }
 0x41e   : > { %v6075_v5 = vmul.f32 %v9937_v53, %v6020_v49  ;;  %v6421_v42 = vadd.f32 %v6389_v20, %v6355_v51  ;;  %v5761_v51 = vadd.f32 %v10024_v13, %v5672_v43 }
 0x41f   : > { %v5844_v32 = vpop.f32.mrf.mxu3 }
 0x420   : > { %v6111_v47 = vadd.f32 %v9944_v35, %v6075_v5  ;;  %v6453_v36 = vmax.f32 %v6421_v42, 0.0  ;;  %v5845_v7 = vadd.f32 %v5844_v32, %v5756_v39  ;;  %v10636_v42 = vld [vmem:[#allocation70_spill] sm:$0xff] }
 0x421   : > { %v6237_v8 = vpop.f32.mrf.mxu2  ;;  %v5674_v39 = vadd.f32 %v10636_v42, %v5585_v2  ;;  %v10644_v42 = vld [vmem:[#allocation52_spill] sm:$0xff] }
 0x422   : > { %v6143_v38 = vmax.f32 %v6111_v47, 0.0  ;;  %6486 = vst.msk [vmem:[%s10196_s30] sm:$0xff] %vm554_vm0, %v6453_v36  ;;  %v5934_v54 = vadd.f32 %v5933_v41, %v5845_v7  ;;  %v6320_v16 = vmul.f32 %v10174_v4, %v6237_v8  ;;  %v6392_v8 = vld [vmem:[%s8346_s19 + $0x18] sm:$0xff]  ;;  %v5943_v3 = vpop.f32.mrf.mxu0 }
 0x424   : > { %v6356_v45 = vadd.f32 %v10179_v28, %v6320_v16  ;;  %v6165_v26 = vpack.c.bf16 %v6143_v38, %v6142_v19  ;;  %v6023_v37 = vadd.f32 %v6022_v24, %v5934_v54  ;;  %v6391_v24 = vld [vmem:[%s8346_s19 + $0x10] sm:$0xff]  ;;  %v10637_v19 = vld [vmem:[#allocation81_spill] sm:$0xff]  ;;  %v10638_v38 = vld [vmem:[#allocation47_spill] sm:$0xff] }
 0x425   : > { %v5588_v54 = vadd.f32 %v10638_v38, %v10637_v19 }
 0x426   : > { %v6422_v34 = vadd.f32 %v6390_v59, %v6356_v45  ;;  %7827 = vmatmul.msk.bf16.gmra.mxu2 %vm6173_vm2, %v6165_v26  ;;  %v6076_v31 = vmul.f32 %v9937_v53, %v6023_v37  ;;  %v5763_v45 = vadd.f32 %v10040_v11, %v5674_v39  ;;  %v6032_v26 = vpop.f32.mrf.mxu1  ;;  %v10641_v11 = vld [vmem:[#allocation49_spill] sm:$0xff] }
 0x427   : > { %v5846_v6 = vpop.f32.mrf.mxu3 }
 0x428   : > { %v6454_v41 = vmax.f32 %v6422_v34, 0.0  ;;  %v5847_v15 = vadd.f32 %v5846_v6, %v5758_v23  ;;  %v6112_v20 = vadd.f32 %v9944_v35, %v6076_v31  ;;  %v10639_v6 = vld [vmem:[#allocation71_spill] sm:$0xff]  ;;  %v10640_v31 = vld [vmem:[#allocation82_spill] sm:$0xff] }
 0x429   : > { %v6240_v52 = vpop.f32.mrf.mxu2 }
 0x42a   : > { %6487 = vst.msk [vmem:[%s10196_s30 + $0x8] sm:$0xff] %vm554_vm0, %v6454_v41  ;;  %v5936_v25 = vadd.f32 %v5935_v27, %v5847_v15  ;;  %v6321_v56 = vmul.f32 %v10174_v4, %v6240_v52  ;;  %v6144_v32 = vmax.f32 %v6112_v20, 0.0  ;;  %v5677_v41 = vadd.f32 %v10639_v6, %v5588_v54  ;;  %v10642_v20 = vld [vmem:[#allocation72_spill] sm:$0xff] }
 0x42c   : > { %v6025_v18 = vadd.f32 %v6024_v10, %v5936_v25  ;;  %v6357_v55 = vadd.f32 %v10179_v28, %v6321_v56  ;;  %v5590_v25 = vadd.f32 %v10641_v11, %v10640_v31  ;;  %v10648_v11 = vld [vmem:[#allocation74_spill] sm:$0xff] }
 0x42e   : > { %v6077_v49 = vmul.f32 %v9937_v53, %v6025_v18  ;;  %v6423_v27 = vadd.f32 %v6391_v24, %v6357_v55  ;;  %v5945_v24 = vpop.f32.mrf.mxu0  ;;  %v6034_v2 = vpop.f32.mrf.mxu1 }
 0x42f   : > { %v5849_v60 = vpop.f32.mrf.mxu3 }
 0x430   : > { %v6113_v48 = vadd.f32 %v9944_v35, %v6077_v49  ;;  %v6455_v0 = vmax.f32 %v6423_v27, 0.0  ;;  %v5850_v10 = vadd.f32 %v5849_v60, %v5761_v51  ;;  %v5679_v49 = vadd.f32 %v10642_v20, %v5590_v25 }
 0x431   : > { %v6242_v5 = vpop.f32.mrf.mxu2 }
 0x432   : > { %v6145_v47 = vmax.f32 %v6113_v48, 0.0  ;;  %6488 = vst.msk [vmem:[%s10196_s30 + $0x10] sm:$0xff] %vm554_vm0, %v6455_v0  ;;  %v5939_v36 = vadd.f32 %v5938_v57, %v5850_v10  ;;  %v6322_v7 = vmul.f32 %v10174_v4, %v6242_v5  ;;  %v6394_v0 = vld [vmem:[%s8346_s19 + $0x28] sm:$0xff]  ;;  %v10643_v5 = vld [vmem:[#allocation83_spill] sm:$0xff] }
 0x433   : > { %v5593_v39 = vadd.f32 %v10644_v42, %v10643_v5  ;;  %v10651_v42 = vld [vmem:[#allocation75_spill] sm:$0xff] }
 0x434   : > { %v6358_v29 = vadd.f32 %v10179_v28, %v6322_v7  ;;  %v6166_v13 = vpack.c.bf16 %v6145_v47, %v6144_v32  ;;  %v6028_v16 = vadd.f32 %v6027_v9, %v5939_v36  ;;  %v6393_v9 = vld [vmem:[%s8346_s19 + $0x20] sm:$0xff]  ;;  %v5768_v36 = vadd.f32 %v10075_v58, %v5679_v49 }
 0x436   : > { %v6424_v59 = vadd.f32 %v6392_v8, %v6358_v29  ;;  %7828 = vmatmul.msk.bf16.gmra.mxu2 %vm6173_vm2, %v6166_v13  ;;  %v6078_v37 = vmul.f32 %v9937_v53, %v6028_v16  ;;  %v5948_v13 = vpop.f32.mrf.mxu0  ;;  %v10645_v16 = vld [vmem:[#allocation73_spill] sm:$0xff] }
 0x437   : > { %v5851_v57 = vpop.f32.mrf.mxu3 }
 0x438   : > { %v6456_v21 = vmax.f32 %v6424_v59, 0.0  ;;  %v5852_v1 = vadd.f32 %v5851_v57, %v5763_v45  ;;  %v6114_v56 = vadd.f32 %v9944_v35, %v6078_v37  ;;  %v5682_v59 = vadd.f32 %v10645_v16, %v5593_v39  ;;  %v6037_v45 = vpop.f32.mrf.mxu1 }
 0x439   : > { %v6245_v62 = vpop.f32.mrf.mxu2 }
 0x43a   : > { %6489 = vst.msk [vmem:[%s10196_s30 + $0x18] sm:$0xff] %vm554_vm0, %v6456_v21  ;;  %v5941_v34 = vadd.f32 %v5940_v33, %v5852_v1  ;;  %v6323_v23 = vmul.f32 %v10174_v4, %v6245_v62  ;;  %v5766_v33 = vadd.f32 %v10056_v44, %v5677_v41  ;;  %v6146_v27 = vmax.f32 %v6114_v56, 0.0  ;;  %v10646_v21 = vld [vmem:[#allocation84_spill] sm:$0xff]  ;;  %v10647_v1 = vld [vmem:[#allocation55_spill] sm:$0xff] }
 0x43b   : > { %v5595_v62 = vadd.f32 %v10647_v1, %v10646_v21  ;;  %v5771_v6 = vadd.f32 %v10097_v40, %v5682_v59 }
 0x43c   : > { %v6030_v15 = vadd.f32 %v6029_v30, %v5941_v34  ;;  %v6359_v52 = vadd.f32 %v10179_v28, %v6323_v23 }
 0x43d   : > { %v5684_v25 = vadd.f32 %v10648_v11, %v5595_v62 }
 0x43e   : > { %v6079_v22 = vmul.f32 %v9937_v53, %v6030_v15  ;;  %v6425_v43 = vadd.f32 %v6393_v9, %v6359_v52 }
 0x43f   : > { %v5854_v18 = vpop.f32.mrf.mxu3 }
 0x440   : > { %v6115_v55 = vadd.f32 %v9944_v35, %v6079_v22  ;;  %v6457_v14 = vmax.f32 %v6425_v43, 0.0  ;;  %v5855_v46 = vadd.f32 %v5854_v18, %v5766_v33  ;;  %v6396_v18 = vld [vmem:[%s8346_s19 + $0x38] sm:$0xff] }
 0x441   : > { %v6247_v30 = vpop.f32.mrf.mxu2 }
 0x442   : > { %v6147_v51 = vmax.f32 %v6115_v55, 0.0  ;;  %6490 = vst.msk [vmem:[%s10196_s30 + $0x20] sm:$0xff] %vm554_vm0, %v6457_v14  ;;  %v5944_v60 = vadd.f32 %v5943_v3, %v5855_v46  ;;  %v6324_v48 = vmul.f32 %v10174_v4, %v6247_v30  ;;  %v6039_v14 = vpop.f32.mrf.mxu1  ;;  %v10649_v46 = vld [vmem:[#allocation85_spill] sm:$0xff] }
 0x444   : > { %v6360_v44 = vadd.f32 %v10179_v28, %v6324_v48  ;;  %v6167_v10 = vpack.c.bf16 %v6147_v51, %v6146_v27  ;;  %v6033_v32 = vadd.f32 %v6032_v26, %v5944_v60  ;;  %v6395_v26 = vld [vmem:[%s8346_s19 + $0x30] sm:$0xff]  ;;  %v5773_v27 = vadd.f32 %v10115_v12, %v5684_v25 }
 0x445   : > { %v10652_v12 = vld [vmem:[#allocation86_spill] sm:$0xff] }
 0x446   : > { %v6426_v47 = vadd.f32 %v6394_v0, %v6360_v44  ;;  %7829 = vmatmul.msk.bf16.gmra.mxu2 %vm6173_vm2, %v6167_v10  ;;  %v6080_v19 = vmul.f32 %v9937_v53, %v6033_v32  ;;  %v6397_v32 = vld [vmem:[%s8346_s19 + $0x40] sm:$0xff] }
 0x447   : > { %v5856_v7 = vpop.f32.mrf.mxu3 }
 0x448   : > { %v6458_v8 = vmax.f32 %v6426_v47, 0.0  ;;  %v5857_v29 = vadd.f32 %v5856_v7, %v5768_v36  ;;  %v6116_v37 = vadd.f32 %v9944_v35, %v6080_v19 }
 0x449   : > { %v6250_v3 = vpop.f32.mrf.mxu2 }
 0x44a   : > { %6491 = vst.msk [vmem:[%s10196_s30 + $0x28] sm:$0xff] %vm554_vm0, %v6458_v8  ;;  %v5946_v38 = vadd.f32 %v5945_v24, %v5857_v29  ;;  %v6325_v54 = vmul.f32 %v10174_v4, %v6250_v3  ;;  %v6148_v56 = vmax.f32 %v6116_v37, 0.0  ;;  %v5950_v24 = vpop.f32.mrf.mxu0  ;;  %v10653_v8 = vld [vmem:[#allocation60_spill] sm:$0xff] }
 0x44b   : > { %v5600_v29 = vadd.f32 %v10653_v8, %v10652_v12 }
 0x44c   : > { %v6035_v57 = vadd.f32 %v6034_v2, %v5946_v38  ;;  %v6361_v58 = vadd.f32 %v10179_v28, %v6325_v54  ;;  %v10650_v2 = vld [vmem:[#allocation58_spill] sm:$0xff]  ;;  %v6042_v54 = vpop.f32.mrf.mxu1 }
 0x44d   : > { %v5598_v30 = vadd.f32 %v10650_v2, %v10649_v46  ;;  %v6399_v46 = vld [vmem:[%s8346_s19 + $0x50] sm:$0xff] }
 0x44e   : > { %v6081_v34 = vmul.f32 %v9937_v53, %v6035_v57  ;;  %v6427_v23 = vadd.f32 %v6395_v26, %v6361_v58  ;;  %v10654_v58 = vld [vmem:[#allocation76_spill] sm:$0xff] }
 0x44f   : > { %v5859_v41 = vpop.f32.mrf.mxu3  ;;  %v5687_v39 = vadd.f32 %v10651_v42, %v5598_v30  ;;  %v5689_v21 = vadd.f32 %v10654_v58, %v5600_v29  ;;  %v10658_v30 = vld [vmem:[#allocation9_spill] sm:$0xff] }
 0x450   : > { %v6117_v9 = vadd.f32 %v9944_v35, %v6081_v34  ;;  %v6459_v15 = vmax.f32 %v6427_v23, 0.0  ;;  %v5860_v52 = vadd.f32 %v5859_v41, %v5771_v6  ;;  %v10655_v6 = vld [vmem:[#allocation87_spill] sm:$0xff]  ;;  %v10656_v41 = vld [vmem:[#allocation62_spill] sm:$0xff] }
 0x451   : > { %v6252_v31 = vpop.f32.mrf.mxu2  ;;  %v5776_v38 = vadd.f32 %v10129_v63, %v5687_v39 }
 0x452   : > { %v6149_v22 = vmax.f32 %v6117_v9, 0.0  ;;  %6492 = vst.msk [vmem:[%s10196_s30 + $0x30] sm:$0xff] %vm554_vm0, %v6459_v15  ;;  %v5949_v43 = vadd.f32 %v5948_v13, %v5860_v52  ;;  %v6326_v33 = vmul.f32 %v10174_v4, %v6252_v31  ;;  %v5953_v7 = vpop.f32.mrf.mxu0  ;;  %v5778_v52 = vadd.f32 %v10140_v61, %v5689_v21 }
 0x454   : > { %v6362_v40 = vadd.f32 %v10179_v28, %v6326_v33  ;;  %v6168_v55 = vpack.c.bf16 %v6149_v22, %v6148_v56  ;;  %v6038_v20 = vadd.f32 %v6037_v45, %v5949_v43  ;;  %v6044_v22 = vpop.f32.mrf.mxu1  ;;  %v8143_v33 = vld [vmem:[%s10469_s5] ss:$0 sm:$0xff] }
 0x456   : > { %v6428_v49 = vadd.f32 %v6396_v18, %v6362_v40  ;;  %7830 = vmatmul.msk.bf16.gmra.mxu2 %vm6173_vm2, %v6168_v55  ;;  %v6082_v44 = vmul.f32 %v9937_v53, %v6038_v20  ;;  %v10657_v55 = vld [vmem:[#allocation77_spill] sm:$0xff]  ;;  %v10659_v20 = vld [vmem:[#allocation64_spill] sm:$0xff] }
 0x457   : > { %v5861_v51 = vpop.f32.mrf.mxu3 }
 0x458   : > { %v6460_v60 = vmax.f32 %v6428_v49, 0.0  ;;  %v5862_v48 = vadd.f32 %v5861_v51, %v5773_v27  ;;  %v6118_v13 = vadd.f32 %v9944_v35, %v6082_v44  ;;  %v5605_v49 = vadd.f32 %v10659_v20, %v10658_v30  ;;  %v8144_v27 = vld [vmem:[%s10470_s6] ss:$0 sm:$0xff] }
 0x459   : > { %v6255_v0 = vpop.f32.mrf.mxu2 }
 0x45a   : > { %6493 = vst.msk [vmem:[%s10196_s30 + $0x38] sm:$0xff] %vm554_vm0, %v6460_v60  ;;  %v5951_v10 = vadd.f32 %v5950_v24, %v5862_v48  ;;  %v6327_v5 = vmul.f32 %v10174_v4, %v6255_v0  ;;  %v6150_v1 = vmax.f32 %v6118_v13, 0.0  ;;  %v5955_v31 = vpop.f32.mrf.mxu0 }
 0x45c   : > { %v6040_v47 = vadd.f32 %v6039_v14, %v5951_v10  ;;  %v6363_v36 = vadd.f32 %v10179_v28, %v6327_v5 }
 0x45e   : > { %v6083_v3 = vmul.f32 %v9937_v53, %v6040_v47  ;;  %v6429_v19 = vadd.f32 %v6397_v32, %v6363_v36  ;;  %v6398_v53 = vld [vmem:[%s8346_s19 + $0x48] sm:$0xff]  ;;  %v10660_v36 = vld [vmem:[#allocation78_spill] sm:$0xff] }
 0x45f   : > { %v5864_v16 = vpop.f32.mrf.mxu3 }
 0x460   : > { %v6119_v59 = vadd.f32 %v9944_v35, %v6083_v3  ;;  %v6461_v45 = vmax.f32 %v6429_v19, 0.0  ;;  %v5865_v26 = vadd.f32 %v5864_v16, %v5776_v38  ;;  %v5603_v35 = vadd.f32 %v10656_v41, %v10655_v6  ;;  %v6400_v3 = vld [vmem:[%s8346_s19 + $0x58] sm:$0xff] }
 0x461   : > { %v6257_v57 = vpop.f32.mrf.mxu2 }
 0x462   : > { %v6151_v62 = vmax.f32 %v6119_v59, 0.0  ;;  %6494 = vst.msk [vmem:[%s10196_s30 + $0x40] sm:$0xff] %vm554_vm0, %v6461_v45  ;;  %v5954_v37 = vadd.f32 %v5953_v7, %v5865_v26  ;;  %v6328_v34 = vmul.f32 %v10174_v4, %v6257_v57  ;;  %v5692_v14 = vadd.f32 %v10657_v55, %v5603_v35  ;;  %v6047_v32 = vpop.f32.mrf.mxu1 }
 0x463   : > { %v5694_v7 = vadd.f32 %v10660_v36, %v5605_v49 }
 0x464   : > { %v6364_v63 = vadd.f32 %v10179_v28, %v6328_v34  ;;  %v6169_v23 = vpack.c.bf16 %v6151_v62, %v6150_v1  ;;  %v6043_v9 = vadd.f32 %v6042_v54, %v5954_v37  ;;  %v5781_v0 = vadd.f32 %v10154_v17, %v5692_v14  ;;  %v6401_v34 = vld [vmem:[%s8346_s19 + $0x60] sm:$0xff] }
 0x465   : > { %v5783_v16 = vadd.f32 %v10164_v50, %v5694_v7 }
 0x466   : > { %v6430_v15 = vadd.f32 %v6398_v53, %v6364_v63  ;;  %7831 = vmatmul.msk.bf16.gmra.mxu2 %vm6173_vm2, %v6169_v23  ;;  %v6084_v24 = vmul.f32 %v8143_v33, %v6043_v9 }
 0x467   : > { %v5866_v11 = vpop.f32.mrf.mxu3  ;;  %v5958_v44 = vpop.f32.mrf.mxu0 }
 0x468   : > { %v6462_v25 = vmax.f32 %v6430_v15, 0.0  ;;  %v5867_v56 = vadd.f32 %v5866_v11, %v5778_v52  ;;  %v6120_v51 = vadd.f32 %v8144_v27, %v6084_v24  ;;  %v6402_v11 = vld [vmem:[%s8346_s19 + $0x68] sm:$0xff] }
 0x469   : > { %v6260_v43 = vpop.f32.mrf.mxu2 }
 0x46a   : > { %6495 = vst.msk [vmem:[%s10196_s30 + $0x48] sm:$0xff] %vm554_vm0, %v6462_v25  ;;  %v5956_v18 = vadd.f32 %v5955_v31, %v5867_v56  ;;  %v6329_v40 = vmul.f32 %v10174_v4, %v6260_v43  ;;  %v6152_v12 = vmax.f32 %v6120_v51, 0.0  ;;  %v6049_v37 = vpop.f32.mrf.mxu1 }
 0x46c   : > { %v6045_v61 = vadd.f32 %v6044_v22, %v5956_v18  ;;  %v6365_v2 = vadd.f32 %v10179_v28, %v6329_v40  ;;  %v6403_v18 = vld [vmem:[%s8346_s19 + $0x70] sm:$0xff] }
 0x46e   : > { %v6085_v60 = vmul.f32 %v8143_v33, %v6045_v61  ;;  %v6431_v48 = vadd.f32 %v6399_v46, %v6365_v2  ;;  %v6404_v2 = vld [vmem:[%s8346_s19 + $0x78] sm:$0xff] }
 0x46f   : > { %v5869_v10 = vpop.f32.mrf.mxu3  ;;  %v5960_v57 = vpop.f32.mrf.mxu0 }
 0x470   : > { %v6121_v5 = vadd.f32 %v8144_v27, %v6085_v60  ;;  %v6463_v42 = vmax.f32 %v6431_v48, 0.0  ;;  %v5870_v39 = vadd.f32 %v5869_v10, %v5781_v0  ;;  %v6405_v60 = vld [vmem:[%s8346_s19 + $0x80] sm:$0xff] }
 0x471   : > { %v6262_v47 = vpop.f32.mrf.mxu2 }
 0x472   : > { %v6153_v8 = vmax.f32 %v6121_v5, 0.0  ;;  %6496 = vst.msk [vmem:[%s10196_s30 + $0x50] sm:$0xff] %vm554_vm0, %v6463_v42  ;;  %v5959_v29 = vadd.f32 %v5958_v44, %v5870_v39  ;;  %v6330_v13 = vmul.f32 %v10174_v4, %v6262_v47  ;;  %v6406_v42 = vld [vmem:[%s8346_s19 + $0x88] sm:$0xff] }
 0x474   : > { %v6366_v17 = vadd.f32 %v10179_v28, %v6330_v13  ;;  %v6170_v19 = vpack.c.bf16 %v6153_v8, %v6152_v12  ;;  %v6048_v38 = vadd.f32 %v6047_v32, %v5959_v29  ;;  %v6407_v12 = vld [vmem:[%s8346_s19 + $0x90] sm:$0xff] }
 0x476   : > { %v6432_v54 = vadd.f32 %v6400_v3, %v6366_v17  ;;  %7832 = vmatmul.msk.bf16.gmra.mxu2 %vm6173_vm2, %v6170_v19  ;;  %v6086_v21 = vmul.f32 %v8143_v33, %v6048_v38  ;;  %v6408_v19 = vld [vmem:[%s8346_s19 + $0x98] sm:$0xff] }
 0x477   : > { %v5871_v59 = vpop.f32.mrf.mxu3 }
 0x478   : > { %v6464_v45 = vmax.f32 %v6432_v54, 0.0  ;;  %v5872_v26 = vadd.f32 %v5871_v59, %v5783_v16  ;;  %v6122_v23 = vadd.f32 %v8144_v27, %v6086_v21 }
 0x479   : > { %v6265_v58 = vpop.f32.mrf.mxu2 }
 0x47a   : > { %6497 = vst.msk [vmem:[%s10196_s30 + $0x58] sm:$0xff] %vm554_vm0, %v6464_v45  ;;  %v5961_v1 = vadd.f32 %v5960_v57, %v5872_v26  ;;  %v6331_v62 = vmul.f32 %v10174_v4, %v6265_v58  ;;  %v6154_v15 = vmax.f32 %v6122_v23, 0.0  ;;  %v6409_v26 = vld [vmem:[%s8346_s19 + $0xa0] sm:$0xff] }
 0x47c   : > { %v6050_v53 = vadd.f32 %v6049_v37, %v5961_v1  ;;  %v6367_v63 = vadd.f32 %v10179_v28, %v6331_v62  ;;  %v6410_v37 = vld [vmem:[%s8346_s19 + $0xa8] sm:$0xff] }
 0x47e   : > { %v6087_v50 = vmul.f32 %v8143_v33, %v6050_v53  ;;  %v6433_v6 = vadd.f32 %v6401_v34, %v6367_v63 }
 0x480   : > { %v6123_v41 = vadd.f32 %v8144_v27, %v6087_v50  ;;  %v6465_v35 = vmax.f32 %v6433_v6, 0.0  ;;  %v6411_v6 = vld [vmem:[%s8346_s19 + $0xb0] sm:$0xff] }
 0x481   : > { %v6267_v9 = vpop.f32.mrf.mxu2 }
 0x482   : > { %v6155_v52 = vmax.f32 %v6123_v41, 0.0  ;;  %6498 = vst.msk [vmem:[%s10196_s30 + $0x60] sm:$0xff] %vm554_vm0, %v6465_v35  ;;  %v6332_v31 = vmul.f32 %v10174_v4, %v6267_v9 }
 0x484   : > { %v6368_v25 = vadd.f32 %v10179_v28, %v6332_v31  ;;  %v6171_v56 = vpack.c.bf16 %v6155_v52, %v6154_v15  ;;  %v6412_v31 = vld [vmem:[%s8346_s19 + $0xb8] sm:$0xff] }
 0x486   : > { %v6434_v22 = vadd.f32 %v6402_v11, %v6368_v25  ;;  %7833 = vmatmul.msk.bf16.gmra.mxu2 %vm6173_vm2, %v6171_v56 }
 0x488   : > { %v6466_v43 = vmax.f32 %v6434_v22, 0.0 }
 0x489   : > { %v6270_v33 = vpop.f32.mrf.mxu2 }
 0x48a   : > { %6499 = vst.msk [vmem:[%s10196_s30 + $0x68] sm:$0xff] %vm554_vm0, %v6466_v43  ;;  %v6333_v24 = vmul.f32 %v10174_v4, %v6270_v33  ;;  %v6413_v33 = vld [vmem:[%s8346_s19 + $0xc0] sm:$0xff] }
 0x48c   : > { %v6369_v40 = vadd.f32 %v10179_v28, %v6333_v24 }
 0x48e   : > { %v6435_v55 = vadd.f32 %v6403_v18, %v6369_v40 }
 0x490   : > { %v6467_v14 = vmax.f32 %v6435_v55, 0.0 }
 0x491   : > { %v6272_v46 = vpop.f32.mrf.mxu2 }
 0x492   : > { %6500 = vst.msk [vmem:[%s10196_s30 + $0x70] sm:$0xff] %vm554_vm0, %v6467_v14  ;;  %v6334_v61 = vmul.f32 %v10174_v4, %v6272_v46  ;;  %v6414_v46 = vld [vmem:[%s8346_s19 + $0xc8] sm:$0xff] }
 0x494   : > { %v6370_v30 = vadd.f32 %v10179_v28, %v6334_v61 }
 0x496   : > { %v6436_v20 = vadd.f32 %v6404_v2, %v6370_v30 }
 0x498   : > { %v6468_v49 = vmax.f32 %v6436_v20, 0.0 }
 0x499   : > { %v6275_v27 = vpop.f32.mrf.mxu2 }
 0x49a   : > { %6501 = vst.msk [vmem:[%s10196_s30 + $0x78] sm:$0xff] %vm554_vm0, %v6468_v49  ;;  %v6335_v51 = vmul.f32 %v10174_v4, %v6275_v27  ;;  %v6415_v27 = vld [vmem:[%s8346_s19 + $0xd0] sm:$0xff] }
 0x49c   : > { %v6371_v48 = vadd.f32 %v10179_v28, %v6335_v51 }
 0x49e   : > { %v6437_v0 = vadd.f32 %v6405_v60, %v6371_v48 }
 0x4a0   : > { %v6469_v44 = vmax.f32 %v6437_v0, 0.0 }
 0x4a1   : > { %v6277_v10 = vpop.f32.mrf.mxu2 }
 0x4a2   : > { %6502 = vst.msk [vmem:[%s10196_s30 + $0x80] sm:$0xff] %vm554_vm0, %v6469_v44  ;;  %v6336_v5 = vmul.f32 %v10174_v4, %v6277_v10  ;;  %v6416_v10 = vld [vmem:[%s8346_s19 + $0xd8] sm:$0xff] }
 0x4a4   : > { %v6372_v39 = vadd.f32 %v10179_v28, %v6336_v5 }
 0x4a6   : > { %v6438_v32 = vadd.f32 %v6406_v42, %v6372_v39 }
 0x4a8   : > { %v6470_v47 = vmax.f32 %v6438_v32, 0.0 }
 0x4a9   : > { %v6280_v36 = vpop.f32.mrf.mxu2 }
 0x4aa   : > { %6503 = vst.msk [vmem:[%s10196_s30 + $0x88] sm:$0xff] %vm554_vm0, %v6470_v47  ;;  %v6337_v7 = vmul.f32 %v10174_v4, %v6280_v36  ;;  %v6417_v36 = vld [vmem:[%s8346_s19 + $0xe0] sm:$0xff] }
 0x4ac   : > { %v6373_v8 = vadd.f32 %v10179_v28, %v6337_v7 }
 0x4ae   : > { %v6439_v29 = vadd.f32 %v6407_v12, %v6373_v8 }
 0x4b0   : > { %v6471_v13 = vmax.f32 %v6439_v29, 0.0 }
 0x4b1   : > { %v6282_v3 = vpop.f32.mrf.mxu2 }
 0x4b2   : > { %6504 = vst.msk [vmem:[%s10196_s30 + $0x90] sm:$0xff] %vm554_vm0, %v6471_v13  ;;  %v6338_v17 = vmul.f32 %v10174_v4, %v6282_v3  ;;  %v6418_v3 = vld [vmem:[%s8346_s19 + $0xe8] sm:$0xff] }
 0x4b4   : > { %v6374_v38 = vadd.f32 %v10179_v28, %v6338_v17 }
 0x4b6   : > { %v6440_v54 = vadd.f32 %v6408_v19, %v6374_v38 }
 0x4b8   : > { %v6472_v16 = vmax.f32 %v6440_v54, 0.0 }
 0x4b9   : > { %v6285_v59 = vpop.f32.mrf.mxu2 }
 0x4ba   : > { %6505 = vst.msk [vmem:[%s10196_s30 + $0x98] sm:$0xff] %vm554_vm0, %v6472_v16  ;;  %v6339_v45 = vmul.f32 %v10174_v4, %v6285_v59  ;;  %v6419_v59 = vld [vmem:[%s8346_s19 + $0xf0] sm:$0xff] }
 0x4bc   : > { %v6375_v57 = vadd.f32 %v10179_v28, %v6339_v45 }
 0x4be   : > { %v6441_v58 = vadd.f32 %v6409_v26, %v6375_v57 }
 0x4c0   : > { %v6473_v21 = vmax.f32 %v6441_v58, 0.0 }
 0x4c1   : > { %v6287_v1 = vpop.f32.mrf.mxu2 }
 0x4c2   : > { %6506 = vst.msk [vmem:[%s10196_s30 + $0xa0] sm:$0xff] %vm554_vm0, %v6473_v21  ;;  %v6340_v62 = vmul.f32 %v10174_v4, %v6287_v1  ;;  %v6420_v1 = vld [vmem:[%s8346_s19 + $0xf8] sm:$0xff] }
 0x4c4   : > { %v6376_v34 = vadd.f32 %v10179_v28, %v6340_v62 }
 0x4c6   : > { %v6442_v53 = vadd.f32 %v6410_v37, %v6376_v34 }
 0x4c8   : > { %v6474_v63 = vmax.f32 %v6442_v53, 0.0 }
 0x4c9   : > { %v6290_v23 = vpop.f32.mrf.mxu2 }
 0x4ca   : > { %6507 = vst.msk [vmem:[%s10196_s30 + $0xa8] sm:$0xff] %vm554_vm0, %v6474_v63  ;;  %v6341_v50 = vmul.f32 %v10174_v4, %v6290_v23 }
 0x4cc   : > { %v6377_v41 = vadd.f32 %v10179_v28, %v6341_v50 }
 0x4ce   : > { %v6443_v35 = vadd.f32 %v6411_v6, %v6377_v41 }
 0x4d0   : > { %v6475_v9 = vmax.f32 %v6443_v35, 0.0 }
 0x4d1   : > { %v6292_v15 = vpop.f32.mrf.mxu2 }
 0x4d2   : > { %6508 = vst.msk [vmem:[%s10196_s30 + $0xb0] sm:$0xff] %vm554_vm0, %v6475_v9  ;;  %v6342_v52 = vmul.f32 %v10174_v4, %v6292_v15 }
 0x4d4   : > { %v6378_v11 = vadd.f32 %v10179_v28, %v6342_v52 }
 0x4d6   : > { %v6444_v25 = vadd.f32 %v6412_v31, %v6378_v11 }
 0x4d8   : > { %v6476_v56 = vmax.f32 %v6444_v25, 0.0 }
 0x4d9   : > { %v6295_v22 = vpop.f32.mrf.mxu2 }
 0x4da   : > { %6509 = vst.msk [vmem:[%s10196_s30 + $0xb8] sm:$0xff] %vm554_vm0, %v6476_v56  ;;  %v6343_v43 = vmul.f32 %v10174_v4, %v6295_v22 }
 0x4dc   : > { %v6379_v24 = vadd.f32 %v10179_v28, %v6343_v43 }
 0x4de   : > { %v6445_v18 = vadd.f32 %v6413_v33, %v6379_v24 }
 0x4e0   : > { %v6477_v40 = vmax.f32 %v6445_v18, 0.0 }
 0x4e1   : > { %v6297_v55 = vpop.f32.mrf.mxu2 }
 0x4e2   : > { %6510 = vst.msk [vmem:[%s10196_s30 + $0xc0] sm:$0xff] %vm554_vm0, %v6477_v40  ;;  %v6344_v14 = vmul.f32 %v10174_v4, %v6297_v55 }
 0x4e4   : > { %v6380_v61 = vadd.f32 %v10179_v28, %v6344_v14 }
 0x4e6   : > { %v6446_v2 = vadd.f32 %v6414_v46, %v6380_v61 }
 0x4e8   : > { %v6478_v30 = vmax.f32 %v6446_v2, 0.0 }
 0x4e9   : > { %v6300_v20 = vpop.f32.mrf.mxu2 }
 0x4ea   : > { %6511 = vst.msk [vmem:[%s10196_s30 + $0xc8] sm:$0xff] %vm554_vm0, %v6478_v30  ;;  %v6345_v49 = vmul.f32 %v10174_v4, %v6300_v20 }
 0x4ec   : > { %v6381_v51 = vadd.f32 %v10179_v28, %v6345_v49 }
 0x4ee   : > { %v6447_v60 = vadd.f32 %v6415_v27, %v6381_v51 }
 0x4f0   : > { %v6479_v48 = vmax.f32 %v6447_v60, 0.0 }
 0x4f1   : > { %v6302_v0 = vpop.f32.mrf.mxu2 }
 0x4f2   : > { %6512 = vst.msk [vmem:[%s10196_s30 + $0xd0] sm:$0xff] %vm554_vm0, %v6479_v48  ;;  %v6346_v44 = vmul.f32 %v10174_v4, %v6302_v0 }
 0x4f4   : > { %v6382_v5 = vadd.f32 %v10179_v28, %v6346_v44 }
 0x4f6   : > { %v6448_v42 = vadd.f32 %v6416_v10, %v6382_v5 }
 0x4f8   : > { %v6480_v39 = vmax.f32 %v6448_v42, 0.0 }
 0x4f9   : > { %v6305_v32 = vpop.f32.mrf.mxu2 }
 0x4fa   : > { %6513 = vst.msk [vmem:[%s10196_s30 + $0xd8] sm:$0xff] %vm554_vm0, %v6480_v39  ;;  %v6347_v47 = vmul.f32 %v10174_v4, %v6305_v32 }
 0x4fc   : > { %v6383_v7 = vadd.f32 %v10179_v28, %v6347_v47 }
 0x4fe   : > { %v6449_v12 = vadd.f32 %v6417_v36, %v6383_v7 }
 0x500   : > { %v6481_v8 = vmax.f32 %v6449_v12, 0.0 }
 0x501   : > { %v6307_v29 = vpop.f32.mrf.mxu2 }
 0x502   : > { %6514 = vst.msk [vmem:[%s10196_s30 + $0xe0] sm:$0xff] %vm554_vm0, %v6481_v8  ;;  %v6348_v13 = vmul.f32 %v10174_v4, %v6307_v29 }
 0x504   : > { %v6384_v17 = vadd.f32 %v10179_v28, %v6348_v13 }
 0x506   : > { %v6450_v19 = vadd.f32 %v6418_v3, %v6384_v17 }
 0x508   : > { %v6482_v38 = vmax.f32 %v6450_v19, 0.0 }
 0x509   : > { %v6310_v54 = vpop.f32.mrf.mxu2 }
 0x50a   : > { %6515 = vst.msk [vmem:[%s10196_s30 + $0xe8] sm:$0xff] %vm554_vm0, %v6482_v38  ;;  %v6349_v16 = vmul.f32 %v10174_v4, %v6310_v54 }
 0x50c   : > { %v6385_v45 = vadd.f32 %v10179_v28, %v6349_v16 }
 0x50e   : > { %v6451_v26 = vadd.f32 %v6419_v59, %v6385_v45 }
 0x510   : > { %v6483_v57 = vmax.f32 %v6451_v26, 0.0 }
 0x511   : > { %v6312_v58 = vpop.f32.mrf.mxu2 }
 0x512   : > { %6516 = vst.msk [vmem:[%s10196_s30 + $0xf0] sm:$0xff] %vm554_vm0, %v6483_v57  ;;  %v6350_v21 = vmul.f32 %v10174_v4, %v6312_v58 }
 0x514   : > { %v6386_v62 = vadd.f32 %v10179_v28, %v6350_v21 }
 0x516   : > { %v6452_v37 = vadd.f32 %v6420_v1, %v6386_v62 }
 0x518   : > { %v6484_v34 = vmax.f32 %v6452_v37, 0.0 }
 0x51a   : > { %6517 = vst.msk [vmem:[%s10196_s30 + $0xf8] sm:$0xff] %vm554_vm0, %v6484_v34 }
 0x51b   : > { %8172 = shalt.err (!%p8169_p5)
}
 0x51c   : > { %s8226_s28 = smov 128   ;;  %s8227_s30 = smov 8  }
 0x51d   : > { %8075 = dma.vmem_to_hbm [thread:$0]  (%p8323_p4), %s6535_s12, 4096, %s6537_s20, %s6519_s16, %s8226_s28, %s8226_s28, %s8227_s30  }
 0x51e PF: > { %p8081_p6 = scmp.ge.s32.totalorder %s8223_s18, 2  ;;  %s6551_s19 = sand.u32 1, %s8203_s13  }
 0x51f   : > { %s6552_s0 = scalar_lea.sflag [#allocation5], %s6551_s19 }
 0x520   : > { %p8078_p7 = pnand %p8081_p6, %p8330_p8 }
 0x522   : > { %p8079_p9 = pneg %p8078_p7 }
 0x524   : > { %8198 = dma.done.wait (%p8079_p9), %s6552_s0, 4096  }
 0x525   : > { %8200 = vsyncadd (%p8079_p9), %s6552_s0, 4294963200  ;;  %s23_s18 = sadd.s32 1, %s8223_s18   ;;  %s10661_s13 = smov %s8207_s14 }
 0x526   : > { %p20_p10 = scmp.ge.s32.totalorder %s23_s18, 4   ;;  %s10662_s14 = smov %s8211_s15 }
 0x527   : > { %s10663_s15 = smov %s8336_s26  ;;  %s10664_s16 = smov %s8219_s17 }
 0x528   : > { %s10665_s17 = smov %s10667_s21  ;;  %22 = sbr.rel (!%p20_p10) target bundleno = 6 (0x6), region = 105 }
 0x52d   :  { %6558 = vsyncpa [#allocation5], 1 }
 0x52e   :  { %6560 = vsyncpa [#allocation5 + $0x1], 1 }

</bundles_post_ra>
